<compile_context>
chip_gen: v7x
topology: tpu7x:2x2x1
jax: 0.10.0
libtpu: 0.0.40
codegen_flags: <defaults>
</compile_context>

<pallas_src>
import jax
import jax.numpy as jnp
import numpy as np
from jax.experimental import pallas as pl
from jax.experimental.pallas import tpu as pltpu

H, W = 6, 7
P = H * W                      # 42 spatial positions per board
ACTION_SIZE = 7
C1, C2, F1 = 32, 64, 128       # conv1 / conv2 channels, fc1 width
NPAD = 128                     # fc2 output padded to a full lane extent
BT_MAX = 128                   # max boards per grid block (lane-width tile)


def _round_up(n, m):
    return (n + m - 1) // m * m


def _choose_bt(b):
    """Boards per grid block: big tiles (<=128) but >=2 blocks when possible
    so both v7x TensorCores get work (single-TC chips are unaffected)."""
    bp8 = _round_up(max(b, 1), 8)
    bt = min(BT_MAX, bp8)
    if bp8 > 8:
        bt = min(bt, _round_up(pl.cdiv(bp8, 2), 8))
    return bt


# ---------------- fused Pallas kernel ----------------

def _dqn_fused_kernel(x_ref, w1_ref, b1_ref, w2_ref, b2_ref,
                      wf1_ref, bf1_ref, wf2_ref, bf2_ref, o_ref):
    # conv1 as a dense zero-stuffed matmul over board positions.
    # Output lanes are ordered p*C1 + c (board-major rows).
    h1 = jnp.dot(x_ref[...], w1_ref[...], preferred_element_type=jnp.float32)
    h1 = jnp.maximum(h1 + b1_ref[...], 0.0).astype(jnp.bfloat16)   # (BT, 1344)

    # conv2 as a dense zero-stuffed matmul, K = 1344 (lanes p*C2 + c).
    h2 = jnp.dot(h1, w2_ref[...], preferred_element_type=jnp.float32)
    h2 = jnp.maximum(h2 + b2_ref[...], 0.0).astype(jnp.bfloat16)   # (BT, 2688)

    # fc1: one K = 2688 matmul.  The NCHW flatten ordering was folded into
    # wf1 at prepare time, so no in-kernel transpose/reshape is needed.
    h3 = jnp.dot(h2, wf1_ref[...], preferred_element_type=jnp.float32)
    h3 = jnp.maximum(h3 + bf1_ref[...], 0.0).astype(jnp.bfloat16)  # (BT, 128)

    # fc2: lane-dense (BT, 128) store; wrapper slices [:, :7].
    o_ref[...] = (jnp.dot(h3, wf2_ref[...], preferred_element_type=jnp.float32)
                  + bf2_ref[...])


# ---------------- wrapper ----------------

def _full_spec(shape):
    return pl.BlockSpec(shape, lambda i: (0,) * len(shape))


def dqn_forward(prep, x):
    """Fused Pallas forward. x: any (..., 42)-compatible state batch."""
    x = jnp.asarray(x, jnp.float32).reshape(-1, P)
    b = x.shape[0]
    bt = _choose_bt(b)
    nb = pl.cdiv(b, bt)
    bp = nb * bt
    xp = jnp.pad(x, ((0, bp - b), (0, 0))).astype(jnp.bfloat16)

    grid_spec = pltpu.PrefetchScalarGridSpec(
        num_scalar_prefetch=0,
        grid=(nb,),
        in_specs=[
            pl.BlockSpec((bt, P), lambda i: (i, 0)),  # boards, lane-dense bf16
            _full_spec((P, P * C1)),                  # conv1 dense w   (bf16)
            _full_spec((1, P * C1)),                  # conv1 dense b   (f32)
            _full_spec((P * C1, P * C2)),             # conv2 dense w   (bf16)
            _full_spec((1, P * C2)),                  # conv2 dense b   (f32)
            _full_spec((P * C2, F1)),                 # fc1 w reordered (bf16)
            _full_spec((1, F1)),                      # fc1 b           (f32)
            _full_spec((F1, NPAD)),                   # fc2 w padded    (bf16)
            _full_spec((1, NPAD)),                    # fc2 b padded    (f32)
        ],
        out_specs=pl.BlockSpec((bt, NPAD), lambda i: (i, 0)),
    )
    out = pl.pallas_call(
        _dqn_fused_kernel,
        out_shape=jax.ShapeDtypeStruct((bp, NPAD), jnp.float32),
        grid_spec=grid_spec,
        compiler_params=pltpu.CompilerParams(
            dimension_semantics=("parallel",),
            vmem_limit_bytes=48 * 1024 * 1024,
        ),
    )(xp, prep["w1"], prep["b1"], prep["w2"], prep["b2"],
      prep["wf1"], prep["bf1"], prep["wf2"], prep["bf2"])
    return out[:b, :ACTION_SIZE]


# ---------------- params: init + one-time layout prep ----------------

def init_params(key):
    ks = jax.random.split(key, 8)

    def u(k, shape, fan_in):
        bound = 1.0 / jnp.sqrt(jnp.float32(fan_in))
        return jax.random.uniform(k, shape, jnp.float32, -bound, bound)

    return {
        "conv1_w": u(ks[0], (32, 1, 3, 3), 1 * 9),        # OIHW like PyTorch
        "conv1_b": u(ks[1], (32,), 1 * 9),
        "conv2_w": u(ks[2], (64, 32, 3, 3), 32 * 9),
        "conv2_b": u(ks[3], (64,), 32 * 9),
        "fc1_w":   u(ks[4], (128, 64 * H * W), 64 * H * W),
        "fc1_b":   u(ks[5], (128,), 64 * H * W),
        "fc2_w":   u(ks[6], (ACTION_SIZE, 128), 128),
        "fc2_b":   u(ks[7], (ACTION_SIZE,), 128),
    }


def _conv3x3_to_dense(w_oihw, cin, cout):
    """Zero-stuffed dense matrix for a 3x3 SAME conv on the 6x7 board.

    Input lanes are ordered p_in*cin + c_in, output lanes p_out*cout + c_out:
    dense[p_in*cin + ci, p_out*cout + co] = w[co, ci, kh, kw] whenever the tap
    (kh, kw) maps p_in onto p_out (zero padding elsewhere)."""
    w = np.asarray(w_oihw, np.float32)              # (cout, cin, 3, 3)
    dense = np.zeros((P * cin, P * cout), np.float32)
    for ho in range(H):
        for wo in range(W):
            p_out = ho * W + wo
            for kh in range(3):
                hi = ho + kh - 1
                if not (0 <= hi < H):
                    continue
                for kw in range(3):
                    wi = wo + kw - 1
                    if not (0 <= wi < W):
                        continue
                    p_in = hi * W + wi
                    dense[p_in * cin:(p_in + 1) * cin,
                          p_out * cout:(p_out + 1) * cout] = w[:, :, kh, kw].T
    return jnp.asarray(dense)


def prepare_params(params):
    """One-time host-side weight layout transforms into kernel-native layouts."""
    w1 = _conv3x3_to_dense(params["conv1_w"], 1, C1)          # (42, 1344)
    w2 = _conv3x3_to_dense(params["conv2_w"], C1, C2)         # (1344, 2688)
    b1 = jnp.tile(params["conv1_b"], P).reshape(1, P * C1)    # lane = p*C1 + c
    b2 = jnp.tile(params["conv2_b"], P).reshape(1, P * C2)
    # fc1_w is (F1, C2*P) over NCHW-flat columns j = c*P + p; re-order once so
    # its rows follow the kernel's p*C2 + c lane layout.
    wf1 = params["fc1_w"].reshape(F1, C2, P).transpose(2, 1, 0).reshape(P * C2, F1)
    wf2 = jnp.zeros((F1, NPAD), jnp.float32).at[:, :ACTION_SIZE].set(
        params["fc2_w"].T)
    bf2 = jnp.zeros((1, NPAD), jnp.float32).at[:, :ACTION_SIZE].set(
        params["fc2_b"][None, :])
    return {
        "w1": w1.astype(jnp.bfloat16),
        "b1": b1.astype(jnp.float32),
        "w2": w2.astype(jnp.bfloat16),
        "b2": b2.astype(jnp.float32),
        "wf1": wf1.astype(jnp.bfloat16),
        "bf1": params["fc1_b"].reshape(1, F1).astype(jnp.float32),
        "wf2": wf2.astype(jnp.bfloat16),
        "bf2": bf2,
    }


# ---------------- pure-JAX reference ----------------

def dqn_forward_ref(params, x):
    B = x.shape[0]
    y = x.reshape(B, 1, H, W).astype(jnp.float32)
    y = jax.lax.conv_general_dilated(y, params["conv1_w"], (1, 1), "SAME",
                                     dimension_numbers=("NCHW", "OIHW", "NCHW"))
    y = jax.nn.relu(y + params["conv1_b"][None, :, None, None])
    y = jax.lax.conv_general_dilated(y, params["conv2_w"], (1, 1), "SAME",
                                     dimension_numbers=("NCHW", "OIHW", "NCHW"))
    y = jax.nn.relu(y + params["conv2_b"][None, :, None, None])
    y = y.reshape(B, -1)
    y = jax.nn.relu(y @ params["fc1_w"].T + params["fc1_b"])
    return y @ params["fc2_w"].T + params["fc2_b"]


if __name__ == "__main__":
    key = jax.random.PRNGKey(0)
    pkey, xkey = jax.random.split(key)
    params = init_params(pkey)
    prep = prepare_params(params)          # one-time layout transforms

    # batch=2 flat 6x7 boards (the module view()s any 42-element state)
    x = jax.random.uniform(xkey, (2, 42), jnp.float32)

    fwd = jax.jit(dqn_forward)
    out = jax.block_until_ready(fwd(prep, x))
    ref = jax.block_until_ready(dqn_forward_ref(params, x))

    assert out.shape == (2, ACTION_SIZE), out.shape
    # bf16 matmul inputs (f32 accumulate) -> loosened tolerance vs f32 reference
    assert jnp.allclose(out, ref, atol=2e-2, rtol=2e-2), (out, ref)
    print("KERNEL_OK")
</pallas_src>

<mosaic_0001>
module attributes {stable_mosaic.version = 11 : i64} {
  func.func @_dqn_fused_kernel(%arg0: i32, %arg1: memref<8x42xbf16, #tpu.memory_space<vmem>>, %arg2: memref<42x1344xbf16, #tpu.memory_space<vmem>>, %arg3: memref<1x1344xf32, #tpu.memory_space<vmem>>, %arg4: memref<1344x2688xbf16, #tpu.memory_space<vmem>>, %arg5: memref<1x2688xf32, #tpu.memory_space<vmem>>, %arg6: memref<2688x128xbf16, #tpu.memory_space<vmem>>, %arg7: memref<1x128xf32, #tpu.memory_space<vmem>>, %arg8: memref<128x128xbf16, #tpu.memory_space<vmem>>, %arg9: memref<1x128xf32, #tpu.memory_space<vmem>>, %arg10: memref<8x128xf32, #tpu.memory_space<vmem>>) attributes {dimension_semantics = [#tpu.dimension_semantics<parallel>], iteration_bounds = array<i64: 1>, scalar_prefetch = 0 : i64, scratch_operands = 0 : i64, tpu.core_type = #tpu.core_type<tc>, window_params = [{transform_indices = @transform_0, window_bounds = array<i64: 8, 42>}, {pipeline_mode = #tpu.pipeline_mode<synchronous>, transform_indices = @transform_1, window_bounds = array<i64: 42, 1344>}, {pipeline_mode = #tpu.pipeline_mode<synchronous>, transform_indices = @transform_2, window_bounds = array<i64: 1, 1344>}, {pipeline_mode = #tpu.pipeline_mode<synchronous>, transform_indices = @transform_3, window_bounds = array<i64: 1344, 2688>}, {pipeline_mode = #tpu.pipeline_mode<synchronous>, transform_indices = @transform_4, window_bounds = array<i64: 1, 2688>}, {pipeline_mode = #tpu.pipeline_mode<synchronous>, transform_indices = @transform_5, window_bounds = array<i64: 2688, 128>}, {pipeline_mode = #tpu.pipeline_mode<synchronous>, transform_indices = @transform_6, window_bounds = array<i64: 1, 128>}, {pipeline_mode = #tpu.pipeline_mode<synchronous>, transform_indices = @transform_7, window_bounds = array<i64: 128, 128>}, {pipeline_mode = #tpu.pipeline_mode<synchronous>, transform_indices = @transform_8, window_bounds = array<i64: 1, 128>}, {transform_indices = @transform_9, window_bounds = array<i64: 8, 128>}]} {
    %c0 = arith.constant 0 : index
    %c0_0 = arith.constant 0 : index
    %0 = vector.load %arg1[%c0, %c0_0] : memref<8x42xbf16, #tpu.memory_space<vmem>>, vector<8x42xbf16>
    %c0_1 = arith.constant 0 : index
    %c0_2 = arith.constant 0 : index
    %1 = vector.load %arg2[%c0_1, %c0_2] : memref<42x1344xbf16, #tpu.memory_space<vmem>>, vector<42x1344xbf16>
    %cst = arith.constant dense<0.000000e+00> : vector<8x1344xf32>
    %2 = tpu.matmul %0, %1, %cst {dimension_numbers = #tpu.dot_dimension_numbers<[1], [0], [0], [1], [0, 0, 1, 1], [], []>} : vector<8x42xbf16>, vector<42x1344xbf16>, vector<8x1344xf32> -> vector<8x1344xf32>
    %c0_3 = arith.constant 0 : index
    %c0_4 = arith.constant 0 : index
    %3 = vector.load %arg3[%c0_3, %c0_4] : memref<1x1344xf32, #tpu.memory_space<vmem>>, vector<1x1344xf32>
    %4 = vector.broadcast %3 : vector<1x1344xf32> to vector<8x1344xf32>
    %5 = arith.addf %2, %4 : vector<8x1344xf32>
    %cst_5 = arith.constant 0.000000e+00 : f32
    %6 = vector.broadcast %cst_5 : f32 to vector<8x1344xf32>
    %7 = arith.maximumf %5, %6 : vector<8x1344xf32>
    %8 = arith.truncf %7 : vector<8x1344xf32> to vector<8x1344xbf16>
    %c0_6 = arith.constant 0 : index
    %c0_7 = arith.constant 0 : index
    %9 = vector.load %arg4[%c0_6, %c0_7] : memref<1344x2688xbf16, #tpu.memory_space<vmem>>, vector<1344x2688xbf16>
    %cst_8 = arith.constant dense<0.000000e+00> : vector<8x2688xf32>
    %10 = tpu.matmul %8, %9, %cst_8 {dimension_numbers = #tpu.dot_dimension_numbers<[1], [0], [0], [1], [0, 0, 1, 1], [], []>} : vector<8x1344xbf16>, vector<1344x2688xbf16>, vector<8x2688xf32> -> vector<8x2688xf32>
    %c0_9 = arith.constant 0 : index
    %c0_10 = arith.constant 0 : index
    %11 = vector.load %arg5[%c0_9, %c0_10] : memref<1x2688xf32, #tpu.memory_space<vmem>>, vector<1x2688xf32>
    %12 = vector.broadcast %11 : vector<1x2688xf32> to vector<8x2688xf32>
    %13 = arith.addf %10, %12 : vector<8x2688xf32>
    %cst_11 = arith.constant 0.000000e+00 : f32
    %14 = vector.broadcast %cst_11 : f32 to vector<8x2688xf32>
    %15 = arith.maximumf %13, %14 : vector<8x2688xf32>
    %16 = arith.truncf %15 : vector<8x2688xf32> to vector<8x2688xbf16>
    %c0_12 = arith.constant 0 : index
    %c0_13 = arith.constant 0 : index
    %17 = vector.load %arg6[%c0_12, %c0_13] : memref<2688x128xbf16, #tpu.memory_space<vmem>>, vector<2688x128xbf16>
    %cst_14 = arith.constant dense<0.000000e+00> : vector<8x128xf32>
    %18 = tpu.matmul %16, %17, %cst_14 {dimension_numbers = #tpu.dot_dimension_numbers<[1], [0], [0], [1], [0, 0, 1, 1], [], []>} : vector<8x2688xbf16>, vector<2688x128xbf16>, vector<8x128xf32> -> vector<8x128xf32>
    %c0_15 = arith.constant 0 : index
    %c0_16 = arith.constant 0 : index
    %19 = vector.load %arg7[%c0_15, %c0_16] : memref<1x128xf32, #tpu.memory_space<vmem>>, vector<1x128xf32>
    %20 = vector.broadcast %19 : vector<1x128xf32> to vector<8x128xf32>
    %21 = arith.addf %18, %20 : vector<8x128xf32>
    %cst_17 = arith.constant 0.000000e+00 : f32
    %22 = vector.broadcast %cst_17 : f32 to vector<8x128xf32>
    %23 = arith.maximumf %21, %22 : vector<8x128xf32>
    %24 = arith.truncf %23 : vector<8x128xf32> to vector<8x128xbf16>
    %c0_18 = arith.constant 0 : index
    %c0_19 = arith.constant 0 : index
    %25 = vector.load %arg8[%c0_18, %c0_19] : memref<128x128xbf16, #tpu.memory_space<vmem>>, vector<128x128xbf16>
    %cst_20 = arith.constant dense<0.000000e+00> : vector<8x128xf32>
    %26 = tpu.matmul %24, %25, %cst_20 {dimension_numbers = #tpu.dot_dimension_numbers<[1], [0], [0], [1], [0, 0, 1, 1], [], []>} : vector<8x128xbf16>, vector<128x128xbf16>, vector<8x128xf32> -> vector<8x128xf32>
    %c0_21 = arith.constant 0 : index
    %c0_22 = arith.constant 0 : index
    %27 = vector.load %arg9[%c0_21, %c0_22] : memref<1x128xf32, #tpu.memory_space<vmem>>, vector<1x128xf32>
    %28 = vector.broadcast %27 : vector<1x128xf32> to vector<8x128xf32>
    %29 = arith.addf %26, %28 : vector<8x128xf32>
    %c0_23 = arith.constant 0 : index
    %c0_24 = arith.constant 0 : index
    %30 = vector.load %arg10[%c0_23, %c0_24] : memref<8x128xf32, #tpu.memory_space<vmem>>, vector<8x128xf32>
    tpu.vector_store %arg10[%c0_23, %c0_24], %29 {strides = array<i32>} : memref<8x128xf32, #tpu.memory_space<vmem>>, vector<8x128xf32>,
    return
  }
  func.func @transform_0(%arg0: i32) -> (i32, i32) {
    %c0_i32 = arith.constant 0 : i32
    %c0_i32_0 = arith.constant 0 : i32
    return %arg0, %c0_i32 : i32, i32
  }
  func.func @transform_1(%arg0: i32) -> (i32, i32) {
    %c0_i32 = arith.constant 0 : i32
    %c0_i32_0 = arith.constant 0 : i32
    %c0_i32_1 = arith.constant 0 : i32
    return %c0_i32, %c0_i32_0 : i32, i32
  }
  func.func @transform_2(%arg0: i32) -> (i32, i32) {
    %c0_i32 = arith.constant 0 : i32
    %c0_i32_0 = arith.constant 0 : i32
    %c0_i32_1 = arith.constant 0 : i32
    return %c0_i32, %c0_i32_0 : i32, i32
  }
  func.func @transform_3(%arg0: i32) -> (i32, i32) {
    %c0_i32 = arith.constant 0 : i32
    %c0_i32_0 = arith.constant 0 : i32
    %c0_i32_1 = arith.constant 0 : i32
    return %c0_i32, %c0_i32_0 : i32, i32
  }
  func.func @transform_4(%arg0: i32) -> (i32, i32) {
    %c0_i32 = arith.constant 0 : i32
    %c0_i32_0 = arith.constant 0 : i32
    %c0_i32_1 = arith.constant 0 : i32
    return %c0_i32, %c0_i32_0 : i32, i32
  }
  func.func @transform_5(%arg0: i32) -> (i32, i32) {
    %c0_i32 = arith.constant 0 : i32
    %c0_i32_0 = arith.constant 0 : i32
    %c0_i32_1 = arith.constant 0 : i32
    return %c0_i32, %c0_i32_0 : i32, i32
  }
  func.func @transform_6(%arg0: i32) -> (i32, i32) {
    %c0_i32 = arith.constant 0 : i32
    %c0_i32_0 = arith.constant 0 : i32
    %c0_i32_1 = arith.constant 0 : i32
    return %c0_i32, %c0_i32_0 : i32, i32
  }
  func.func @transform_7(%arg0: i32) -> (i32, i32) {
    %c0_i32 = arith.constant 0 : i32
    %c0_i32_0 = arith.constant 0 : i32
    %c0_i32_1 = arith.constant 0 : i32
    return %c0_i32, %c0_i32_0 : i32, i32
  }
  func.func @transform_8(%arg0: i32) -> (i32, i32) {
    %c0_i32 = arith.constant 0 : i32
    %c0_i32_0 = arith.constant 0 : i32
    %c0_i32_1 = arith.constant 0 : i32
    return %c0_i32, %c0_i32_0 : i32, i32
  }
  func.func @transform_9(%arg0: i32) -> (i32, i32) {
    %c0_i32 = arith.constant 0 : i32
    %c0_i32_0 = arith.constant 0 : i32
    return %arg0, %c0_i32 : i32, i32
  }
}

</mosaic_0001>

<bundles_post_ra>
// kernel: dqn_forward.1
= control target key start
LH: loop header
LB: loop body
LE: loop exit
PB: predicated region body
PF: predicated region fallthrough
CT: control target
= control target key end

     0   :  { %14 = vsyncpa [#allocation3], 0  ;;  %s22461_s0 = inlined_call_operand.vmem [shape: bf16[8,42], index: 0, kind: input, shape index: {}]   ;;  %s22462_s1 = inlined_call_operand.hbm [shape: bf16[42,1344], index: 1, kind: input, shape index: {}]   ;;  %s22463_s2 = inlined_call_operand.hbm [shape: f32[1,1344], index: 2, kind: input, shape index: {}]   ;;  %s22464_s3 = inlined_call_operand.hbm [shape: bf16[1344,2688], index: 3, kind: input, shape index: {}]   ;;  %s22465_s4 = inlined_call_operand.hbm [shape: f32[1,2688], index: 4, kind: input, shape index: {}]   ;;  %s22466_s5 = inlined_call_operand.hbm [shape: bf16[2688,128], index: 5, kind: input, shape index: {}]   ;;  %s22467_s6 = inlined_call_operand.hbm [shape: f32[1,128], index: 6, kind: input, shape index: {}]   ;;  %s22468_s7 = inlined_call_operand.hbm [shape: bf16[128,128], index: 7, kind: input, shape index: {}]   ;;  %s22469_s8 = inlined_call_operand.hbm [shape: f32[1,128], index: 8, kind: input, shape index: {}]   ;;  %s22470_s9 = inlined_call_operand.vmem [shape: f32[8,128], index: 9, kind: output, shape index: {}]  }
   0x1   :  { %15 = vsyncpa [#allocation5], 0 }
   0x2   :  { %16 = vsyncpa [#allocation8], 0 }
   0x3   :  { %17 = vsyncpa [#allocation11], 0 }
   0x4   :  { %18 = vsyncpa [#allocation14], 0  ;;  %s21884_s30 = smov [#allocation4]   ;;  %s21885_s11 = smov [#allocation7]  }
   0x5   :  { %s39_s10 = sshll.u32 %s21884_s30, 4  ;;  %s61_s12 = sshll.u32 %s21885_s11, 4  ;;  %s40_s10 = int_to_ptr.vmem [resolvable:$true] %s39_s10  ;;  %s62_s12 = int_to_ptr.vmem [resolvable:$true] %s61_s12 }
   0x6   :  { %s21698_s15 = scalar_lea.hbm %s22463_s2, 176 }
   0x7   :  { %p21699_p0 = scmp.ne.s32.totalorder %s22463_s2, %s21698_s15  ;;  %p21702_p1 = scmp.lt.u32.totalorder %s21698_s15, %s22463_s2 }
   0x9   :  { %p21704_p2 = pnand %p21702_p1, %p21699_p0 }
   0xb   :  { %21707 = shalt.err (!%p21704_p2)
}
   0xc   :  { %s21708_s20 = scalar_lea.vmem %s40_s10, 176  ;;  %s21712_s21 = scalar_lea.vmem %s40_s10, 192 }
   0xd   :  { %p21709_p3 = scmp.ne.s32.totalorder %s40_s10, %s21708_s20  ;;  %p21713_p4 = scmp.lt.s32.totalorder %s40_s10, %s40_s10 }
   0xe   :  { %p21714_p5 = scmp.lt.s32.totalorder %s21712_s21, %s21708_s20 }
  0x10   :  { %p21715_p6 = por %p21714_p5, %p21713_p4 }
  0x12   :  { %p21716_p7 = pnand %p21715_p6, %p21709_p3 }
  0x14   :  { %21719 = shalt.err (!%p21716_p7)
}
  0x15   :  { %42 = dma.hbm_to_vmem [thread:$0]  %s22463_s2, 176, %s40_s10, [#allocation5]  }
  0x16   :  { %s21720_s26 = scalar_lea.hbm %s22465_s4, 336 }
  0x17   :  { %p21721_p8 = scmp.ne.s32.totalorder %s22465_s4, %s21720_s26  ;;  %p21724_p9 = scmp.lt.u32.totalorder %s21720_s26, %s22465_s4 }
  0x19   :  { %p21726_p10 = pnand %p21724_p9, %p21721_p8 }
  0x1b   :  { %21729 = shalt.err (!%p21726_p10)
}
  0x1c   :  { %s21730_s11 = scalar_lea.vmem %s62_s12, 336  ;;  %s21734_s13 = scalar_lea.vmem %s62_s12, 352 }
  0x1d   :  { %p21731_p11 = scmp.ne.s32.totalorder %s62_s12, %s21730_s11  ;;  %p21735_p12 = scmp.lt.s32.totalorder %s62_s12, %s62_s12 }
  0x1e   :  { %p21736_p13 = scmp.lt.s32.totalorder %s21734_s13, %s21730_s11 }
  0x20   :  { %p21737_p0 = por %p21736_p13, %p21735_p12 }
  0x22   :  { %p21738_p1 = pnand %p21737_p0, %p21731_p11 }
  0x24   :  { %21741 = shalt.err (!%p21738_p1)
}
  0x25   :  { %64 = dma.hbm_to_vmem [thread:$0]  %s22465_s4, 336, %s62_s12, [#allocation8]  }
  0x26   :  { %s21886_s14 = smov [#allocation10]   ;;  %s21887_s16 = smov [#allocation2]  }
  0x27   :  { %s83_s15 = sshll.u32 %s21886_s14, 4  ;;  %s26_s17 = sshll.u32 %s21887_s16, 4  ;;  %s84_s15 = int_to_ptr.vmem [resolvable:$true] %s83_s15  ;;  %s21975_s17 = int_to_ptr.vmem [resolvable:$true] %s26_s17 }
  0x28   :  { %s21742_s20 = scalar_lea.hbm %s22467_s6, 16 }
  0x29   :  { %p21743_p2 = scmp.ne.s32.totalorder %s22467_s6, %s21742_s20  ;;  %p21746_p3 = scmp.lt.u32.totalorder %s21742_s20, %s22467_s6 }
  0x2b   :  { %p21748_p4 = pnand %p21746_p3, %p21743_p2 }
  0x2d   :  { %21751 = shalt.err (!%p21748_p4)
}
  0x2e   :  { %s21752_s4 = scalar_lea.vmem %s84_s15, 16  ;;  %s21756_s12 = scalar_lea.vmem %s84_s15, 32 }
  0x2f   :  { %p21753_p5 = scmp.ne.s32.totalorder %s84_s15, %s21752_s4  ;;  %p21757_p6 = scmp.lt.s32.totalorder %s84_s15, %s84_s15 }
  0x30   :  { %p21758_p7 = scmp.lt.s32.totalorder %s21756_s12, %s21752_s4 }
  0x32   :  { %p21759_p8 = por %p21758_p7, %p21757_p6 }
  0x34   :  { %p21760_p9 = pnand %p21759_p8, %p21753_p5 }
  0x36   :  { %21763 = shalt.err (!%p21760_p9)
}
  0x37   :  { %86 = dma.hbm_to_vmem [thread:$0]  %s22467_s6, 16, %s84_s15, [#allocation11]  }
  0x38   :  { %s21764_s29 = scalar_lea.hbm %s22462_s1, 4224 }
  0x39   :  { %p21765_p10 = scmp.ne.s32.totalorder %s22462_s1, %s21764_s29  ;;  %p21768_p11 = scmp.lt.u32.totalorder %s21764_s29, %s22462_s1 }
  0x3b   :  { %p21770_p12 = pnand %p21768_p11, %p21765_p10 }
  0x3d   :  { %21773 = shalt.err (!%p21770_p12)
}
  0x3e   :  { %s21774_s10 = scalar_lea.vmem %s21975_s17, 4224  ;;  %p21779_p0 = scmp.lt.s32.totalorder %s21975_s17, %s21975_s17 }
  0x3f   :  { %p21775_p13 = scmp.ne.s32.totalorder %s21975_s17, %s21774_s10  ;;  %p21780_p1 = scmp.lt.s32.totalorder %s21774_s10, %s21774_s10 }
  0x41   :  { %p21781_p2 = por %p21780_p1, %p21779_p0 }
  0x43   :  { %p21782_p3 = pnand %p21781_p2, %p21775_p13 }
  0x45   :  { %21785 = shalt.err (!%p21782_p3)
}
  0x46   :  { %s21888_s6 = smov 704   ;;  %s21889_s14 = smov 44  }
  0x47   :  { %32 = dma.hbm_to_vmem [thread:$0]  %s22462_s1, 4224, %s21975_s17, [#allocation3], %s21888_s6, %s21888_s6, %s21889_s14  }
  0x48   :  { %s21890_s18 = smov [#allocation6]   ;;  %s21786_s22 = scalar_lea.hbm %s22464_s3, 225792 }
  0x49   :  { %s48_s19 = sshll.u32 %s21890_s18, 4  ;;  %p21787_p4 = scmp.ne.s32.totalorder %s22464_s3, %s21786_s22  ;;  %s49_s19 = int_to_ptr.vmem [resolvable:$true] %s48_s19 }
  0x4a   :  { %p21790_p5 = scmp.lt.u32.totalorder %s21786_s22, %s22464_s3 }
  0x4c   :  { %p21792_p6 = pnand %p21790_p5, %p21787_p4 }
  0x4e   :  { %21795 = shalt.err (!%p21792_p6)
}
  0x4f   :  { %s21796_s25 = scalar_lea.vmem %s49_s19, 225792  ;;  %p21801_p8 = scmp.lt.s32.totalorder %s49_s19, %s49_s19 }
  0x50   :  { %p21797_p7 = scmp.ne.s32.totalorder %s49_s19, %s21796_s25  ;;  %p21802_p9 = scmp.lt.s32.totalorder %s21796_s25, %s21796_s25 }
  0x52   :  { %p21803_p10 = por %p21802_p9, %p21801_p8 }
  0x54   :  { %p21804_p11 = pnand %p21803_p10, %p21797_p7 }
  0x56   :  { %21807 = shalt.err (!%p21804_p11)
}
  0x57   :  { %s21891_s1 = smov 1344   ;;  %s21892_s17 = smov 84  }
  0x58   :  { %54 = dma.hbm_to_vmem [thread:$0]  %s22464_s3, 225792, %s49_s19, [#allocation5], %s21891_s1, %s21891_s1, %s21892_s17  }
  0x59   :  { %s21893_s28 = smov [#allocation9]   ;;  %s21808_s13 = scalar_lea.hbm %s22466_s5, 21504 }
  0x5a   :  { %s70_s29 = sshll.u32 %s21893_s28, 4  ;;  %p21809_p12 = scmp.ne.s32.totalorder %s22466_s5, %s21808_s13  ;;  %s71_s29 = int_to_ptr.vmem [resolvable:$true] %s70_s29 }
  0x5b   :  { %p21812_p13 = scmp.lt.u32.totalorder %s21808_s13, %s22466_s5 }
  0x5d   :  { %p21814_p0 = pnand %p21812_p13, %p21809_p12 }
  0x5f   :  { %21817 = shalt.err (!%p21814_p0)
}
  0x60   :  { %s21818_s15 = scalar_lea.vmem %s71_s29, 21504  ;;  %p21823_p2 = scmp.lt.s32.totalorder %s71_s29, %s71_s29 }
  0x61   :  { %p21819_p1 = scmp.ne.s32.totalorder %s71_s29, %s21818_s15  ;;  %p21824_p3 = scmp.lt.s32.totalorder %s21818_s15, %s21818_s15 }
  0x63   :  { %p21825_p4 = por %p21824_p3, %p21823_p2 }
  0x65   :  { %p21826_p5 = pnand %p21825_p4, %p21819_p1 }
  0x67   :  { %21829 = shalt.err (!%p21826_p5)
}
  0x68   :  { %s21894_s3 = smov 64   ;;  %s21895_s16 = smov 4  }
  0x69   :  { %76 = dma.hbm_to_vmem [thread:$0]  %s22466_s5, 21504, %s71_s29, [#allocation8], %s21894_s3, %s21894_s3, %s21895_s16  }
  0x6a   :  { %s21896_s20 = smov [#allocation12]   ;;  %s21897_s22 = smov [#allocation13]  }
  0x6b   :  { %s92_s21 = sshll.u32 %s21896_s20, 4  ;;  %s105_s23 = sshll.u32 %s21897_s22, 4  ;;  %s93_s21 = int_to_ptr.vmem [resolvable:$true] %s92_s21  ;;  %s106_s23 = int_to_ptr.vmem [resolvable:$true] %s105_s23 }
  0x6c   :  { %s21830_s12 = scalar_lea.hbm %s22468_s7, 1024 }
  0x6d   :  { %p21831_p6 = scmp.ne.s32.totalorder %s22468_s7, %s21830_s12  ;;  %p21834_p7 = scmp.lt.u32.totalorder %s21830_s12, %s22468_s7 }
  0x6f   :  { %p21836_p8 = pnand %p21834_p7, %p21831_p6 }
  0x71   :  { %21839 = shalt.err (!%p21836_p8)
}
  0x72   :  { %s21840_s5 = scalar_lea.vmem %s93_s21, 1024  ;;  %p21845_p10 = scmp.lt.s32.totalorder %s93_s21, %s93_s21 }
  0x73   :  { %p21841_p9 = scmp.ne.s32.totalorder %s93_s21, %s21840_s5  ;;  %p21846_p11 = scmp.lt.s32.totalorder %s21840_s5, %s21840_s5 }
  0x75   :  { %p21847_p12 = por %p21846_p11, %p21845_p10 }
  0x77   :  { %p21848_p13 = pnand %p21847_p12, %p21841_p9 }
  0x79   :  { %21851 = shalt.err (!%p21848_p13)
}
  0x7a   :  { %98 = dma.hbm_to_vmem [thread:$0]  %s22468_s7, 1024, %s93_s21, [#allocation11], %s21894_s3, %s21894_s3, %s21895_s16  }
  0x7b   :  { %s21852_s11 = scalar_lea.hbm %s22469_s8, 16 }
  0x7c   :  { %p21853_p0 = scmp.ne.s32.totalorder %s22469_s8, %s21852_s11  ;;  %p21856_p1 = scmp.lt.u32.totalorder %s21852_s11, %s22469_s8 }
  0x7e   :  { %p21858_p2 = pnand %p21856_p1, %p21853_p0 }
  0x80   :  { %21861 = shalt.err (!%p21858_p2)
}
  0x81   :  { %s21862_s14 = scalar_lea.vmem %s106_s23, 16  ;;  %s21866_s15 = scalar_lea.vmem %s106_s23, 32 }
  0x82   :  { %p21863_p3 = scmp.ne.s32.totalorder %s106_s23, %s21862_s14  ;;  %p21867_p4 = scmp.lt.s32.totalorder %s106_s23, %s106_s23 }
  0x83   :  { %p21868_p5 = scmp.lt.s32.totalorder %s21866_s15, %s21862_s14 }
  0x85   :  { %p21869_p6 = por %p21868_p5, %p21867_p4 }
  0x87   :  { %p21870_p7 = pnand %p21869_p6, %p21863_p3 }
  0x89   :  { %21873 = shalt.err (!%p21870_p7)
}
  0x8a   :  { %108 = dma.hbm_to_vmem [thread:$0]  %s22469_s8, 16, %s106_s23, [#allocation14]  }
  0x8b   :  { %21874 = dma.done.wait [#allocation3], 4224  }
  0x8c   :  { %21875 = vsyncadd [#allocation3], 4294963072 }
  0x8d   :  { %21876 = dma.done.wait [#allocation5], 225968  }
  0x8e   :  { %21877 = vsyncadd [#allocation5], 4294741328 }
  0x8f   :  { %21878 = dma.done.wait [#allocation8], 21840  }
  0x90   :  { %21879 = vsyncadd [#allocation8], 4294945456 }
  0x91   :  { %21880 = dma.done.wait [#allocation11], 1040  }
  0x92   :  { %21881 = vsyncadd [#allocation11], 4294966256 }
  0x93   :  { %21882 = dma.done.wait [#allocation14], 16  }
  0x94   :  { %21883 = vsyncadd [#allocation14], 4294967280  ;;  %v21898_v0 = vmov 0   ;;  %v18868_v1 = vld [vmem:[#allocation2 + $0x4] ss:$44 sps:$4 sm:$0xff]   ;;  %vm391_vm0 = vcmask 1044480  }
  0x95   :  { %457 = vmatprep.mubr.bf16.mxu1 %v21898_v0  ;;  %539 = vmatprep.mubr.bf16.mxu0 %v21898_v0  ;;  %v18870_v2 = vld [vmem:[#allocation2] ss:$44 sps:$4 sm:$0xff]   ;;  %v18871_v3 = vld [vmem:[#allocation2 + $0x5c] ss:$44 sps:$4 sm:$0xff]   ;;  %v18873_v4 = vld [vmem:[#allocation2 + $0x58] ss:$44 sps:$4 sm:$0xff]  }
  0x96   :  { %425 = vmatprep.subr.bf16.mxu1 %v18868_v1  ;;  %v18874_v5 = vld [vmem:[#allocation2 + $0xb4] ss:$44 sps:$4 sm:$0x1f]   ;;  %v18876_v6 = vld [vmem:[#allocation2 + $0xb0] ss:$44 sps:$4 sm:$0x1f]  }
  0x97   :  { %426 = vmatpush1.bf16.msra.mxu1 %v18870_v2  ;;  %v393_v7 = vsel %vm391_vm0, %v18876_v6, 0  ;;  %v18879_v8 = vld [vmem:[#allocation2 + $0xc] ss:$44 sps:$4 sm:$0xff]   ;;  %v22061_v9 = vld [vmem:[%s22461_s0] sm:$0xf]  ;;  %vm387_vm1 = vcmask 343040  }
  0x98   :  { %427 = vmatprep.subr.bf16.mxu1 %v18871_v3  ;;  %v18877_v10 = vld [vmem:[#allocation2 + $0x8] ss:$44 sps:$4 sm:$0xff]   ;;  %v18888_v12 = vld [vmem:[#allocation2 + $0x10] ss:$44 sps:$4 sm:$0xff]   ;;  %v18889_v14 = vld [vmem:[#allocation2 + $0x6c] ss:$44 sps:$4 sm:$0xff]  }
  0x99   :  { %v18886_v11 = vld [vmem:[#allocation2 + $0x14] ss:$44 sps:$4 sm:$0xff]   ;;  %v18882_v13 = vld [vmem:[#allocation2 + $0x64] ss:$44 sps:$4 sm:$0xff]   ;;  %v18897_v24 = vld [vmem:[#allocation2 + $0x1c] ss:$44 sps:$4 sm:$0xff]  }
  0x9a   :  { %507 = vmatprep.subr.bf16.mxu0 %v18886_v11  ;;  %v18891_v15 = vld [vmem:[#allocation2 + $0x68] ss:$44 sps:$4 sm:$0xff]   ;;  %v18892_v16 = vld [vmem:[#allocation2 + $0xc4] ss:$44 sps:$4 sm:$0x1f]   ;;  %v21899_v41 = vmov 0.0  }
  0x9b   :  { %428 = vmatpush1.bf16.msra.mxu1 %v18873_v4  ;;  %508 = vmatpush1.bf16.msra.mxu0 %v18888_v12  ;;  %v18894_v17 = vld [vmem:[#allocation2 + $0xc0] ss:$44 sps:$4 sm:$0x1f]   ;;  %v18885_v19 = vld [vmem:[#allocation2 + $0xb8] ss:$44 sps:$4 sm:$0x1f]  }
  0x9c   :  { %16248 = vmatprep.subr.msk.bf16.mxu1 %vm391_vm0, %v18874_v5  ;;  %509 = vmatprep.subr.bf16.mxu0 %v18889_v14  ;;  %v18880_v18 = vld [vmem:[#allocation2 + $0x60] ss:$44 sps:$4 sm:$0xff]   ;;  %v18883_v20 = vld [vmem:[#allocation2 + $0xbc] ss:$44 sps:$4 sm:$0x1f]   ;;  %v405_v21 = vsel %vm391_vm0, %v18894_v17, 0 }
  0x9d   :  { %v18906_v22 = vld [vmem:[#allocation2 + $0x24] ss:$44 sps:$4 sm:$0xff]   ;;  %v399_v23 = vsel %vm391_vm0, %v18885_v19, 0  ;;  %v18904_v25 = vld [vmem:[#allocation2 + $0x20] ss:$44 sps:$4 sm:$0xff]   ;;  %vm21900_vm2 = vmmov 0  }
  0x9e   :  { %v18910_v26 = vld [vmem:[#allocation2 + $0x7c] ss:$44 sps:$4 sm:$0xff]   ;;  %v18895_v27 = vld [vmem:[#allocation2 + $0x18] ss:$44 sps:$4 sm:$0xff]   ;;  %v18900_v28 = vld [vmem:[#allocation2 + $0x74] ss:$44 sps:$4 sm:$0xff]  }
  0x9f   :  { %430 = vmatpush1.bf16.msra.mxu1 %v393_v7  ;;  %510 = vmatpush1.bf16.msra.mxu0 %v18891_v15  ;;  %v18908_v29 = vld [vmem:[#allocation2 + $0x78] ss:$44 sps:$4 sm:$0xff]   ;;  %v18912_v30 = vld [vmem:[#allocation2 + $0xd4] ss:$44 sps:$4 sm:$0x1f]   ;;  %vm11555_vm3 = vcmask 523264  }
  0xa0   :  { %466 = vmatprep.subr.bf16.mxu1 %v18879_v8  ;;  %16252 = vmatprep.subr.msk.bf16.mxu0 %vm391_vm0, %v18892_v16  ;;  %v18914_v31 = vld [vmem:[#allocation2 + $0xd0] ss:$44 sps:$4 sm:$0x1f]   ;;  %v18901_v33 = vld [vmem:[#allocation2 + $0xcc] ss:$44 sps:$4 sm:$0x1f]  }
  0xa1   :  { %v18898_v32 = vld [vmem:[#allocation2 + $0x70] ss:$44 sps:$4 sm:$0xff]   ;;  %v18903_v34 = vld [vmem:[#allocation2 + $0xc8] ss:$44 sps:$4 sm:$0x1f]   ;;  %v417_v35 = vsel %vm391_vm0, %v18914_v31, 0 }
  0xa2   :  { %16249 = vmatmul.mubr.msk.bf16.vlgmr.msra.gmra.mrb[0].mxu1 %vm387_vm1, %v22061_v9  ;;  %v18918_v36 = vld [vmem:[#allocation6 + $0x4] ss:$84 sps:$4 sm:$0xff]   ;;  %v411_v37 = vsel %vm391_vm0, %v18903_v34, 0  ;;  %v18916_v38 = vld [vmem:[#allocation6] ss:$84 sps:$4 sm:$0xff]  }
  0xa3   :  { %467 = vmatpush1.bf16.msra.mxu1 %v18877_v10  ;;  %498 = vmatprep.mubr.bf16.mxu1 %v21898_v0  ;;  %v18924_v39 = vld [vmem:[#allocation6 + $0xac] ss:$84 sps:$4 sm:$0xff]   ;;  %v18922_v42 = vld [vmem:[#allocation6 + $0xa8] ss:$84 sps:$4 sm:$0xff]   ;;  %v18928_v46 = vld [vmem:[#allocation6 + $0x150] ss:$84 sps:$4 sm:$0xff]  }
  0xa4   :  { %468 = vmatprep.subr.bf16.mxu1 %v18882_v13  ;;  %512 = vmatpush1.bf16.msra.mxu0 %v405_v21  ;;  %v18907_v40 = vld [vmem:[#allocation2 + $0x28] ss:$44 sps:$4 sm:$0xff]   ;;  %v18911_v44 = vld [vmem:[#allocation2 + $0x80] ss:$44 sps:$4 sm:$0xff]   ;;  %v18936_v47 = vld [vmem:[#allocation6 + $0x1fc] ss:$84 sps:$4 sm:$0xff]  }
  0xa5   :  { %589 = vmatprep.subr.bf16.mxu0 %v18906_v22  ;;  %v18930_v43 = vld [vmem:[#allocation6 + $0x154] ss:$84 sps:$4 sm:$0xff]   ;;  %v18915_v45 = vld [vmem:[#allocation2 + $0xd8] ss:$44 sps:$4 sm:$0x1f]  }
  0xa6   :  { %v423_v48 = vsel %vm391_vm0, %v18915_v45, 0  ;;  %v18921_v49 = vld [vmem:[#allocation6 + $0xc] ss:$84 sps:$4 sm:$0xff]   ;;  %v18942_v51 = vld [vmem:[#allocation6 + $0x2a4] ss:$84 sps:$4 sm:$0xff]  }
  0xa7   :  { %469 = vmatpush1.bf16.msra.mxu1 %v18880_v18  ;;  %16253 = vmatmul.mubr.msk.bf16.vlgmr.msra.gmra.mrb[0].mxu0 %vm387_vm1, %v22061_v9  ;;  %v18934_v50 = vld [vmem:[#allocation6 + $0x1f8] ss:$84 sps:$4 sm:$0xff]   ;;  %v18919_v52 = vld [vmem:[#allocation6 + $0x8] ss:$84 sps:$4 sm:$0xff]   ;;  %v18940_v54 = vld [vmem:[#allocation6 + $0x2a0] ss:$84 sps:$4 sm:$0xff]  }
  0xa8   :  { %16250 = vmatprep.subr.msk.bf16.mxu1 %vm391_vm0, %v18883_v20  ;;  %590 = vmatpush1.bf16.msra.mxu0 %v18904_v25  ;;  %v18927_v53 = vld [vmem:[#allocation6 + $0xb4] ss:$84 sps:$4 sm:$0xff]   ;;  %v18948_v55 = vld [vmem:[#allocation6 + $0x34c] ss:$84 sps:$4 sm:$0xff]   ;;  %v18925_v56 = vld [vmem:[#allocation6 + $0xb0] ss:$84 sps:$4 sm:$0xff]  }
  0xa9   :  { %591 = vmatprep.subr.bf16.mxu0 %v18910_v26  ;;  %621 = vmatprep.mubr.bf16.mxu0 %v21898_v0  ;;  %v18933_v57 = vld [vmem:[#allocation6 + $0x15c] ss:$84 sps:$4 sm:$0xff]   ;;  %v18954_v59 = vld [vmem:[#allocation6 + $0x3f4] ss:$84 sps:$4 sm:$0xff]   ;;  %v18931_v60 = vld [vmem:[#allocation6 + $0x158] ss:$84 sps:$4 sm:$0xff]  }
  0xaa   :  { %v18946_v58 = vld [vmem:[#allocation6 + $0x348] ss:$84 sps:$4 sm:$0xff]   ;;  %v18939_v61 = vld [vmem:[#allocation6 + $0x204] ss:$84 sps:$4 sm:$0xff]   ;;  %v18937_v1 = vld [vmem:[#allocation6 + $0x200] ss:$84 sps:$4 sm:$0xff]  }
  0xab   :  { %471 = vmatpush1.bf16.msra.mxu1 %v399_v23  ;;  %v18952_v62 = vld [vmem:[#allocation6 + $0x3f0] ss:$84 sps:$4 sm:$0xff]   ;;  %v18945_v2 = vld [vmem:[#allocation6 + $0x2ac] ss:$84 sps:$4 sm:$0xff]   ;;  %v18943_v5 = vld [vmem:[#allocation6 + $0x2a8] ss:$84 sps:$4 sm:$0xff]  }
  0xac   :  { %548 = vmatprep.subr.bf16.mxu1 %v18897_v24  ;;  %592 = vmatpush1.bf16.msra.mxu0 %v18908_v29  ;;  %v18960_v63 = vld [vmem:[#allocation6 + $0x49c] ss:$84 sps:$4 sm:$0xff]   ;;  %v18958_v3 = vld [vmem:[#allocation6 + $0x498] ss:$84 sps:$4 sm:$0xff]   ;;  %v18951_v6 = vld [vmem:[#allocation6 + $0x354] ss:$84 sps:$4 sm:$0xff]  }
  0xad   :  { %16256 = vmatprep.subr.msk.bf16.mxu0 %vm391_vm0, %v18912_v30  ;;  %v18966_v4 = vld [vmem:[#allocation6 + $0x544] ss:$84 sps:$4 sm:$0xff]   ;;  %v18964_v7 = vld [vmem:[#allocation6 + $0x540] ss:$84 sps:$4 sm:$0xff]   ;;  %v18957_v10 = vld [vmem:[#allocation6 + $0x3fc] ss:$84 sps:$4 sm:$0xff]  }
  0xae   :  { %16251 = vmatmul.mubr.msk.bf16.vlgmr.msra.gmra.mrb[4].mxu1 %vm387_vm1, %v22061_v9  ;;  %v18972_v8 = vld [vmem:[#allocation6 + $0x5ec] ss:$84 sps:$4 sm:$0xff]   ;;  %v18970_v11 = vld [vmem:[#allocation6 + $0x5e8] ss:$84 sps:$4 sm:$0xff]   ;;  %v18963_v14 = vld [vmem:[#allocation6 + $0x4a4] ss:$84 sps:$4 sm:$0xff]  }
  0xaf   :  { %549 = vmatpush1.bf16.msra.mxu1 %v18895_v27  ;;  %580 = vmatprep.mubr.bf16.mxu1 %v21898_v0  ;;  %v18978_v12 = vld [vmem:[#allocation6 + $0x694] ss:$84 sps:$4 sm:$0xff]   ;;  %v18955_v13 = vld [vmem:[#allocation6 + $0x3f8] ss:$84 sps:$4 sm:$0xff]   ;;  %v18976_v15 = vld [vmem:[#allocation6 + $0x690] ss:$84 sps:$4 sm:$0xff]  }
  0xb0   :  { %550 = vmatprep.subr.bf16.mxu1 %v18900_v28  ;;  %594 = vmatpush1.bf16.msra.mxu0 %v417_v35  ;;  %v18984_v16 = vld [vmem:[#allocation6 + $0x73c] ss:$84 sps:$4 sm:$0xff]   ;;  %v18961_v17 = vld [vmem:[#allocation6 + $0x4a0] ss:$84 sps:$4 sm:$0xff]   ;;  %v18982_v19 = vld [vmem:[#allocation6 + $0x738] ss:$84 sps:$4 sm:$0xff]  }
  0xb1   :  { %11559 = vmatprep.subr.bf16.mxu0 %v18918_v36  ;;  %v18969_v18 = vld [vmem:[#allocation6 + $0x54c] ss:$84 sps:$4 sm:$0xff]   ;;  %v18990_v20 = vld [vmem:[#allocation6 + $0x7e4] ss:$84 sps:$4 sm:$0xff]   ;;  %v18967_v21 = vld [vmem:[#allocation6 + $0x548] ss:$84 sps:$4 sm:$0xff]  }
  0xb2   :  { %v18975_v22 = vld [vmem:[#allocation6 + $0x5f4] ss:$84 sps:$4 sm:$0xff]   ;;  %v18996_v24 = vld [vmem:[#allocation6 + $0x88c] ss:$84 sps:$4 sm:$0xff]   ;;  %v18973_v25 = vld [vmem:[#allocation6 + $0x5f0] ss:$84 sps:$4 sm:$0xff]  }
  0xb3   :  { %551 = vmatpush1.bf16.msra.mxu1 %v18898_v32  ;;  %16257 = vmatmul.mubr.msk.bf16.vlgmr.msra.gmra.mrb[4].mxu0 %vm387_vm1, %v22061_v9  ;;  %v18988_v23 = vld [vmem:[#allocation6 + $0x7e0] ss:$84 sps:$4 sm:$0xff]   ;;  %v18981_v26 = vld [vmem:[#allocation6 + $0x69c] ss:$84 sps:$4 sm:$0xff]   ;;  %v18979_v28 = vld [vmem:[#allocation6 + $0x698] ss:$84 sps:$4 sm:$0xff]  }
  0xb4   :  { %16254 = vmatprep.subr.msk.bf16.mxu1 %vm391_vm0, %v18901_v33  ;;  %11560 = vmatpush1.bf16.msra.mxu0 %v18916_v38  ;;  %v18994_v27 = vld [vmem:[#allocation6 + $0x888] ss:$84 sps:$4 sm:$0xff]   ;;  %v18987_v29 = vld [vmem:[#allocation6 + $0x744] ss:$84 sps:$4 sm:$0xff]   ;;  %v18985_v30 = vld [vmem:[#allocation6 + $0x740] ss:$84 sps:$4 sm:$0xff]  }
  0xb5   :  { %11561 = vmatprep.subr.bf16.mxu0 %v18924_v39  ;;  %v18993_v31 = vld [vmem:[#allocation6 + $0x7ec] ss:$84 sps:$4 sm:$0xff]   ;;  %v18991_v32 = vld [vmem:[#allocation6 + $0x7e8] ss:$84 sps:$4 sm:$0xff]   ;;  %v19000_v35 = vld [vmem:[#allocation6 + $0x930] ss:$84 sps:$4 sm:$0xff]  }
  0xb6   :  { %v19002_v33 = vld [vmem:[#allocation6 + $0x934] ss:$84 sps:$4 sm:$0xff]   ;;  %v18997_v36 = vld [vmem:[#allocation6 + $0x890] ss:$84 sps:$4 sm:$0xff]   ;;  %v19006_v39 = vld [vmem:[#allocation6 + $0x9d8] ss:$84 sps:$4 sm:$0xff]  }
  0xb7   :  { %553 = vmatpush1.bf16.msra.mxu1 %v411_v37  ;;  %v18999_v34 = vld [vmem:[#allocation6 + $0x894] ss:$84 sps:$4 sm:$0xff]   ;;  %v19008_v37 = vld [vmem:[#allocation6 + $0x9dc] ss:$84 sps:$4 sm:$0xff]   ;;  %v19017_v45 = vld [vmem:[#allocation6 + $0xa8c] ss:$84 sps:$4 sm:$0xff]  }
  0xb8   :  { %18569 = vmatprep.subr.bf16.mxu1 %v21899_v41  ;;  %11562 = vmatpush1.bf16.msra.mxu0 %v18922_v42  ;;  %v19005_v38 = vld [vmem:[#allocation6 + $0x93c] ss:$84 sps:$4 sm:$0xff]   ;;  %v19014_v42 = vld [vmem:[#allocation6 + $0xa84] ss:$84 sps:$4 sm:$0xff]  }
  0xb9   :  { %11563 = vmatprep.subr.bf16.mxu0 %v18930_v43  ;;  %v19011_v43 = vld [vmem:[#allocation6 + $0x9e4] ss:$84 sps:$4 sm:$0xff]  }
  0xba   :  { %16255 = vmatmul.mubr.msk.bf16.vlgmr.msra.gmra.mrb[8].mxu1 %vm387_vm1, %v22061_v9 }
  0xbb   :  { %18570 = vmatpush3.bf16.msra.mxu1 %v18907_v40  ;;  %18575 = vmatprep.mubr.msk.bf16.mxu1 %vm21900_vm2, %v21899_v41  ;;  %v19003_v40 = vld [vmem:[#allocation6 + $0x938] ss:$84 sps:$4 sm:$0xff]  }
  0xbc   :  { %18571 = vmatprep.subr.bf16.mxu1 %v21899_v41  ;;  %11564 = vmatpush1.bf16.msra.mxu0 %v18928_v46  ;;  %v175_v46 = vlaneseq }
  0xbd   :  { %11565 = vmatprep.subr.bf16.mxu0 %v18936_v47 }
  0xbe   :  { %v22092_v47 = vshrl.u32 %v175_v46, 7  ;;  %v19054_v46 = vld [vmem:[#allocation6 + $0xf18] ss:$84 sps:$4 sm:$0xff]  }
  0xbf   :  { %18572 = vmatpush3.bf16.msra.mxu1 %v18911_v44  ;;  %v19009_v44 = vld [vmem:[#allocation6 + $0x9e0] ss:$84 sps:$4 sm:$0xff]  }
  0xc0   :  { %18573 = vmatprep.subr.bf16.mxu1 %v21899_v41  ;;  %11566 = vmatpush1.bf16.msra.mxu0 %v18934_v50  ;;  %v22100_v50 = vsub.s32 1, %v22092_v47 }
  0xc1   :  { %11567 = vmatprep.subr.bf16.mxu0 %v18942_v51 }
  0xc3   :  { %18574 = vmatpush3.bf16.msra.mxu1 %v423_v48  ;;  %v22095_v48 = vsub.s32 0, %v22092_v47 }
  0xc4   :  { %11805 = vmatprep.subr.bf16.mxu1 %v18921_v49  ;;  %11568 = vmatpush1.bf16.msra.mxu0 %v18940_v54  ;;  %v22097_v49 = vld [vmem:[#allocation4] sm:$0xff] }
  0xc5   :  { %11569 = vmatprep.subr.bf16.mxu0 %v18948_v55  ;;  %v178_v51 = vrot.slane %v22097_v49, %v22095_v48 }
  0xc6   :  { %18576 = vmatmul.mubr.msk.bf16.vlgmr.msra.gmra.mrb[12].mxu1 %vm387_vm1, %v22061_v9  ;;  %v18949_v9 = vld [vmem:[#allocation6 + $0x350] ss:$84 sps:$4 sm:$0xff]  }
  0xc7   :  { %11806 = vmatpush1.bf16.msra.mxu1 %v18919_v52  ;;  %v182_v52 = vrot.slane %v22097_v49, %v22100_v50 }
  0xc8   :  { %11807 = vmatprep.subr.bf16.mxu1 %v18927_v53  ;;  %11570 = vmatpush1.bf16.msra.mxu0 %v18946_v58 }
  0xc9   :  { %11571 = vmatprep.subr.bf16.mxu0 %v18954_v59 }
  0xcb   :  { %11808 = vmatpush1.bf16.msra.mxu1 %v18925_v56 }
  0xcc   :  { %11809 = vmatprep.subr.bf16.mxu1 %v18933_v57  ;;  %11572 = vmatpush1.bf16.msra.mxu0 %v18952_v62  ;;  %v19015_v62 = vld [vmem:[#allocation6 + $0xa88] ss:$84 sps:$4 sm:$0xff]  }
  0xcd   :  { %11573 = vmatprep.subr.bf16.mxu0 %v18960_v63 }
  0xcf   :  { %11810 = vmatpush1.bf16.msra.mxu1 %v18931_v60 }
  0xd0   :  { %11811 = vmatprep.subr.bf16.mxu1 %v18939_v61  ;;  %11574 = vmatpush1.bf16.msra.mxu0 %v18958_v3  ;;  %v19012_v61 = vld [vmem:[#allocation6 + $0xa80] ss:$84 sps:$4 sm:$0xff]  }
  0xd1   :  { %11575 = vmatprep.subr.bf16.mxu0 %v18966_v4  ;;  %v19020_v3 = vld [vmem:[#allocation6 + $0xb2c] ss:$84 sps:$4 sm:$0xff]   ;;  %v19023_v4 = vld [vmem:[#allocation6 + $0xb34] ss:$84 sps:$4 sm:$0xff]  }
  0xd3   :  { %11812 = vmatpush1.bf16.msra.mxu1 %v18937_v1  ;;  %v22109_v1 = vsub.s32 3, %v22092_v47 }
  0xd4   :  { %11813 = vmatprep.subr.bf16.mxu1 %v18945_v2  ;;  %11576 = vmatpush1.bf16.msra.mxu0 %v18964_v7  ;;  %v19021_v7 = vld [vmem:[#allocation6 + $0xb30] ss:$84 sps:$4 sm:$0xff]  }
  0xd5   :  { %11577 = vmatprep.subr.bf16.mxu0 %v18972_v8  ;;  %v190_v8 = vrot.slane %v22097_v49, %v22109_v1 }
  0xd7   :  { %11814 = vmatpush1.bf16.msra.mxu1 %v18943_v5 }
  0xd8   :  { %11815 = vmatprep.subr.bf16.mxu1 %v18951_v6  ;;  %11578 = vmatpush1.bf16.msra.mxu0 %v18970_v11  ;;  %v19018_v6 = vld [vmem:[#allocation6 + $0xb28] ss:$84 sps:$4 sm:$0xff]  }
  0xd9   :  { %11579 = vmatprep.subr.bf16.mxu0 %v18978_v12  ;;  %v19029_v11 = vld [vmem:[#allocation6 + $0xbdc] ss:$84 sps:$4 sm:$0xff]  }
  0xdb   :  { %11816 = vmatpush1.bf16.msra.mxu1 %v18949_v9 }
  0xdc   :  { %11817 = vmatprep.subr.bf16.mxu1 %v18957_v10  ;;  %11580 = vmatpush1.bf16.msra.mxu0 %v18976_v15  ;;  %v19026_v10 = vld [vmem:[#allocation6 + $0xbd4] ss:$84 sps:$4 sm:$0xff]  }
  0xdd   :  { %11581 = vmatprep.subr.bf16.mxu0 %v18984_v16  ;;  %v19024_v16 = vld [vmem:[#allocation6 + $0xbd0] ss:$84 sps:$4 sm:$0xff]  }
  0xdf   :  { %11818 = vmatpush1.bf16.msra.mxu1 %v18955_v13 }
  0xe0   :  { %11819 = vmatprep.subr.bf16.mxu1 %v18963_v14  ;;  %11582 = vmatpush1.bf16.msra.mxu0 %v18982_v19 }
  0xe1   :  { %11583 = vmatprep.subr.bf16.mxu0 %v18990_v20  ;;  %v19032_v20 = vld [vmem:[#allocation6 + $0xc7c] ss:$84 sps:$4 sm:$0xff]  }
  0xe3   :  { %11820 = vmatpush1.bf16.msra.mxu1 %v18961_v17  ;;  %v19027_v17 = vld [vmem:[#allocation6 + $0xbd8] ss:$84 sps:$4 sm:$0xff]  }
  0xe4   :  { %11821 = vmatprep.subr.bf16.mxu1 %v18969_v18  ;;  %11584 = vmatpush1.bf16.msra.mxu0 %v18988_v23 }
  0xe5   :  { %11585 = vmatprep.subr.bf16.mxu0 %v18996_v24  ;;  %v19030_v24 = vld [vmem:[#allocation6 + $0xc78] ss:$84 sps:$4 sm:$0xff]  }
  0xe7   :  { %11822 = vmatpush1.bf16.msra.mxu1 %v18967_v21  ;;  %v19035_v21 = vld [vmem:[#allocation6 + $0xc84] ss:$84 sps:$4 sm:$0xff]  }
  0xe8   :  { %11823 = vmatprep.subr.bf16.mxu1 %v18975_v22  ;;  %11586 = vmatpush1.bf16.msra.mxu0 %v18994_v27  ;;  %v19038_v27 = vld [vmem:[#allocation6 + $0xd24] ss:$84 sps:$4 sm:$0xff]  }
  0xe9   :  { %11587 = vmatprep.subr.bf16.mxu0 %v19002_v33 }
  0xeb   :  { %11824 = vmatpush1.bf16.msra.mxu1 %v18973_v25  ;;  %v19033_v25 = vld [vmem:[#allocation6 + $0xc80] ss:$84 sps:$4 sm:$0xff]  }
  0xec   :  { %11825 = vmatprep.subr.bf16.mxu1 %v18981_v26  ;;  %11588 = vmatpush1.bf16.msra.mxu0 %v19000_v35  ;;  %v19045_v35 = vld [vmem:[#allocation6 + $0xdd0] ss:$84 sps:$4 sm:$0xff]  }
  0xed   :  { %11589 = vmatprep.subr.bf16.mxu0 %v19008_v37  ;;  %v19050_v37 = vld [vmem:[#allocation6 + $0xe74] ss:$84 sps:$4 sm:$0xff]  }
  0xef   :  { %11826 = vmatpush1.bf16.msra.mxu1 %v18979_v28  ;;  %v19041_v28 = vld [vmem:[#allocation6 + $0xd2c] ss:$84 sps:$4 sm:$0xff]  }
  0xf0   :  { %11827 = vmatprep.subr.bf16.mxu1 %v18987_v29  ;;  %11590 = vmatpush1.bf16.msra.mxu0 %v19006_v39  ;;  %v19036_v29 = vld [vmem:[#allocation6 + $0xd20] ss:$84 sps:$4 sm:$0xff]  }
  0xf1   :  { %11600 = vmatprep.subr.bf16.mxu0 %v19014_v42  ;;  %v19048_v42 = vld [vmem:[#allocation6 + $0xe70] ss:$84 sps:$4 sm:$0xff]  }
  0xf3   :  { %11828 = vmatpush1.bf16.msra.mxu1 %v18985_v30  ;;  %v19039_v30 = vld [vmem:[#allocation6 + $0xd28] ss:$84 sps:$4 sm:$0xff]  }
  0xf4   :  { %11829 = vmatprep.subr.bf16.mxu1 %v18993_v31  ;;  %v19044_v31 = vld [vmem:[#allocation6 + $0xdcc] ss:$84 sps:$4 sm:$0xff]  }
  0xf7   :  { %11830 = vmatpush1.bf16.msra.mxu1 %v18991_v32  ;;  %v19047_v32 = vld [vmem:[#allocation6 + $0xdd4] ss:$84 sps:$4 sm:$0xff]  }
  0xf8   :  { %11831 = vmatprep.subr.bf16.mxu1 %v18999_v34  ;;  %v19042_v34 = vld [vmem:[#allocation6 + $0xdc8] ss:$84 sps:$4 sm:$0xff]  }
  0xfb   :  { %11832 = vmatpush1.bf16.msra.mxu1 %v18997_v36 }
  0xfc   :  { %11833 = vmatprep.subr.bf16.mxu1 %v19005_v38  ;;  %v19053_v38 = vld [vmem:[#allocation6 + $0xe7c] ss:$84 sps:$4 sm:$0xff]  }
  0xff   :  { %11834 = vmatpush1.bf16.msra.mxu1 %v19003_v40 }
 0x100   :  { %11835 = vmatprep.subr.bf16.mxu1 %v19011_v43  ;;  %v19051_v43 = vld [vmem:[#allocation6 + $0xe78] ss:$84 sps:$4 sm:$0xff]  }
 0x103   :  { %11836 = vmatpush1.bf16.msra.mxu1 %v19009_v44  ;;  %v19056_v44 = vld [vmem:[#allocation6 + $0xf1c] ss:$84 sps:$4 sm:$0xff]  }
 0x104   :  { %11846 = vmatprep.subr.bf16.mxu1 %v19017_v45  ;;  %v19059_v45 = vld [vmem:[#allocation6 + $0xf24] ss:$84 sps:$4 sm:$0xff]  }
 0x175   :  { %v459_v53 = vpop.f32.mrb[0].mxu1 }
 0x176   :  { %v460_v54 = vadd.f32 %v459_v53, %v178_v51  ;;  %v461_v55 = vpop.f32.mrb[1].mxu1  ;;  %v19057_v51 = vld [vmem:[#allocation6 + $0xf20] ss:$84 sps:$4 sm:$0xff]   ;;  %v19062_v53 = vld [vmem:[#allocation6 + $0xfc4] ss:$84 sps:$4 sm:$0xff]  }
 0x177   :  { %v462_v56 = vadd.f32 %v461_v55, %v182_v52  ;;  %v463_v57 = vpop.f32.mrb[2].mxu1 }
 0x178   :  { %v670_v58 = vmax.f32 %v460_v54, 0.0  ;;  %v464_v59 = vpop.f32.mrb[3].mxu1  ;;  %v19065_v54 = vld [vmem:[#allocation6 + $0xfcc] ss:$84 sps:$4 sm:$0xff]  }
 0x179   :  { %v671_v60 = vmax.f32 %v462_v56, 0.0  ;;  %v19063_v59 = vld [vmem:[#allocation6 + $0xfc8] ss:$84 sps:$4 sm:$0xff]  }
 0x17a   :  { %v22111_v2 = vpack.c.bf16 %v670_v58, %v670_v58  ;;  %v22117_v5 = vpop.f32.mrb[0].mxu0  ;;  %v19060_v58 = vld [vmem:[#allocation6 + $0xfc0] ss:$84 sps:$4 sm:$0xff]  }
 0x17b   :  { %v22106_v63 = vpack.c.bf16 %v671_v60, %v671_v60  ;;  %v22121_v9 = vpop.f32.mrb[1].mxu0  ;;  %v19068_v60 = vld [vmem:[#allocation6 + $0x106c] ss:$84 sps:$4 sm:$0xff]  }
 0x17c   :  { %v545_v12 = vpop.f32.mrb[2].mxu0 }
 0x17d   :  { %11591 = vmatprep.mubr.bf16.mxu0 %v22106_v63  ;;  %11837 = vmatprep.mubr.bf16.mxu1 %v22106_v63  ;;  %v546_v14 = vpop.f32.mrb[3].mxu0 }
 0x17e   :  { %11592 = vmatmul.mubr.bf16.vlgmr.msra.gmra.mrb[8].mxu0 %v22111_v2  ;;  %11838 = vmatmul.mubr.bf16.vlgmr.msra.gmra.mrb[16].mxu1 %v22111_v2 }
 0x17f   :  { %11601 = vmatpush1.bf16.msra.mxu0 %v19012_v61  ;;  %11847 = vmatpush1.bf16.msra.mxu1 %v19015_v62  ;;  %v19071_v61 = vld [vmem:[#allocation6 + $0x1074] ss:$84 sps:$4 sm:$0xff]  }
 0x180   :  { %11602 = vmatprep.subr.bf16.mxu0 %v19020_v3  ;;  %11848 = vmatprep.subr.bf16.mxu1 %v19023_v4  ;;  %v19066_v62 = vld [vmem:[#allocation6 + $0x1068] ss:$84 sps:$4 sm:$0xff]   ;;  %v19069_v3 = vld [vmem:[#allocation6 + $0x1070] ss:$84 sps:$4 sm:$0xff]  }
 0x181   :  { %v22123_v13 = vpop.f32.mrb[4].mxu1  ;;  %v19074_v4 = vld [vmem:[#allocation6 + $0x1114] ss:$84 sps:$4 sm:$0xff]  }
 0x182   :  { %v502_v15 = vpop.f32.mrb[5].mxu1 }
 0x183   :  { %11603 = vmatpush1.bf16.msra.mxu0 %v19018_v6  ;;  %11849 = vmatpush1.bf16.msra.mxu1 %v19021_v7  ;;  %v503_v18 = vadd.f32 %v502_v15, %v190_v8  ;;  %v504_v19 = vpop.f32.mrb[6].mxu1  ;;  %v19077_v6 = vld [vmem:[#allocation6 + $0x111c] ss:$84 sps:$4 sm:$0xff]   ;;  %v22138_v8 = vsub.s32 2, %v22092_v47 }
 0x184   :  { %11604 = vmatprep.subr.bf16.mxu0 %v19026_v10  ;;  %11850 = vmatprep.subr.bf16.mxu1 %v19029_v11  ;;  %v505_v22 = vpop.f32.mrb[7].mxu1  ;;  %v172_v7 = vld [vmem:[#allocation4 + $0x8] sm:$0x7]  ;;  %v19072_v10 = vld [vmem:[#allocation6 + $0x1110] ss:$84 sps:$4 sm:$0xff]  }
 0x185   :  { %v673_v23 = vmax.f32 %v503_v18, 0.0  ;;  %v19075_v11 = vld [vmem:[#allocation6 + $0x1118] ss:$84 sps:$4 sm:$0xff]   ;;  %v218_v12 = vrot.slane %v172_v7, %v22138_v8  ;;  %v19080_v15 = vld [vmem:[#allocation6 + $0x11bc] ss:$84 sps:$4 sm:$0xff]  }
 0x186   :  { %v22129_v33 = vpop.f32.mrb[4].mxu0  ;;  %v19081_v22 = vld [vmem:[#allocation6 + $0x11c0] ss:$84 sps:$4 sm:$0xff]   ;;  %v19123_v7 = vld [vmem:[#allocation6 + $0x1658] ss:$84 sps:$4 sm:$0xff]  }
 0x187   :  { %11605 = vmatpush1.bf16.msra.mxu0 %v19024_v16  ;;  %11851 = vmatpush1.bf16.msra.mxu1 %v19027_v17  ;;  %v22125_v26 = vpack.c.bf16 %v673_v23, %v673_v23  ;;  %v22131_v36 = vpop.f32.mrb[5].mxu0  ;;  %v19083_v16 = vld [vmem:[#allocation6 + $0x11c4] ss:$84 sps:$4 sm:$0xff]  }
 0x188   :  { %11606 = vmatprep.subr.bf16.mxu0 %v19032_v20  ;;  %11852 = vmatprep.subr.bf16.mxu1 %v19035_v21  ;;  %v627_v39 = vpop.f32.mrb[6].mxu0  ;;  %v19078_v21 = vld [vmem:[#allocation6 + $0x11b8] ss:$84 sps:$4 sm:$0xff]  }
 0x189   :  { %11632 = vmatprep.mubr.bf16.mxu0 %v22125_v26  ;;  %11878 = vmatprep.mubr.bf16.mxu1 %v22125_v26  ;;  %v628_v40 = vpop.f32.mrb[7].mxu0  ;;  %v19086_v23 = vld [vmem:[#allocation6 + $0x1264] ss:$84 sps:$4 sm:$0xff]  }
 0x18a   :  { %v19096_v40 = vld [vmem:[#allocation6 + $0x13b0] ss:$84 sps:$4 sm:$0xff]  }
 0x18b   :  { %11607 = vmatpush1.bf16.msra.mxu0 %v19030_v24  ;;  %11853 = vmatpush1.bf16.msra.mxu1 %v19033_v25  ;;  %v19089_v24 = vld [vmem:[#allocation6 + $0x126c] ss:$84 sps:$4 sm:$0xff]  }
 0x18c   :  { %11608 = vmatprep.subr.bf16.mxu0 %v19038_v27  ;;  %11854 = vmatprep.subr.bf16.mxu1 %v19041_v28  ;;  %v19084_v25 = vld [vmem:[#allocation6 + $0x1260] ss:$84 sps:$4 sm:$0xff]   ;;  %v19087_v27 = vld [vmem:[#allocation6 + $0x1268] ss:$84 sps:$4 sm:$0xff]  }
 0x18d   :  { %v22133_v52 = vpop.f32.mrb[8].mxu1  ;;  %v19092_v28 = vld [vmem:[#allocation6 + $0x130c] ss:$84 sps:$4 sm:$0xff]  }
 0x18e   :  { %v22135_v55 = vpop.f32.mrb[9].mxu1 }
 0x18f   :  { %11609 = vmatpush1.bf16.msra.mxu0 %v19036_v29  ;;  %11855 = vmatpush1.bf16.msra.mxu1 %v19039_v30  ;;  %v586_v56 = vpop.f32.mrb[10].mxu1  ;;  %v19095_v29 = vld [vmem:[#allocation6 + $0x1314] ss:$84 sps:$4 sm:$0xff]   ;;  %v22144_v30 = vsub.s32 5, %v22092_v47 }
 0x190   :  { %11610 = vmatprep.subr.bf16.mxu0 %v19044_v31  ;;  %11856 = vmatprep.subr.bf16.mxu1 %v19047_v32  ;;  %v587_v57 = vpop.f32.mrb[11].mxu1  ;;  %v186_v31 = vrot.slane %v22097_v49, %v22138_v8  ;;  %v19090_v32 = vld [vmem:[#allocation6 + $0x1308] ss:$84 sps:$4 sm:$0xff]  }
 0x191   :  { %v19111_v56 = vld [vmem:[#allocation6 + $0x1508] ss:$84 sps:$4 sm:$0xff]  }
 0x192   :  { %v501_v39 = vadd.f32 %v22123_v13, %v186_v31  ;;  %v19108_v13 = vld [vmem:[#allocation6 + $0x1500] ss:$84 sps:$4 sm:$0xff]   ;;  %v19155_v31 = vld [vmem:[#allocation6 + $0x19a4] ss:$84 sps:$4 sm:$0xff]  }
 0x193   :  { %11611 = vmatpush1.bf16.msra.mxu0 %v19042_v34  ;;  %11857 = vmatpush1.bf16.msra.mxu1 %v19045_v35  ;;  %v19093_v34 = vld [vmem:[#allocation6 + $0x1310] ss:$84 sps:$4 sm:$0xff]   ;;  %v19098_v35 = vld [vmem:[#allocation6 + $0x13b4] ss:$84 sps:$4 sm:$0xff]  }
 0x194   :  { %11612 = vmatprep.subr.bf16.mxu0 %v19050_v37  ;;  %11858 = vmatprep.subr.bf16.mxu1 %v19053_v38  ;;  %v19101_v37 = vld [vmem:[#allocation6 + $0x13bc] ss:$84 sps:$4 sm:$0xff]   ;;  %v198_v38 = vrot.slane %v22097_v49, %v22144_v30  ;;  %v19110_v49 = vld [vmem:[#allocation6 + $0x1504] ss:$84 sps:$4 sm:$0xff]  }
 0x197   :  { %11613 = vmatpush1.bf16.msra.mxu0 %v19048_v42  ;;  %11859 = vmatpush1.bf16.msra.mxu1 %v19051_v43  ;;  %v19099_v42 = vld [vmem:[#allocation6 + $0x13b8] ss:$84 sps:$4 sm:$0xff]   ;;  %v19104_v43 = vld [vmem:[#allocation6 + $0x145c] ss:$84 sps:$4 sm:$0xff]  }
 0x198   :  { %11614 = vmatprep.subr.bf16.mxu0 %v19056_v44  ;;  %11860 = vmatprep.subr.bf16.mxu1 %v19059_v45  ;;  %v19107_v44 = vld [vmem:[#allocation6 + $0x1464] ss:$84 sps:$4 sm:$0xff]   ;;  %v544_v45 = vadd.f32 %v22121_v9, %v198_v38  ;;  %v19119_v9 = vld [vmem:[#allocation6 + $0x15b4] ss:$84 sps:$4 sm:$0xff]  }
 0x199   :  { %v664_v14 = vpop.f32.mrb[12].mxu1  ;;  %v19156_v38 = vld [vmem:[#allocation6 + $0x1a40] ss:$84 sps:$4 sm:$0xff]  }
 0x19a   :  { %v18577_v17 = vpop.f32.mrb[13].mxu1  ;;  %v22141_v18 = vadd.f32 %v664_v14, %v218_v12  ;;  %v675_v57 = vmax.f32 %v544_v45, 0.0  ;;  %v19126_v12 = vld [vmem:[#allocation6 + $0x16f8] ss:$84 sps:$4 sm:$0xff]   ;;  %v19129_v14 = vld [vmem:[#allocation6 + $0x1700] ss:$84 sps:$4 sm:$0xff]  }
 0x19b   :  { %11615 = vmatpush1.bf16.msra.mxu0 %v19054_v46  ;;  %11861 = vmatpush1.bf16.msra.mxu1 %v19057_v51  ;;  %v667_v19 = vpop.f32.mrb[14].mxu1  ;;  %v672_v46 = vmax.f32 %v501_v39, 0.0  ;;  %v19102_v51 = vld [vmem:[#allocation6 + $0x1458] ss:$84 sps:$4 sm:$0xff]   ;;  %v19132_v17 = vld [vmem:[#allocation6 + $0x17a0] ss:$84 sps:$4 sm:$0xff]  }
 0x19c   :  { %11616 = vmatprep.subr.bf16.mxu0 %v19062_v53  ;;  %11862 = vmatprep.subr.bf16.mxu1 %v19065_v54  ;;  %v18578_v20 = vpop.f32.mrb[15].mxu1  ;;  %v19105_v53 = vld [vmem:[#allocation6 + $0x1460] ss:$84 sps:$4 sm:$0xff]   ;;  %v19135_v19 = vld [vmem:[#allocation6 + $0x17a8] ss:$84 sps:$4 sm:$0xff]  }
 0x19d   :  { %v19113_v54 = vld [vmem:[#allocation6 + $0x150c] ss:$84 sps:$4 sm:$0xff]   ;;  %v19159_v39 = vld [vmem:[#allocation6 + $0x1a48] ss:$84 sps:$4 sm:$0xff]  }
 0x19e   :  { %v19140_v20 = vld [vmem:[#allocation6 + $0x184c] ss:$84 sps:$4 sm:$0xff]   ;;  %v19170_v45 = vld [vmem:[#allocation6 + $0x1b94] ss:$84 sps:$4 sm:$0xff]  }
 0x19f   :  { %11617 = vmatpush1.bf16.msra.mxu0 %v19060_v58  ;;  %11863 = vmatpush1.bf16.msra.mxu1 %v19063_v59  ;;  %v22152_v58 = vpack.c.bf16 %v672_v46, %v672_v46  ;;  %v19116_v59 = vld [vmem:[#allocation6 + $0x15ac] ss:$84 sps:$4 sm:$0xff]   ;;  %v19173_v46 = vld [vmem:[#allocation6 + $0x1b9c] ss:$84 sps:$4 sm:$0xff]  }
 0x1a0   :  { %11618 = vmatprep.subr.bf16.mxu0 %v19068_v60  ;;  %11864 = vmatprep.subr.bf16.mxu1 %v19071_v61  ;;  %v19114_v60 = vld [vmem:[#allocation6 + $0x15a8] ss:$84 sps:$4 sm:$0xff]   ;;  %v19117_v61 = vld [vmem:[#allocation6 + $0x15b0] ss:$84 sps:$4 sm:$0xff]  }
 0x1a3   :  { %11619 = vmatpush1.bf16.msra.mxu0 %v19066_v62  ;;  %11865 = vmatpush1.bf16.msra.mxu1 %v19069_v3  ;;  %v22154_v62 = vpack.c.bf16 %v675_v57, %v675_v57  ;;  %v19122_v3 = vld [vmem:[#allocation6 + $0x1654] ss:$84 sps:$4 sm:$0xff]   ;;  %v19182_v57 = vld [vmem:[#allocation6 + $0x1ce4] ss:$84 sps:$4 sm:$0xff]  }
 0x1a4   :  { %11620 = vmatprep.subr.bf16.mxu0 %v19074_v4  ;;  %11866 = vmatprep.subr.bf16.mxu1 %v19077_v6  ;;  %v19125_v4 = vld [vmem:[#allocation6 + $0x165c] ss:$84 sps:$4 sm:$0xff]  }
 0x1a5   :  { %v19120_v6 = vld [vmem:[#allocation6 + $0x1650] ss:$84 sps:$4 sm:$0xff]  }
 0x1a7   :  { %11621 = vmatpush1.bf16.msra.mxu0 %v19072_v10  ;;  %11867 = vmatpush1.bf16.msra.mxu1 %v19075_v11  ;;  %v19128_v10 = vld [vmem:[#allocation6 + $0x16fc] ss:$84 sps:$4 sm:$0xff]   ;;  %v19131_v11 = vld [vmem:[#allocation6 + $0x1704] ss:$84 sps:$4 sm:$0xff]  }
 0x1a8   :  { %11622 = vmatprep.subr.bf16.mxu0 %v19080_v15  ;;  %11868 = vmatprep.subr.bf16.mxu1 %v19083_v16  ;;  %v19134_v15 = vld [vmem:[#allocation6 + $0x17a4] ss:$84 sps:$4 sm:$0xff]   ;;  %v19137_v16 = vld [vmem:[#allocation6 + $0x17ac] ss:$84 sps:$4 sm:$0xff]  }
 0x1ab   :  { %11623 = vmatpush1.bf16.msra.mxu0 %v19078_v21  ;;  %11869 = vmatpush1.bf16.msra.mxu1 %v19081_v22  ;;  %v19143_v21 = vld [vmem:[#allocation6 + $0x1854] ss:$84 sps:$4 sm:$0xff]  }
 0x1ac   :  { %11624 = vmatprep.subr.bf16.mxu0 %v19086_v23  ;;  %11870 = vmatprep.subr.bf16.mxu1 %v19089_v24  ;;  %v19138_v22 = vld [vmem:[#allocation6 + $0x1848] ss:$84 sps:$4 sm:$0xff]   ;;  %v19141_v23 = vld [vmem:[#allocation6 + $0x1850] ss:$84 sps:$4 sm:$0xff]  }
 0x1ad   :  { %v19146_v24 = vld [vmem:[#allocation6 + $0x18f4] ss:$84 sps:$4 sm:$0xff]  }
 0x1af   :  { %11625 = vmatpush1.bf16.msra.mxu0 %v19084_v25  ;;  %11871 = vmatpush1.bf16.msra.mxu1 %v19087_v27  ;;  %v19149_v25 = vld [vmem:[#allocation6 + $0x18fc] ss:$84 sps:$4 sm:$0xff]  }
 0x1b0   :  { %11626 = vmatprep.subr.bf16.mxu0 %v19092_v28  ;;  %11872 = vmatprep.subr.bf16.mxu1 %v19095_v29  ;;  %v19144_v27 = vld [vmem:[#allocation6 + $0x18f0] ss:$84 sps:$4 sm:$0xff]   ;;  %v19147_v28 = vld [vmem:[#allocation6 + $0x18f8] ss:$84 sps:$4 sm:$0xff]  }
 0x1b1   :  { %v19152_v29 = vld [vmem:[#allocation6 + $0x199c] ss:$84 sps:$4 sm:$0xff]  }
 0x1b3   :  { %11627 = vmatpush1.bf16.msra.mxu0 %v19090_v32  ;;  %11873 = vmatpush1.bf16.msra.mxu1 %v19093_v34  ;;  %v19150_v32 = vld [vmem:[#allocation6 + $0x1998] ss:$84 sps:$4 sm:$0xff]   ;;  %v19153_v34 = vld [vmem:[#allocation6 + $0x19a0] ss:$84 sps:$4 sm:$0xff]  }
 0x1b4   :  { %11628 = vmatprep.subr.bf16.mxu0 %v19098_v35  ;;  %11874 = vmatprep.subr.bf16.mxu1 %v19101_v37  ;;  %v19158_v35 = vld [vmem:[#allocation6 + $0x1a44] ss:$84 sps:$4 sm:$0xff]   ;;  %v19161_v37 = vld [vmem:[#allocation6 + $0x1a4c] ss:$84 sps:$4 sm:$0xff]  }
 0x1b7   :  { %11629 = vmatpush1.bf16.msra.mxu0 %v19096_v40  ;;  %11875 = vmatpush1.bf16.msra.mxu1 %v19099_v42  ;;  %v19164_v40 = vld [vmem:[#allocation6 + $0x1aec] ss:$84 sps:$4 sm:$0xff]   ;;  %v19167_v42 = vld [vmem:[#allocation6 + $0x1af4] ss:$84 sps:$4 sm:$0xff]  }
 0x1b8   :  { %11630 = vmatprep.subr.bf16.mxu0 %v19104_v43  ;;  %11876 = vmatprep.subr.bf16.mxu1 %v19107_v44  ;;  %v19162_v43 = vld [vmem:[#allocation6 + $0x1ae8] ss:$84 sps:$4 sm:$0xff]   ;;  %v19165_v44 = vld [vmem:[#allocation6 + $0x1af0] ss:$84 sps:$4 sm:$0xff]  }
 0x1bb   :  { %11631 = vmatpush1.bf16.msra.mxu0 %v19102_v51  ;;  %11877 = vmatpush1.bf16.msra.mxu1 %v19105_v53  ;;  %v19168_v51 = vld [vmem:[#allocation6 + $0x1b90] ss:$84 sps:$4 sm:$0xff]   ;;  %v19171_v53 = vld [vmem:[#allocation6 + $0x1b98] ss:$84 sps:$4 sm:$0xff]  }
 0x1bc   :  { %11641 = vmatprep.subr.bf16.mxu0 %v19110_v49  ;;  %11887 = vmatprep.subr.bf16.mxu1 %v19113_v54  ;;  %v19176_v49 = vld [vmem:[#allocation6 + $0x1c3c] ss:$84 sps:$4 sm:$0xff]   ;;  %v19179_v54 = vld [vmem:[#allocation6 + $0x1c44] ss:$84 sps:$4 sm:$0xff]  }
 0x1be   :  { %11633 = vmatmul.mubr.bf16.vlgmr.msra.gmra.mrb[8].mxu0 %v22152_v58  ;;  %11879 = vmatmul.mubr.bf16.vlgmr.msra.gmra.mrb[16].mxu1 %v22152_v58 }
 0x1bf   :  { %11642 = vmatpush1.bf16.msra.mxu0 %v19108_v13  ;;  %11888 = vmatpush1.bf16.msra.mxu1 %v19111_v56  ;;  %v19174_v13 = vld [vmem:[#allocation6 + $0x1c38] ss:$84 sps:$4 sm:$0xff]   ;;  %v19177_v56 = vld [vmem:[#allocation6 + $0x1c40] ss:$84 sps:$4 sm:$0xff]  }
 0x1c0   :  { %11643 = vmatprep.subr.bf16.mxu0 %v19116_v59  ;;  %11889 = vmatprep.subr.bf16.mxu1 %v19119_v9  ;;  %v19185_v59 = vld [vmem:[#allocation6 + $0x1cec] ss:$84 sps:$4 sm:$0xff]  }
 0x1c1   :  { %11673 = vmatprep.mubr.bf16.mxu0 %v22154_v62  ;;  %11919 = vmatprep.mubr.bf16.mxu1 %v22154_v62  ;;  %v19180_v9 = vld [vmem:[#allocation6 + $0x1ce0] ss:$84 sps:$4 sm:$0xff]  }
 0x1c3   :  { %11644 = vmatpush1.bf16.msra.mxu0 %v19114_v60  ;;  %11890 = vmatpush1.bf16.msra.mxu1 %v19117_v61  ;;  %v19183_v60 = vld [vmem:[#allocation6 + $0x1ce8] ss:$84 sps:$4 sm:$0xff]   ;;  %v22161_v61 = vsub.s32 4, %v22092_v47 }
 0x1c4   :  { %11645 = vmatprep.subr.bf16.mxu0 %v19122_v3  ;;  %11891 = vmatprep.subr.bf16.mxu1 %v19125_v4  ;;  %v19188_v3 = vld [vmem:[#allocation6 + $0x1d8c] ss:$84 sps:$4 sm:$0xff]   ;;  %v19191_v4 = vld [vmem:[#allocation6 + $0x1d94] ss:$84 sps:$4 sm:$0xff]  }
 0x1c7   :  { %11646 = vmatpush1.bf16.msra.mxu0 %v19120_v6  ;;  %11892 = vmatpush1.bf16.msra.mxu1 %v19123_v7  ;;  %v19186_v6 = vld [vmem:[#allocation6 + $0x1d88] ss:$84 sps:$4 sm:$0xff]   ;;  %v19189_v7 = vld [vmem:[#allocation6 + $0x1d90] ss:$84 sps:$4 sm:$0xff]  }
 0x1c8   :  { %11647 = vmatprep.subr.bf16.mxu0 %v19128_v10  ;;  %11893 = vmatprep.subr.bf16.mxu1 %v19131_v11  ;;  %v22164_v10 = vsub.s32 7, %v22092_v47  ;;  %v22166_v11 = vld [vmem:[#allocation4] sm:$0xff] }
 0x1cb   :  { %11648 = vmatpush1.bf16.msra.mxu0 %v19126_v12  ;;  %11894 = vmatpush1.bf16.msra.mxu1 %v19129_v14  ;;  %v194_v12 = vrot.slane %v22166_v11, %v22161_v61  ;;  %v19194_v14 = vld [vmem:[#allocation6 + $0x1e34] ss:$84 sps:$4 sm:$0xff]  }
 0x1cc   :  { %11649 = vmatprep.subr.bf16.mxu0 %v19134_v15  ;;  %11895 = vmatprep.subr.bf16.mxu1 %v19137_v16  ;;  %v19197_v15 = vld [vmem:[#allocation6 + $0x1e3c] ss:$84 sps:$4 sm:$0xff]  }
 0x1cd   :  { %v19192_v16 = vld [vmem:[#allocation6 + $0x1e30] ss:$84 sps:$4 sm:$0xff]  }
 0x1cf   :  { %11650 = vmatpush1.bf16.msra.mxu0 %v19132_v17  ;;  %11896 = vmatpush1.bf16.msra.mxu1 %v19135_v19  ;;  %v19195_v17 = vld [vmem:[#allocation6 + $0x1e38] ss:$84 sps:$4 sm:$0xff]   ;;  %v206_v19 = vrot.slane %v22166_v11, %v22164_v10 }
 0x1d0   :  { %11651 = vmatprep.subr.bf16.mxu0 %v19140_v20  ;;  %11897 = vmatprep.subr.bf16.mxu1 %v19143_v21  ;;  %v542_v20 = vadd.f32 %v22117_v5, %v194_v12  ;;  %v19200_v21 = vld [vmem:[#allocation6 + $0x1edc] ss:$84 sps:$4 sm:$0xff]  }
 0x1d1   :  { %v19248_v12 = vld [vmem:[#allocation6 + $0x241c] ss:$84 sps:$4 sm:$0xff]  }
 0x1d3   :  { %11652 = vmatpush1.bf16.msra.mxu0 %v19138_v22  ;;  %11898 = vmatpush1.bf16.msra.mxu1 %v19141_v23  ;;  %v19203_v22 = vld [vmem:[#allocation6 + $0x1ee4] ss:$84 sps:$4 sm:$0xff]  }
 0x1d4   :  { %11653 = vmatprep.subr.bf16.mxu0 %v19146_v24  ;;  %11899 = vmatprep.subr.bf16.mxu1 %v19149_v25  ;;  %v19198_v23 = vld [vmem:[#allocation6 + $0x1ed8] ss:$84 sps:$4 sm:$0xff]   ;;  %v19201_v24 = vld [vmem:[#allocation6 + $0x1ee0] ss:$84 sps:$4 sm:$0xff]   ;;  %v585_v25 = vadd.f32 %v22135_v55, %v206_v19  ;;  %v19210_v55 = vld [vmem:[#allocation6 + $0x2028] ss:$84 sps:$4 sm:$0xff]  }
 0x1d5   :  { %v19257_v19 = vld [vmem:[#allocation6 + $0x24cc] ss:$84 sps:$4 sm:$0xff]  }
 0x1d6   :  { %v677_v5 = vmax.f32 %v585_v25, 0.0  ;;  %v19261_v25 = vld [vmem:[#allocation6 + $0x2570] ss:$84 sps:$4 sm:$0xff]  }
 0x1d7   :  { %11654 = vmatpush1.bf16.msra.mxu0 %v19144_v27  ;;  %11900 = vmatpush1.bf16.msra.mxu1 %v19147_v28  ;;  %v674_v27 = vmax.f32 %v542_v20, 0.0  ;;  %v19206_v28 = vld [vmem:[#allocation6 + $0x1f84] ss:$84 sps:$4 sm:$0xff]   ;;  %v19252_v20 = vld [vmem:[#allocation6 + $0x24c0] ss:$84 sps:$4 sm:$0xff]  }
 0x1d8   :  { %11655 = vmatprep.subr.bf16.mxu0 %v19152_v29  ;;  %11901 = vmatprep.subr.bf16.mxu1 %v19155_v31  ;;  %v19209_v29 = vld [vmem:[#allocation6 + $0x1f8c] ss:$84 sps:$4 sm:$0xff]  }
 0x1d9   :  { %v19204_v31 = vld [vmem:[#allocation6 + $0x1f80] ss:$84 sps:$4 sm:$0xff]  }
 0x1db   :  { %11656 = vmatpush1.bf16.msra.mxu0 %v19150_v32  ;;  %11902 = vmatpush1.bf16.msra.mxu1 %v19153_v34  ;;  %v19207_v32 = vld [vmem:[#allocation6 + $0x1f88] ss:$84 sps:$4 sm:$0xff]   ;;  %v22174_v34 = vpack.c.bf16 %v674_v27, %v674_v27 }
 0x1dc   :  { %11657 = vmatprep.subr.bf16.mxu0 %v19158_v35  ;;  %11903 = vmatprep.subr.bf16.mxu1 %v19161_v37  ;;  %v19212_v35 = vld [vmem:[#allocation6 + $0x202c] ss:$84 sps:$4 sm:$0xff]   ;;  %v19215_v37 = vld [vmem:[#allocation6 + $0x2034] ss:$84 sps:$4 sm:$0xff]  }
 0x1dd   :  { %v19266_v27 = vld [vmem:[#allocation6 + $0x2614] ss:$84 sps:$4 sm:$0xff]  }
 0x1df   :  { %11658 = vmatpush1.bf16.msra.mxu0 %v19156_v38  ;;  %11904 = vmatpush1.bf16.msra.mxu1 %v19159_v39  ;;  %v22176_v38 = vpack.c.bf16 %v677_v5, %v677_v5  ;;  %v19213_v39 = vld [vmem:[#allocation6 + $0x2030] ss:$84 sps:$4 sm:$0xff]  }
 0x1e0   :  { %11659 = vmatprep.subr.bf16.mxu0 %v19164_v40  ;;  %11905 = vmatprep.subr.bf16.mxu1 %v19167_v42  ;;  %v19218_v40 = vld [vmem:[#allocation6 + $0x20d4] ss:$84 sps:$4 sm:$0xff]   ;;  %v19221_v42 = vld [vmem:[#allocation6 + $0x20dc] ss:$84 sps:$4 sm:$0xff]   ;;  %v19275_v5 = vld [vmem:[#allocation6 + $0x26c4] ss:$84 sps:$4 sm:$0xff]  }
 0x1e3   :  { %11660 = vmatpush1.bf16.msra.mxu0 %v19162_v43  ;;  %11906 = vmatpush1.bf16.msra.mxu1 %v19165_v44  ;;  %v19216_v43 = vld [vmem:[#allocation6 + $0x20d0] ss:$84 sps:$4 sm:$0xff]   ;;  %v19219_v44 = vld [vmem:[#allocation6 + $0x20d8] ss:$84 sps:$4 sm:$0xff]  }
 0x1e4   :  { %11661 = vmatprep.subr.bf16.mxu0 %v19170_v45  ;;  %11907 = vmatprep.subr.bf16.mxu1 %v19173_v46  ;;  %v19224_v45 = vld [vmem:[#allocation6 + $0x217c] ss:$84 sps:$4 sm:$0xff]   ;;  %v19227_v46 = vld [vmem:[#allocation6 + $0x2184] ss:$84 sps:$4 sm:$0xff]  }
 0x1e7   :  { %11662 = vmatpush1.bf16.msra.mxu0 %v19168_v51  ;;  %11908 = vmatpush1.bf16.msra.mxu1 %v19171_v53  ;;  %v19222_v51 = vld [vmem:[#allocation6 + $0x2178] ss:$84 sps:$4 sm:$0xff]   ;;  %v19225_v53 = vld [vmem:[#allocation6 + $0x2180] ss:$84 sps:$4 sm:$0xff]  }
 0x1e8   :  { %11663 = vmatprep.subr.bf16.mxu0 %v19176_v49  ;;  %11909 = vmatprep.subr.bf16.mxu1 %v19179_v54  ;;  %v19230_v49 = vld [vmem:[#allocation6 + $0x2224] ss:$84 sps:$4 sm:$0xff]   ;;  %v19233_v54 = vld [vmem:[#allocation6 + $0x222c] ss:$84 sps:$4 sm:$0xff]  }
 0x1eb   :  { %11664 = vmatpush1.bf16.msra.mxu0 %v19174_v13  ;;  %11910 = vmatpush1.bf16.msra.mxu1 %v19177_v56  ;;  %v19228_v13 = vld [vmem:[#allocation6 + $0x2220] ss:$84 sps:$4 sm:$0xff]   ;;  %v19231_v56 = vld [vmem:[#allocation6 + $0x2228] ss:$84 sps:$4 sm:$0xff]  }
 0x1ec   :  { %11665 = vmatprep.subr.bf16.mxu0 %v19182_v57  ;;  %11911 = vmatprep.subr.bf16.mxu1 %v19185_v59  ;;  %v19236_v57 = vld [vmem:[#allocation6 + $0x22cc] ss:$84 sps:$4 sm:$0xff]   ;;  %v19239_v59 = vld [vmem:[#allocation6 + $0x22d4] ss:$84 sps:$4 sm:$0xff]  }
 0x1ef   :  { %11666 = vmatpush1.bf16.msra.mxu0 %v19180_v9  ;;  %11912 = vmatpush1.bf16.msra.mxu1 %v19183_v60  ;;  %v19234_v9 = vld [vmem:[#allocation6 + $0x22c8] ss:$84 sps:$4 sm:$0xff]   ;;  %v19237_v60 = vld [vmem:[#allocation6 + $0x22d0] ss:$84 sps:$4 sm:$0xff]  }
 0x1f0   :  { %11667 = vmatprep.subr.bf16.mxu0 %v19188_v3  ;;  %11913 = vmatprep.subr.bf16.mxu1 %v19191_v4  ;;  %v19242_v3 = vld [vmem:[#allocation6 + $0x2374] ss:$84 sps:$4 sm:$0xff]   ;;  %v19245_v4 = vld [vmem:[#allocation6 + $0x237c] ss:$84 sps:$4 sm:$0xff]  }
 0x1f3   :  { %11668 = vmatpush1.bf16.msra.mxu0 %v19186_v6  ;;  %11914 = vmatpush1.bf16.msra.mxu1 %v19189_v7  ;;  %v19240_v6 = vld [vmem:[#allocation6 + $0x2370] ss:$84 sps:$4 sm:$0xff]   ;;  %v19243_v7 = vld [vmem:[#allocation6 + $0x2378] ss:$84 sps:$4 sm:$0xff]  }
 0x1f4   :  { %11669 = vmatprep.subr.bf16.mxu0 %v19194_v14  ;;  %11915 = vmatprep.subr.bf16.mxu1 %v19197_v15  ;;  %v19251_v14 = vld [vmem:[#allocation6 + $0x2424] ss:$84 sps:$4 sm:$0xff]  }
 0x1f5   :  { %v19246_v15 = vld [vmem:[#allocation6 + $0x2418] ss:$84 sps:$4 sm:$0xff]  }
 0x1f7   :  { %11670 = vmatpush1.bf16.msra.mxu0 %v19192_v16  ;;  %11916 = vmatpush1.bf16.msra.mxu1 %v19195_v17  ;;  %v19249_v16 = vld [vmem:[#allocation6 + $0x2420] ss:$84 sps:$4 sm:$0xff]   ;;  %v19254_v17 = vld [vmem:[#allocation6 + $0x24c4] ss:$84 sps:$4 sm:$0xff]  }
 0x1f8   :  { %11671 = vmatprep.subr.bf16.mxu0 %v19200_v21  ;;  %11917 = vmatprep.subr.bf16.mxu1 %v19203_v22  ;;  %v19255_v21 = vld [vmem:[#allocation6 + $0x24c8] ss:$84 sps:$4 sm:$0xff]   ;;  %v19260_v22 = vld [vmem:[#allocation6 + $0x256c] ss:$84 sps:$4 sm:$0xff]  }
 0x1fb   :  { %11672 = vmatpush1.bf16.msra.mxu0 %v19198_v23  ;;  %11918 = vmatpush1.bf16.msra.mxu1 %v19201_v24  ;;  %v19263_v23 = vld [vmem:[#allocation6 + $0x2574] ss:$84 sps:$4 sm:$0xff]  }
 0x1fc   :  { %11682 = vmatprep.subr.bf16.mxu0 %v19206_v28  ;;  %11928 = vmatprep.subr.bf16.mxu1 %v19209_v29  ;;  %v19258_v24 = vld [vmem:[#allocation6 + $0x2568] ss:$84 sps:$4 sm:$0xff]   ;;  %v19264_v29 = vld [vmem:[#allocation6 + $0x2610] ss:$84 sps:$4 sm:$0xff]  }
 0x1fd   :  { %v19269_v28 = vld [vmem:[#allocation6 + $0x261c] ss:$84 sps:$4 sm:$0xff]  }
 0x1fe   :  { %11674 = vmatmul.mubr.bf16.vlgmr.msra.gmra.mrb[8].mxu0 %v22174_v34  ;;  %11920 = vmatmul.mubr.bf16.vlgmr.msra.gmra.mrb[16].mxu1 %v22174_v34 }
 0x1ff   :  { %11683 = vmatpush1.bf16.msra.mxu0 %v19204_v31  ;;  %11929 = vmatpush1.bf16.msra.mxu1 %v19207_v32  ;;  %v19267_v31 = vld [vmem:[#allocation6 + $0x2618] ss:$84 sps:$4 sm:$0xff]   ;;  %v19272_v32 = vld [vmem:[#allocation6 + $0x26bc] ss:$84 sps:$4 sm:$0xff]  }
 0x200   :  { %11684 = vmatprep.subr.bf16.mxu0 %v19212_v35  ;;  %11930 = vmatprep.subr.bf16.mxu1 %v19215_v37  ;;  %v19270_v35 = vld [vmem:[#allocation6 + $0x26b8] ss:$84 sps:$4 sm:$0xff]   ;;  %v19273_v37 = vld [vmem:[#allocation6 + $0x26c0] ss:$84 sps:$4 sm:$0xff]  }
 0x201   :  { %11714 = vmatprep.mubr.bf16.mxu0 %v22176_v38  ;;  %11960 = vmatprep.mubr.bf16.mxu1 %v22176_v38 }
 0x203   :  { %11685 = vmatpush1.bf16.msra.mxu0 %v19210_v55  ;;  %11931 = vmatpush1.bf16.msra.mxu1 %v19213_v39  ;;  %v19278_v55 = vld [vmem:[#allocation6 + $0x2764] ss:$84 sps:$4 sm:$0xff]   ;;  %v19281_v39 = vld [vmem:[#allocation6 + $0x276c] ss:$84 sps:$4 sm:$0xff]  }
 0x204   :  { %11686 = vmatprep.subr.bf16.mxu0 %v19218_v40  ;;  %11932 = vmatprep.subr.bf16.mxu1 %v19221_v42  ;;  %v19276_v40 = vld [vmem:[#allocation6 + $0x2760] ss:$84 sps:$4 sm:$0xff]   ;;  %v19279_v42 = vld [vmem:[#allocation6 + $0x2768] ss:$84 sps:$4 sm:$0xff]  }
 0x207   :  { %11687 = vmatpush1.bf16.msra.mxu0 %v19216_v43  ;;  %11933 = vmatpush1.bf16.msra.mxu1 %v19219_v44  ;;  %v22183_v43 = vsub.s32 6, %v22092_v47  ;;  %v19284_v44 = vld [vmem:[#allocation6 + $0x280c] ss:$84 sps:$4 sm:$0xff]  }
 0x208   :  { %11688 = vmatprep.subr.bf16.mxu0 %v19224_v45  ;;  %11934 = vmatprep.subr.bf16.mxu1 %v19227_v46  ;;  %v19287_v45 = vld [vmem:[#allocation6 + $0x2814] ss:$84 sps:$4 sm:$0xff]  }
 0x209   :  { %v19282_v46 = vld [vmem:[#allocation6 + $0x2808] ss:$84 sps:$4 sm:$0xff]  }
 0x20b   :  { %11689 = vmatpush1.bf16.msra.mxu0 %v19222_v51  ;;  %11935 = vmatpush1.bf16.msra.mxu1 %v19225_v53  ;;  %v19285_v51 = vld [vmem:[#allocation6 + $0x2810] ss:$84 sps:$4 sm:$0xff]   ;;  %v202_v53 = vrot.slane %v22166_v11, %v22183_v43 }
 0x20c   :  { %11690 = vmatprep.subr.bf16.mxu0 %v19230_v49  ;;  %11936 = vmatprep.subr.bf16.mxu1 %v19233_v54  ;;  %v19290_v49 = vld [vmem:[#allocation6 + $0x28b4] ss:$84 sps:$4 sm:$0xff]   ;;  %v19293_v54 = vld [vmem:[#allocation6 + $0x28bc] ss:$84 sps:$4 sm:$0xff]  }
 0x20f   :  { %11691 = vmatpush1.bf16.msra.mxu0 %v19228_v13  ;;  %11937 = vmatpush1.bf16.msra.mxu1 %v19231_v56  ;;  %v22187_v13 = vld [vmem:[#allocation4 + $0x8] sm:$0x7]  ;;  %v19288_v56 = vld [vmem:[#allocation6 + $0x28b0] ss:$84 sps:$4 sm:$0xff]  }
 0x210   :  { %11692 = vmatprep.subr.bf16.mxu0 %v19236_v57  ;;  %11938 = vmatprep.subr.bf16.mxu1 %v19239_v59  ;;  %v214_v47 = vrot.slane %v22187_v13, %v22100_v50  ;;  %v19291_v57 = vld [vmem:[#allocation6 + $0x28b8] ss:$84 sps:$4 sm:$0xff]   ;;  %v583_v59 = vadd.f32 %v22133_v52, %v202_v53  ;;  %v19344_v53 = vld [vmem:[#allocation6 + $0x2e9c] ss:$84 sps:$4 sm:$0xff]  }
 0x212   :  { %v626_v11 = vadd.f32 %v22131_v36, %v214_v47  ;;  %v19345_v47 = vld [vmem:[#allocation6 + $0x2ea0] ss:$84 sps:$4 sm:$0xff]  }
 0x213   :  { %11693 = vmatpush1.bf16.msra.mxu0 %v19234_v9  ;;  %11939 = vmatpush1.bf16.msra.mxu1 %v19237_v60  ;;  %v19296_v9 = vld [vmem:[#allocation6 + $0x295c] ss:$84 sps:$4 sm:$0xff]   ;;  %v19299_v60 = vld [vmem:[#allocation6 + $0x2964] ss:$84 sps:$4 sm:$0xff]  }
 0x214   :  { %11694 = vmatprep.subr.bf16.mxu0 %v19242_v3  ;;  %11940 = vmatprep.subr.bf16.mxu1 %v19245_v4  ;;  %v19294_v3 = vld [vmem:[#allocation6 + $0x2958] ss:$84 sps:$4 sm:$0xff]   ;;  %v19297_v4 = vld [vmem:[#allocation6 + $0x2960] ss:$84 sps:$4 sm:$0xff]  }
 0x217   :  { %11695 = vmatpush1.bf16.msra.mxu0 %v19240_v6  ;;  %11941 = vmatpush1.bf16.msra.mxu1 %v19243_v7  ;;  %v676_v6 = vmax.f32 %v583_v59, 0.0  ;;  %v19302_v7 = vld [vmem:[#allocation6 + $0x2a04] ss:$84 sps:$4 sm:$0xff]   ;;  %v19353_v59 = vld [vmem:[#allocation6 + $0x2f4c] ss:$84 sps:$4 sm:$0xff]  }
 0x218   :  { %11696 = vmatprep.subr.bf16.mxu0 %v19248_v12  ;;  %11942 = vmatprep.subr.bf16.mxu1 %v19251_v14  ;;  %v19305_v12 = vld [vmem:[#allocation6 + $0x2a0c] ss:$84 sps:$4 sm:$0xff]   ;;  %v679_v14 = vmax.f32 %v626_v11, 0.0  ;;  %v19354_v11 = vld [vmem:[#allocation6 + $0x2fe8] ss:$84 sps:$4 sm:$0xff]  }
 0x219   :  { %v22193_v52 = vpack.c.bf16 %v676_v6, %v676_v6  ;;  %v19362_v6 = vld [vmem:[#allocation6 + $0x3094] ss:$84 sps:$4 sm:$0xff]  }
 0x21a   :  { %v22195_v36 = vpack.c.bf16 %v679_v14, %v679_v14  ;;  %v19363_v14 = vld [vmem:[#allocation6 + $0x3098] ss:$84 sps:$4 sm:$0xff]  }
 0x21b   :  { %11697 = vmatpush1.bf16.msra.mxu0 %v19246_v15  ;;  %11943 = vmatpush1.bf16.msra.mxu1 %v19249_v16  ;;  %v19300_v15 = vld [vmem:[#allocation6 + $0x2a00] ss:$84 sps:$4 sm:$0xff]   ;;  %v19303_v16 = vld [vmem:[#allocation6 + $0x2a08] ss:$84 sps:$4 sm:$0xff]  }
 0x21c   :  { %11698 = vmatprep.subr.bf16.mxu0 %v19254_v17  ;;  %11944 = vmatprep.subr.bf16.mxu1 %v19257_v19  ;;  %v19308_v17 = vld [vmem:[#allocation6 + $0x2aac] ss:$84 sps:$4 sm:$0xff]   ;;  %v19306_v19 = vld [vmem:[#allocation6 + $0x2aa8] ss:$84 sps:$4 sm:$0xff]  }
 0x21f   :  { %11699 = vmatpush1.bf16.msra.mxu0 %v19252_v20  ;;  %11945 = vmatpush1.bf16.msra.mxu1 %v19255_v21  ;;  %v19311_v20 = vld [vmem:[#allocation6 + $0x2ab4] ss:$84 sps:$4 sm:$0xff]   ;;  %v19309_v21 = vld [vmem:[#allocation6 + $0x2ab0] ss:$84 sps:$4 sm:$0xff]  }
 0x220   :  { %11700 = vmatprep.subr.bf16.mxu0 %v19260_v22  ;;  %11946 = vmatprep.subr.bf16.mxu1 %v19263_v23  ;;  %v19314_v22 = vld [vmem:[#allocation6 + $0x2b54] ss:$84 sps:$4 sm:$0xff]   ;;  %v19312_v23 = vld [vmem:[#allocation6 + $0x2b50] ss:$84 sps:$4 sm:$0xff]  }
 0x223   :  { %11701 = vmatpush1.bf16.msra.mxu0 %v19258_v24  ;;  %11947 = vmatpush1.bf16.msra.mxu1 %v19261_v25  ;;  %v19317_v24 = vld [vmem:[#allocation6 + $0x2b5c] ss:$84 sps:$4 sm:$0xff]   ;;  %v19315_v25 = vld [vmem:[#allocation6 + $0x2b58] ss:$84 sps:$4 sm:$0xff]  }
 0x224   :  { %11702 = vmatprep.subr.bf16.mxu0 %v19266_v27  ;;  %11948 = vmatprep.subr.bf16.mxu1 %v19269_v28  ;;  %v19320_v27 = vld [vmem:[#allocation6 + $0x2bfc] ss:$84 sps:$4 sm:$0xff]   ;;  %v19318_v28 = vld [vmem:[#allocation6 + $0x2bf8] ss:$84 sps:$4 sm:$0xff]  }
 0x227   :  { %11703 = vmatpush1.bf16.msra.mxu0 %v19264_v29  ;;  %11949 = vmatpush1.bf16.msra.mxu1 %v19267_v31  ;;  %v19323_v29 = vld [vmem:[#allocation6 + $0x2c04] ss:$84 sps:$4 sm:$0xff]   ;;  %v19321_v31 = vld [vmem:[#allocation6 + $0x2c00] ss:$84 sps:$4 sm:$0xff]  }
 0x228   :  { %11704 = vmatprep.subr.bf16.mxu0 %v19272_v32  ;;  %11950 = vmatprep.subr.bf16.mxu1 %v19275_v5  ;;  %v19326_v32 = vld [vmem:[#allocation6 + $0x2ca4] ss:$84 sps:$4 sm:$0xff]   ;;  %v19324_v5 = vld [vmem:[#allocation6 + $0x2ca0] ss:$84 sps:$4 sm:$0xff]  }
 0x22b   :  { %11705 = vmatpush1.bf16.msra.mxu0 %v19270_v35  ;;  %11951 = vmatpush1.bf16.msra.mxu1 %v19273_v37  ;;  %v19329_v35 = vld [vmem:[#allocation6 + $0x2cac] ss:$84 sps:$4 sm:$0xff]   ;;  %v19327_v37 = vld [vmem:[#allocation6 + $0x2ca8] ss:$84 sps:$4 sm:$0xff]  }
 0x22c   :  { %11706 = vmatprep.subr.bf16.mxu0 %v19278_v55  ;;  %11952 = vmatprep.subr.bf16.mxu1 %v19281_v39  ;;  %v19332_v55 = vld [vmem:[#allocation6 + $0x2d4c] ss:$84 sps:$4 sm:$0xff]   ;;  %v19335_v39 = vld [vmem:[#allocation6 + $0x2d54] ss:$84 sps:$4 sm:$0xff]  }
 0x22f   :  { %11707 = vmatpush1.bf16.msra.mxu0 %v19276_v40  ;;  %11953 = vmatpush1.bf16.msra.mxu1 %v19279_v42  ;;  %v19330_v40 = vld [vmem:[#allocation6 + $0x2d48] ss:$84 sps:$4 sm:$0xff]   ;;  %v19333_v42 = vld [vmem:[#allocation6 + $0x2d50] ss:$84 sps:$4 sm:$0xff]  }
 0x230   :  { %11708 = vmatprep.subr.bf16.mxu0 %v19284_v44  ;;  %11954 = vmatprep.subr.bf16.mxu1 %v19287_v45  ;;  %v19338_v44 = vld [vmem:[#allocation6 + $0x2df4] ss:$84 sps:$4 sm:$0xff]   ;;  %v19341_v45 = vld [vmem:[#allocation6 + $0x2dfc] ss:$84 sps:$4 sm:$0xff]  }
 0x233   :  { %11709 = vmatpush1.bf16.msra.mxu0 %v19282_v46  ;;  %11955 = vmatpush1.bf16.msra.mxu1 %v19285_v51  ;;  %v19336_v46 = vld [vmem:[#allocation6 + $0x2df0] ss:$84 sps:$4 sm:$0xff]   ;;  %v19339_v51 = vld [vmem:[#allocation6 + $0x2df8] ss:$84 sps:$4 sm:$0xff]  }
 0x234   :  { %11710 = vmatprep.subr.bf16.mxu0 %v19290_v49  ;;  %11956 = vmatprep.subr.bf16.mxu1 %v19293_v54  ;;  %v19342_v49 = vld [vmem:[#allocation6 + $0x2e98] ss:$84 sps:$4 sm:$0xff]  }
 0x235   :  { %v19347_v54 = vld [vmem:[#allocation6 + $0x2ea4] ss:$84 sps:$4 sm:$0xff]  }
 0x237   :  { %11711 = vmatpush1.bf16.msra.mxu0 %v19288_v56  ;;  %11957 = vmatpush1.bf16.msra.mxu1 %v19291_v57  ;;  %v19350_v56 = vld [vmem:[#allocation6 + $0x2f44] ss:$84 sps:$4 sm:$0xff]   ;;  %v19348_v57 = vld [vmem:[#allocation6 + $0x2f40] ss:$84 sps:$4 sm:$0xff]  }
 0x238   :  { %11712 = vmatprep.subr.bf16.mxu0 %v19296_v9  ;;  %11958 = vmatprep.subr.bf16.mxu1 %v19299_v60  ;;  %v19351_v9 = vld [vmem:[#allocation6 + $0x2f48] ss:$84 sps:$4 sm:$0xff]   ;;  %v19356_v60 = vld [vmem:[#allocation6 + $0x2fec] ss:$84 sps:$4 sm:$0xff]  }
 0x23b   :  { %11713 = vmatpush1.bf16.msra.mxu0 %v19294_v3  ;;  %11959 = vmatpush1.bf16.msra.mxu1 %v19297_v4  ;;  %v19359_v3 = vld [vmem:[#allocation6 + $0x2ff4] ss:$84 sps:$4 sm:$0xff]   ;;  %v19357_v4 = vld [vmem:[#allocation6 + $0x2ff0] ss:$84 sps:$4 sm:$0xff]  }
 0x23c   :  { %11723 = vmatprep.subr.bf16.mxu0 %v19302_v7  ;;  %11969 = vmatprep.subr.bf16.mxu1 %v19305_v12  ;;  %v19360_v7 = vld [vmem:[#allocation6 + $0x3090] ss:$84 sps:$4 sm:$0xff]  }
 0x23d   :  { %v19365_v12 = vld [vmem:[#allocation6 + $0x309c] ss:$84 sps:$4 sm:$0xff]  }
 0x23e   :  { %11715 = vmatmul.mubr.bf16.vlgmr.msra.gmra.mrb[8].mxu0 %v22193_v52  ;;  %11961 = vmatmul.mubr.bf16.vlgmr.msra.gmra.mrb[16].mxu1 %v22193_v52 }
 0x23f   :  { %11724 = vmatpush1.bf16.msra.mxu0 %v19300_v15  ;;  %11755 = vmatprep.mubr.bf16.mxu0 %v22195_v36  ;;  %v19368_v15 = vld [vmem:[#allocation6 + $0x313c] ss:$84 sps:$4 sm:$0xff]  }
 0x240   :  { %11970 = vmatpush1.bf16.msra.mxu1 %v19303_v16  ;;  %12001 = vmatprep.mubr.bf16.mxu1 %v22195_v36  ;;  %v19366_v16 = vld [vmem:[#allocation6 + $0x3138] ss:$84 sps:$4 sm:$0xff]  }
 0x241   :  { %11725 = vmatprep.subr.bf16.mxu0 %v19308_v17  ;;  %11971 = vmatprep.subr.bf16.mxu1 %v19311_v20  ;;  %v19371_v17 = vld [vmem:[#allocation6 + $0x3144] ss:$84 sps:$4 sm:$0xff]  }
 0x242   :  { %v19374_v20 = vld [vmem:[#allocation6 + $0x31e4] ss:$84 sps:$4 sm:$0xff]  }
 0x243   :  { %11726 = vmatpush1.bf16.msra.mxu0 %v19306_v19  ;;  %v19369_v19 = vld [vmem:[#allocation6 + $0x3140] ss:$84 sps:$4 sm:$0xff]  }
 0x244   :  { %11972 = vmatpush1.bf16.msra.mxu1 %v19309_v21  ;;  %11727 = vmatprep.subr.bf16.mxu0 %v19314_v22  ;;  %v19372_v21 = vld [vmem:[#allocation6 + $0x31e0] ss:$84 sps:$4 sm:$0xff]  }
 0x245   :  { %11973 = vmatprep.subr.bf16.mxu1 %v19317_v24  ;;  %v19377_v22 = vld [vmem:[#allocation6 + $0x31ec] ss:$84 sps:$4 sm:$0xff]  }
 0x246   :  { %v19380_v24 = vld [vmem:[#allocation6 + $0x328c] ss:$84 sps:$4 sm:$0xff]  }
 0x247   :  { %11728 = vmatpush1.bf16.msra.mxu0 %v19312_v23  ;;  %v19375_v23 = vld [vmem:[#allocation6 + $0x31e8] ss:$84 sps:$4 sm:$0xff]  }
 0x248   :  { %11974 = vmatpush1.bf16.msra.mxu1 %v19315_v25  ;;  %11729 = vmatprep.subr.bf16.mxu0 %v19320_v27  ;;  %v19378_v25 = vld [vmem:[#allocation6 + $0x3288] ss:$84 sps:$4 sm:$0xff]  }
 0x249   :  { %11975 = vmatprep.subr.bf16.mxu1 %v19323_v29  ;;  %v19383_v27 = vld [vmem:[#allocation6 + $0x3294] ss:$84 sps:$4 sm:$0xff]   ;;  %v19381_v29 = vld [vmem:[#allocation6 + $0x3290] ss:$84 sps:$4 sm:$0xff]  }
 0x24b   :  { %11730 = vmatpush1.bf16.msra.mxu0 %v19318_v28  ;;  %v210_v28 = vrot.slane %v22187_v13, %v22095_v48  ;;  %v19393_v13 = vld [vmem:[#allocation6 + $0x33e0] ss:$84 sps:$4 sm:$0xff]  }
 0x24c   :  { %11976 = vmatpush1.bf16.msra.mxu1 %v19321_v31  ;;  %11731 = vmatprep.subr.bf16.mxu0 %v19326_v32  ;;  %v19386_v31 = vld [vmem:[#allocation6 + $0x3334] ss:$84 sps:$4 sm:$0xff]   ;;  %v19384_v32 = vld [vmem:[#allocation6 + $0x3330] ss:$84 sps:$4 sm:$0xff]  }
 0x24d   :  { %11977 = vmatprep.subr.bf16.mxu1 %v19329_v35  ;;  %v624_v35 = vadd.f32 %v22129_v33, %v210_v28  ;;  %v19399_v33 = vld [vmem:[#allocation6 + $0x3488] ss:$84 sps:$4 sm:$0xff]  }
 0x24e   :  { %v19443_v28 = vld [vmem:[#allocation6 + $0x214] ss:$84 sps:$4 sm:$0xff]  }
 0x24f   :  { %11732 = vmatpush1.bf16.msra.mxu0 %v19324_v5  ;;  %v19389_v5 = vld [vmem:[#allocation6 + $0x333c] ss:$84 sps:$4 sm:$0xff]  }
 0x250   :  { %11978 = vmatpush1.bf16.msra.mxu1 %v19327_v37  ;;  %11733 = vmatprep.subr.bf16.mxu0 %v19332_v55  ;;  %v19387_v37 = vld [vmem:[#allocation6 + $0x3338] ss:$84 sps:$4 sm:$0xff]   ;;  %v19392_v55 = vld [vmem:[#allocation6 + $0x33dc] ss:$84 sps:$4 sm:$0xff]  }
 0x251   :  { %11979 = vmatprep.subr.bf16.mxu1 %v19335_v39  ;;  %v19390_v39 = vld [vmem:[#allocation6 + $0x33d8] ss:$84 sps:$4 sm:$0xff]  }
 0x253   :  { %11734 = vmatpush1.bf16.msra.mxu0 %v19330_v40  ;;  %v19395_v40 = vld [vmem:[#allocation6 + $0x33e4] ss:$84 sps:$4 sm:$0xff]  }
 0x254   :  { %11980 = vmatpush1.bf16.msra.mxu1 %v19333_v42  ;;  %11735 = vmatprep.subr.bf16.mxu0 %v19338_v44  ;;  %v678_v42 = vmax.f32 %v624_v35, 0.0  ;;  %v19398_v44 = vld [vmem:[#allocation6 + $0x3484] ss:$84 sps:$4 sm:$0xff]  }
 0x255   :  { %11981 = vmatprep.subr.bf16.mxu1 %v19341_v45  ;;  %v19401_v45 = vld [vmem:[#allocation6 + $0x348c] ss:$84 sps:$4 sm:$0xff]  }
 0x256   :  { %v19447_v35 = vld [vmem:[#allocation6 + $0x2b8] ss:$84 sps:$4 sm:$0xff]  }
 0x257   :  { %11736 = vmatpush1.bf16.msra.mxu0 %v19336_v46  ;;  %v19396_v46 = vld [vmem:[#allocation6 + $0x3480] ss:$84 sps:$4 sm:$0xff]  }
 0x258   :  { %11982 = vmatpush1.bf16.msra.mxu1 %v19339_v51  ;;  %11737 = vmatprep.subr.bf16.mxu0 %v19344_v53  ;;  %v22204_v51 = vpack.c.bf16 %v678_v42, %v678_v42  ;;  %v19404_v53 = vld [vmem:[#allocation6 + $0x352c] ss:$84 sps:$4 sm:$0xff]   ;;  %v19458_v42 = vld [vmem:[#allocation6 + $0x404] ss:$84 sps:$4 sm:$0xff]  }
 0x259   :  { %11983 = vmatprep.subr.bf16.mxu1 %v19347_v54  ;;  %v19407_v54 = vld [vmem:[#allocation6 + $0x3534] ss:$84 sps:$4 sm:$0xff]  }
 0x25b   :  { %11738 = vmatpush1.bf16.msra.mxu0 %v19342_v49  ;;  %v19402_v49 = vld [vmem:[#allocation6 + $0x3528] ss:$84 sps:$4 sm:$0xff]  }
 0x25c   :  { %11984 = vmatpush1.bf16.msra.mxu1 %v19345_v47  ;;  %11739 = vmatprep.subr.bf16.mxu0 %v19350_v56  ;;  %v19405_v47 = vld [vmem:[#allocation6 + $0x3530] ss:$84 sps:$4 sm:$0xff]   ;;  %v19410_v56 = vld [vmem:[#allocation6 + $0x35d4] ss:$84 sps:$4 sm:$0xff]  }
 0x25d   :  { %11985 = vmatprep.subr.bf16.mxu1 %v19353_v59  ;;  %v19413_v59 = vld [vmem:[#allocation6 + $0x35dc] ss:$84 sps:$4 sm:$0xff]  }
 0x25f   :  { %11740 = vmatpush1.bf16.msra.mxu0 %v19348_v57  ;;  %v19408_v57 = vld [vmem:[#allocation6 + $0x35d0] ss:$84 sps:$4 sm:$0xff]  }
 0x260   :  { %11986 = vmatpush1.bf16.msra.mxu1 %v19351_v9  ;;  %11741 = vmatprep.subr.bf16.mxu0 %v19356_v60  ;;  %v19411_v9 = vld [vmem:[#allocation6 + $0x35d8] ss:$84 sps:$4 sm:$0xff]   ;;  %v19416_v60 = vld [vmem:[#allocation6 + $0x367c] ss:$84 sps:$4 sm:$0xff]  }
 0x261   :  { %11987 = vmatprep.subr.bf16.mxu1 %v19359_v3  ;;  %v19419_v3 = vld [vmem:[#allocation6 + $0x3684] ss:$84 sps:$4 sm:$0xff]  }
 0x263   :  { %11742 = vmatpush1.bf16.msra.mxu0 %v19354_v11  ;;  %v19414_v11 = vld [vmem:[#allocation6 + $0x3678] ss:$84 sps:$4 sm:$0xff]  }
 0x264   :  { %11988 = vmatpush1.bf16.msra.mxu1 %v19357_v4  ;;  %11743 = vmatprep.subr.bf16.mxu0 %v19362_v6  ;;  %v680_v4 = vmax.f32 %v22141_v18, 0.0  ;;  %v19417_v6 = vld [vmem:[#allocation6 + $0x3680] ss:$84 sps:$4 sm:$0xff]   ;;  %v19426_v18 = vld [vmem:[#allocation6 + $0xb8] ss:$84 sps:$4 sm:$0xff]  }
 0x265   :  { %11989 = vmatprep.subr.bf16.mxu1 %v19365_v12  ;;  %v19425_v12 = vld [vmem:[#allocation6 + $0x1c] ss:$84 sps:$4 sm:$0xff]  }
 0x267   :  { %11744 = vmatpush1.bf16.msra.mxu0 %v19360_v7  ;;  %v19422_v7 = vld [vmem:[#allocation6 + $0x14] ss:$84 sps:$4 sm:$0xff]  }
 0x268   :  { %11990 = vmatpush1.bf16.msra.mxu1 %v19363_v14  ;;  %11745 = vmatprep.subr.bf16.mxu0 %v19368_v15  ;;  %v19420_v14 = vld [vmem:[#allocation6 + $0x10] ss:$84 sps:$4 sm:$0xff]   ;;  %v19423_v15 = vld [vmem:[#allocation6 + $0x18] ss:$84 sps:$4 sm:$0xff]  }
 0x269   :  { %11991 = vmatprep.subr.bf16.mxu1 %v19371_v17  ;;  %v22211_v17 = vpack.c.bf16 %v680_v4, %v680_v4  ;;  %v19480_v4 = vld [vmem:[#allocation6 + $0x6a0] ss:$84 sps:$4 sm:$0xff]  }
 0x26b   :  { %11746 = vmatpush1.bf16.msra.mxu0 %v19366_v16  ;;  %v19428_v16 = vld [vmem:[#allocation6 + $0xbc] ss:$84 sps:$4 sm:$0xff]  }
 0x26c   :  { %11992 = vmatpush1.bf16.msra.mxu1 %v19369_v19  ;;  %11747 = vmatprep.subr.bf16.mxu0 %v19374_v20  ;;  %v19429_v19 = vld [vmem:[#allocation6 + $0xc0] ss:$84 sps:$4 sm:$0xff]   ;;  %v19431_v20 = vld [vmem:[#allocation6 + $0xc4] ss:$84 sps:$4 sm:$0xff]  }
 0x26d   :  { %11993 = vmatprep.subr.bf16.mxu1 %v19377_v22  ;;  %v19437_v22 = vld [vmem:[#allocation6 + $0x16c] ss:$84 sps:$4 sm:$0xff]  }
 0x26f   :  { %11748 = vmatpush1.bf16.msra.mxu0 %v19372_v21  ;;  %v19434_v21 = vld [vmem:[#allocation6 + $0x164] ss:$84 sps:$4 sm:$0xff]  }
 0x270   :  { %11994 = vmatpush1.bf16.msra.mxu1 %v19375_v23  ;;  %11749 = vmatprep.subr.bf16.mxu0 %v19380_v24  ;;  %v19432_v23 = vld [vmem:[#allocation6 + $0x160] ss:$84 sps:$4 sm:$0xff]   ;;  %v19435_v24 = vld [vmem:[#allocation6 + $0x168] ss:$84 sps:$4 sm:$0xff]  }
 0x271   :  { %11995 = vmatprep.subr.bf16.mxu1 %v19383_v27  ;;  %v19438_v27 = vld [vmem:[#allocation6 + $0x208] ss:$84 sps:$4 sm:$0xff]  }
 0x273   :  { %11750 = vmatpush1.bf16.msra.mxu0 %v19378_v25  ;;  %v19440_v25 = vld [vmem:[#allocation6 + $0x20c] ss:$84 sps:$4 sm:$0xff]  }
 0x274   :  { %11996 = vmatpush1.bf16.msra.mxu1 %v19381_v29  ;;  %11751 = vmatprep.subr.bf16.mxu0 %v19386_v31  ;;  %v19441_v29 = vld [vmem:[#allocation6 + $0x210] ss:$84 sps:$4 sm:$0xff]   ;;  %v19446_v31 = vld [vmem:[#allocation6 + $0x2b4] ss:$84 sps:$4 sm:$0xff]  }
 0x275   :  { %11997 = vmatprep.subr.bf16.mxu1 %v19389_v5  ;;  %v19449_v5 = vld [vmem:[#allocation6 + $0x2bc] ss:$84 sps:$4 sm:$0xff]  }
 0x277   :  { %11752 = vmatpush1.bf16.msra.mxu0 %v19384_v32  ;;  %v19444_v32 = vld [vmem:[#allocation6 + $0x2b0] ss:$84 sps:$4 sm:$0xff]  }
 0x278   :  { %11998 = vmatpush1.bf16.msra.mxu1 %v19387_v37  ;;  %11753 = vmatprep.subr.bf16.mxu0 %v19392_v55  ;;  %v19452_v37 = vld [vmem:[#allocation6 + $0x35c] ss:$84 sps:$4 sm:$0xff]   ;;  %v19450_v55 = vld [vmem:[#allocation6 + $0x358] ss:$84 sps:$4 sm:$0xff]  }
 0x279   :  { %11999 = vmatprep.subr.bf16.mxu1 %v19395_v40  ;;  %v19453_v40 = vld [vmem:[#allocation6 + $0x360] ss:$84 sps:$4 sm:$0xff]  }
 0x27b   :  { %11754 = vmatpush1.bf16.msra.mxu0 %v19390_v39  ;;  %v19455_v39 = vld [vmem:[#allocation6 + $0x364] ss:$84 sps:$4 sm:$0xff]  }
 0x27c   :  { %12000 = vmatpush1.bf16.msra.mxu1 %v19393_v13  ;;  %11764 = vmatprep.subr.bf16.mxu0 %v19398_v44  ;;  %v19456_v13 = vld [vmem:[#allocation6 + $0x400] ss:$84 sps:$4 sm:$0xff]  }
 0x27d   :  { %12010 = vmatprep.subr.bf16.mxu1 %v19401_v45  ;;  %v19461_v44 = vld [vmem:[#allocation6 + $0x40c] ss:$84 sps:$4 sm:$0xff]   ;;  %v19459_v45 = vld [vmem:[#allocation6 + $0x408] ss:$84 sps:$4 sm:$0xff]  }
 0x27e   :  { %11756 = vmatmul.mubr.bf16.vlgmr.msra.gmra.mrb[8].mxu0 %v22204_v51 }
 0x27f   :  { %12002 = vmatmul.mubr.bf16.vlgmr.msra.gmra.mrb[16].mxu1 %v22204_v51  ;;  %11765 = vmatpush1.bf16.msra.mxu0 %v19396_v46  ;;  %v19464_v46 = vld [vmem:[#allocation6 + $0x4ac] ss:$84 sps:$4 sm:$0xff]  }
 0x280   :  { %12011 = vmatpush1.bf16.msra.mxu1 %v19399_v33  ;;  %11766 = vmatprep.subr.bf16.mxu0 %v19404_v53  ;;  %v19462_v33 = vld [vmem:[#allocation6 + $0x4a8] ss:$84 sps:$4 sm:$0xff]  }
 0x281   :  { %12012 = vmatprep.subr.bf16.mxu1 %v19407_v54  ;;  %11796 = vmatprep.mubr.bf16.mxu0 %v21898_v0  ;;  %v19467_v53 = vld [vmem:[#allocation6 + $0x4b4] ss:$84 sps:$4 sm:$0xff]  }
 0x282   :  { %12042 = vmatprep.mubr.bf16.mxu1 %v21898_v0  ;;  %v19470_v54 = vld [vmem:[#allocation6 + $0x554] ss:$84 sps:$4 sm:$0xff]  }
 0x283   :  { %11767 = vmatpush1.bf16.msra.mxu0 %v19402_v49  ;;  %v19465_v49 = vld [vmem:[#allocation6 + $0x4b0] ss:$84 sps:$4 sm:$0xff]  }
 0x284   :  { %12013 = vmatpush1.bf16.msra.mxu1 %v19405_v47  ;;  %11768 = vmatprep.subr.bf16.mxu0 %v19410_v56  ;;  %v19468_v47 = vld [vmem:[#allocation6 + $0x550] ss:$84 sps:$4 sm:$0xff]  }
 0x285   :  { %12014 = vmatprep.subr.bf16.mxu1 %v19413_v59  ;;  %v19473_v56 = vld [vmem:[#allocation6 + $0x55c] ss:$84 sps:$4 sm:$0xff]  }
 0x286   :  { %v19476_v59 = vld [vmem:[#allocation6 + $0x5fc] ss:$84 sps:$4 sm:$0xff]  }
 0x287   :  { %11769 = vmatpush1.bf16.msra.mxu0 %v19408_v57  ;;  %v19471_v57 = vld [vmem:[#allocation6 + $0x558] ss:$84 sps:$4 sm:$0xff]  }
 0x288   :  { %12015 = vmatpush1.bf16.msra.mxu1 %v19411_v9  ;;  %11770 = vmatprep.subr.bf16.mxu0 %v19416_v60  ;;  %v19474_v9 = vld [vmem:[#allocation6 + $0x5f8] ss:$84 sps:$4 sm:$0xff]  }
 0x289   :  { %12016 = vmatprep.subr.bf16.mxu1 %v19419_v3  ;;  %v19479_v60 = vld [vmem:[#allocation6 + $0x604] ss:$84 sps:$4 sm:$0xff]  }
 0x28a   :  { %v19482_v3 = vld [vmem:[#allocation6 + $0x6a4] ss:$84 sps:$4 sm:$0xff]  }
 0x28b   :  { %11771 = vmatpush1.bf16.msra.mxu0 %v19414_v11  ;;  %v19477_v11 = vld [vmem:[#allocation6 + $0x600] ss:$84 sps:$4 sm:$0xff]  }
 0x28c   :  { %12017 = vmatpush1.bf16.msra.mxu1 %v19417_v6  ;;  %12051 = vmatprep.subr.bf16.mxu0 %v19422_v7  ;;  %v19485_v6 = vld [vmem:[#allocation6 + $0x6ac] ss:$84 sps:$4 sm:$0xff]   ;;  %v19483_v7 = vld [vmem:[#allocation6 + $0x6a8] ss:$84 sps:$4 sm:$0xff]  }
 0x28d   :  { %12297 = vmatprep.subr.bf16.mxu1 %v19425_v12  ;;  %v19488_v12 = vld [vmem:[#allocation6 + $0x74c] ss:$84 sps:$4 sm:$0xff]  }
 0x28e   :  { %18023 = vmatmul.mubr.msk.bf16.vlgmr.msra.gmra.mrb[8].mxu0 %vm11555_vm3, %v22211_v17 }
 0x28f   :  { %18024 = vmatmul.mubr.msk.bf16.vlgmr.msra.gmra.mrb[16].mxu1 %vm11555_vm3, %v22211_v17  ;;  %12052 = vmatpush1.bf16.msra.mxu0 %v19420_v14  ;;  %v19486_v14 = vld [vmem:[#allocation6 + $0x748] ss:$84 sps:$4 sm:$0xff]  }
 0x290   :  { %12083 = vmatprep.mubr.bf16.mxu0 %v22106_v63  ;;  %12298 = vmatpush1.bf16.msra.mxu1 %v19423_v15  ;;  %v19491_v15 = vld [vmem:[#allocation6 + $0x754] ss:$84 sps:$4 sm:$0xff]  }
 0x291   :  { %12329 = vmatprep.mubr.bf16.mxu1 %v22106_v63  ;;  %12053 = vmatprep.subr.bf16.mxu0 %v19428_v16  ;;  %v19489_v16 = vld [vmem:[#allocation6 + $0x750] ss:$84 sps:$4 sm:$0xff]  }
 0x292   :  { %12299 = vmatprep.subr.bf16.mxu1 %v19431_v20  ;;  %v19497_v20 = vld [vmem:[#allocation6 + $0x7fc] ss:$84 sps:$4 sm:$0xff]  }
 0x293   :  { %12054 = vmatpush1.bf16.msra.mxu0 %v19426_v18  ;;  %v19494_v18 = vld [vmem:[#allocation6 + $0x7f4] ss:$84 sps:$4 sm:$0xff]  }
 0x294   :  { %12300 = vmatpush1.bf16.msra.mxu1 %v19429_v19  ;;  %12055 = vmatprep.subr.bf16.mxu0 %v19434_v21  ;;  %v19492_v19 = vld [vmem:[#allocation6 + $0x7f0] ss:$84 sps:$4 sm:$0xff]   ;;  %v19495_v21 = vld [vmem:[#allocation6 + $0x7f8] ss:$84 sps:$4 sm:$0xff]  }
 0x295   :  { %12301 = vmatprep.subr.bf16.mxu1 %v19437_v22  ;;  %v19500_v22 = vld [vmem:[#allocation6 + $0x89c] ss:$84 sps:$4 sm:$0xff]  }
 0x297   :  { %12056 = vmatpush1.bf16.msra.mxu0 %v19432_v23  ;;  %v19498_v23 = vld [vmem:[#allocation6 + $0x898] ss:$84 sps:$4 sm:$0xff]  }
 0x298   :  { %12302 = vmatpush1.bf16.msra.mxu1 %v19435_v24  ;;  %12057 = vmatprep.subr.bf16.mxu0 %v19440_v25  ;;  %v19503_v24 = vld [vmem:[#allocation6 + $0x8a4] ss:$84 sps:$4 sm:$0xff]   ;;  %v19501_v25 = vld [vmem:[#allocation6 + $0x8a0] ss:$84 sps:$4 sm:$0xff]  }
 0x299   :  { %12303 = vmatprep.subr.bf16.mxu1 %v19443_v28  ;;  %v19504_v28 = vld [vmem:[#allocation6 + $0x940] ss:$84 sps:$4 sm:$0xff]  }
 0x29b   :  { %12058 = vmatpush1.bf16.msra.mxu0 %v19438_v27  ;;  %v19506_v27 = vld [vmem:[#allocation6 + $0x944] ss:$84 sps:$4 sm:$0xff]  }
 0x29c   :  { %12304 = vmatpush1.bf16.msra.mxu1 %v19441_v29  ;;  %12059 = vmatprep.subr.bf16.mxu0 %v19446_v31  ;;  %v19509_v29 = vld [vmem:[#allocation6 + $0x94c] ss:$84 sps:$4 sm:$0xff]   ;;  %v19507_v31 = vld [vmem:[#allocation6 + $0x948] ss:$84 sps:$4 sm:$0xff]  }
 0x29d   :  { %12305 = vmatprep.subr.bf16.mxu1 %v19449_v5  ;;  %v19510_v5 = vld [vmem:[#allocation6 + $0x9e8] ss:$84 sps:$4 sm:$0xff]  }
 0x29f   :  { %12060 = vmatpush1.bf16.msra.mxu0 %v19444_v32  ;;  %v19512_v32 = vld [vmem:[#allocation6 + $0x9ec] ss:$84 sps:$4 sm:$0xff]  }
 0x2a0   :  { %12306 = vmatpush1.bf16.msra.mxu1 %v19447_v35  ;;  %12061 = vmatprep.subr.bf16.mxu0 %v19452_v37  ;;  %v19515_v35 = vld [vmem:[#allocation6 + $0x9f4] ss:$84 sps:$4 sm:$0xff]   ;;  %v19513_v37 = vld [vmem:[#allocation6 + $0x9f0] ss:$84 sps:$4 sm:$0xff]  }
 0x2a1   :  { %12307 = vmatprep.subr.bf16.mxu1 %v19455_v39  ;;  %v19516_v39 = vld [vmem:[#allocation6 + $0xa90] ss:$84 sps:$4 sm:$0xff]  }
 0x2a3   :  { %12062 = vmatpush1.bf16.msra.mxu0 %v19450_v55  ;;  %v19518_v55 = vld [vmem:[#allocation6 + $0xa94] ss:$84 sps:$4 sm:$0xff]  }
 0x2a4   :  { %12308 = vmatpush1.bf16.msra.mxu1 %v19453_v40  ;;  %12063 = vmatprep.subr.bf16.mxu0 %v19458_v42  ;;  %v19521_v40 = vld [vmem:[#allocation6 + $0xa9c] ss:$84 sps:$4 sm:$0xff]   ;;  %v19519_v42 = vld [vmem:[#allocation6 + $0xa98] ss:$84 sps:$4 sm:$0xff]  }
 0x2a5   :  { %12309 = vmatprep.subr.bf16.mxu1 %v19461_v44  ;;  %v19522_v44 = vld [vmem:[#allocation6 + $0xb38] ss:$84 sps:$4 sm:$0xff]  }
 0x2a7   :  { %12064 = vmatpush1.bf16.msra.mxu0 %v19456_v13  ;;  %v19524_v13 = vld [vmem:[#allocation6 + $0xb3c] ss:$84 sps:$4 sm:$0xff]  }
 0x2a8   :  { %12310 = vmatpush1.bf16.msra.mxu1 %v19459_v45  ;;  %12065 = vmatprep.subr.bf16.mxu0 %v19464_v46  ;;  %v19525_v45 = vld [vmem:[#allocation6 + $0xb40] ss:$84 sps:$4 sm:$0xff]   ;;  %v19527_v46 = vld [vmem:[#allocation6 + $0xb44] ss:$84 sps:$4 sm:$0xff]  }
 0x2a9   :  { %12311 = vmatprep.subr.bf16.mxu1 %v19467_v53  ;;  %v19533_v53 = vld [vmem:[#allocation6 + $0xbec] ss:$84 sps:$4 sm:$0xff]  }
 0x2ab   :  { %12066 = vmatpush1.bf16.msra.mxu0 %v19462_v33  ;;  %v19530_v33 = vld [vmem:[#allocation6 + $0xbe4] ss:$84 sps:$4 sm:$0xff]  }
 0x2ac   :  { %12312 = vmatpush1.bf16.msra.mxu1 %v19465_v49  ;;  %12067 = vmatprep.subr.bf16.mxu0 %v19470_v54  ;;  %v19528_v49 = vld [vmem:[#allocation6 + $0xbe0] ss:$84 sps:$4 sm:$0xff]   ;;  %v19531_v54 = vld [vmem:[#allocation6 + $0xbe8] ss:$84 sps:$4 sm:$0xff]  }
 0x2ad   :  { %12313 = vmatprep.subr.bf16.mxu1 %v19473_v56  ;;  %v19534_v56 = vld [vmem:[#allocation6 + $0xc88] ss:$84 sps:$4 sm:$0xff]  }
 0x2af   :  { %12068 = vmatpush1.bf16.msra.mxu0 %v19468_v47  ;;  %v19536_v47 = vld [vmem:[#allocation6 + $0xc8c] ss:$84 sps:$4 sm:$0xff]  }
 0x2b0   :  { %12314 = vmatpush1.bf16.msra.mxu1 %v19471_v57  ;;  %12069 = vmatprep.subr.bf16.mxu0 %v19476_v59  ;;  %v19539_v57 = vld [vmem:[#allocation6 + $0xc94] ss:$84 sps:$4 sm:$0xff]   ;;  %v19537_v59 = vld [vmem:[#allocation6 + $0xc90] ss:$84 sps:$4 sm:$0xff]  }
 0x2b1   :  { %12315 = vmatprep.subr.bf16.mxu1 %v19479_v60  ;;  %v19540_v60 = vld [vmem:[#allocation6 + $0xd30] ss:$84 sps:$4 sm:$0xff]  }
 0x2b3   :  { %12070 = vmatpush1.bf16.msra.mxu0 %v19474_v9  ;;  %v19542_v9 = vld [vmem:[#allocation6 + $0xd34] ss:$84 sps:$4 sm:$0xff]  }
 0x2b4   :  { %12316 = vmatpush1.bf16.msra.mxu1 %v19477_v11  ;;  %12071 = vmatprep.subr.bf16.mxu0 %v19482_v3  ;;  %v19545_v11 = vld [vmem:[#allocation6 + $0xd3c] ss:$84 sps:$4 sm:$0xff]   ;;  %v19543_v3 = vld [vmem:[#allocation6 + $0xd38] ss:$84 sps:$4 sm:$0xff]  }
 0x2b5   :  { %12317 = vmatprep.subr.bf16.mxu1 %v19485_v6  ;;  %v19546_v6 = vld [vmem:[#allocation6 + $0xdd8] ss:$84 sps:$4 sm:$0xff]  }
 0x2b7   :  { %12072 = vmatpush1.bf16.msra.mxu0 %v19480_v4  ;;  %v19548_v4 = vld [vmem:[#allocation6 + $0xddc] ss:$84 sps:$4 sm:$0xff]  }
 0x2b8   :  { %12318 = vmatpush1.bf16.msra.mxu1 %v19483_v7  ;;  %12073 = vmatprep.subr.bf16.mxu0 %v19488_v12  ;;  %v19551_v7 = vld [vmem:[#allocation6 + $0xde4] ss:$84 sps:$4 sm:$0xff]   ;;  %v19549_v12 = vld [vmem:[#allocation6 + $0xde0] ss:$84 sps:$4 sm:$0xff]  }
 0x2b9   :  { %12319 = vmatprep.subr.bf16.mxu1 %v19491_v15  ;;  %v19557_v15 = vld [vmem:[#allocation6 + $0xe8c] ss:$84 sps:$4 sm:$0xff]  }
 0x2bb   :  { %12074 = vmatpush1.bf16.msra.mxu0 %v19486_v14  ;;  %v19554_v14 = vld [vmem:[#allocation6 + $0xe84] ss:$84 sps:$4 sm:$0xff]  }
 0x2bc   :  { %12320 = vmatpush1.bf16.msra.mxu1 %v19489_v16  ;;  %12075 = vmatprep.subr.bf16.mxu0 %v19494_v18  ;;  %v19552_v16 = vld [vmem:[#allocation6 + $0xe80] ss:$84 sps:$4 sm:$0xff]   ;;  %v19555_v18 = vld [vmem:[#allocation6 + $0xe88] ss:$84 sps:$4 sm:$0xff]  }
 0x2bd   :  { %12321 = vmatprep.subr.bf16.mxu1 %v19497_v20  ;;  %v19563_v20 = vld [vmem:[#allocation6 + $0xf34] ss:$84 sps:$4 sm:$0xff]  }
 0x2bf   :  { %12076 = vmatpush1.bf16.msra.mxu0 %v19492_v19  ;;  %v19560_v19 = vld [vmem:[#allocation6 + $0xf2c] ss:$84 sps:$4 sm:$0xff]  }
 0x2c0   :  { %12322 = vmatpush1.bf16.msra.mxu1 %v19495_v21  ;;  %12077 = vmatprep.subr.bf16.mxu0 %v19500_v22  ;;  %v19558_v21 = vld [vmem:[#allocation6 + $0xf28] ss:$84 sps:$4 sm:$0xff]   ;;  %v19561_v22 = vld [vmem:[#allocation6 + $0xf30] ss:$84 sps:$4 sm:$0xff]  }
 0x2c1   :  { %12323 = vmatprep.subr.bf16.mxu1 %v19503_v24  ;;  %v19564_v24 = vld [vmem:[#allocation6 + $0xfd0] ss:$84 sps:$4 sm:$0xff]  }
 0x2c3   :  { %12078 = vmatpush1.bf16.msra.mxu0 %v19498_v23  ;;  %v19566_v23 = vld [vmem:[#allocation6 + $0xfd4] ss:$84 sps:$4 sm:$0xff]  }
 0x2c4   :  { %12324 = vmatpush1.bf16.msra.mxu1 %v19501_v25  ;;  %12079 = vmatprep.subr.bf16.mxu0 %v19506_v27  ;;  %v19569_v25 = vld [vmem:[#allocation6 + $0xfdc] ss:$84 sps:$4 sm:$0xff]   ;;  %v19567_v27 = vld [vmem:[#allocation6 + $0xfd8] ss:$84 sps:$4 sm:$0xff]  }
 0x2c5   :  { %12325 = vmatprep.subr.bf16.mxu1 %v19509_v29  ;;  %v19570_v29 = vld [vmem:[#allocation6 + $0x1078] ss:$84 sps:$4 sm:$0xff]  }
 0x2c7   :  { %12080 = vmatpush1.bf16.msra.mxu0 %v19504_v28  ;;  %v19572_v28 = vld [vmem:[#allocation6 + $0x107c] ss:$84 sps:$4 sm:$0xff]  }
 0x2c8   :  { %12326 = vmatpush1.bf16.msra.mxu1 %v19507_v31  ;;  %12081 = vmatprep.subr.bf16.mxu0 %v19512_v32  ;;  %v19575_v31 = vld [vmem:[#allocation6 + $0x1084] ss:$84 sps:$4 sm:$0xff]   ;;  %v19573_v32 = vld [vmem:[#allocation6 + $0x1080] ss:$84 sps:$4 sm:$0xff]  }
 0x2c9   :  { %12327 = vmatprep.subr.bf16.mxu1 %v19515_v35  ;;  %v19576_v35 = vld [vmem:[#allocation6 + $0x1120] ss:$84 sps:$4 sm:$0xff]  }
 0x2cb   :  { %12082 = vmatpush1.bf16.msra.mxu0 %v19510_v5  ;;  %v19578_v5 = vld [vmem:[#allocation6 + $0x1124] ss:$84 sps:$4 sm:$0xff]  }
 0x2cc   :  { %12328 = vmatpush1.bf16.msra.mxu1 %v19513_v37  ;;  %12092 = vmatprep.subr.bf16.mxu0 %v19518_v55  ;;  %v19581_v37 = vld [vmem:[#allocation6 + $0x112c] ss:$84 sps:$4 sm:$0xff]   ;;  %v19579_v55 = vld [vmem:[#allocation6 + $0x1128] ss:$84 sps:$4 sm:$0xff]  }
 0x2cd   :  { %12338 = vmatprep.subr.bf16.mxu1 %v19521_v40  ;;  %v19582_v40 = vld [vmem:[#allocation6 + $0x11c8] ss:$84 sps:$4 sm:$0xff]  }
 0x2ce   :  { %12084 = vmatmul.mubr.bf16.vlgmr.msra.gmra.mrb[12].mxu0 %v22111_v2 }
 0x2cf   :  { %12330 = vmatmul.mubr.bf16.vlgmr.msra.gmra.mrb[20].mxu1 %v22111_v2  ;;  %12093 = vmatpush1.bf16.msra.mxu0 %v19516_v39  ;;  %v19584_v39 = vld [vmem:[#allocation6 + $0x11cc] ss:$84 sps:$4 sm:$0xff]  }
 0x2d0   :  { %12124 = vmatprep.mubr.bf16.mxu0 %v22125_v26  ;;  %12339 = vmatpush1.bf16.msra.mxu1 %v19519_v42  ;;  %v19587_v42 = vld [vmem:[#allocation6 + $0x11d4] ss:$84 sps:$4 sm:$0xff]  }
 0x2d1   :  { %12370 = vmatprep.mubr.bf16.mxu1 %v22125_v26  ;;  %12094 = vmatprep.subr.bf16.mxu0 %v19524_v13  ;;  %v19585_v13 = vld [vmem:[#allocation6 + $0x11d0] ss:$84 sps:$4 sm:$0xff]  }
 0x2d2   :  { %12340 = vmatprep.subr.bf16.mxu1 %v19527_v46  ;;  %v19593_v46 = vld [vmem:[#allocation6 + $0x127c] ss:$84 sps:$4 sm:$0xff]  }
 0x2d3   :  { %12095 = vmatpush1.bf16.msra.mxu0 %v19522_v44  ;;  %v19590_v44 = vld [vmem:[#allocation6 + $0x1274] ss:$84 sps:$4 sm:$0xff]  }
 0x2d4   :  { %12341 = vmatpush1.bf16.msra.mxu1 %v19525_v45  ;;  %12096 = vmatprep.subr.bf16.mxu0 %v19530_v33  ;;  %v19588_v45 = vld [vmem:[#allocation6 + $0x1270] ss:$84 sps:$4 sm:$0xff]   ;;  %v19591_v33 = vld [vmem:[#allocation6 + $0x1278] ss:$84 sps:$4 sm:$0xff]  }
 0x2d5   :  { %12342 = vmatprep.subr.bf16.mxu1 %v19533_v53  ;;  %v19596_v53 = vld [vmem:[#allocation6 + $0x131c] ss:$84 sps:$4 sm:$0xff]  }
 0x2d7   :  { %12097 = vmatpush1.bf16.msra.mxu0 %v19528_v49  ;;  %v19594_v49 = vld [vmem:[#allocation6 + $0x1318] ss:$84 sps:$4 sm:$0xff]  }
 0x2d8   :  { %12343 = vmatpush1.bf16.msra.mxu1 %v19531_v54  ;;  %12098 = vmatprep.subr.bf16.mxu0 %v19536_v47  ;;  %v19599_v54 = vld [vmem:[#allocation6 + $0x1324] ss:$84 sps:$4 sm:$0xff]   ;;  %v19597_v47 = vld [vmem:[#allocation6 + $0x1320] ss:$84 sps:$4 sm:$0xff]  }
 0x2d9   :  { %12344 = vmatprep.subr.bf16.mxu1 %v19539_v57  ;;  %v19600_v57 = vld [vmem:[#allocation6 + $0x13c0] ss:$84 sps:$4 sm:$0xff]  }
 0x2db   :  { %12099 = vmatpush1.bf16.msra.mxu0 %v19534_v56  ;;  %v19602_v56 = vld [vmem:[#allocation6 + $0x13c4] ss:$84 sps:$4 sm:$0xff]  }
 0x2dc   :  { %12345 = vmatpush1.bf16.msra.mxu1 %v19537_v59  ;;  %12100 = vmatprep.subr.bf16.mxu0 %v19542_v9  ;;  %v19605_v59 = vld [vmem:[#allocation6 + $0x13cc] ss:$84 sps:$4 sm:$0xff]   ;;  %v19603_v9 = vld [vmem:[#allocation6 + $0x13c8] ss:$84 sps:$4 sm:$0xff]  }
 0x2dd   :  { %12346 = vmatprep.subr.bf16.mxu1 %v19545_v11  ;;  %v19606_v11 = vld [vmem:[#allocation6 + $0x1468] ss:$84 sps:$4 sm:$0xff]  }
 0x2df   :  { %12101 = vmatpush1.bf16.msra.mxu0 %v19540_v60  ;;  %v19608_v60 = vld [vmem:[#allocation6 + $0x146c] ss:$84 sps:$4 sm:$0xff]  }
 0x2e0   :  { %12347 = vmatpush1.bf16.msra.mxu1 %v19543_v3  ;;  %12102 = vmatprep.subr.bf16.mxu0 %v19548_v4  ;;  %v19611_v3 = vld [vmem:[#allocation6 + $0x1474] ss:$84 sps:$4 sm:$0xff]   ;;  %v19609_v4 = vld [vmem:[#allocation6 + $0x1470] ss:$84 sps:$4 sm:$0xff]  }
 0x2e1   :  { %12348 = vmatprep.subr.bf16.mxu1 %v19551_v7  ;;  %v19612_v7 = vld [vmem:[#allocation6 + $0x1510] ss:$84 sps:$4 sm:$0xff]  }
 0x2e3   :  { %12103 = vmatpush1.bf16.msra.mxu0 %v19546_v6  ;;  %v19614_v6 = vld [vmem:[#allocation6 + $0x1514] ss:$84 sps:$4 sm:$0xff]  }
 0x2e4   :  { %12349 = vmatpush1.bf16.msra.mxu1 %v19549_v12  ;;  %12104 = vmatprep.subr.bf16.mxu0 %v19554_v14  ;;  %v19617_v12 = vld [vmem:[#allocation6 + $0x151c] ss:$84 sps:$4 sm:$0xff]   ;;  %v19615_v14 = vld [vmem:[#allocation6 + $0x1518] ss:$84 sps:$4 sm:$0xff]  }
 0x2e5   :  { %12350 = vmatprep.subr.bf16.mxu1 %v19557_v15  ;;  %v19620_v15 = vld [vmem:[#allocation6 + $0x15bc] ss:$84 sps:$4 sm:$0xff]  }
 0x2e7   :  { %12105 = vmatpush1.bf16.msra.mxu0 %v19552_v16  ;;  %v19618_v16 = vld [vmem:[#allocation6 + $0x15b8] ss:$84 sps:$4 sm:$0xff]  }
 0x2e8   :  { %12351 = vmatpush1.bf16.msra.mxu1 %v19555_v18  ;;  %12106 = vmatprep.subr.bf16.mxu0 %v19560_v19  ;;  %v19621_v18 = vld [vmem:[#allocation6 + $0x15c0] ss:$84 sps:$4 sm:$0xff]   ;;  %v19623_v19 = vld [vmem:[#allocation6 + $0x15c4] ss:$84 sps:$4 sm:$0xff]  }
 0x2e9   :  { %12352 = vmatprep.subr.bf16.mxu1 %v19563_v20  ;;  %v19626_v20 = vld [vmem:[#allocation6 + $0x1664] ss:$84 sps:$4 sm:$0xff]  }
 0x2eb   :  { %12107 = vmatpush1.bf16.msra.mxu0 %v19558_v21  ;;  %v19629_v21 = vld [vmem:[#allocation6 + $0x166c] ss:$84 sps:$4 sm:$0xff]  }
 0x2ec   :  { %12353 = vmatpush1.bf16.msra.mxu1 %v19561_v22  ;;  %12108 = vmatprep.subr.bf16.mxu0 %v19566_v23  ;;  %v19624_v22 = vld [vmem:[#allocation6 + $0x1660] ss:$84 sps:$4 sm:$0xff]   ;;  %v19627_v23 = vld [vmem:[#allocation6 + $0x1668] ss:$84 sps:$4 sm:$0xff]  }
 0x2ed   :  { %12354 = vmatprep.subr.bf16.mxu1 %v19569_v25  ;;  %v19630_v25 = vld [vmem:[#allocation6 + $0x1708] ss:$84 sps:$4 sm:$0xff]  }
 0x2ef   :  { %12109 = vmatpush1.bf16.msra.mxu0 %v19564_v24  ;;  %v19632_v24 = vld [vmem:[#allocation6 + $0x170c] ss:$84 sps:$4 sm:$0xff]  }
 0x2f0   :  { %12355 = vmatpush1.bf16.msra.mxu1 %v19567_v27  ;;  %12110 = vmatprep.subr.bf16.mxu0 %v19572_v28  ;;  %v19635_v27 = vld [vmem:[#allocation6 + $0x1714] ss:$84 sps:$4 sm:$0xff]   ;;  %v19633_v28 = vld [vmem:[#allocation6 + $0x1710] ss:$84 sps:$4 sm:$0xff]  }
 0x2f1   :  { %12356 = vmatprep.subr.bf16.mxu1 %v19575_v31  ;;  %v19636_v31 = vld [vmem:[#allocation6 + $0x17b0] ss:$84 sps:$4 sm:$0xff]  }
 0x2f3   :  { %12111 = vmatpush1.bf16.msra.mxu0 %v19570_v29  ;;  %v19638_v29 = vld [vmem:[#allocation6 + $0x17b4] ss:$84 sps:$4 sm:$0xff]  }
 0x2f4   :  { %12357 = vmatpush1.bf16.msra.mxu1 %v19573_v32  ;;  %12112 = vmatprep.subr.bf16.mxu0 %v19578_v5  ;;  %v19641_v32 = vld [vmem:[#allocation6 + $0x17bc] ss:$84 sps:$4 sm:$0xff]   ;;  %v19639_v5 = vld [vmem:[#allocation6 + $0x17b8] ss:$84 sps:$4 sm:$0xff]  }
 0x2f5   :  { %12358 = vmatprep.subr.bf16.mxu1 %v19581_v37  ;;  %v19642_v37 = vld [vmem:[#allocation6 + $0x1858] ss:$84 sps:$4 sm:$0xff]  }
 0x2f7   :  { %12113 = vmatpush1.bf16.msra.mxu0 %v19576_v35  ;;  %v19644_v35 = vld [vmem:[#allocation6 + $0x185c] ss:$84 sps:$4 sm:$0xff]  }
 0x2f8   :  { %12359 = vmatpush1.bf16.msra.mxu1 %v19579_v55  ;;  %12114 = vmatprep.subr.bf16.mxu0 %v19584_v39  ;;  %v19647_v55 = vld [vmem:[#allocation6 + $0x1864] ss:$84 sps:$4 sm:$0xff]   ;;  %v19645_v39 = vld [vmem:[#allocation6 + $0x1860] ss:$84 sps:$4 sm:$0xff]  }
 0x2f9   :  { %12360 = vmatprep.subr.bf16.mxu1 %v19587_v42  ;;  %v19648_v42 = vld [vmem:[#allocation6 + $0x1900] ss:$84 sps:$4 sm:$0xff]  }
 0x2fb   :  { %12115 = vmatpush1.bf16.msra.mxu0 %v19582_v40  ;;  %v19650_v40 = vld [vmem:[#allocation6 + $0x1904] ss:$84 sps:$4 sm:$0xff]  }
 0x2fc   :  { %12361 = vmatpush1.bf16.msra.mxu1 %v19585_v13  ;;  %12116 = vmatprep.subr.bf16.mxu0 %v19590_v44  ;;  %v19653_v13 = vld [vmem:[#allocation6 + $0x190c] ss:$84 sps:$4 sm:$0xff]   ;;  %v19651_v44 = vld [vmem:[#allocation6 + $0x1908] ss:$84 sps:$4 sm:$0xff]  }
 0x2fd   :  { %12362 = vmatprep.subr.bf16.mxu1 %v19593_v46  ;;  %v19654_v46 = vld [vmem:[#allocation6 + $0x19a8] ss:$84 sps:$4 sm:$0xff]  }
 0x2ff   :  { %12117 = vmatpush1.bf16.msra.mxu0 %v19588_v45  ;;  %v19656_v45 = vld [vmem:[#allocation6 + $0x19ac] ss:$84 sps:$4 sm:$0xff]  }
 0x300   :  { %12363 = vmatpush1.bf16.msra.mxu1 %v19591_v33  ;;  %12118 = vmatprep.subr.bf16.mxu0 %v19596_v53  ;;  %v19659_v33 = vld [vmem:[#allocation6 + $0x19b4] ss:$84 sps:$4 sm:$0xff]   ;;  %v19657_v53 = vld [vmem:[#allocation6 + $0x19b0] ss:$84 sps:$4 sm:$0xff]  }
 0x301   :  { %12364 = vmatprep.subr.bf16.mxu1 %v19599_v54  ;;  %v19660_v54 = vld [vmem:[#allocation6 + $0x1a50] ss:$84 sps:$4 sm:$0xff]  }
 0x303   :  { %12119 = vmatpush1.bf16.msra.mxu0 %v19594_v49  ;;  %v19662_v49 = vld [vmem:[#allocation6 + $0x1a54] ss:$84 sps:$4 sm:$0xff]  }
 0x304   :  { %12365 = vmatpush1.bf16.msra.mxu1 %v19597_v47  ;;  %12120 = vmatprep.subr.bf16.mxu0 %v19602_v56  ;;  %v19665_v47 = vld [vmem:[#allocation6 + $0x1a5c] ss:$84 sps:$4 sm:$0xff]   ;;  %v19663_v56 = vld [vmem:[#allocation6 + $0x1a58] ss:$84 sps:$4 sm:$0xff]  }
 0x305   :  { %12366 = vmatprep.subr.bf16.mxu1 %v19605_v59  ;;  %v19666_v59 = vld [vmem:[#allocation6 + $0x1af8] ss:$84 sps:$4 sm:$0xff]  }
 0x307   :  { %12121 = vmatpush1.bf16.msra.mxu0 %v19600_v57  ;;  %v19668_v57 = vld [vmem:[#allocation6 + $0x1afc] ss:$84 sps:$4 sm:$0xff]  }
 0x308   :  { %12367 = vmatpush1.bf16.msra.mxu1 %v19603_v9  ;;  %12122 = vmatprep.subr.bf16.mxu0 %v19608_v60  ;;  %v19671_v9 = vld [vmem:[#allocation6 + $0x1b04] ss:$84 sps:$4 sm:$0xff]   ;;  %v19669_v60 = vld [vmem:[#allocation6 + $0x1b00] ss:$84 sps:$4 sm:$0xff]  }
 0x309   :  { %12368 = vmatprep.subr.bf16.mxu1 %v19611_v3  ;;  %v19672_v3 = vld [vmem:[#allocation6 + $0x1ba0] ss:$84 sps:$4 sm:$0xff]  }
 0x30b   :  { %12123 = vmatpush1.bf16.msra.mxu0 %v19606_v11  ;;  %v19674_v11 = vld [vmem:[#allocation6 + $0x1ba4] ss:$84 sps:$4 sm:$0xff]  }
 0x30c   :  { %12369 = vmatpush1.bf16.msra.mxu1 %v19609_v4  ;;  %12133 = vmatprep.subr.bf16.mxu0 %v19614_v6  ;;  %v19677_v4 = vld [vmem:[#allocation6 + $0x1bac] ss:$84 sps:$4 sm:$0xff]   ;;  %v19675_v6 = vld [vmem:[#allocation6 + $0x1ba8] ss:$84 sps:$4 sm:$0xff]  }
 0x30d   :  { %12379 = vmatprep.subr.bf16.mxu1 %v19617_v12  ;;  %v19678_v12 = vld [vmem:[#allocation6 + $0x1c48] ss:$84 sps:$4 sm:$0xff]  }
 0x30e   :  { %12125 = vmatmul.mubr.bf16.vlgmr.msra.gmra.mrb[12].mxu0 %v22152_v58 }
 0x30f   :  { %12371 = vmatmul.mubr.bf16.vlgmr.msra.gmra.mrb[20].mxu1 %v22152_v58  ;;  %12134 = vmatpush1.bf16.msra.mxu0 %v19612_v7  ;;  %v19680_v7 = vld [vmem:[#allocation6 + $0x1c4c] ss:$84 sps:$4 sm:$0xff]  }
 0x310   :  { %12165 = vmatprep.mubr.bf16.mxu0 %v22154_v62  ;;  %12380 = vmatpush1.bf16.msra.mxu1 %v19615_v14  ;;  %v19683_v14 = vld [vmem:[#allocation6 + $0x1c54] ss:$84 sps:$4 sm:$0xff]  }
 0x311   :  { %12411 = vmatprep.mubr.bf16.mxu1 %v22154_v62  ;;  %12135 = vmatprep.subr.bf16.mxu0 %v19620_v15  ;;  %v19681_v15 = vld [vmem:[#allocation6 + $0x1c50] ss:$84 sps:$4 sm:$0xff]  }
 0x312   :  { %12381 = vmatprep.subr.bf16.mxu1 %v19623_v19  ;;  %v19689_v19 = vld [vmem:[#allocation6 + $0x1cfc] ss:$84 sps:$4 sm:$0xff]  }
 0x313   :  { %12136 = vmatpush1.bf16.msra.mxu0 %v19618_v16  ;;  %v19686_v16 = vld [vmem:[#allocation6 + $0x1cf4] ss:$84 sps:$4 sm:$0xff]  }
 0x314   :  { %12382 = vmatpush1.bf16.msra.mxu1 %v19621_v18  ;;  %12137 = vmatprep.subr.bf16.mxu0 %v19626_v20  ;;  %v19684_v18 = vld [vmem:[#allocation6 + $0x1cf0] ss:$84 sps:$4 sm:$0xff]   ;;  %v19687_v20 = vld [vmem:[#allocation6 + $0x1cf8] ss:$84 sps:$4 sm:$0xff]  }
 0x315   :  { %12383 = vmatprep.subr.bf16.mxu1 %v19629_v21  ;;  %v19692_v21 = vld [vmem:[#allocation6 + $0x1d9c] ss:$84 sps:$4 sm:$0xff]  }
 0x317   :  { %12138 = vmatpush1.bf16.msra.mxu0 %v19624_v22  ;;  %v19690_v22 = vld [vmem:[#allocation6 + $0x1d98] ss:$84 sps:$4 sm:$0xff]  }
 0x318   :  { %12384 = vmatpush1.bf16.msra.mxu1 %v19627_v23  ;;  %12139 = vmatprep.subr.bf16.mxu0 %v19632_v24  ;;  %v19695_v23 = vld [vmem:[#allocation6 + $0x1da4] ss:$84 sps:$4 sm:$0xff]   ;;  %v19693_v24 = vld [vmem:[#allocation6 + $0x1da0] ss:$84 sps:$4 sm:$0xff]  }
 0x319   :  { %12385 = vmatprep.subr.bf16.mxu1 %v19635_v27  ;;  %v19696_v27 = vld [vmem:[#allocation6 + $0x1e40] ss:$84 sps:$4 sm:$0xff]  }
 0x31b   :  { %12140 = vmatpush1.bf16.msra.mxu0 %v19630_v25  ;;  %v19698_v25 = vld [vmem:[#allocation6 + $0x1e44] ss:$84 sps:$4 sm:$0xff]  }
 0x31c   :  { %12386 = vmatpush1.bf16.msra.mxu1 %v19633_v28  ;;  %12141 = vmatprep.subr.bf16.mxu0 %v19638_v29  ;;  %v19701_v28 = vld [vmem:[#allocation6 + $0x1e4c] ss:$84 sps:$4 sm:$0xff]   ;;  %v19699_v29 = vld [vmem:[#allocation6 + $0x1e48] ss:$84 sps:$4 sm:$0xff]  }
 0x31d   :  { %12387 = vmatprep.subr.bf16.mxu1 %v19641_v32  ;;  %v19702_v32 = vld [vmem:[#allocation6 + $0x1ee8] ss:$84 sps:$4 sm:$0xff]  }
 0x31f   :  { %12142 = vmatpush1.bf16.msra.mxu0 %v19636_v31  ;;  %v19704_v31 = vld [vmem:[#allocation6 + $0x1eec] ss:$84 sps:$4 sm:$0xff]  }
 0x320   :  { %12388 = vmatpush1.bf16.msra.mxu1 %v19639_v5  ;;  %12143 = vmatprep.subr.bf16.mxu0 %v19644_v35  ;;  %v19707_v5 = vld [vmem:[#allocation6 + $0x1ef4] ss:$84 sps:$4 sm:$0xff]   ;;  %v19705_v35 = vld [vmem:[#allocation6 + $0x1ef0] ss:$84 sps:$4 sm:$0xff]  }
 0x321   :  { %12389 = vmatprep.subr.bf16.mxu1 %v19647_v55  ;;  %v19708_v55 = vld [vmem:[#allocation6 + $0x1f90] ss:$84 sps:$4 sm:$0xff]  }
 0x323   :  { %12144 = vmatpush1.bf16.msra.mxu0 %v19642_v37  ;;  %v19710_v37 = vld [vmem:[#allocation6 + $0x1f94] ss:$84 sps:$4 sm:$0xff]  }
 0x324   :  { %12390 = vmatpush1.bf16.msra.mxu1 %v19645_v39  ;;  %12145 = vmatprep.subr.bf16.mxu0 %v19650_v40  ;;  %v19713_v39 = vld [vmem:[#allocation6 + $0x1f9c] ss:$84 sps:$4 sm:$0xff]   ;;  %v19711_v40 = vld [vmem:[#allocation6 + $0x1f98] ss:$84 sps:$4 sm:$0xff]  }
 0x325   :  { %12391 = vmatprep.subr.bf16.mxu1 %v19653_v13  ;;  %v19719_v13 = vld [vmem:[#allocation6 + $0x2044] ss:$84 sps:$4 sm:$0xff]  }
 0x327   :  { %12146 = vmatpush1.bf16.msra.mxu0 %v19648_v42  ;;  %v19716_v42 = vld [vmem:[#allocation6 + $0x203c] ss:$84 sps:$4 sm:$0xff]  }
 0x328   :  { %12392 = vmatpush1.bf16.msra.mxu1 %v19651_v44  ;;  %12147 = vmatprep.subr.bf16.mxu0 %v19656_v45  ;;  %v19714_v44 = vld [vmem:[#allocation6 + $0x2038] ss:$84 sps:$4 sm:$0xff]   ;;  %v19717_v45 = vld [vmem:[#allocation6 + $0x2040] ss:$84 sps:$4 sm:$0xff]  }
 0x329   :  { %12393 = vmatprep.subr.bf16.mxu1 %v19659_v33  ;;  %v19720_v33 = vld [vmem:[#allocation6 + $0x20e0] ss:$84 sps:$4 sm:$0xff]  }
 0x32b   :  { %12148 = vmatpush1.bf16.msra.mxu0 %v19654_v46  ;;  %v19722_v46 = vld [vmem:[#allocation6 + $0x20e4] ss:$84 sps:$4 sm:$0xff]  }
 0x32c   :  { %12394 = vmatpush1.bf16.msra.mxu1 %v19657_v53  ;;  %12149 = vmatprep.subr.bf16.mxu0 %v19662_v49  ;;  %v19725_v53 = vld [vmem:[#allocation6 + $0x20ec] ss:$84 sps:$4 sm:$0xff]   ;;  %v19723_v49 = vld [vmem:[#allocation6 + $0x20e8] ss:$84 sps:$4 sm:$0xff]  }
 0x32d   :  { %12395 = vmatprep.subr.bf16.mxu1 %v19665_v47  ;;  %v19726_v47 = vld [vmem:[#allocation6 + $0x2188] ss:$84 sps:$4 sm:$0xff]  }
 0x32f   :  { %12150 = vmatpush1.bf16.msra.mxu0 %v19660_v54  ;;  %v19728_v54 = vld [vmem:[#allocation6 + $0x218c] ss:$84 sps:$4 sm:$0xff]  }
 0x330   :  { %12396 = vmatpush1.bf16.msra.mxu1 %v19663_v56  ;;  %12151 = vmatprep.subr.bf16.mxu0 %v19668_v57  ;;  %v19731_v56 = vld [vmem:[#allocation6 + $0x2194] ss:$84 sps:$4 sm:$0xff]   ;;  %v19729_v57 = vld [vmem:[#allocation6 + $0x2190] ss:$84 sps:$4 sm:$0xff]  }
 0x331   :  { %12397 = vmatprep.subr.bf16.mxu1 %v19671_v9  ;;  %v19732_v9 = vld [vmem:[#allocation6 + $0x2230] ss:$84 sps:$4 sm:$0xff]  }
 0x333   :  { %12152 = vmatpush1.bf16.msra.mxu0 %v19666_v59  ;;  %v19734_v59 = vld [vmem:[#allocation6 + $0x2234] ss:$84 sps:$4 sm:$0xff]  }
 0x334   :  { %12398 = vmatpush1.bf16.msra.mxu1 %v19669_v60  ;;  %12153 = vmatprep.subr.bf16.mxu0 %v19674_v11  ;;  %v19737_v60 = vld [vmem:[#allocation6 + $0x223c] ss:$84 sps:$4 sm:$0xff]   ;;  %v19735_v11 = vld [vmem:[#allocation6 + $0x2238] ss:$84 sps:$4 sm:$0xff]  }
 0x335   :  { %12399 = vmatprep.subr.bf16.mxu1 %v19677_v4  ;;  %v19743_v4 = vld [vmem:[#allocation6 + $0x22e4] ss:$84 sps:$4 sm:$0xff]  }
 0x337   :  { %12154 = vmatpush1.bf16.msra.mxu0 %v19672_v3  ;;  %v19740_v3 = vld [vmem:[#allocation6 + $0x22dc] ss:$84 sps:$4 sm:$0xff]  }
 0x338   :  { %12400 = vmatpush1.bf16.msra.mxu1 %v19675_v6  ;;  %12155 = vmatprep.subr.bf16.mxu0 %v19680_v7  ;;  %v19738_v6 = vld [vmem:[#allocation6 + $0x22d8] ss:$84 sps:$4 sm:$0xff]   ;;  %v19741_v7 = vld [vmem:[#allocation6 + $0x22e0] ss:$84 sps:$4 sm:$0xff]  }
 0x339   :  { %12401 = vmatprep.subr.bf16.mxu1 %v19683_v14 }
 0x33b   :  { %12156 = vmatpush1.bf16.msra.mxu0 %v19678_v12  ;;  %v19746_v12 = vld [vmem:[#allocation6 + $0x2384] ss:$84 sps:$4 sm:$0xff]  }
 0x33c   :  { %12402 = vmatpush1.bf16.msra.mxu1 %v19681_v15  ;;  %12157 = vmatprep.subr.bf16.mxu0 %v19686_v16  ;;  %v19749_v15 = vld [vmem:[#allocation6 + $0x238c] ss:$84 sps:$4 sm:$0xff]  }
 0x33d   :  { %12403 = vmatprep.subr.bf16.mxu1 %v19689_v19  ;;  %v19744_v19 = vld [vmem:[#allocation6 + $0x2380] ss:$84 sps:$4 sm:$0xff]  }
 0x33f   :  { %12158 = vmatpush1.bf16.msra.mxu0 %v19684_v18 }
 0x340   :  { %12404 = vmatpush1.bf16.msra.mxu1 %v19687_v20  ;;  %12159 = vmatprep.subr.bf16.mxu0 %v19692_v21  ;;  %v19747_v20 = vld [vmem:[#allocation6 + $0x2388] ss:$84 sps:$4 sm:$0xff]  }
 0x341   :  { %12405 = vmatprep.subr.bf16.mxu1 %v19695_v23 }
 0x343   :  { %12160 = vmatpush1.bf16.msra.mxu0 %v19690_v22 }
 0x344   :  { %12406 = vmatpush1.bf16.msra.mxu1 %v19693_v24  ;;  %12161 = vmatprep.subr.bf16.mxu0 %v19698_v25  ;;  %v19752_v25 = vld [vmem:[#allocation6 + $0x242c] ss:$84 sps:$4 sm:$0xff]  }
 0x345   :  { %12407 = vmatprep.subr.bf16.mxu1 %v19701_v28  ;;  %v19755_v28 = vld [vmem:[#allocation6 + $0x2434] ss:$84 sps:$4 sm:$0xff]  }
 0x347   :  { %12162 = vmatpush1.bf16.msra.mxu0 %v19696_v27 }
 0x348   :  { %12408 = vmatpush1.bf16.msra.mxu1 %v19699_v29  ;;  %12163 = vmatprep.subr.bf16.mxu0 %v19704_v31  ;;  %v19750_v29 = vld [vmem:[#allocation6 + $0x2428] ss:$84 sps:$4 sm:$0xff]   ;;  %v19753_v31 = vld [vmem:[#allocation6 + $0x2430] ss:$84 sps:$4 sm:$0xff]  }
 0x349   :  { %12409 = vmatprep.subr.bf16.mxu1 %v19707_v5  ;;  %v19756_v5 = vld [vmem:[#allocation6 + $0x24d0] ss:$84 sps:$4 sm:$0xff]  }
 0x34b   :  { %12164 = vmatpush1.bf16.msra.mxu0 %v19702_v32  ;;  %v19758_v32 = vld [vmem:[#allocation6 + $0x24d4] ss:$84 sps:$4 sm:$0xff]  }
 0x34c   :  { %12410 = vmatpush1.bf16.msra.mxu1 %v19705_v35  ;;  %12174 = vmatprep.subr.bf16.mxu0 %v19710_v37  ;;  %v19761_v35 = vld [vmem:[#allocation6 + $0x24dc] ss:$84 sps:$4 sm:$0xff]   ;;  %v19759_v37 = vld [vmem:[#allocation6 + $0x24d8] ss:$84 sps:$4 sm:$0xff]  }
 0x34d   :  { %12420 = vmatprep.subr.bf16.mxu1 %v19713_v39  ;;  %v19762_v39 = vld [vmem:[#allocation6 + $0x2578] ss:$84 sps:$4 sm:$0xff]  }
 0x34e   :  { %12166 = vmatmul.mubr.bf16.vlgmr.msra.gmra.mrb[12].mxu0 %v22174_v34 }
 0x34f   :  { %12412 = vmatmul.mubr.bf16.vlgmr.msra.gmra.mrb[20].mxu1 %v22174_v34  ;;  %12175 = vmatpush1.bf16.msra.mxu0 %v19708_v55  ;;  %v19764_v55 = vld [vmem:[#allocation6 + $0x257c] ss:$84 sps:$4 sm:$0xff]  }
 0x350   :  { %12206 = vmatprep.mubr.bf16.mxu0 %v22176_v38  ;;  %12421 = vmatpush1.bf16.msra.mxu1 %v19711_v40  ;;  %v19767_v40 = vld [vmem:[#allocation6 + $0x2584] ss:$84 sps:$4 sm:$0xff]  }
 0x351   :  { %12452 = vmatprep.mubr.bf16.mxu1 %v22176_v38  ;;  %12176 = vmatprep.subr.bf16.mxu0 %v19716_v42  ;;  %v19765_v42 = vld [vmem:[#allocation6 + $0x2580] ss:$84 sps:$4 sm:$0xff]  }
 0x352   :  { %12422 = vmatprep.subr.bf16.mxu1 %v19719_v13  ;;  %v19770_v13 = vld [vmem:[#allocation6 + $0x2624] ss:$84 sps:$4 sm:$0xff]  }
 0x353   :  { %12177 = vmatpush1.bf16.msra.mxu0 %v19714_v44  ;;  %v19768_v44 = vld [vmem:[#allocation6 + $0x2620] ss:$84 sps:$4 sm:$0xff]  }
 0x354   :  { %12423 = vmatpush1.bf16.msra.mxu1 %v19717_v45  ;;  %12178 = vmatprep.subr.bf16.mxu0 %v19722_v46  ;;  %v19773_v45 = vld [vmem:[#allocation6 + $0x262c] ss:$84 sps:$4 sm:$0xff]   ;;  %v19771_v46 = vld [vmem:[#allocation6 + $0x2628] ss:$84 sps:$4 sm:$0xff]  }
 0x355   :  { %12424 = vmatprep.subr.bf16.mxu1 %v19725_v53  ;;  %v19774_v53 = vld [vmem:[#allocation6 + $0x26c8] ss:$84 sps:$4 sm:$0xff]  }
 0x357   :  { %12179 = vmatpush1.bf16.msra.mxu0 %v19720_v33  ;;  %v19776_v33 = vld [vmem:[#allocation6 + $0x26cc] ss:$84 sps:$4 sm:$0xff]  }
 0x358   :  { %12425 = vmatpush1.bf16.msra.mxu1 %v19723_v49  ;;  %12180 = vmatprep.subr.bf16.mxu0 %v19728_v54  ;;  %v19779_v49 = vld [vmem:[#allocation6 + $0x26d4] ss:$84 sps:$4 sm:$0xff]   ;;  %v19777_v54 = vld [vmem:[#allocation6 + $0x26d0] ss:$84 sps:$4 sm:$0xff]  }
 0x359   :  { %12426 = vmatprep.subr.bf16.mxu1 %v19731_v56  ;;  %v19780_v56 = vld [vmem:[#allocation6 + $0x2770] ss:$84 sps:$4 sm:$0xff]  }
 0x35b   :  { %12181 = vmatpush1.bf16.msra.mxu0 %v19726_v47  ;;  %v19782_v47 = vld [vmem:[#allocation6 + $0x2774] ss:$84 sps:$4 sm:$0xff]  }
 0x35c   :  { %12427 = vmatpush1.bf16.msra.mxu1 %v19729_v57  ;;  %12182 = vmatprep.subr.bf16.mxu0 %v19734_v59  ;;  %v19785_v57 = vld [vmem:[#allocation6 + $0x277c] ss:$84 sps:$4 sm:$0xff]   ;;  %v19783_v59 = vld [vmem:[#allocation6 + $0x2778] ss:$84 sps:$4 sm:$0xff]  }
 0x35d   :  { %12428 = vmatprep.subr.bf16.mxu1 %v19737_v60  ;;  %v19786_v60 = vld [vmem:[#allocation6 + $0x2818] ss:$84 sps:$4 sm:$0xff]  }
 0x35f   :  { %12183 = vmatpush1.bf16.msra.mxu0 %v19732_v9  ;;  %v19788_v9 = vld [vmem:[#allocation6 + $0x281c] ss:$84 sps:$4 sm:$0xff]  }
 0x360   :  { %12429 = vmatpush1.bf16.msra.mxu1 %v19735_v11  ;;  %12184 = vmatprep.subr.bf16.mxu0 %v19740_v3  ;;  %v19791_v11 = vld [vmem:[#allocation6 + $0x2824] ss:$84 sps:$4 sm:$0xff]   ;;  %v19789_v3 = vld [vmem:[#allocation6 + $0x2820] ss:$84 sps:$4 sm:$0xff]  }
 0x361   :  { %v22231_v14 = vpop.f32.mrb[8].mxu0  ;;  %12430 = vmatprep.subr.bf16.mxu1 %v19743_v4  ;;  %v19794_v4 = vld [vmem:[#allocation6 + $0x28c4] ss:$84 sps:$4 sm:$0xff]  }
 0x362   :  { %v22233_v16 = vpop.f32.mrb[16].mxu1  ;;  %v22235_v18 = vpop.f32.mrb[9].mxu0 }
 0x363   :  { %v22237_v21 = vpop.f32.mrb[17].mxu1  ;;  %v11802_v22 = vpop.f32.mrb[10].mxu0  ;;  %12185 = vmatpush1.bf16.msra.mxu0 %v19738_v6  ;;  %v19792_v6 = vld [vmem:[#allocation6 + $0x28c0] ss:$84 sps:$4 sm:$0xff]  }
 0x364   :  { %v12048_v23 = vpop.f32.mrb[18].mxu1  ;;  %12431 = vmatpush1.bf16.msra.mxu1 %v19741_v7  ;;  %v11803_v24 = vpop.f32.mrb[11].mxu0  ;;  %12186 = vmatprep.subr.bf16.mxu0 %v19746_v12  ;;  %v19797_v7 = vld [vmem:[#allocation6 + $0x28cc] ss:$84 sps:$4 sm:$0xff]   ;;  %v19795_v12 = vld [vmem:[#allocation6 + $0x28c8] ss:$84 sps:$4 sm:$0xff]  }
 0x365   :  { %v12049_v27 = vpop.f32.mrb[19].mxu1  ;;  %12432 = vmatprep.subr.bf16.mxu1 %v19749_v15  ;;  %v19800_v15 = vld [vmem:[#allocation6 + $0x296c] ss:$84 sps:$4 sm:$0xff]   ;;  %v19801_v22 = vld [vmem:[#allocation6 + $0x2970] ss:$84 sps:$4 sm:$0xff]  }
 0x366   :  { %v19806_v23 = vld [vmem:[#allocation6 + $0x2a14] ss:$84 sps:$4 sm:$0xff]   ;;  %v19804_v24 = vld [vmem:[#allocation6 + $0x2a10] ss:$84 sps:$4 sm:$0xff]   ;;  %v19807_v27 = vld [vmem:[#allocation6 + $0x2a18] ss:$84 sps:$4 sm:$0xff]  }
 0x367   :  { %12187 = vmatpush1.bf16.msra.mxu0 %v19744_v19  ;;  %v19798_v19 = vld [vmem:[#allocation6 + $0x2968] ss:$84 sps:$4 sm:$0xff]  }
 0x368   :  { %12433 = vmatpush1.bf16.msra.mxu1 %v19747_v20  ;;  %12188 = vmatprep.subr.bf16.mxu0 %v19752_v25  ;;  %v19803_v20 = vld [vmem:[#allocation6 + $0x2974] ss:$84 sps:$4 sm:$0xff]   ;;  %v19809_v25 = vld [vmem:[#allocation6 + $0x2a1c] ss:$84 sps:$4 sm:$0xff]  }
 0x369   :  { %12434 = vmatprep.subr.bf16.mxu1 %v19755_v28  ;;  %v19812_v28 = vld [vmem:[#allocation6 + $0x2abc] ss:$84 sps:$4 sm:$0xff]  }
 0x36b   :  { %12189 = vmatpush1.bf16.msra.mxu0 %v19750_v29  ;;  %v19810_v29 = vld [vmem:[#allocation6 + $0x2ab8] ss:$84 sps:$4 sm:$0xff]  }
 0x36c   :  { %12435 = vmatpush1.bf16.msra.mxu1 %v19753_v31  ;;  %12190 = vmatprep.subr.bf16.mxu0 %v19758_v32  ;;  %v19815_v31 = vld [vmem:[#allocation6 + $0x2ac4] ss:$84 sps:$4 sm:$0xff]   ;;  %v19813_v32 = vld [vmem:[#allocation6 + $0x2ac0] ss:$84 sps:$4 sm:$0xff]  }
 0x36d   :  { %12436 = vmatprep.subr.bf16.mxu1 %v19761_v35  ;;  %v19816_v35 = vld [vmem:[#allocation6 + $0x2b60] ss:$84 sps:$4 sm:$0xff]  }
 0x36f   :  { %12191 = vmatpush1.bf16.msra.mxu0 %v19756_v5  ;;  %v19818_v5 = vld [vmem:[#allocation6 + $0x2b64] ss:$84 sps:$4 sm:$0xff]  }
 0x370   :  { %12437 = vmatpush1.bf16.msra.mxu1 %v19759_v37  ;;  %12192 = vmatprep.subr.bf16.mxu0 %v19764_v55  ;;  %v19821_v37 = vld [vmem:[#allocation6 + $0x2b6c] ss:$84 sps:$4 sm:$0xff]   ;;  %v19819_v55 = vld [vmem:[#allocation6 + $0x2b68] ss:$84 sps:$4 sm:$0xff]  }
 0x371   :  { %12438 = vmatprep.subr.bf16.mxu1 %v19767_v40  ;;  %v19822_v40 = vld [vmem:[#allocation6 + $0x2c08] ss:$84 sps:$4 sm:$0xff]  }
 0x373   :  { %12193 = vmatpush1.bf16.msra.mxu0 %v19762_v39  ;;  %v19824_v39 = vld [vmem:[#allocation6 + $0x2c0c] ss:$84 sps:$4 sm:$0xff]  }
 0x374   :  { %12439 = vmatpush1.bf16.msra.mxu1 %v19765_v42  ;;  %12194 = vmatprep.subr.bf16.mxu0 %v19770_v13  ;;  %v19827_v42 = vld [vmem:[#allocation6 + $0x2c14] ss:$84 sps:$4 sm:$0xff]   ;;  %v19825_v13 = vld [vmem:[#allocation6 + $0x2c10] ss:$84 sps:$4 sm:$0xff]  }
 0x375   :  { %12440 = vmatprep.subr.bf16.mxu1 %v19773_v45  ;;  %v19828_v45 = vld [vmem:[#allocation6 + $0x2cb0] ss:$84 sps:$4 sm:$0xff]  }
 0x377   :  { %12195 = vmatpush1.bf16.msra.mxu0 %v19768_v44  ;;  %v19830_v44 = vld [vmem:[#allocation6 + $0x2cb4] ss:$84 sps:$4 sm:$0xff]  }
 0x378   :  { %12441 = vmatpush1.bf16.msra.mxu1 %v19771_v46  ;;  %12196 = vmatprep.subr.bf16.mxu0 %v19776_v33  ;;  %v19833_v46 = vld [vmem:[#allocation6 + $0x2cbc] ss:$84 sps:$4 sm:$0xff]   ;;  %v19831_v33 = vld [vmem:[#allocation6 + $0x2cb8] ss:$84 sps:$4 sm:$0xff]  }
 0x379   :  { %12442 = vmatprep.subr.bf16.mxu1 %v19779_v49  ;;  %v19839_v49 = vld [vmem:[#allocation6 + $0x2d64] ss:$84 sps:$4 sm:$0xff]  }
 0x37b   :  { %12197 = vmatpush1.bf16.msra.mxu0 %v19774_v53  ;;  %v19836_v53 = vld [vmem:[#allocation6 + $0x2d5c] ss:$84 sps:$4 sm:$0xff]  }
 0x37c   :  { %12443 = vmatpush1.bf16.msra.mxu1 %v19777_v54  ;;  %12198 = vmatprep.subr.bf16.mxu0 %v19782_v47  ;;  %v19834_v54 = vld [vmem:[#allocation6 + $0x2d58] ss:$84 sps:$4 sm:$0xff]   ;;  %v19837_v47 = vld [vmem:[#allocation6 + $0x2d60] ss:$84 sps:$4 sm:$0xff]  }
 0x37d   :  { %12444 = vmatprep.subr.bf16.mxu1 %v19785_v57  ;;  %v19845_v57 = vld [vmem:[#allocation6 + $0x2e0c] ss:$84 sps:$4 sm:$0xff]  }
 0x37f   :  { %12199 = vmatpush1.bf16.msra.mxu0 %v19780_v56  ;;  %v19842_v56 = vld [vmem:[#allocation6 + $0x2e04] ss:$84 sps:$4 sm:$0xff]  }
 0x380   :  { %12445 = vmatpush1.bf16.msra.mxu1 %v19783_v59  ;;  %12200 = vmatprep.subr.bf16.mxu0 %v19788_v9  ;;  %v19840_v59 = vld [vmem:[#allocation6 + $0x2e00] ss:$84 sps:$4 sm:$0xff]   ;;  %v19843_v9 = vld [vmem:[#allocation6 + $0x2e08] ss:$84 sps:$4 sm:$0xff]  }
 0x381   :  { %12446 = vmatprep.subr.bf16.mxu1 %v19791_v11  ;;  %v19846_v11 = vld [vmem:[#allocation6 + $0x2ea8] ss:$84 sps:$4 sm:$0xff]  }
 0x383   :  { %12201 = vmatpush1.bf16.msra.mxu0 %v19786_v60  ;;  %v19848_v60 = vld [vmem:[#allocation6 + $0x2eac] ss:$84 sps:$4 sm:$0xff]  }
 0x384   :  { %12447 = vmatpush1.bf16.msra.mxu1 %v19789_v3  ;;  %12202 = vmatprep.subr.bf16.mxu0 %v19794_v4  ;;  %v19851_v3 = vld [vmem:[#allocation6 + $0x2eb4] ss:$84 sps:$4 sm:$0xff]   ;;  %v19849_v4 = vld [vmem:[#allocation6 + $0x2eb0] ss:$84 sps:$4 sm:$0xff]  }
 0x385   :  { %12448 = vmatprep.subr.bf16.mxu1 %v19797_v7  ;;  %v19852_v7 = vld [vmem:[#allocation6 + $0x2f50] ss:$84 sps:$4 sm:$0xff]  }
 0x387   :  { %12203 = vmatpush1.bf16.msra.mxu0 %v19792_v6  ;;  %v19854_v6 = vld [vmem:[#allocation6 + $0x2f54] ss:$84 sps:$4 sm:$0xff]  }
 0x388   :  { %12449 = vmatpush1.bf16.msra.mxu1 %v19795_v12  ;;  %12204 = vmatprep.subr.bf16.mxu0 %v19800_v15  ;;  %v19857_v12 = vld [vmem:[#allocation6 + $0x2f5c] ss:$84 sps:$4 sm:$0xff]   ;;  %v19855_v15 = vld [vmem:[#allocation6 + $0x2f58] ss:$84 sps:$4 sm:$0xff]  }
 0x389   :  { %12450 = vmatprep.subr.bf16.mxu1 %v19803_v20  ;;  %v19858_v20 = vld [vmem:[#allocation6 + $0x2ff8] ss:$84 sps:$4 sm:$0xff]  }
 0x38b   :  { %12205 = vmatpush1.bf16.msra.mxu0 %v19798_v19  ;;  %v19860_v19 = vld [vmem:[#allocation6 + $0x2ffc] ss:$84 sps:$4 sm:$0xff]  }
 0x38c   :  { %12451 = vmatpush1.bf16.msra.mxu1 %v19801_v22  ;;  %12215 = vmatprep.subr.bf16.mxu0 %v19806_v23  ;;  %v19863_v22 = vld [vmem:[#allocation6 + $0x3004] ss:$84 sps:$4 sm:$0xff]   ;;  %v19861_v23 = vld [vmem:[#allocation6 + $0x3000] ss:$84 sps:$4 sm:$0xff]  }
 0x38d   :  { %12461 = vmatprep.subr.bf16.mxu1 %v19809_v25  ;;  %v19864_v25 = vld [vmem:[#allocation6 + $0x30a0] ss:$84 sps:$4 sm:$0xff]  }
 0x38e   :  { %12207 = vmatmul.mubr.bf16.vlgmr.msra.gmra.mrb[12].mxu0 %v22193_v52 }
 0x38f   :  { %12453 = vmatmul.mubr.bf16.vlgmr.msra.gmra.mrb[20].mxu1 %v22193_v52  ;;  %12216 = vmatpush1.bf16.msra.mxu0 %v19804_v24  ;;  %v19866_v24 = vld [vmem:[#allocation6 + $0x30a4] ss:$84 sps:$4 sm:$0xff]  }
 0x390   :  { %12247 = vmatprep.mubr.bf16.mxu0 %v22195_v36  ;;  %12462 = vmatpush1.bf16.msra.mxu1 %v19807_v27  ;;  %v19869_v27 = vld [vmem:[#allocation6 + $0x30ac] ss:$84 sps:$4 sm:$0xff]  }
 0x391   :  { %12493 = vmatprep.mubr.bf16.mxu1 %v22195_v36  ;;  %12217 = vmatprep.subr.bf16.mxu0 %v19812_v28  ;;  %v19867_v28 = vld [vmem:[#allocation6 + $0x30a8] ss:$84 sps:$4 sm:$0xff]  }
 0x392   :  { %12463 = vmatprep.subr.bf16.mxu1 %v19815_v31  ;;  %v19870_v31 = vld [vmem:[#allocation6 + $0x3148] ss:$84 sps:$4 sm:$0xff]  }
 0x393   :  { %12218 = vmatpush1.bf16.msra.mxu0 %v19810_v29  ;;  %v19872_v29 = vld [vmem:[#allocation6 + $0x314c] ss:$84 sps:$4 sm:$0xff]  }
 0x394   :  { %12464 = vmatpush1.bf16.msra.mxu1 %v19813_v32  ;;  %12219 = vmatprep.subr.bf16.mxu0 %v19818_v5  ;;  %v19875_v32 = vld [vmem:[#allocation6 + $0x3154] ss:$84 sps:$4 sm:$0xff]   ;;  %v19873_v5 = vld [vmem:[#allocation6 + $0x3150] ss:$84 sps:$4 sm:$0xff]  }
 0x395   :  { %12465 = vmatprep.subr.bf16.mxu1 %v19821_v37  ;;  %v19876_v37 = vld [vmem:[#allocation6 + $0x31f0] ss:$84 sps:$4 sm:$0xff]  }
 0x397   :  { %12220 = vmatpush1.bf16.msra.mxu0 %v19816_v35  ;;  %v19878_v35 = vld [vmem:[#allocation6 + $0x31f4] ss:$84 sps:$4 sm:$0xff]  }
 0x398   :  { %12466 = vmatpush1.bf16.msra.mxu1 %v19819_v55  ;;  %12221 = vmatprep.subr.bf16.mxu0 %v19824_v39  ;;  %v19881_v55 = vld [vmem:[#allocation6 + $0x31fc] ss:$84 sps:$4 sm:$0xff]   ;;  %v19879_v39 = vld [vmem:[#allocation6 + $0x31f8] ss:$84 sps:$4 sm:$0xff]  }
 0x399   :  { %12467 = vmatprep.subr.bf16.mxu1 %v19827_v42  ;;  %v19882_v42 = vld [vmem:[#allocation6 + $0x3298] ss:$84 sps:$4 sm:$0xff]  }
 0x39b   :  { %12222 = vmatpush1.bf16.msra.mxu0 %v19822_v40  ;;  %v19884_v40 = vld [vmem:[#allocation6 + $0x329c] ss:$84 sps:$4 sm:$0xff]  }
 0x39c   :  { %12468 = vmatpush1.bf16.msra.mxu1 %v19825_v13  ;;  %12223 = vmatprep.subr.bf16.mxu0 %v19830_v44  ;;  %v19887_v13 = vld [vmem:[#allocation6 + $0x32a4] ss:$84 sps:$4 sm:$0xff]   ;;  %v19885_v44 = vld [vmem:[#allocation6 + $0x32a0] ss:$84 sps:$4 sm:$0xff]  }
 0x39d   :  { %12469 = vmatprep.subr.bf16.mxu1 %v19833_v46  ;;  %v19888_v46 = vld [vmem:[#allocation6 + $0x3340] ss:$84 sps:$4 sm:$0xff]  }
 0x39f   :  { %12224 = vmatpush1.bf16.msra.mxu0 %v19828_v45  ;;  %v19890_v45 = vld [vmem:[#allocation6 + $0x3344] ss:$84 sps:$4 sm:$0xff]  }
 0x3a0   :  { %12470 = vmatpush1.bf16.msra.mxu1 %v19831_v33  ;;  %12225 = vmatprep.subr.bf16.mxu0 %v19836_v53  ;;  %v19893_v33 = vld [vmem:[#allocation6 + $0x334c] ss:$84 sps:$4 sm:$0xff]   ;;  %v19891_v53 = vld [vmem:[#allocation6 + $0x3348] ss:$84 sps:$4 sm:$0xff]  }
 0x3a1   :  { %12471 = vmatprep.subr.bf16.mxu1 %v19839_v49  ;;  %v19896_v49 = vld [vmem:[#allocation6 + $0x33ec] ss:$84 sps:$4 sm:$0xff]  }
 0x3a3   :  { %12226 = vmatpush1.bf16.msra.mxu0 %v19834_v54  ;;  %v19894_v54 = vld [vmem:[#allocation6 + $0x33e8] ss:$84 sps:$4 sm:$0xff]  }
 0x3a4   :  { %12472 = vmatpush1.bf16.msra.mxu1 %v19837_v47  ;;  %12227 = vmatprep.subr.bf16.mxu0 %v19842_v56  ;;  %v19899_v47 = vld [vmem:[#allocation6 + $0x33f4] ss:$84 sps:$4 sm:$0xff]   ;;  %v19897_v56 = vld [vmem:[#allocation6 + $0x33f0] ss:$84 sps:$4 sm:$0xff]  }
 0x3a5   :  { %12473 = vmatprep.subr.bf16.mxu1 %v19845_v57  ;;  %v19902_v57 = vld [vmem:[#allocation6 + $0x3494] ss:$84 sps:$4 sm:$0xff]  }
 0x3a7   :  { %12228 = vmatpush1.bf16.msra.mxu0 %v19840_v59  ;;  %v19900_v59 = vld [vmem:[#allocation6 + $0x3490] ss:$84 sps:$4 sm:$0xff]  }
 0x3a8   :  { %12474 = vmatpush1.bf16.msra.mxu1 %v19843_v9  ;;  %12229 = vmatprep.subr.bf16.mxu0 %v19848_v60  ;;  %v19905_v9 = vld [vmem:[#allocation6 + $0x349c] ss:$84 sps:$4 sm:$0xff]   ;;  %v19903_v60 = vld [vmem:[#allocation6 + $0x3498] ss:$84 sps:$4 sm:$0xff]  }
 0x3a9   :  { %12475 = vmatprep.subr.bf16.mxu1 %v19851_v3  ;;  %v19906_v3 = vld [vmem:[#allocation6 + $0x3538] ss:$84 sps:$4 sm:$0xff]  }
 0x3ab   :  { %12230 = vmatpush1.bf16.msra.mxu0 %v19846_v11  ;;  %v19908_v11 = vld [vmem:[#allocation6 + $0x353c] ss:$84 sps:$4 sm:$0xff]  }
 0x3ac   :  { %12476 = vmatpush1.bf16.msra.mxu1 %v19849_v4  ;;  %12231 = vmatprep.subr.bf16.mxu0 %v19854_v6  ;;  %v19911_v4 = vld [vmem:[#allocation6 + $0x3544] ss:$84 sps:$4 sm:$0xff]   ;;  %v19909_v6 = vld [vmem:[#allocation6 + $0x3540] ss:$84 sps:$4 sm:$0xff]  }
 0x3ad   :  { %12477 = vmatprep.subr.bf16.mxu1 %v19857_v12  ;;  %v19912_v12 = vld [vmem:[#allocation6 + $0x35e0] ss:$84 sps:$4 sm:$0xff]  }
 0x3af   :  { %12232 = vmatpush1.bf16.msra.mxu0 %v19852_v7  ;;  %v19914_v7 = vld [vmem:[#allocation6 + $0x35e4] ss:$84 sps:$4 sm:$0xff]  }
 0x3b0   :  { %12478 = vmatpush1.bf16.msra.mxu1 %v19855_v15  ;;  %12233 = vmatprep.subr.bf16.mxu0 %v19860_v19  ;;  %v19917_v15 = vld [vmem:[#allocation6 + $0x35ec] ss:$84 sps:$4 sm:$0xff]   ;;  %v19915_v19 = vld [vmem:[#allocation6 + $0x35e8] ss:$84 sps:$4 sm:$0xff]  }
 0x3b1   :  { %12479 = vmatprep.subr.bf16.mxu1 %v19863_v22  ;;  %v19918_v22 = vld [vmem:[#allocation6 + $0x3688] ss:$84 sps:$4 sm:$0xff]  }
 0x3b3   :  { %12234 = vmatpush1.bf16.msra.mxu0 %v19858_v20  ;;  %v19920_v20 = vld [vmem:[#allocation6 + $0x368c] ss:$84 sps:$4 sm:$0xff]  }
 0x3b4   :  { %12480 = vmatpush1.bf16.msra.mxu1 %v19861_v23  ;;  %12235 = vmatprep.subr.bf16.mxu0 %v19866_v24  ;;  %v19923_v23 = vld [vmem:[#allocation6 + $0x3694] ss:$84 sps:$4 sm:$0xff]   ;;  %v19921_v24 = vld [vmem:[#allocation6 + $0x3690] ss:$84 sps:$4 sm:$0xff]  }
 0x3b5   :  { %12481 = vmatprep.subr.bf16.mxu1 %v19869_v27  ;;  %v19929_v27 = vld [vmem:[#allocation6 + $0x2c] ss:$84 sps:$4 sm:$0xff]  }
 0x3b7   :  { %12236 = vmatpush1.bf16.msra.mxu0 %v19864_v25  ;;  %v19926_v25 = vld [vmem:[#allocation6 + $0x24] ss:$84 sps:$4 sm:$0xff]  }
 0x3b8   :  { %12482 = vmatpush1.bf16.msra.mxu1 %v19867_v28  ;;  %12237 = vmatprep.subr.bf16.mxu0 %v19872_v29  ;;  %v19924_v28 = vld [vmem:[#allocation6 + $0x20] ss:$84 sps:$4 sm:$0xff]   ;;  %v19927_v29 = vld [vmem:[#allocation6 + $0x28] ss:$84 sps:$4 sm:$0xff]  }
 0x3b9   :  { %12483 = vmatprep.subr.bf16.mxu1 %v19875_v32  ;;  %v19930_v32 = vld [vmem:[#allocation6 + $0xc8] ss:$84 sps:$4 sm:$0xff]  }
 0x3bb   :  { %12238 = vmatpush1.bf16.msra.mxu0 %v19870_v31  ;;  %v19932_v31 = vld [vmem:[#allocation6 + $0xcc] ss:$84 sps:$4 sm:$0xff]  }
 0x3bc   :  { %12484 = vmatpush1.bf16.msra.mxu1 %v19873_v5  ;;  %12239 = vmatprep.subr.bf16.mxu0 %v19878_v35  ;;  %v19933_v5 = vld [vmem:[#allocation6 + $0xd0] ss:$84 sps:$4 sm:$0xff]   ;;  %v19935_v35 = vld [vmem:[#allocation6 + $0xd4] ss:$84 sps:$4 sm:$0xff]  }
 0x3bd   :  { %12485 = vmatprep.subr.bf16.mxu1 %v19881_v55  ;;  %v19941_v55 = vld [vmem:[#allocation6 + $0x17c] ss:$84 sps:$4 sm:$0xff]  }
 0x3bf   :  { %12240 = vmatpush1.bf16.msra.mxu0 %v19876_v37  ;;  %v19938_v37 = vld [vmem:[#allocation6 + $0x174] ss:$84 sps:$4 sm:$0xff]  }
 0x3c0   :  { %12486 = vmatpush1.bf16.msra.mxu1 %v19879_v39  ;;  %12241 = vmatprep.subr.bf16.mxu0 %v19884_v40  ;;  %v19936_v39 = vld [vmem:[#allocation6 + $0x170] ss:$84 sps:$4 sm:$0xff]   ;;  %v19939_v40 = vld [vmem:[#allocation6 + $0x178] ss:$84 sps:$4 sm:$0xff]  }
 0x3c1   :  { %12487 = vmatprep.subr.bf16.mxu1 %v19887_v13  ;;  %v19942_v13 = vld [vmem:[#allocation6 + $0x218] ss:$84 sps:$4 sm:$0xff]  }
 0x3c3   :  { %12242 = vmatpush1.bf16.msra.mxu0 %v19882_v42  ;;  %v19944_v42 = vld [vmem:[#allocation6 + $0x21c] ss:$84 sps:$4 sm:$0xff]  }
 0x3c4   :  { %12488 = vmatpush1.bf16.msra.mxu1 %v19885_v44  ;;  %12243 = vmatprep.subr.bf16.mxu0 %v19890_v45  ;;  %v19947_v44 = vld [vmem:[#allocation6 + $0x224] ss:$84 sps:$4 sm:$0xff]   ;;  %v19945_v45 = vld [vmem:[#allocation6 + $0x220] ss:$84 sps:$4 sm:$0xff]  }
 0x3c5   :  { %12489 = vmatprep.subr.bf16.mxu1 %v19893_v33  ;;  %v19948_v33 = vld [vmem:[#allocation6 + $0x2c0] ss:$84 sps:$4 sm:$0xff]  }
 0x3c7   :  { %12244 = vmatpush1.bf16.msra.mxu0 %v19888_v46  ;;  %v19950_v46 = vld [vmem:[#allocation6 + $0x2c4] ss:$84 sps:$4 sm:$0xff]  }
 0x3c8   :  { %12490 = vmatpush1.bf16.msra.mxu1 %v19891_v53  ;;  %12245 = vmatprep.subr.bf16.mxu0 %v19896_v49  ;;  %v19953_v53 = vld [vmem:[#allocation6 + $0x2cc] ss:$84 sps:$4 sm:$0xff]   ;;  %v19951_v49 = vld [vmem:[#allocation6 + $0x2c8] ss:$84 sps:$4 sm:$0xff]  }
 0x3c9   :  { %12491 = vmatprep.subr.bf16.mxu1 %v19899_v47  ;;  %v19954_v47 = vld [vmem:[#allocation6 + $0x368] ss:$84 sps:$4 sm:$0xff]  }
 0x3cb   :  { %12246 = vmatpush1.bf16.msra.mxu0 %v19894_v54  ;;  %v19956_v54 = vld [vmem:[#allocation6 + $0x36c] ss:$84 sps:$4 sm:$0xff]  }
 0x3cc   :  { %12492 = vmatpush1.bf16.msra.mxu1 %v19897_v56  ;;  %12256 = vmatprep.subr.bf16.mxu0 %v19902_v57  ;;  %v19959_v56 = vld [vmem:[#allocation6 + $0x374] ss:$84 sps:$4 sm:$0xff]   ;;  %v19957_v57 = vld [vmem:[#allocation6 + $0x370] ss:$84 sps:$4 sm:$0xff]  }
 0x3cd   :  { %12502 = vmatprep.subr.bf16.mxu1 %v19905_v9  ;;  %v19960_v9 = vld [vmem:[#allocation6 + $0x410] ss:$84 sps:$4 sm:$0xff]  }
 0x3ce   :  { %12248 = vmatmul.mubr.bf16.vlgmr.msra.gmra.mrb[12].mxu0 %v22204_v51 }
 0x3cf   :  { %12494 = vmatmul.mubr.bf16.vlgmr.msra.gmra.mrb[20].mxu1 %v22204_v51  ;;  %12257 = vmatpush1.bf16.msra.mxu0 %v19900_v59  ;;  %v19962_v59 = vld [vmem:[#allocation6 + $0x414] ss:$84 sps:$4 sm:$0xff]  }
 0x3d0   :  { %12503 = vmatpush1.bf16.msra.mxu1 %v19903_v60  ;;  %12258 = vmatprep.subr.bf16.mxu0 %v19908_v11  ;;  %v19965_v60 = vld [vmem:[#allocation6 + $0x41c] ss:$84 sps:$4 sm:$0xff]   ;;  %v19963_v11 = vld [vmem:[#allocation6 + $0x418] ss:$84 sps:$4 sm:$0xff]  }
 0x3d1   :  { %12504 = vmatprep.subr.bf16.mxu1 %v19911_v4  ;;  %12288 = vmatprep.mubr.bf16.mxu0 %v21898_v0  ;;  %v19966_v4 = vld [vmem:[#allocation6 + $0x4b8] ss:$84 sps:$4 sm:$0xff]  }
 0x3d2   :  { %12534 = vmatprep.mubr.bf16.mxu1 %v21898_v0 }
 0x3d3   :  { %12259 = vmatpush1.bf16.msra.mxu0 %v19906_v3  ;;  %v19968_v3 = vld [vmem:[#allocation6 + $0x4bc] ss:$84 sps:$4 sm:$0xff]  }
 0x3d4   :  { %12505 = vmatpush1.bf16.msra.mxu1 %v19909_v6  ;;  %12260 = vmatprep.subr.bf16.mxu0 %v19914_v7  ;;  %v19971_v6 = vld [vmem:[#allocation6 + $0x4c4] ss:$84 sps:$4 sm:$0xff]   ;;  %v19969_v7 = vld [vmem:[#allocation6 + $0x4c0] ss:$84 sps:$4 sm:$0xff]  }
 0x3d5   :  { %12506 = vmatprep.subr.bf16.mxu1 %v19917_v15  ;;  %v19972_v15 = vld [vmem:[#allocation6 + $0x560] ss:$84 sps:$4 sm:$0xff]  }
 0x3d7   :  { %12261 = vmatpush1.bf16.msra.mxu0 %v19912_v12  ;;  %v19974_v12 = vld [vmem:[#allocation6 + $0x564] ss:$84 sps:$4 sm:$0xff]  }
 0x3d8   :  { %12507 = vmatpush1.bf16.msra.mxu1 %v19915_v19  ;;  %12262 = vmatprep.subr.bf16.mxu0 %v19920_v20  ;;  %v19977_v19 = vld [vmem:[#allocation6 + $0x56c] ss:$84 sps:$4 sm:$0xff]   ;;  %v19975_v20 = vld [vmem:[#allocation6 + $0x568] ss:$84 sps:$4 sm:$0xff]  }
 0x3d9   :  { %12508 = vmatprep.subr.bf16.mxu1 %v19923_v23  ;;  %v19978_v23 = vld [vmem:[#allocation6 + $0x608] ss:$84 sps:$4 sm:$0xff]  }
 0x3db   :  { %12263 = vmatpush1.bf16.msra.mxu0 %v19918_v22  ;;  %v19980_v22 = vld [vmem:[#allocation6 + $0x60c] ss:$84 sps:$4 sm:$0xff]  }
 0x3dc   :  { %12509 = vmatpush1.bf16.msra.mxu1 %v19921_v24  ;;  %12543 = vmatprep.subr.bf16.mxu0 %v19926_v25  ;;  %v19983_v24 = vld [vmem:[#allocation6 + $0x614] ss:$84 sps:$4 sm:$0xff]   ;;  %v19981_v25 = vld [vmem:[#allocation6 + $0x610] ss:$84 sps:$4 sm:$0xff]  }
 0x3dd   :  { %12789 = vmatprep.subr.bf16.mxu1 %v19929_v27  ;;  %v19986_v27 = vld [vmem:[#allocation6 + $0x6b4] ss:$84 sps:$4 sm:$0xff]  }
 0x3de   :  { %18025 = vmatmul.mubr.msk.bf16.vlgmr.msra.gmra.mrb[12].mxu0 %vm11555_vm3, %v22211_v17 }
 0x3df   :  { %18026 = vmatmul.mubr.msk.bf16.vlgmr.msra.gmra.mrb[20].mxu1 %vm11555_vm3, %v22211_v17  ;;  %12544 = vmatpush1.bf16.msra.mxu0 %v19924_v28  ;;  %v19984_v28 = vld [vmem:[#allocation6 + $0x6b0] ss:$84 sps:$4 sm:$0xff]  }
 0x3e0   :  { %12575 = vmatprep.mubr.bf16.mxu0 %v22106_v63  ;;  %12790 = vmatpush1.bf16.msra.mxu1 %v19927_v29  ;;  %v19989_v29 = vld [vmem:[#allocation6 + $0x6bc] ss:$84 sps:$4 sm:$0xff]  }
 0x3e1   :  { %12821 = vmatprep.mubr.bf16.mxu1 %v22106_v63  ;;  %12545 = vmatprep.subr.bf16.mxu0 %v19932_v31  ;;  %v19987_v31 = vld [vmem:[#allocation6 + $0x6b8] ss:$84 sps:$4 sm:$0xff]  }
 0x3e2   :  { %12791 = vmatprep.subr.bf16.mxu1 %v19935_v35  ;;  %v19995_v35 = vld [vmem:[#allocation6 + $0x764] ss:$84 sps:$4 sm:$0xff]  }
 0x3e3   :  { %12546 = vmatpush1.bf16.msra.mxu0 %v19930_v32  ;;  %v19992_v32 = vld [vmem:[#allocation6 + $0x75c] ss:$84 sps:$4 sm:$0xff]  }
 0x3e4   :  { %12792 = vmatpush1.bf16.msra.mxu1 %v19933_v5  ;;  %12547 = vmatprep.subr.bf16.mxu0 %v19938_v37  ;;  %v19990_v5 = vld [vmem:[#allocation6 + $0x758] ss:$84 sps:$4 sm:$0xff]   ;;  %v19993_v37 = vld [vmem:[#allocation6 + $0x760] ss:$84 sps:$4 sm:$0xff]  }
 0x3e5   :  { %12793 = vmatprep.subr.bf16.mxu1 %v19941_v55  ;;  %v19998_v55 = vld [vmem:[#allocation6 + $0x804] ss:$84 sps:$4 sm:$0xff]  }
 0x3e7   :  { %12548 = vmatpush1.bf16.msra.mxu0 %v19936_v39  ;;  %v19996_v39 = vld [vmem:[#allocation6 + $0x800] ss:$84 sps:$4 sm:$0xff]  }
 0x3e8   :  { %12794 = vmatpush1.bf16.msra.mxu1 %v19939_v40  ;;  %12549 = vmatprep.subr.bf16.mxu0 %v19944_v42  ;;  %v20001_v40 = vld [vmem:[#allocation6 + $0x80c] ss:$84 sps:$4 sm:$0xff]   ;;  %v19999_v42 = vld [vmem:[#allocation6 + $0x808] ss:$84 sps:$4 sm:$0xff]  }
 0x3e9   :  { %12795 = vmatprep.subr.bf16.mxu1 %v19947_v44  ;;  %v20002_v44 = vld [vmem:[#allocation6 + $0x8a8] ss:$84 sps:$4 sm:$0xff]  }
 0x3eb   :  { %12550 = vmatpush1.bf16.msra.mxu0 %v19942_v13  ;;  %v20004_v13 = vld [vmem:[#allocation6 + $0x8ac] ss:$84 sps:$4 sm:$0xff]  }
 0x3ec   :  { %12796 = vmatpush1.bf16.msra.mxu1 %v19945_v45  ;;  %12551 = vmatprep.subr.bf16.mxu0 %v19950_v46  ;;  %v20007_v45 = vld [vmem:[#allocation6 + $0x8b4] ss:$84 sps:$4 sm:$0xff]   ;;  %v20005_v46 = vld [vmem:[#allocation6 + $0x8b0] ss:$84 sps:$4 sm:$0xff]  }
 0x3ed   :  { %12797 = vmatprep.subr.bf16.mxu1 %v19953_v53  ;;  %v20008_v53 = vld [vmem:[#allocation6 + $0x950] ss:$84 sps:$4 sm:$0xff]  }
 0x3ef   :  { %12552 = vmatpush1.bf16.msra.mxu0 %v19948_v33  ;;  %v20010_v33 = vld [vmem:[#allocation6 + $0x954] ss:$84 sps:$4 sm:$0xff]  }
 0x3f0   :  { %12798 = vmatpush1.bf16.msra.mxu1 %v19951_v49  ;;  %12553 = vmatprep.subr.bf16.mxu0 %v19956_v54  ;;  %v20013_v49 = vld [vmem:[#allocation6 + $0x95c] ss:$84 sps:$4 sm:$0xff]   ;;  %v20011_v54 = vld [vmem:[#allocation6 + $0x958] ss:$84 sps:$4 sm:$0xff]  }
 0x3f1   :  { %12799 = vmatprep.subr.bf16.mxu1 %v19959_v56  ;;  %v20014_v56 = vld [vmem:[#allocation6 + $0x9f8] ss:$84 sps:$4 sm:$0xff]  }
 0x3f3   :  { %12554 = vmatpush1.bf16.msra.mxu0 %v19954_v47  ;;  %v20016_v47 = vld [vmem:[#allocation6 + $0x9fc] ss:$84 sps:$4 sm:$0xff]  }
 0x3f4   :  { %12800 = vmatpush1.bf16.msra.mxu1 %v19957_v57  ;;  %12555 = vmatprep.subr.bf16.mxu0 %v19962_v59  ;;  %v20019_v57 = vld [vmem:[#allocation6 + $0xa04] ss:$84 sps:$4 sm:$0xff]   ;;  %v20017_v59 = vld [vmem:[#allocation6 + $0xa00] ss:$84 sps:$4 sm:$0xff]  }
 0x3f5   :  { %12801 = vmatprep.subr.bf16.mxu1 %v19965_v60  ;;  %v20020_v60 = vld [vmem:[#allocation6 + $0xaa0] ss:$84 sps:$4 sm:$0xff]  }
 0x3f7   :  { %12556 = vmatpush1.bf16.msra.mxu0 %v19960_v9  ;;  %v20022_v9 = vld [vmem:[#allocation6 + $0xaa4] ss:$84 sps:$4 sm:$0xff]  }
 0x3f8   :  { %12802 = vmatpush1.bf16.msra.mxu1 %v19963_v11  ;;  %12557 = vmatprep.subr.bf16.mxu0 %v19968_v3  ;;  %v20025_v11 = vld [vmem:[#allocation6 + $0xaac] ss:$84 sps:$4 sm:$0xff]   ;;  %v20023_v3 = vld [vmem:[#allocation6 + $0xaa8] ss:$84 sps:$4 sm:$0xff]  }
 0x3f9   :  { %12803 = vmatprep.subr.bf16.mxu1 %v19971_v6  ;;  %v20026_v6 = vld [vmem:[#allocation6 + $0xb48] ss:$84 sps:$4 sm:$0xff]  }
 0x3fb   :  { %12558 = vmatpush1.bf16.msra.mxu0 %v19966_v4  ;;  %v20028_v4 = vld [vmem:[#allocation6 + $0xb4c] ss:$84 sps:$4 sm:$0xff]  }
 0x3fc   :  { %12804 = vmatpush1.bf16.msra.mxu1 %v19969_v7  ;;  %12559 = vmatprep.subr.bf16.mxu0 %v19974_v12  ;;  %v20029_v7 = vld [vmem:[#allocation6 + $0xb50] ss:$84 sps:$4 sm:$0xff]   ;;  %v20031_v12 = vld [vmem:[#allocation6 + $0xb54] ss:$84 sps:$4 sm:$0xff]  }
 0x3fd   :  { %12805 = vmatprep.subr.bf16.mxu1 %v19977_v19  ;;  %v20037_v19 = vld [vmem:[#allocation6 + $0xbfc] ss:$84 sps:$4 sm:$0xff]  }
 0x3ff   :  { %12560 = vmatpush1.bf16.msra.mxu0 %v19972_v15  ;;  %v20034_v15 = vld [vmem:[#allocation6 + $0xbf4] ss:$84 sps:$4 sm:$0xff]  }
 0x400   :  { %12806 = vmatpush1.bf16.msra.mxu1 %v19975_v20  ;;  %12561 = vmatprep.subr.bf16.mxu0 %v19980_v22  ;;  %v20032_v20 = vld [vmem:[#allocation6 + $0xbf0] ss:$84 sps:$4 sm:$0xff]   ;;  %v20035_v22 = vld [vmem:[#allocation6 + $0xbf8] ss:$84 sps:$4 sm:$0xff]  }
 0x401   :  { %12807 = vmatprep.subr.bf16.mxu1 %v19983_v24  ;;  %v20038_v24 = vld [vmem:[#allocation6 + $0xc98] ss:$84 sps:$4 sm:$0xff]  }
 0x403   :  { %12562 = vmatpush1.bf16.msra.mxu0 %v19978_v23  ;;  %v20040_v23 = vld [vmem:[#allocation6 + $0xc9c] ss:$84 sps:$4 sm:$0xff]  }
 0x404   :  { %12808 = vmatpush1.bf16.msra.mxu1 %v19981_v25  ;;  %12563 = vmatprep.subr.bf16.mxu0 %v19986_v27  ;;  %v20043_v25 = vld [vmem:[#allocation6 + $0xca4] ss:$84 sps:$4 sm:$0xff]   ;;  %v20041_v27 = vld [vmem:[#allocation6 + $0xca0] ss:$84 sps:$4 sm:$0xff]  }
 0x405   :  { %12809 = vmatprep.subr.bf16.mxu1 %v19989_v29  ;;  %v20044_v29 = vld [vmem:[#allocation6 + $0xd40] ss:$84 sps:$4 sm:$0xff]  }
 0x407   :  { %12564 = vmatpush1.bf16.msra.mxu0 %v19984_v28  ;;  %v20046_v28 = vld [vmem:[#allocation6 + $0xd44] ss:$84 sps:$4 sm:$0xff]  }
 0x408   :  { %12810 = vmatpush1.bf16.msra.mxu1 %v19987_v31  ;;  %12565 = vmatprep.subr.bf16.mxu0 %v19992_v32  ;;  %v20049_v31 = vld [vmem:[#allocation6 + $0xd4c] ss:$84 sps:$4 sm:$0xff]   ;;  %v20047_v32 = vld [vmem:[#allocation6 + $0xd48] ss:$84 sps:$4 sm:$0xff]  }
 0x409   :  { %12811 = vmatprep.subr.bf16.mxu1 %v19995_v35  ;;  %v20050_v35 = vld [vmem:[#allocation6 + $0xde8] ss:$84 sps:$4 sm:$0xff]  }
 0x40b   :  { %12566 = vmatpush1.bf16.msra.mxu0 %v19990_v5  ;;  %v20052_v5 = vld [vmem:[#allocation6 + $0xdec] ss:$84 sps:$4 sm:$0xff]  }
 0x40c   :  { %12812 = vmatpush1.bf16.msra.mxu1 %v19993_v37  ;;  %12567 = vmatprep.subr.bf16.mxu0 %v19998_v55  ;;  %v20055_v37 = vld [vmem:[#allocation6 + $0xdf4] ss:$84 sps:$4 sm:$0xff]   ;;  %v20053_v55 = vld [vmem:[#allocation6 + $0xdf0] ss:$84 sps:$4 sm:$0xff]  }
 0x40d   :  { %12813 = vmatprep.subr.bf16.mxu1 %v20001_v40  ;;  %v20061_v40 = vld [vmem:[#allocation6 + $0xe9c] ss:$84 sps:$4 sm:$0xff]  }
 0x40f   :  { %12568 = vmatpush1.bf16.msra.mxu0 %v19996_v39  ;;  %v20058_v39 = vld [vmem:[#allocation6 + $0xe94] ss:$84 sps:$4 sm:$0xff]  }
 0x410   :  { %12814 = vmatpush1.bf16.msra.mxu1 %v19999_v42  ;;  %12569 = vmatprep.subr.bf16.mxu0 %v20004_v13  ;;  %v20056_v42 = vld [vmem:[#allocation6 + $0xe90] ss:$84 sps:$4 sm:$0xff]   ;;  %v20059_v13 = vld [vmem:[#allocation6 + $0xe98] ss:$84 sps:$4 sm:$0xff]  }
 0x411   :  { %12815 = vmatprep.subr.bf16.mxu1 %v20007_v45  ;;  %v20067_v45 = vld [vmem:[#allocation6 + $0xf44] ss:$84 sps:$4 sm:$0xff]  }
 0x413   :  { %12570 = vmatpush1.bf16.msra.mxu0 %v20002_v44  ;;  %v20064_v44 = vld [vmem:[#allocation6 + $0xf3c] ss:$84 sps:$4 sm:$0xff]  }
 0x414   :  { %12816 = vmatpush1.bf16.msra.mxu1 %v20005_v46  ;;  %12571 = vmatprep.subr.bf16.mxu0 %v20010_v33  ;;  %v20062_v46 = vld [vmem:[#allocation6 + $0xf38] ss:$84 sps:$4 sm:$0xff]   ;;  %v20065_v33 = vld [vmem:[#allocation6 + $0xf40] ss:$84 sps:$4 sm:$0xff]  }
 0x415   :  { %12817 = vmatprep.subr.bf16.mxu1 %v20013_v49  ;;  %v20068_v49 = vld [vmem:[#allocation6 + $0xfe0] ss:$84 sps:$4 sm:$0xff]  }
 0x417   :  { %12572 = vmatpush1.bf16.msra.mxu0 %v20008_v53  ;;  %v20070_v53 = vld [vmem:[#allocation6 + $0xfe4] ss:$84 sps:$4 sm:$0xff]  }
 0x418   :  { %12818 = vmatpush1.bf16.msra.mxu1 %v20011_v54  ;;  %12573 = vmatprep.subr.bf16.mxu0 %v20016_v47  ;;  %v20073_v54 = vld [vmem:[#allocation6 + $0xfec] ss:$84 sps:$4 sm:$0xff]   ;;  %v20071_v47 = vld [vmem:[#allocation6 + $0xfe8] ss:$84 sps:$4 sm:$0xff]  }
 0x419   :  { %12819 = vmatprep.subr.bf16.mxu1 %v20019_v57  ;;  %v20074_v57 = vld [vmem:[#allocation6 + $0x1088] ss:$84 sps:$4 sm:$0xff]  }
 0x41b   :  { %12574 = vmatpush1.bf16.msra.mxu0 %v20014_v56  ;;  %v20076_v56 = vld [vmem:[#allocation6 + $0x108c] ss:$84 sps:$4 sm:$0xff]  }
 0x41c   :  { %12820 = vmatpush1.bf16.msra.mxu1 %v20017_v59  ;;  %12584 = vmatprep.subr.bf16.mxu0 %v20022_v9  ;;  %v20079_v59 = vld [vmem:[#allocation6 + $0x1094] ss:$84 sps:$4 sm:$0xff]   ;;  %v20077_v9 = vld [vmem:[#allocation6 + $0x1090] ss:$84 sps:$4 sm:$0xff]  }
 0x41d   :  { %12830 = vmatprep.subr.bf16.mxu1 %v20025_v11  ;;  %v20080_v11 = vld [vmem:[#allocation6 + $0x1130] ss:$84 sps:$4 sm:$0xff]  }
 0x41e   :  { %12576 = vmatmul.mubr.bf16.vlgmr.msra.gmra.mrb[16].mxu0 %v22111_v2 }
 0x41f   :  { %12822 = vmatmul.mubr.bf16.vlgmr.msra.gmra.mrb[24].mxu1 %v22111_v2  ;;  %12585 = vmatpush1.bf16.msra.mxu0 %v20020_v60  ;;  %v20082_v60 = vld [vmem:[#allocation6 + $0x1134] ss:$84 sps:$4 sm:$0xff]  }
 0x420   :  { %12616 = vmatprep.mubr.bf16.mxu0 %v22125_v26  ;;  %12831 = vmatpush1.bf16.msra.mxu1 %v20023_v3  ;;  %v20085_v3 = vld [vmem:[#allocation6 + $0x113c] ss:$84 sps:$4 sm:$0xff]  }
 0x421   :  { %12862 = vmatprep.mubr.bf16.mxu1 %v22125_v26  ;;  %12586 = vmatprep.subr.bf16.mxu0 %v20028_v4  ;;  %v20083_v4 = vld [vmem:[#allocation6 + $0x1138] ss:$84 sps:$4 sm:$0xff]  }
 0x422   :  { %12832 = vmatprep.subr.bf16.mxu1 %v20031_v12  ;;  %v20091_v12 = vld [vmem:[#allocation6 + $0x11e4] ss:$84 sps:$4 sm:$0xff]  }
 0x423   :  { %12587 = vmatpush1.bf16.msra.mxu0 %v20026_v6  ;;  %v20088_v6 = vld [vmem:[#allocation6 + $0x11dc] ss:$84 sps:$4 sm:$0xff]  }
 0x424   :  { %12833 = vmatpush1.bf16.msra.mxu1 %v20029_v7  ;;  %12588 = vmatprep.subr.bf16.mxu0 %v20034_v15  ;;  %v20086_v7 = vld [vmem:[#allocation6 + $0x11d8] ss:$84 sps:$4 sm:$0xff]   ;;  %v20089_v15 = vld [vmem:[#allocation6 + $0x11e0] ss:$84 sps:$4 sm:$0xff]  }
 0x425   :  { %12834 = vmatprep.subr.bf16.mxu1 %v20037_v19  ;;  %v20094_v19 = vld [vmem:[#allocation6 + $0x1284] ss:$84 sps:$4 sm:$0xff]  }
 0x427   :  { %12589 = vmatpush1.bf16.msra.mxu0 %v20032_v20  ;;  %v20092_v20 = vld [vmem:[#allocation6 + $0x1280] ss:$84 sps:$4 sm:$0xff]  }
 0x428   :  { %12835 = vmatpush1.bf16.msra.mxu1 %v20035_v22  ;;  %12590 = vmatprep.subr.bf16.mxu0 %v20040_v23  ;;  %v20097_v22 = vld [vmem:[#allocation6 + $0x128c] ss:$84 sps:$4 sm:$0xff]   ;;  %v20095_v23 = vld [vmem:[#allocation6 + $0x1288] ss:$84 sps:$4 sm:$0xff]  }
 0x429   :  { %12836 = vmatprep.subr.bf16.mxu1 %v20043_v25  ;;  %v20098_v25 = vld [vmem:[#allocation6 + $0x1328] ss:$84 sps:$4 sm:$0xff]  }
 0x42b   :  { %12591 = vmatpush1.bf16.msra.mxu0 %v20038_v24  ;;  %v20100_v24 = vld [vmem:[#allocation6 + $0x132c] ss:$84 sps:$4 sm:$0xff]  }
 0x42c   :  { %12837 = vmatpush1.bf16.msra.mxu1 %v20041_v27  ;;  %12592 = vmatprep.subr.bf16.mxu0 %v20046_v28  ;;  %v20103_v27 = vld [vmem:[#allocation6 + $0x1334] ss:$84 sps:$4 sm:$0xff]   ;;  %v20101_v28 = vld [vmem:[#allocation6 + $0x1330] ss:$84 sps:$4 sm:$0xff]  }
 0x42d   :  { %12838 = vmatprep.subr.bf16.mxu1 %v20049_v31  ;;  %v20104_v31 = vld [vmem:[#allocation6 + $0x13d0] ss:$84 sps:$4 sm:$0xff]  }
 0x42f   :  { %12593 = vmatpush1.bf16.msra.mxu0 %v20044_v29  ;;  %v20106_v29 = vld [vmem:[#allocation6 + $0x13d4] ss:$84 sps:$4 sm:$0xff]  }
 0x430   :  { %12839 = vmatpush1.bf16.msra.mxu1 %v20047_v32  ;;  %12594 = vmatprep.subr.bf16.mxu0 %v20052_v5  ;;  %v20109_v32 = vld [vmem:[#allocation6 + $0x13dc] ss:$84 sps:$4 sm:$0xff]   ;;  %v20107_v5 = vld [vmem:[#allocation6 + $0x13d8] ss:$84 sps:$4 sm:$0xff]  }
 0x431   :  { %12840 = vmatprep.subr.bf16.mxu1 %v20055_v37  ;;  %v20110_v37 = vld [vmem:[#allocation6 + $0x1478] ss:$84 sps:$4 sm:$0xff]  }
 0x433   :  { %12595 = vmatpush1.bf16.msra.mxu0 %v20050_v35  ;;  %v20112_v35 = vld [vmem:[#allocation6 + $0x147c] ss:$84 sps:$4 sm:$0xff]  }
 0x434   :  { %12841 = vmatpush1.bf16.msra.mxu1 %v20053_v55  ;;  %12596 = vmatprep.subr.bf16.mxu0 %v20058_v39  ;;  %v20115_v55 = vld [vmem:[#allocation6 + $0x1484] ss:$84 sps:$4 sm:$0xff]   ;;  %v20113_v39 = vld [vmem:[#allocation6 + $0x1480] ss:$84 sps:$4 sm:$0xff]  }
 0x435   :  { %12842 = vmatprep.subr.bf16.mxu1 %v20061_v40  ;;  %v20118_v40 = vld [vmem:[#allocation6 + $0x1524] ss:$84 sps:$4 sm:$0xff]  }
 0x437   :  { %12597 = vmatpush1.bf16.msra.mxu0 %v20056_v42  ;;  %v20116_v42 = vld [vmem:[#allocation6 + $0x1520] ss:$84 sps:$4 sm:$0xff]  }
 0x438   :  { %12843 = vmatpush1.bf16.msra.mxu1 %v20059_v13  ;;  %12598 = vmatprep.subr.bf16.mxu0 %v20064_v44  ;;  %v20121_v13 = vld [vmem:[#allocation6 + $0x152c] ss:$84 sps:$4 sm:$0xff]   ;;  %v20119_v44 = vld [vmem:[#allocation6 + $0x1528] ss:$84 sps:$4 sm:$0xff]  }
 0x439   :  { %12844 = vmatprep.subr.bf16.mxu1 %v20067_v45  ;;  %v20124_v45 = vld [vmem:[#allocation6 + $0x15cc] ss:$84 sps:$4 sm:$0xff]  }
 0x43b   :  { %12599 = vmatpush1.bf16.msra.mxu0 %v20062_v46  ;;  %v20122_v46 = vld [vmem:[#allocation6 + $0x15c8] ss:$84 sps:$4 sm:$0xff]  }
 0x43c   :  { %12845 = vmatpush1.bf16.msra.mxu1 %v20065_v33  ;;  %12600 = vmatprep.subr.bf16.mxu0 %v20070_v53  ;;  %v20125_v33 = vld [vmem:[#allocation6 + $0x15d0] ss:$84 sps:$4 sm:$0xff]   ;;  %v20127_v53 = vld [vmem:[#allocation6 + $0x15d4] ss:$84 sps:$4 sm:$0xff]  }
 0x43d   :  { %12846 = vmatprep.subr.bf16.mxu1 %v20073_v54  ;;  %v20133_v54 = vld [vmem:[#allocation6 + $0x167c] ss:$84 sps:$4 sm:$0xff]  }
 0x43f   :  { %12601 = vmatpush1.bf16.msra.mxu0 %v20068_v49  ;;  %v20130_v49 = vld [vmem:[#allocation6 + $0x1674] ss:$84 sps:$4 sm:$0xff]  }
 0x440   :  { %12847 = vmatpush1.bf16.msra.mxu1 %v20071_v47  ;;  %12602 = vmatprep.subr.bf16.mxu0 %v20076_v56  ;;  %v20128_v47 = vld [vmem:[#allocation6 + $0x1670] ss:$84 sps:$4 sm:$0xff]   ;;  %v20131_v56 = vld [vmem:[#allocation6 + $0x1678] ss:$84 sps:$4 sm:$0xff]  }
 0x441   :  { %12848 = vmatprep.subr.bf16.mxu1 %v20079_v59  ;;  %v20134_v59 = vld [vmem:[#allocation6 + $0x1718] ss:$84 sps:$4 sm:$0xff]  }
 0x443   :  { %12603 = vmatpush1.bf16.msra.mxu0 %v20074_v57  ;;  %v20136_v57 = vld [vmem:[#allocation6 + $0x171c] ss:$84 sps:$4 sm:$0xff]  }
 0x444   :  { %12849 = vmatpush1.bf16.msra.mxu1 %v20077_v9  ;;  %12604 = vmatprep.subr.bf16.mxu0 %v20082_v60  ;;  %v20139_v9 = vld [vmem:[#allocation6 + $0x1724] ss:$84 sps:$4 sm:$0xff]   ;;  %v20137_v60 = vld [vmem:[#allocation6 + $0x1720] ss:$84 sps:$4 sm:$0xff]  }
 0x445   :  { %12850 = vmatprep.subr.bf16.mxu1 %v20085_v3  ;;  %v20140_v3 = vld [vmem:[#allocation6 + $0x17c0] ss:$84 sps:$4 sm:$0xff]  }
 0x447   :  { %12605 = vmatpush1.bf16.msra.mxu0 %v20080_v11  ;;  %v20142_v11 = vld [vmem:[#allocation6 + $0x17c4] ss:$84 sps:$4 sm:$0xff]  }
 0x448   :  { %12851 = vmatpush1.bf16.msra.mxu1 %v20083_v4  ;;  %12606 = vmatprep.subr.bf16.mxu0 %v20088_v6  ;;  %v20145_v4 = vld [vmem:[#allocation6 + $0x17cc] ss:$84 sps:$4 sm:$0xff]   ;;  %v20143_v6 = vld [vmem:[#allocation6 + $0x17c8] ss:$84 sps:$4 sm:$0xff]  }
 0x449   :  { %12852 = vmatprep.subr.bf16.mxu1 %v20091_v12  ;;  %v20146_v12 = vld [vmem:[#allocation6 + $0x1868] ss:$84 sps:$4 sm:$0xff]  }
 0x44b   :  { %12607 = vmatpush1.bf16.msra.mxu0 %v20086_v7  ;;  %v20148_v7 = vld [vmem:[#allocation6 + $0x186c] ss:$84 sps:$4 sm:$0xff]  }
 0x44c   :  { %12853 = vmatpush1.bf16.msra.mxu1 %v20089_v15  ;;  %12608 = vmatprep.subr.bf16.mxu0 %v20094_v19  ;;  %v20151_v15 = vld [vmem:[#allocation6 + $0x1874] ss:$84 sps:$4 sm:$0xff]   ;;  %v20149_v19 = vld [vmem:[#allocation6 + $0x1870] ss:$84 sps:$4 sm:$0xff]  }
 0x44d   :  { %12854 = vmatprep.subr.bf16.mxu1 %v20097_v22  ;;  %v20152_v22 = vld [vmem:[#allocation6 + $0x1910] ss:$84 sps:$4 sm:$0xff]  }
 0x44f   :  { %12609 = vmatpush1.bf16.msra.mxu0 %v20092_v20  ;;  %v20154_v20 = vld [vmem:[#allocation6 + $0x1914] ss:$84 sps:$4 sm:$0xff]  }
 0x450   :  { %12855 = vmatpush1.bf16.msra.mxu1 %v20095_v23  ;;  %12610 = vmatprep.subr.bf16.mxu0 %v20100_v24  ;;  %v20157_v23 = vld [vmem:[#allocation6 + $0x191c] ss:$84 sps:$4 sm:$0xff]   ;;  %v20155_v24 = vld [vmem:[#allocation6 + $0x1918] ss:$84 sps:$4 sm:$0xff]  }
 0x451   :  { %12856 = vmatprep.subr.bf16.mxu1 %v20103_v27  ;;  %v20158_v27 = vld [vmem:[#allocation6 + $0x19b8] ss:$84 sps:$4 sm:$0xff]  }
 0x453   :  { %12611 = vmatpush1.bf16.msra.mxu0 %v20098_v25  ;;  %v20160_v25 = vld [vmem:[#allocation6 + $0x19bc] ss:$84 sps:$4 sm:$0xff]  }
 0x454   :  { %12857 = vmatpush1.bf16.msra.mxu1 %v20101_v28  ;;  %12612 = vmatprep.subr.bf16.mxu0 %v20106_v29  ;;  %v20163_v28 = vld [vmem:[#allocation6 + $0x19c4] ss:$84 sps:$4 sm:$0xff]   ;;  %v20161_v29 = vld [vmem:[#allocation6 + $0x19c0] ss:$84 sps:$4 sm:$0xff]  }
 0x455   :  { %12858 = vmatprep.subr.bf16.mxu1 %v20109_v32  ;;  %v20164_v32 = vld [vmem:[#allocation6 + $0x1a60] ss:$84 sps:$4 sm:$0xff]  }
 0x457   :  { %12613 = vmatpush1.bf16.msra.mxu0 %v20104_v31  ;;  %v20166_v31 = vld [vmem:[#allocation6 + $0x1a64] ss:$84 sps:$4 sm:$0xff]  }
 0x458   :  { %12859 = vmatpush1.bf16.msra.mxu1 %v20107_v5  ;;  %12614 = vmatprep.subr.bf16.mxu0 %v20112_v35  ;;  %v20169_v5 = vld [vmem:[#allocation6 + $0x1a6c] ss:$84 sps:$4 sm:$0xff]   ;;  %v20167_v35 = vld [vmem:[#allocation6 + $0x1a68] ss:$84 sps:$4 sm:$0xff]  }
 0x459   :  { %12860 = vmatprep.subr.bf16.mxu1 %v20115_v55  ;;  %v20170_v55 = vld [vmem:[#allocation6 + $0x1b08] ss:$84 sps:$4 sm:$0xff]  }
 0x45b   :  { %12615 = vmatpush1.bf16.msra.mxu0 %v20110_v37  ;;  %v20172_v37 = vld [vmem:[#allocation6 + $0x1b0c] ss:$84 sps:$4 sm:$0xff]  }
 0x45c   :  { %12861 = vmatpush1.bf16.msra.mxu1 %v20113_v39  ;;  %12625 = vmatprep.subr.bf16.mxu0 %v20118_v40  ;;  %v20175_v39 = vld [vmem:[#allocation6 + $0x1b14] ss:$84 sps:$4 sm:$0xff]   ;;  %v20173_v40 = vld [vmem:[#allocation6 + $0x1b10] ss:$84 sps:$4 sm:$0xff]  }
 0x45d   :  { %12871 = vmatprep.subr.bf16.mxu1 %v20121_v13  ;;  %v20176_v13 = vld [vmem:[#allocation6 + $0x1bb0] ss:$84 sps:$4 sm:$0xff]  }
 0x45e   :  { %12617 = vmatmul.mubr.bf16.vlgmr.msra.gmra.mrb[16].mxu0 %v22152_v58 }
 0x45f   :  { %12863 = vmatmul.mubr.bf16.vlgmr.msra.gmra.mrb[24].mxu1 %v22152_v58  ;;  %12626 = vmatpush1.bf16.msra.mxu0 %v20116_v42  ;;  %v20178_v42 = vld [vmem:[#allocation6 + $0x1bb4] ss:$84 sps:$4 sm:$0xff]  }
 0x460   :  { %12657 = vmatprep.mubr.bf16.mxu0 %v22154_v62  ;;  %12872 = vmatpush1.bf16.msra.mxu1 %v20119_v44  ;;  %v20181_v44 = vld [vmem:[#allocation6 + $0x1bbc] ss:$84 sps:$4 sm:$0xff]  }
 0x461   :  { %12903 = vmatprep.mubr.bf16.mxu1 %v22154_v62  ;;  %12627 = vmatprep.subr.bf16.mxu0 %v20124_v45  ;;  %v20179_v45 = vld [vmem:[#allocation6 + $0x1bb8] ss:$84 sps:$4 sm:$0xff]  }
 0x462   :  { %12873 = vmatprep.subr.bf16.mxu1 %v20127_v53  ;;  %v20187_v53 = vld [vmem:[#allocation6 + $0x1c64] ss:$84 sps:$4 sm:$0xff]  }
 0x463   :  { %12628 = vmatpush1.bf16.msra.mxu0 %v20122_v46  ;;  %v20184_v46 = vld [vmem:[#allocation6 + $0x1c5c] ss:$84 sps:$4 sm:$0xff]  }
 0x464   :  { %12874 = vmatpush1.bf16.msra.mxu1 %v20125_v33  ;;  %12629 = vmatprep.subr.bf16.mxu0 %v20130_v49  ;;  %v20182_v33 = vld [vmem:[#allocation6 + $0x1c58] ss:$84 sps:$4 sm:$0xff]   ;;  %v20185_v49 = vld [vmem:[#allocation6 + $0x1c60] ss:$84 sps:$4 sm:$0xff]  }
 0x465   :  { %12875 = vmatprep.subr.bf16.mxu1 %v20133_v54  ;;  %v20190_v54 = vld [vmem:[#allocation6 + $0x1d04] ss:$84 sps:$4 sm:$0xff]  }
 0x467   :  { %12630 = vmatpush1.bf16.msra.mxu0 %v20128_v47  ;;  %v20188_v47 = vld [vmem:[#allocation6 + $0x1d00] ss:$84 sps:$4 sm:$0xff]  }
 0x468   :  { %12876 = vmatpush1.bf16.msra.mxu1 %v20131_v56  ;;  %12631 = vmatprep.subr.bf16.mxu0 %v20136_v57  ;;  %v20193_v56 = vld [vmem:[#allocation6 + $0x1d0c] ss:$84 sps:$4 sm:$0xff]   ;;  %v20191_v57 = vld [vmem:[#allocation6 + $0x1d08] ss:$84 sps:$4 sm:$0xff]  }
 0x469   :  { %12877 = vmatprep.subr.bf16.mxu1 %v20139_v9  ;;  %v20194_v9 = vld [vmem:[#allocation6 + $0x1da8] ss:$84 sps:$4 sm:$0xff]  }
 0x46b   :  { %12632 = vmatpush1.bf16.msra.mxu0 %v20134_v59  ;;  %v20196_v59 = vld [vmem:[#allocation6 + $0x1dac] ss:$84 sps:$4 sm:$0xff]  }
 0x46c   :  { %12878 = vmatpush1.bf16.msra.mxu1 %v20137_v60  ;;  %12633 = vmatprep.subr.bf16.mxu0 %v20142_v11  ;;  %v20199_v60 = vld [vmem:[#allocation6 + $0x1db4] ss:$84 sps:$4 sm:$0xff]   ;;  %v20197_v11 = vld [vmem:[#allocation6 + $0x1db0] ss:$84 sps:$4 sm:$0xff]  }
 0x46d   :  { %12879 = vmatprep.subr.bf16.mxu1 %v20145_v4  ;;  %v20200_v4 = vld [vmem:[#allocation6 + $0x1e50] ss:$84 sps:$4 sm:$0xff]  }
 0x46f   :  { %12634 = vmatpush1.bf16.msra.mxu0 %v20140_v3  ;;  %v20202_v3 = vld [vmem:[#allocation6 + $0x1e54] ss:$84 sps:$4 sm:$0xff]  }
 0x470   :  { %12880 = vmatpush1.bf16.msra.mxu1 %v20143_v6  ;;  %12635 = vmatprep.subr.bf16.mxu0 %v20148_v7  ;;  %v20205_v6 = vld [vmem:[#allocation6 + $0x1e5c] ss:$84 sps:$4 sm:$0xff]   ;;  %v20203_v7 = vld [vmem:[#allocation6 + $0x1e58] ss:$84 sps:$4 sm:$0xff]  }
 0x471   :  { %12881 = vmatprep.subr.bf16.mxu1 %v20151_v15  ;;  %v20206_v15 = vld [vmem:[#allocation6 + $0x1ef8] ss:$84 sps:$4 sm:$0xff]  }
 0x473   :  { %12636 = vmatpush1.bf16.msra.mxu0 %v20146_v12  ;;  %v20208_v12 = vld [vmem:[#allocation6 + $0x1efc] ss:$84 sps:$4 sm:$0xff]  }
 0x474   :  { %12882 = vmatpush1.bf16.msra.mxu1 %v20149_v19  ;;  %12637 = vmatprep.subr.bf16.mxu0 %v20154_v20  ;;  %v20211_v19 = vld [vmem:[#allocation6 + $0x1f04] ss:$84 sps:$4 sm:$0xff]   ;;  %v20209_v20 = vld [vmem:[#allocation6 + $0x1f00] ss:$84 sps:$4 sm:$0xff]  }
 0x475   :  { %12883 = vmatprep.subr.bf16.mxu1 %v20157_v23  ;;  %v20212_v23 = vld [vmem:[#allocation6 + $0x1fa0] ss:$84 sps:$4 sm:$0xff]  }
 0x477   :  { %12638 = vmatpush1.bf16.msra.mxu0 %v20152_v22  ;;  %v20214_v22 = vld [vmem:[#allocation6 + $0x1fa4] ss:$84 sps:$4 sm:$0xff]  }
 0x478   :  { %12884 = vmatpush1.bf16.msra.mxu1 %v20155_v24  ;;  %12639 = vmatprep.subr.bf16.mxu0 %v20160_v25  ;;  %v20217_v24 = vld [vmem:[#allocation6 + $0x1fac] ss:$84 sps:$4 sm:$0xff]   ;;  %v20215_v25 = vld [vmem:[#allocation6 + $0x1fa8] ss:$84 sps:$4 sm:$0xff]  }
 0x479   :  { %12885 = vmatprep.subr.bf16.mxu1 %v20163_v28  ;;  %v20223_v28 = vld [vmem:[#allocation6 + $0x2054] ss:$84 sps:$4 sm:$0xff]  }
 0x47b   :  { %12640 = vmatpush1.bf16.msra.mxu0 %v20158_v27  ;;  %v20220_v27 = vld [vmem:[#allocation6 + $0x204c] ss:$84 sps:$4 sm:$0xff]  }
 0x47c   :  { %12886 = vmatpush1.bf16.msra.mxu1 %v20161_v29  ;;  %12641 = vmatprep.subr.bf16.mxu0 %v20166_v31  ;;  %v20218_v29 = vld [vmem:[#allocation6 + $0x2048] ss:$84 sps:$4 sm:$0xff]   ;;  %v20221_v31 = vld [vmem:[#allocation6 + $0x2050] ss:$84 sps:$4 sm:$0xff]  }
 0x47d   :  { %12887 = vmatprep.subr.bf16.mxu1 %v20169_v5  ;;  %v20224_v5 = vld [vmem:[#allocation6 + $0x20f0] ss:$84 sps:$4 sm:$0xff]  }
 0x47f   :  { %12642 = vmatpush1.bf16.msra.mxu0 %v20164_v32  ;;  %v20226_v32 = vld [vmem:[#allocation6 + $0x20f4] ss:$84 sps:$4 sm:$0xff]  }
 0x480   :  { %12888 = vmatpush1.bf16.msra.mxu1 %v20167_v35  ;;  %12643 = vmatprep.subr.bf16.mxu0 %v20172_v37  ;;  %v20229_v35 = vld [vmem:[#allocation6 + $0x20fc] ss:$84 sps:$4 sm:$0xff]   ;;  %v20227_v37 = vld [vmem:[#allocation6 + $0x20f8] ss:$84 sps:$4 sm:$0xff]  }
 0x481   :  { %12889 = vmatprep.subr.bf16.mxu1 %v20175_v39  ;;  %v20230_v39 = vld [vmem:[#allocation6 + $0x2198] ss:$84 sps:$4 sm:$0xff]  }
 0x483   :  { %12644 = vmatpush1.bf16.msra.mxu0 %v20170_v55  ;;  %v20232_v55 = vld [vmem:[#allocation6 + $0x219c] ss:$84 sps:$4 sm:$0xff]  }
 0x484   :  { %12890 = vmatpush1.bf16.msra.mxu1 %v20173_v40  ;;  %12645 = vmatprep.subr.bf16.mxu0 %v20178_v42  ;;  %v20235_v40 = vld [vmem:[#allocation6 + $0x21a4] ss:$84 sps:$4 sm:$0xff]   ;;  %v20233_v42 = vld [vmem:[#allocation6 + $0x21a0] ss:$84 sps:$4 sm:$0xff]  }
 0x485   :  { %12891 = vmatprep.subr.bf16.mxu1 %v20181_v44  ;;  %v20236_v44 = vld [vmem:[#allocation6 + $0x2240] ss:$84 sps:$4 sm:$0xff]  }
 0x487   :  { %12646 = vmatpush1.bf16.msra.mxu0 %v20176_v13  ;;  %v20238_v13 = vld [vmem:[#allocation6 + $0x2244] ss:$84 sps:$4 sm:$0xff]  }
 0x488   :  { %12892 = vmatpush1.bf16.msra.mxu1 %v20179_v45  ;;  %12647 = vmatprep.subr.bf16.mxu0 %v20184_v46  ;;  %v20241_v45 = vld [vmem:[#allocation6 + $0x224c] ss:$84 sps:$4 sm:$0xff]   ;;  %v20239_v46 = vld [vmem:[#allocation6 + $0x2248] ss:$84 sps:$4 sm:$0xff]  }
 0x489   :  { %12893 = vmatprep.subr.bf16.mxu1 %v20187_v53  ;;  %v20247_v53 = vld [vmem:[#allocation6 + $0x22f4] ss:$84 sps:$4 sm:$0xff]  }
 0x48b   :  { %12648 = vmatpush1.bf16.msra.mxu0 %v20182_v33  ;;  %v20244_v33 = vld [vmem:[#allocation6 + $0x22ec] ss:$84 sps:$4 sm:$0xff]  }
 0x48c   :  { %12894 = vmatpush1.bf16.msra.mxu1 %v20185_v49  ;;  %12649 = vmatprep.subr.bf16.mxu0 %v20190_v54  ;;  %v20242_v49 = vld [vmem:[#allocation6 + $0x22e8] ss:$84 sps:$4 sm:$0xff]   ;;  %v20245_v54 = vld [vmem:[#allocation6 + $0x22f0] ss:$84 sps:$4 sm:$0xff]  }
 0x48d   :  { %12895 = vmatprep.subr.bf16.mxu1 %v20193_v56 }
 0x48f   :  { %12650 = vmatpush1.bf16.msra.mxu0 %v20188_v47  ;;  %v20250_v47 = vld [vmem:[#allocation6 + $0x2394] ss:$84 sps:$4 sm:$0xff]  }
 0x490   :  { %12896 = vmatpush1.bf16.msra.mxu1 %v20191_v57  ;;  %12651 = vmatprep.subr.bf16.mxu0 %v20196_v59  ;;  %v20253_v57 = vld [vmem:[#allocation6 + $0x239c] ss:$84 sps:$4 sm:$0xff]  }
 0x491   :  { %12897 = vmatprep.subr.bf16.mxu1 %v20199_v60  ;;  %v20248_v60 = vld [vmem:[#allocation6 + $0x2390] ss:$84 sps:$4 sm:$0xff]  }
 0x493   :  { %12652 = vmatpush1.bf16.msra.mxu0 %v20194_v9 }
 0x494   :  { %12898 = vmatpush1.bf16.msra.mxu1 %v20197_v11  ;;  %12653 = vmatprep.subr.bf16.mxu0 %v20202_v3 }
 0x495   :  { %12899 = vmatprep.subr.bf16.mxu1 %v20205_v6 }
 0x497   :  { %12654 = vmatpush1.bf16.msra.mxu0 %v20200_v4 }
 0x498   :  { %12900 = vmatpush1.bf16.msra.mxu1 %v20203_v7  ;;  %12655 = vmatprep.subr.bf16.mxu0 %v20208_v12  ;;  %v20251_v7 = vld [vmem:[#allocation6 + $0x2398] ss:$84 sps:$4 sm:$0xff]   ;;  %v20256_v12 = vld [vmem:[#allocation6 + $0x243c] ss:$84 sps:$4 sm:$0xff]  }
 0x499   :  { %12901 = vmatprep.subr.bf16.mxu1 %v20211_v19  ;;  %v20259_v19 = vld [vmem:[#allocation6 + $0x2444] ss:$84 sps:$4 sm:$0xff]  }
 0x49b   :  { %12656 = vmatpush1.bf16.msra.mxu0 %v20206_v15 }
 0x49c   :  { %12902 = vmatpush1.bf16.msra.mxu1 %v20209_v20  ;;  %12666 = vmatprep.subr.bf16.mxu0 %v20214_v22  ;;  %v20254_v20 = vld [vmem:[#allocation6 + $0x2438] ss:$84 sps:$4 sm:$0xff]   ;;  %v20257_v22 = vld [vmem:[#allocation6 + $0x2440] ss:$84 sps:$4 sm:$0xff]  }
 0x49d   :  { %12912 = vmatprep.subr.bf16.mxu1 %v20217_v24  ;;  %v20260_v24 = vld [vmem:[#allocation6 + $0x24e0] ss:$84 sps:$4 sm:$0xff]  }
 0x49e   :  { %12658 = vmatmul.mubr.bf16.vlgmr.msra.gmra.mrb[16].mxu0 %v22174_v34 }
 0x49f   :  { %12904 = vmatmul.mubr.bf16.vlgmr.msra.gmra.mrb[24].mxu1 %v22174_v34  ;;  %12667 = vmatpush1.bf16.msra.mxu0 %v20212_v23  ;;  %v20262_v23 = vld [vmem:[#allocation6 + $0x24e4] ss:$84 sps:$4 sm:$0xff]  }
 0x4a0   :  { %12698 = vmatprep.mubr.bf16.mxu0 %v22176_v38  ;;  %12913 = vmatpush1.bf16.msra.mxu1 %v20215_v25  ;;  %v20265_v25 = vld [vmem:[#allocation6 + $0x24ec] ss:$84 sps:$4 sm:$0xff]  }
 0x4a1   :  { %12944 = vmatprep.mubr.bf16.mxu1 %v22176_v38  ;;  %12668 = vmatprep.subr.bf16.mxu0 %v20220_v27  ;;  %v20263_v27 = vld [vmem:[#allocation6 + $0x24e8] ss:$84 sps:$4 sm:$0xff]  }
 0x4a2   :  { %12914 = vmatprep.subr.bf16.mxu1 %v20223_v28  ;;  %v20268_v28 = vld [vmem:[#allocation6 + $0x258c] ss:$84 sps:$4 sm:$0xff]  }
 0x4a3   :  { %12669 = vmatpush1.bf16.msra.mxu0 %v20218_v29  ;;  %v20266_v29 = vld [vmem:[#allocation6 + $0x2588] ss:$84 sps:$4 sm:$0xff]  }
 0x4a4   :  { %12915 = vmatpush1.bf16.msra.mxu1 %v20221_v31  ;;  %12670 = vmatprep.subr.bf16.mxu0 %v20226_v32  ;;  %v20271_v31 = vld [vmem:[#allocation6 + $0x2594] ss:$84 sps:$4 sm:$0xff]   ;;  %v20269_v32 = vld [vmem:[#allocation6 + $0x2590] ss:$84 sps:$4 sm:$0xff]  }
 0x4a5   :  { %12916 = vmatprep.subr.bf16.mxu1 %v20229_v35  ;;  %v20272_v35 = vld [vmem:[#allocation6 + $0x2630] ss:$84 sps:$4 sm:$0xff]  }
 0x4a7   :  { %12671 = vmatpush1.bf16.msra.mxu0 %v20224_v5  ;;  %v20274_v5 = vld [vmem:[#allocation6 + $0x2634] ss:$84 sps:$4 sm:$0xff]  }
 0x4a8   :  { %12917 = vmatpush1.bf16.msra.mxu1 %v20227_v37  ;;  %12672 = vmatprep.subr.bf16.mxu0 %v20232_v55  ;;  %v20277_v37 = vld [vmem:[#allocation6 + $0x263c] ss:$84 sps:$4 sm:$0xff]   ;;  %v20275_v55 = vld [vmem:[#allocation6 + $0x2638] ss:$84 sps:$4 sm:$0xff]  }
 0x4a9   :  { %12918 = vmatprep.subr.bf16.mxu1 %v20235_v40  ;;  %v20278_v40 = vld [vmem:[#allocation6 + $0x26d8] ss:$84 sps:$4 sm:$0xff]  }
 0x4ab   :  { %12673 = vmatpush1.bf16.msra.mxu0 %v20230_v39  ;;  %v20280_v39 = vld [vmem:[#allocation6 + $0x26dc] ss:$84 sps:$4 sm:$0xff]  }
 0x4ac   :  { %12919 = vmatpush1.bf16.msra.mxu1 %v20233_v42  ;;  %12674 = vmatprep.subr.bf16.mxu0 %v20238_v13  ;;  %v20283_v42 = vld [vmem:[#allocation6 + $0x26e4] ss:$84 sps:$4 sm:$0xff]   ;;  %v20281_v13 = vld [vmem:[#allocation6 + $0x26e0] ss:$84 sps:$4 sm:$0xff]  }
 0x4ad   :  { %12920 = vmatprep.subr.bf16.mxu1 %v20241_v45  ;;  %v20284_v45 = vld [vmem:[#allocation6 + $0x2780] ss:$84 sps:$4 sm:$0xff]  }
 0x4af   :  { %12675 = vmatpush1.bf16.msra.mxu0 %v20236_v44  ;;  %v20286_v44 = vld [vmem:[#allocation6 + $0x2784] ss:$84 sps:$4 sm:$0xff]  }
 0x4b0   :  { %12921 = vmatpush1.bf16.msra.mxu1 %v20239_v46  ;;  %12676 = vmatprep.subr.bf16.mxu0 %v20244_v33  ;;  %v20289_v46 = vld [vmem:[#allocation6 + $0x278c] ss:$84 sps:$4 sm:$0xff]   ;;  %v20287_v33 = vld [vmem:[#allocation6 + $0x2788] ss:$84 sps:$4 sm:$0xff]  }
 0x4b1   :  { %v22265_v56 = vpop.f32.mrb[12].mxu0  ;;  %12922 = vmatprep.subr.bf16.mxu1 %v20247_v53  ;;  %v20292_v53 = vld [vmem:[#allocation6 + $0x282c] ss:$84 sps:$4 sm:$0xff]  }
 0x4b2   :  { %v22267_v59 = vpop.f32.mrb[20].mxu1  ;;  %v22269_v9 = vpop.f32.mrb[13].mxu0 }
 0x4b3   :  { %v22271_v11 = vpop.f32.mrb[21].mxu1  ;;  %v12294_v3 = vpop.f32.mrb[14].mxu0  ;;  %12677 = vmatpush1.bf16.msra.mxu0 %v20242_v49  ;;  %v20290_v49 = vld [vmem:[#allocation6 + $0x2828] ss:$84 sps:$4 sm:$0xff]  }
 0x4b4   :  { %v12540_v4 = vpop.f32.mrb[22].mxu1  ;;  %12923 = vmatpush1.bf16.msra.mxu1 %v20245_v54  ;;  %v12295_v6 = vpop.f32.mrb[15].mxu0  ;;  %12678 = vmatprep.subr.bf16.mxu0 %v20250_v47  ;;  %v20295_v54 = vld [vmem:[#allocation6 + $0x2834] ss:$84 sps:$4 sm:$0xff]   ;;  %v20293_v47 = vld [vmem:[#allocation6 + $0x2830] ss:$84 sps:$4 sm:$0xff]  }
 0x4b5   :  { %v12541_v15 = vpop.f32.mrb[23].mxu1  ;;  %12924 = vmatprep.subr.bf16.mxu1 %v20253_v57  ;;  %v20298_v57 = vld [vmem:[#allocation6 + $0x28d4] ss:$84 sps:$4 sm:$0xff]   ;;  %v20301_v3 = vld [vmem:[#allocation6 + $0x28dc] ss:$84 sps:$4 sm:$0xff]  }
 0x4b6   :  { %v20299_v4 = vld [vmem:[#allocation6 + $0x28d8] ss:$84 sps:$4 sm:$0xff]   ;;  %v20304_v6 = vld [vmem:[#allocation6 + $0x297c] ss:$84 sps:$4 sm:$0xff]   ;;  %v20305_v15 = vld [vmem:[#allocation6 + $0x2980] ss:$84 sps:$4 sm:$0xff]  }
 0x4b7   :  { %12679 = vmatpush1.bf16.msra.mxu0 %v20248_v60  ;;  %v20296_v60 = vld [vmem:[#allocation6 + $0x28d0] ss:$84 sps:$4 sm:$0xff]  }
 0x4b8   :  { %12925 = vmatpush1.bf16.msra.mxu1 %v20251_v7  ;;  %12680 = vmatprep.subr.bf16.mxu0 %v20256_v12  ;;  %v20302_v7 = vld [vmem:[#allocation6 + $0x2978] ss:$84 sps:$4 sm:$0xff]  }
 0x4b9   :  { %12926 = vmatprep.subr.bf16.mxu1 %v20259_v19  ;;  %v20307_v12 = vld [vmem:[#allocation6 + $0x2984] ss:$84 sps:$4 sm:$0xff]  }
 0x4ba   :  { %v20310_v19 = vld [vmem:[#allocation6 + $0x2a24] ss:$84 sps:$4 sm:$0xff]  }
 0x4bb   :  { %12681 = vmatpush1.bf16.msra.mxu0 %v20254_v20  ;;  %v20308_v20 = vld [vmem:[#allocation6 + $0x2a20] ss:$84 sps:$4 sm:$0xff]  }
 0x4bc   :  { %12927 = vmatpush1.bf16.msra.mxu1 %v20257_v22  ;;  %12682 = vmatprep.subr.bf16.mxu0 %v20262_v23  ;;  %v20313_v22 = vld [vmem:[#allocation6 + $0x2a2c] ss:$84 sps:$4 sm:$0xff]   ;;  %v20311_v23 = vld [vmem:[#allocation6 + $0x2a28] ss:$84 sps:$4 sm:$0xff]  }
 0x4bd   :  { %12928 = vmatprep.subr.bf16.mxu1 %v20265_v25  ;;  %v20314_v25 = vld [vmem:[#allocation6 + $0x2ac8] ss:$84 sps:$4 sm:$0xff]  }
 0x4bf   :  { %12683 = vmatpush1.bf16.msra.mxu0 %v20260_v24  ;;  %v20316_v24 = vld [vmem:[#allocation6 + $0x2acc] ss:$84 sps:$4 sm:$0xff]  }
 0x4c0   :  { %12929 = vmatpush1.bf16.msra.mxu1 %v20263_v27  ;;  %12684 = vmatprep.subr.bf16.mxu0 %v20268_v28  ;;  %v20319_v27 = vld [vmem:[#allocation6 + $0x2ad4] ss:$84 sps:$4 sm:$0xff]   ;;  %v20317_v28 = vld [vmem:[#allocation6 + $0x2ad0] ss:$84 sps:$4 sm:$0xff]  }
 0x4c1   :  { %12930 = vmatprep.subr.bf16.mxu1 %v20271_v31  ;;  %v20320_v31 = vld [vmem:[#allocation6 + $0x2b70] ss:$84 sps:$4 sm:$0xff]  }
 0x4c3   :  { %12685 = vmatpush1.bf16.msra.mxu0 %v20266_v29  ;;  %v20322_v29 = vld [vmem:[#allocation6 + $0x2b74] ss:$84 sps:$4 sm:$0xff]  }
 0x4c4   :  { %12931 = vmatpush1.bf16.msra.mxu1 %v20269_v32  ;;  %12686 = vmatprep.subr.bf16.mxu0 %v20274_v5  ;;  %v20325_v32 = vld [vmem:[#allocation6 + $0x2b7c] ss:$84 sps:$4 sm:$0xff]   ;;  %v20323_v5 = vld [vmem:[#allocation6 + $0x2b78] ss:$84 sps:$4 sm:$0xff]  }
 0x4c5   :  { %12932 = vmatprep.subr.bf16.mxu1 %v20277_v37  ;;  %v20326_v37 = vld [vmem:[#allocation6 + $0x2c18] ss:$84 sps:$4 sm:$0xff]  }
 0x4c7   :  { %12687 = vmatpush1.bf16.msra.mxu0 %v20272_v35  ;;  %v20328_v35 = vld [vmem:[#allocation6 + $0x2c1c] ss:$84 sps:$4 sm:$0xff]  }
 0x4c8   :  { %12933 = vmatpush1.bf16.msra.mxu1 %v20275_v55  ;;  %12688 = vmatprep.subr.bf16.mxu0 %v20280_v39  ;;  %v20331_v55 = vld [vmem:[#allocation6 + $0x2c24] ss:$84 sps:$4 sm:$0xff]   ;;  %v20329_v39 = vld [vmem:[#allocation6 + $0x2c20] ss:$84 sps:$4 sm:$0xff]  }
 0x4c9   :  { %12934 = vmatprep.subr.bf16.mxu1 %v20283_v42  ;;  %v20332_v42 = vld [vmem:[#allocation6 + $0x2cc0] ss:$84 sps:$4 sm:$0xff]  }
 0x4cb   :  { %12689 = vmatpush1.bf16.msra.mxu0 %v20278_v40  ;;  %v20334_v40 = vld [vmem:[#allocation6 + $0x2cc4] ss:$84 sps:$4 sm:$0xff]  }
 0x4cc   :  { %12935 = vmatpush1.bf16.msra.mxu1 %v20281_v13  ;;  %12690 = vmatprep.subr.bf16.mxu0 %v20286_v44  ;;  %v20337_v13 = vld [vmem:[#allocation6 + $0x2ccc] ss:$84 sps:$4 sm:$0xff]   ;;  %v20335_v44 = vld [vmem:[#allocation6 + $0x2cc8] ss:$84 sps:$4 sm:$0xff]  }
 0x4cd   :  { %12936 = vmatprep.subr.bf16.mxu1 %v20289_v46  ;;  %v20343_v46 = vld [vmem:[#allocation6 + $0x2d74] ss:$84 sps:$4 sm:$0xff]  }
 0x4cf   :  { %12691 = vmatpush1.bf16.msra.mxu0 %v20284_v45  ;;  %v20340_v45 = vld [vmem:[#allocation6 + $0x2d6c] ss:$84 sps:$4 sm:$0xff]  }
 0x4d0   :  { %12937 = vmatpush1.bf16.msra.mxu1 %v20287_v33  ;;  %12692 = vmatprep.subr.bf16.mxu0 %v20292_v53  ;;  %v20338_v33 = vld [vmem:[#allocation6 + $0x2d68] ss:$84 sps:$4 sm:$0xff]   ;;  %v20341_v53 = vld [vmem:[#allocation6 + $0x2d70] ss:$84 sps:$4 sm:$0xff]  }
 0x4d1   :  { %12938 = vmatprep.subr.bf16.mxu1 %v20295_v54  ;;  %v20349_v54 = vld [vmem:[#allocation6 + $0x2e1c] ss:$84 sps:$4 sm:$0xff]  }
 0x4d3   :  { %12693 = vmatpush1.bf16.msra.mxu0 %v20290_v49  ;;  %v20346_v49 = vld [vmem:[#allocation6 + $0x2e14] ss:$84 sps:$4 sm:$0xff]  }
 0x4d4   :  { %12939 = vmatpush1.bf16.msra.mxu1 %v20293_v47  ;;  %12694 = vmatprep.subr.bf16.mxu0 %v20298_v57  ;;  %v20344_v47 = vld [vmem:[#allocation6 + $0x2e10] ss:$84 sps:$4 sm:$0xff]   ;;  %v20347_v57 = vld [vmem:[#allocation6 + $0x2e18] ss:$84 sps:$4 sm:$0xff]  }
 0x4d5   :  { %12940 = vmatprep.subr.bf16.mxu1 %v20301_v3  ;;  %v20355_v3 = vld [vmem:[#allocation6 + $0x2ec4] ss:$84 sps:$4 sm:$0xff]  }
 0x4d7   :  { %12695 = vmatpush1.bf16.msra.mxu0 %v20296_v60  ;;  %v20352_v60 = vld [vmem:[#allocation6 + $0x2ebc] ss:$84 sps:$4 sm:$0xff]  }
 0x4d8   :  { %12941 = vmatpush1.bf16.msra.mxu1 %v20299_v4  ;;  %12696 = vmatprep.subr.bf16.mxu0 %v20304_v6  ;;  %v20350_v4 = vld [vmem:[#allocation6 + $0x2eb8] ss:$84 sps:$4 sm:$0xff]   ;;  %v20353_v6 = vld [vmem:[#allocation6 + $0x2ec0] ss:$84 sps:$4 sm:$0xff]  }
 0x4d9   :  { %12942 = vmatprep.subr.bf16.mxu1 %v20307_v12  ;;  %v20361_v12 = vld [vmem:[#allocation6 + $0x2f6c] ss:$84 sps:$4 sm:$0xff]  }
 0x4db   :  { %12697 = vmatpush1.bf16.msra.mxu0 %v20302_v7  ;;  %v20358_v7 = vld [vmem:[#allocation6 + $0x2f64] ss:$84 sps:$4 sm:$0xff]  }
 0x4dc   :  { %12943 = vmatpush1.bf16.msra.mxu1 %v20305_v15  ;;  %12707 = vmatprep.subr.bf16.mxu0 %v20310_v19  ;;  %v20356_v15 = vld [vmem:[#allocation6 + $0x2f60] ss:$84 sps:$4 sm:$0xff]   ;;  %v20359_v19 = vld [vmem:[#allocation6 + $0x2f68] ss:$84 sps:$4 sm:$0xff]  }
 0x4dd   :  { %12953 = vmatprep.subr.bf16.mxu1 %v20313_v22  ;;  %v20367_v22 = vld [vmem:[#allocation6 + $0x3014] ss:$84 sps:$4 sm:$0xff]  }
 0x4de   :  { %12699 = vmatmul.mubr.bf16.vlgmr.msra.gmra.mrb[16].mxu0 %v22193_v52 }
 0x4df   :  { %12945 = vmatmul.mubr.bf16.vlgmr.msra.gmra.mrb[24].mxu1 %v22193_v52  ;;  %12708 = vmatpush1.bf16.msra.mxu0 %v20308_v20  ;;  %v20364_v20 = vld [vmem:[#allocation6 + $0x300c] ss:$84 sps:$4 sm:$0xff]  }
 0x4e0   :  { %12739 = vmatprep.mubr.bf16.mxu0 %v22195_v36  ;;  %12954 = vmatpush1.bf16.msra.mxu1 %v20311_v23  ;;  %v20362_v23 = vld [vmem:[#allocation6 + $0x3008] ss:$84 sps:$4 sm:$0xff]  }
 0x4e1   :  { %12985 = vmatprep.mubr.bf16.mxu1 %v22195_v36  ;;  %12709 = vmatprep.subr.bf16.mxu0 %v20316_v24  ;;  %v20365_v24 = vld [vmem:[#allocation6 + $0x3010] ss:$84 sps:$4 sm:$0xff]  }
 0x4e2   :  { %12955 = vmatprep.subr.bf16.mxu1 %v20319_v27  ;;  %v20373_v27 = vld [vmem:[#allocation6 + $0x30bc] ss:$84 sps:$4 sm:$0xff]  }
 0x4e3   :  { %12710 = vmatpush1.bf16.msra.mxu0 %v20314_v25  ;;  %v20370_v25 = vld [vmem:[#allocation6 + $0x30b4] ss:$84 sps:$4 sm:$0xff]  }
 0x4e4   :  { %12956 = vmatpush1.bf16.msra.mxu1 %v20317_v28  ;;  %12711 = vmatprep.subr.bf16.mxu0 %v20322_v29  ;;  %v20368_v28 = vld [vmem:[#allocation6 + $0x30b0] ss:$84 sps:$4 sm:$0xff]   ;;  %v20371_v29 = vld [vmem:[#allocation6 + $0x30b8] ss:$84 sps:$4 sm:$0xff]  }
 0x4e5   :  { %12957 = vmatprep.subr.bf16.mxu1 %v20325_v32  ;;  %v20379_v32 = vld [vmem:[#allocation6 + $0x3164] ss:$84 sps:$4 sm:$0xff]  }
 0x4e7   :  { %12712 = vmatpush1.bf16.msra.mxu0 %v20320_v31  ;;  %v20376_v31 = vld [vmem:[#allocation6 + $0x315c] ss:$84 sps:$4 sm:$0xff]  }
 0x4e8   :  { %12958 = vmatpush1.bf16.msra.mxu1 %v20323_v5  ;;  %12713 = vmatprep.subr.bf16.mxu0 %v20328_v35  ;;  %v20374_v5 = vld [vmem:[#allocation6 + $0x3158] ss:$84 sps:$4 sm:$0xff]   ;;  %v20377_v35 = vld [vmem:[#allocation6 + $0x3160] ss:$84 sps:$4 sm:$0xff]  }
 0x4e9   :  { %12959 = vmatprep.subr.bf16.mxu1 %v20331_v55  ;;  %v20385_v55 = vld [vmem:[#allocation6 + $0x320c] ss:$84 sps:$4 sm:$0xff]  }
 0x4eb   :  { %12714 = vmatpush1.bf16.msra.mxu0 %v20326_v37  ;;  %v20382_v37 = vld [vmem:[#allocation6 + $0x3204] ss:$84 sps:$4 sm:$0xff]  }
 0x4ec   :  { %12960 = vmatpush1.bf16.msra.mxu1 %v20329_v39  ;;  %12715 = vmatprep.subr.bf16.mxu0 %v20334_v40  ;;  %v20380_v39 = vld [vmem:[#allocation6 + $0x3200] ss:$84 sps:$4 sm:$0xff]   ;;  %v20383_v40 = vld [vmem:[#allocation6 + $0x3208] ss:$84 sps:$4 sm:$0xff]  }
 0x4ed   :  { %12961 = vmatprep.subr.bf16.mxu1 %v20337_v13  ;;  %v20391_v13 = vld [vmem:[#allocation6 + $0x32b4] ss:$84 sps:$4 sm:$0xff]  }
 0x4ef   :  { %12716 = vmatpush1.bf16.msra.mxu0 %v20332_v42  ;;  %v20388_v42 = vld [vmem:[#allocation6 + $0x32ac] ss:$84 sps:$4 sm:$0xff]  }
 0x4f0   :  { %12962 = vmatpush1.bf16.msra.mxu1 %v20335_v44  ;;  %12717 = vmatprep.subr.bf16.mxu0 %v20340_v45  ;;  %v20386_v44 = vld [vmem:[#allocation6 + $0x32a8] ss:$84 sps:$4 sm:$0xff]   ;;  %v20389_v45 = vld [vmem:[#allocation6 + $0x32b0] ss:$84 sps:$4 sm:$0xff]  }
 0x4f1   :  { %12963 = vmatprep.subr.bf16.mxu1 %v20343_v46  ;;  %v20394_v46 = vld [vmem:[#allocation6 + $0x3354] ss:$84 sps:$4 sm:$0xff]  }
 0x4f3   :  { %12718 = vmatpush1.bf16.msra.mxu0 %v20338_v33  ;;  %v20397_v33 = vld [vmem:[#allocation6 + $0x335c] ss:$84 sps:$4 sm:$0xff]  }
 0x4f4   :  { %12964 = vmatpush1.bf16.msra.mxu1 %v20341_v53  ;;  %12719 = vmatprep.subr.bf16.mxu0 %v20346_v49  ;;  %v20392_v53 = vld [vmem:[#allocation6 + $0x3350] ss:$84 sps:$4 sm:$0xff]   ;;  %v20395_v49 = vld [vmem:[#allocation6 + $0x3358] ss:$84 sps:$4 sm:$0xff]  }
 0x4f5   :  { %12965 = vmatprep.subr.bf16.mxu1 %v20349_v54  ;;  %v20400_v54 = vld [vmem:[#allocation6 + $0x33fc] ss:$84 sps:$4 sm:$0xff]  }
 0x4f7   :  { %12720 = vmatpush1.bf16.msra.mxu0 %v20344_v47  ;;  %v20403_v47 = vld [vmem:[#allocation6 + $0x3404] ss:$84 sps:$4 sm:$0xff]  }
 0x4f8   :  { %12966 = vmatpush1.bf16.msra.mxu1 %v20347_v57  ;;  %12721 = vmatprep.subr.bf16.mxu0 %v20352_v60  ;;  %v20398_v57 = vld [vmem:[#allocation6 + $0x33f8] ss:$84 sps:$4 sm:$0xff]   ;;  %v20401_v60 = vld [vmem:[#allocation6 + $0x3400] ss:$84 sps:$4 sm:$0xff]  }
 0x4f9   :  { %12967 = vmatprep.subr.bf16.mxu1 %v20355_v3  ;;  %v20406_v3 = vld [vmem:[#allocation6 + $0x34a4] ss:$84 sps:$4 sm:$0xff]  }
 0x4fb   :  { %12722 = vmatpush1.bf16.msra.mxu0 %v20350_v4  ;;  %v20409_v4 = vld [vmem:[#allocation6 + $0x34ac] ss:$84 sps:$4 sm:$0xff]  }
 0x4fc   :  { %12968 = vmatpush1.bf16.msra.mxu1 %v20353_v6  ;;  %12723 = vmatprep.subr.bf16.mxu0 %v20358_v7  ;;  %v20404_v6 = vld [vmem:[#allocation6 + $0x34a0] ss:$84 sps:$4 sm:$0xff]   ;;  %v20407_v7 = vld [vmem:[#allocation6 + $0x34a8] ss:$84 sps:$4 sm:$0xff]  }
 0x4fd   :  { %12969 = vmatprep.subr.bf16.mxu1 %v20361_v12  ;;  %v20412_v12 = vld [vmem:[#allocation6 + $0x354c] ss:$84 sps:$4 sm:$0xff]  }
 0x4ff   :  { %12724 = vmatpush1.bf16.msra.mxu0 %v20356_v15  ;;  %v20415_v15 = vld [vmem:[#allocation6 + $0x3554] ss:$84 sps:$4 sm:$0xff]  }
 0x500   :  { %12970 = vmatpush1.bf16.msra.mxu1 %v20359_v19  ;;  %12725 = vmatprep.subr.bf16.mxu0 %v20364_v20  ;;  %v20410_v19 = vld [vmem:[#allocation6 + $0x3548] ss:$84 sps:$4 sm:$0xff]   ;;  %v20413_v20 = vld [vmem:[#allocation6 + $0x3550] ss:$84 sps:$4 sm:$0xff]  }
 0x501   :  { %12971 = vmatprep.subr.bf16.mxu1 %v20367_v22  ;;  %v20418_v22 = vld [vmem:[#allocation6 + $0x35f4] ss:$84 sps:$4 sm:$0xff]  }
 0x503   :  { %12726 = vmatpush1.bf16.msra.mxu0 %v20362_v23  ;;  %v20421_v23 = vld [vmem:[#allocation6 + $0x35fc] ss:$84 sps:$4 sm:$0xff]  }
 0x504   :  { %12972 = vmatpush1.bf16.msra.mxu1 %v20365_v24  ;;  %12727 = vmatprep.subr.bf16.mxu0 %v20370_v25  ;;  %v20416_v24 = vld [vmem:[#allocation6 + $0x35f0] ss:$84 sps:$4 sm:$0xff]   ;;  %v20419_v25 = vld [vmem:[#allocation6 + $0x35f8] ss:$84 sps:$4 sm:$0xff]  }
 0x505   :  { %12973 = vmatprep.subr.bf16.mxu1 %v20373_v27  ;;  %v20424_v27 = vld [vmem:[#allocation6 + $0x369c] ss:$84 sps:$4 sm:$0xff]  }
 0x507   :  { %12728 = vmatpush1.bf16.msra.mxu0 %v20368_v28  ;;  %v20427_v28 = vld [vmem:[#allocation6 + $0x36a4] ss:$84 sps:$4 sm:$0xff]  }
 0x508   :  { %12974 = vmatpush1.bf16.msra.mxu1 %v20371_v29  ;;  %12729 = vmatprep.subr.bf16.mxu0 %v20376_v31  ;;  %v20422_v29 = vld [vmem:[#allocation6 + $0x3698] ss:$84 sps:$4 sm:$0xff]   ;;  %v20425_v31 = vld [vmem:[#allocation6 + $0x36a0] ss:$84 sps:$4 sm:$0xff]  }
 0x509   :  { %12975 = vmatprep.subr.bf16.mxu1 %v20379_v32  ;;  %v20430_v32 = vld [vmem:[#allocation6 + $0x34] ss:$84 sps:$4 sm:$0xff]  }
 0x50b   :  { %12730 = vmatpush1.bf16.msra.mxu0 %v20374_v5  ;;  %v20433_v5 = vld [vmem:[#allocation6 + $0x3c] ss:$84 sps:$4 sm:$0xff]  }
 0x50c   :  { %12976 = vmatpush1.bf16.msra.mxu1 %v20377_v35  ;;  %12731 = vmatprep.subr.bf16.mxu0 %v20382_v37  ;;  %v20428_v35 = vld [vmem:[#allocation6 + $0x30] ss:$84 sps:$4 sm:$0xff]   ;;  %v20431_v37 = vld [vmem:[#allocation6 + $0x38] ss:$84 sps:$4 sm:$0xff]  }
 0x50d   :  { %12977 = vmatprep.subr.bf16.mxu1 %v20385_v55  ;;  %v20436_v55 = vld [vmem:[#allocation6 + $0xdc] ss:$84 sps:$4 sm:$0xff]  }
 0x50f   :  { %12732 = vmatpush1.bf16.msra.mxu0 %v20380_v39  ;;  %v20439_v39 = vld [vmem:[#allocation6 + $0xe4] ss:$84 sps:$4 sm:$0xff]  }
 0x510   :  { %12978 = vmatpush1.bf16.msra.mxu1 %v20383_v40  ;;  %12733 = vmatprep.subr.bf16.mxu0 %v20388_v42  ;;  %v20434_v40 = vld [vmem:[#allocation6 + $0xd8] ss:$84 sps:$4 sm:$0xff]   ;;  %v20437_v42 = vld [vmem:[#allocation6 + $0xe0] ss:$84 sps:$4 sm:$0xff]  }
 0x511   :  { %12979 = vmatprep.subr.bf16.mxu1 %v20391_v13  ;;  %v20442_v13 = vld [vmem:[#allocation6 + $0x184] ss:$84 sps:$4 sm:$0xff]  }
 0x513   :  { %12734 = vmatpush1.bf16.msra.mxu0 %v20386_v44  ;;  %v20445_v44 = vld [vmem:[#allocation6 + $0x18c] ss:$84 sps:$4 sm:$0xff]  }
 0x514   :  { %12980 = vmatpush1.bf16.msra.mxu1 %v20389_v45  ;;  %12735 = vmatprep.subr.bf16.mxu0 %v20394_v46  ;;  %v20440_v45 = vld [vmem:[#allocation6 + $0x180] ss:$84 sps:$4 sm:$0xff]   ;;  %v20443_v46 = vld [vmem:[#allocation6 + $0x188] ss:$84 sps:$4 sm:$0xff]  }
 0x515   :  { %12981 = vmatprep.subr.bf16.mxu1 %v20397_v33  ;;  %v20448_v33 = vld [vmem:[#allocation6 + $0x22c] ss:$84 sps:$4 sm:$0xff]  }
 0x517   :  { %12736 = vmatpush1.bf16.msra.mxu0 %v20392_v53  ;;  %v20451_v53 = vld [vmem:[#allocation6 + $0x234] ss:$84 sps:$4 sm:$0xff]  }
 0x518   :  { %12982 = vmatpush1.bf16.msra.mxu1 %v20395_v49  ;;  %12737 = vmatprep.subr.bf16.mxu0 %v20400_v54  ;;  %v20446_v49 = vld [vmem:[#allocation6 + $0x228] ss:$84 sps:$4 sm:$0xff]   ;;  %v20449_v54 = vld [vmem:[#allocation6 + $0x230] ss:$84 sps:$4 sm:$0xff]  }
 0x519   :  { %12983 = vmatprep.subr.bf16.mxu1 %v20403_v47  ;;  %v20454_v47 = vld [vmem:[#allocation6 + $0x2d4] ss:$84 sps:$4 sm:$0xff]  }
 0x51b   :  { %12738 = vmatpush1.bf16.msra.mxu0 %v20398_v57  ;;  %v20457_v57 = vld [vmem:[#allocation6 + $0x2dc] ss:$84 sps:$4 sm:$0xff]  }
 0x51c   :  { %12984 = vmatpush1.bf16.msra.mxu1 %v20401_v60  ;;  %12748 = vmatprep.subr.bf16.mxu0 %v20406_v3  ;;  %v20452_v60 = vld [vmem:[#allocation6 + $0x2d0] ss:$84 sps:$4 sm:$0xff]   ;;  %v20455_v3 = vld [vmem:[#allocation6 + $0x2d8] ss:$84 sps:$4 sm:$0xff]  }
 0x51d   :  { %12994 = vmatprep.subr.bf16.mxu1 %v20409_v4  ;;  %v20460_v4 = vld [vmem:[#allocation6 + $0x37c] ss:$84 sps:$4 sm:$0xff]  }
 0x51e   :  { %12740 = vmatmul.mubr.bf16.vlgmr.msra.gmra.mrb[16].mxu0 %v22204_v51 }
 0x51f   :  { %12986 = vmatmul.mubr.bf16.vlgmr.msra.gmra.mrb[24].mxu1 %v22204_v51  ;;  %12749 = vmatpush1.bf16.msra.mxu0 %v20404_v6  ;;  %v20463_v6 = vld [vmem:[#allocation6 + $0x384] ss:$84 sps:$4 sm:$0xff]  }
 0x520   :  { %12995 = vmatpush1.bf16.msra.mxu1 %v20407_v7  ;;  %12750 = vmatprep.subr.bf16.mxu0 %v20412_v12  ;;  %v20458_v7 = vld [vmem:[#allocation6 + $0x378] ss:$84 sps:$4 sm:$0xff]   ;;  %v20461_v12 = vld [vmem:[#allocation6 + $0x380] ss:$84 sps:$4 sm:$0xff]  }
 0x521   :  { %12996 = vmatprep.subr.bf16.mxu1 %v20415_v15  ;;  %12780 = vmatprep.mubr.bf16.mxu0 %v21898_v0  ;;  %v20466_v15 = vld [vmem:[#allocation6 + $0x424] ss:$84 sps:$4 sm:$0xff]  }
 0x522   :  { %13026 = vmatprep.mubr.bf16.mxu1 %v21898_v0 }
 0x523   :  { %12751 = vmatpush1.bf16.msra.mxu0 %v20410_v19  ;;  %v20469_v19 = vld [vmem:[#allocation6 + $0x42c] ss:$84 sps:$4 sm:$0xff]  }
 0x524   :  { %12997 = vmatpush1.bf16.msra.mxu1 %v20413_v20  ;;  %12752 = vmatprep.subr.bf16.mxu0 %v20418_v22  ;;  %v20464_v20 = vld [vmem:[#allocation6 + $0x420] ss:$84 sps:$4 sm:$0xff]   ;;  %v20467_v22 = vld [vmem:[#allocation6 + $0x428] ss:$84 sps:$4 sm:$0xff]  }
 0x525   :  { %12998 = vmatprep.subr.bf16.mxu1 %v20421_v23  ;;  %v20472_v23 = vld [vmem:[#allocation6 + $0x4cc] ss:$84 sps:$4 sm:$0xff]  }
 0x527   :  { %12753 = vmatpush1.bf16.msra.mxu0 %v20416_v24  ;;  %v20475_v24 = vld [vmem:[#allocation6 + $0x4d4] ss:$84 sps:$4 sm:$0xff]  }
 0x528   :  { %12999 = vmatpush1.bf16.msra.mxu1 %v20419_v25  ;;  %12754 = vmatprep.subr.bf16.mxu0 %v20424_v27  ;;  %v20470_v25 = vld [vmem:[#allocation6 + $0x4c8] ss:$84 sps:$4 sm:$0xff]   ;;  %v20473_v27 = vld [vmem:[#allocation6 + $0x4d0] ss:$84 sps:$4 sm:$0xff]  }
 0x529   :  { %13000 = vmatprep.subr.bf16.mxu1 %v20427_v28  ;;  %v20478_v28 = vld [vmem:[#allocation6 + $0x574] ss:$84 sps:$4 sm:$0xff]  }
 0x52b   :  { %12755 = vmatpush1.bf16.msra.mxu0 %v20422_v29  ;;  %v20481_v29 = vld [vmem:[#allocation6 + $0x57c] ss:$84 sps:$4 sm:$0xff]  }
 0x52c   :  { %13001 = vmatpush1.bf16.msra.mxu1 %v20425_v31  ;;  %13035 = vmatprep.subr.bf16.mxu0 %v20430_v32  ;;  %v20476_v31 = vld [vmem:[#allocation6 + $0x570] ss:$84 sps:$4 sm:$0xff]   ;;  %v20479_v32 = vld [vmem:[#allocation6 + $0x578] ss:$84 sps:$4 sm:$0xff]  }
 0x52d   :  { %13281 = vmatprep.subr.bf16.mxu1 %v20433_v5  ;;  %v20484_v5 = vld [vmem:[#allocation6 + $0x61c] ss:$84 sps:$4 sm:$0xff]  }
 0x52e   :  { %18027 = vmatmul.mubr.msk.bf16.vlgmr.msra.gmra.mrb[16].mxu0 %vm11555_vm3, %v22211_v17 }
 0x52f   :  { %18028 = vmatmul.mubr.msk.bf16.vlgmr.msra.gmra.mrb[24].mxu1 %vm11555_vm3, %v22211_v17  ;;  %13036 = vmatpush1.bf16.msra.mxu0 %v20428_v35  ;;  %v20487_v35 = vld [vmem:[#allocation6 + $0x624] ss:$84 sps:$4 sm:$0xff]  }
 0x530   :  { %13067 = vmatprep.mubr.bf16.mxu0 %v22106_v63  ;;  %13282 = vmatpush1.bf16.msra.mxu1 %v20431_v37  ;;  %v20482_v37 = vld [vmem:[#allocation6 + $0x618] ss:$84 sps:$4 sm:$0xff]  }
 0x531   :  { %13313 = vmatprep.mubr.bf16.mxu1 %v22106_v63  ;;  %13037 = vmatprep.subr.bf16.mxu0 %v20436_v55  ;;  %v20485_v55 = vld [vmem:[#allocation6 + $0x620] ss:$84 sps:$4 sm:$0xff]  }
 0x532   :  { %13283 = vmatprep.subr.bf16.mxu1 %v20439_v39  ;;  %v20490_v39 = vld [vmem:[#allocation6 + $0x6c4] ss:$84 sps:$4 sm:$0xff]  }
 0x533   :  { %13038 = vmatpush1.bf16.msra.mxu0 %v20434_v40  ;;  %v20493_v40 = vld [vmem:[#allocation6 + $0x6cc] ss:$84 sps:$4 sm:$0xff]  }
 0x534   :  { %13284 = vmatpush1.bf16.msra.mxu1 %v20437_v42  ;;  %13039 = vmatprep.subr.bf16.mxu0 %v20442_v13  ;;  %v20488_v42 = vld [vmem:[#allocation6 + $0x6c0] ss:$84 sps:$4 sm:$0xff]   ;;  %v20491_v13 = vld [vmem:[#allocation6 + $0x6c8] ss:$84 sps:$4 sm:$0xff]  }
 0x535   :  { %13285 = vmatprep.subr.bf16.mxu1 %v20445_v44  ;;  %v20496_v44 = vld [vmem:[#allocation6 + $0x76c] ss:$84 sps:$4 sm:$0xff]  }
 0x537   :  { %13040 = vmatpush1.bf16.msra.mxu0 %v20440_v45  ;;  %v20499_v45 = vld [vmem:[#allocation6 + $0x774] ss:$84 sps:$4 sm:$0xff]  }
 0x538   :  { %13286 = vmatpush1.bf16.msra.mxu1 %v20443_v46  ;;  %13041 = vmatprep.subr.bf16.mxu0 %v20448_v33  ;;  %v20494_v46 = vld [vmem:[#allocation6 + $0x768] ss:$84 sps:$4 sm:$0xff]   ;;  %v20497_v33 = vld [vmem:[#allocation6 + $0x770] ss:$84 sps:$4 sm:$0xff]  }
 0x539   :  { %13287 = vmatprep.subr.bf16.mxu1 %v20451_v53  ;;  %v20502_v53 = vld [vmem:[#allocation6 + $0x814] ss:$84 sps:$4 sm:$0xff]  }
 0x53b   :  { %13042 = vmatpush1.bf16.msra.mxu0 %v20446_v49  ;;  %v20505_v49 = vld [vmem:[#allocation6 + $0x81c] ss:$84 sps:$4 sm:$0xff]  }
 0x53c   :  { %13288 = vmatpush1.bf16.msra.mxu1 %v20449_v54  ;;  %13043 = vmatprep.subr.bf16.mxu0 %v20454_v47  ;;  %v20500_v54 = vld [vmem:[#allocation6 + $0x810] ss:$84 sps:$4 sm:$0xff]   ;;  %v20503_v47 = vld [vmem:[#allocation6 + $0x818] ss:$84 sps:$4 sm:$0xff]  }
 0x53d   :  { %13289 = vmatprep.subr.bf16.mxu1 %v20457_v57  ;;  %v20508_v57 = vld [vmem:[#allocation6 + $0x8bc] ss:$84 sps:$4 sm:$0xff]  }
 0x53f   :  { %13044 = vmatpush1.bf16.msra.mxu0 %v20452_v60  ;;  %v20511_v60 = vld [vmem:[#allocation6 + $0x8c4] ss:$84 sps:$4 sm:$0xff]  }
 0x540   :  { %13290 = vmatpush1.bf16.msra.mxu1 %v20455_v3  ;;  %13045 = vmatprep.subr.bf16.mxu0 %v20460_v4  ;;  %v20506_v3 = vld [vmem:[#allocation6 + $0x8b8] ss:$84 sps:$4 sm:$0xff]   ;;  %v20509_v4 = vld [vmem:[#allocation6 + $0x8c0] ss:$84 sps:$4 sm:$0xff]  }
 0x541   :  { %13291 = vmatprep.subr.bf16.mxu1 %v20463_v6  ;;  %v20514_v6 = vld [vmem:[#allocation6 + $0x964] ss:$84 sps:$4 sm:$0xff]  }
 0x543   :  { %13046 = vmatpush1.bf16.msra.mxu0 %v20458_v7  ;;  %v20517_v7 = vld [vmem:[#allocation6 + $0x96c] ss:$84 sps:$4 sm:$0xff]  }
 0x544   :  { %13292 = vmatpush1.bf16.msra.mxu1 %v20461_v12  ;;  %13047 = vmatprep.subr.bf16.mxu0 %v20466_v15  ;;  %v20512_v12 = vld [vmem:[#allocation6 + $0x960] ss:$84 sps:$4 sm:$0xff]   ;;  %v20515_v15 = vld [vmem:[#allocation6 + $0x968] ss:$84 sps:$4 sm:$0xff]  }
 0x545   :  { %13293 = vmatprep.subr.bf16.mxu1 %v20469_v19  ;;  %v20520_v19 = vld [vmem:[#allocation6 + $0xa0c] ss:$84 sps:$4 sm:$0xff]  }
 0x547   :  { %13048 = vmatpush1.bf16.msra.mxu0 %v20464_v20  ;;  %v20523_v20 = vld [vmem:[#allocation6 + $0xa14] ss:$84 sps:$4 sm:$0xff]  }
 0x548   :  { %13294 = vmatpush1.bf16.msra.mxu1 %v20467_v22  ;;  %13049 = vmatprep.subr.bf16.mxu0 %v20472_v23  ;;  %v20518_v22 = vld [vmem:[#allocation6 + $0xa08] ss:$84 sps:$4 sm:$0xff]   ;;  %v20521_v23 = vld [vmem:[#allocation6 + $0xa10] ss:$84 sps:$4 sm:$0xff]  }
 0x549   :  { %13295 = vmatprep.subr.bf16.mxu1 %v20475_v24  ;;  %v20526_v24 = vld [vmem:[#allocation6 + $0xab4] ss:$84 sps:$4 sm:$0xff]  }
 0x54b   :  { %13050 = vmatpush1.bf16.msra.mxu0 %v20470_v25  ;;  %v20529_v25 = vld [vmem:[#allocation6 + $0xabc] ss:$84 sps:$4 sm:$0xff]  }
 0x54c   :  { %13296 = vmatpush1.bf16.msra.mxu1 %v20473_v27  ;;  %13051 = vmatprep.subr.bf16.mxu0 %v20478_v28  ;;  %v20524_v27 = vld [vmem:[#allocation6 + $0xab0] ss:$84 sps:$4 sm:$0xff]   ;;  %v20527_v28 = vld [vmem:[#allocation6 + $0xab8] ss:$84 sps:$4 sm:$0xff]  }
 0x54d   :  { %13297 = vmatprep.subr.bf16.mxu1 %v20481_v29  ;;  %v20532_v29 = vld [vmem:[#allocation6 + $0xb5c] ss:$84 sps:$4 sm:$0xff]  }
 0x54f   :  { %13052 = vmatpush1.bf16.msra.mxu0 %v20476_v31  ;;  %v20535_v31 = vld [vmem:[#allocation6 + $0xb64] ss:$84 sps:$4 sm:$0xff]  }
 0x550   :  { %13298 = vmatpush1.bf16.msra.mxu1 %v20479_v32  ;;  %13053 = vmatprep.subr.bf16.mxu0 %v20484_v5  ;;  %v20530_v32 = vld [vmem:[#allocation6 + $0xb58] ss:$84 sps:$4 sm:$0xff]   ;;  %v20533_v5 = vld [vmem:[#allocation6 + $0xb60] ss:$84 sps:$4 sm:$0xff]  }
 0x551   :  { %13299 = vmatprep.subr.bf16.mxu1 %v20487_v35  ;;  %v20538_v35 = vld [vmem:[#allocation6 + $0xc04] ss:$84 sps:$4 sm:$0xff]  }
 0x553   :  { %13054 = vmatpush1.bf16.msra.mxu0 %v20482_v37  ;;  %v20541_v37 = vld [vmem:[#allocation6 + $0xc0c] ss:$84 sps:$4 sm:$0xff]  }
 0x554   :  { %13300 = vmatpush1.bf16.msra.mxu1 %v20485_v55  ;;  %13055 = vmatprep.subr.bf16.mxu0 %v20490_v39  ;;  %v20536_v55 = vld [vmem:[#allocation6 + $0xc00] ss:$84 sps:$4 sm:$0xff]   ;;  %v20539_v39 = vld [vmem:[#allocation6 + $0xc08] ss:$84 sps:$4 sm:$0xff]  }
 0x555   :  { %13301 = vmatprep.subr.bf16.mxu1 %v20493_v40  ;;  %v20544_v40 = vld [vmem:[#allocation6 + $0xcac] ss:$84 sps:$4 sm:$0xff]  }
 0x557   :  { %13056 = vmatpush1.bf16.msra.mxu0 %v20488_v42  ;;  %v20547_v42 = vld [vmem:[#allocation6 + $0xcb4] ss:$84 sps:$4 sm:$0xff]  }
 0x558   :  { %13302 = vmatpush1.bf16.msra.mxu1 %v20491_v13  ;;  %13057 = vmatprep.subr.bf16.mxu0 %v20496_v44  ;;  %v20542_v13 = vld [vmem:[#allocation6 + $0xca8] ss:$84 sps:$4 sm:$0xff]   ;;  %v20545_v44 = vld [vmem:[#allocation6 + $0xcb0] ss:$84 sps:$4 sm:$0xff]  }
 0x559   :  { %13303 = vmatprep.subr.bf16.mxu1 %v20499_v45  ;;  %v20550_v45 = vld [vmem:[#allocation6 + $0xd54] ss:$84 sps:$4 sm:$0xff]  }
 0x55b   :  { %13058 = vmatpush1.bf16.msra.mxu0 %v20494_v46  ;;  %v20553_v46 = vld [vmem:[#allocation6 + $0xd5c] ss:$84 sps:$4 sm:$0xff]  }
 0x55c   :  { %13304 = vmatpush1.bf16.msra.mxu1 %v20497_v33  ;;  %13059 = vmatprep.subr.bf16.mxu0 %v20502_v53  ;;  %v20548_v33 = vld [vmem:[#allocation6 + $0xd50] ss:$84 sps:$4 sm:$0xff]   ;;  %v20551_v53 = vld [vmem:[#allocation6 + $0xd58] ss:$84 sps:$4 sm:$0xff]  }
 0x55d   :  { %13305 = vmatprep.subr.bf16.mxu1 %v20505_v49  ;;  %v20556_v49 = vld [vmem:[#allocation6 + $0xdfc] ss:$84 sps:$4 sm:$0xff]  }
 0x55f   :  { %13060 = vmatpush1.bf16.msra.mxu0 %v20500_v54  ;;  %v20559_v54 = vld [vmem:[#allocation6 + $0xe04] ss:$84 sps:$4 sm:$0xff]  }
 0x560   :  { %13306 = vmatpush1.bf16.msra.mxu1 %v20503_v47  ;;  %13061 = vmatprep.subr.bf16.mxu0 %v20508_v57  ;;  %v20554_v47 = vld [vmem:[#allocation6 + $0xdf8] ss:$84 sps:$4 sm:$0xff]   ;;  %v20557_v57 = vld [vmem:[#allocation6 + $0xe00] ss:$84 sps:$4 sm:$0xff]  }
 0x561   :  { %13307 = vmatprep.subr.bf16.mxu1 %v20511_v60  ;;  %v20562_v60 = vld [vmem:[#allocation6 + $0xea4] ss:$84 sps:$4 sm:$0xff]  }
 0x563   :  { %13062 = vmatpush1.bf16.msra.mxu0 %v20506_v3  ;;  %v20565_v3 = vld [vmem:[#allocation6 + $0xeac] ss:$84 sps:$4 sm:$0xff]  }
 0x564   :  { %13308 = vmatpush1.bf16.msra.mxu1 %v20509_v4  ;;  %13063 = vmatprep.subr.bf16.mxu0 %v20514_v6  ;;  %v20560_v4 = vld [vmem:[#allocation6 + $0xea0] ss:$84 sps:$4 sm:$0xff]   ;;  %v20563_v6 = vld [vmem:[#allocation6 + $0xea8] ss:$84 sps:$4 sm:$0xff]  }
 0x565   :  { %13309 = vmatprep.subr.bf16.mxu1 %v20517_v7  ;;  %v20568_v7 = vld [vmem:[#allocation6 + $0xf4c] ss:$84 sps:$4 sm:$0xff]  }
 0x567   :  { %13064 = vmatpush1.bf16.msra.mxu0 %v20512_v12  ;;  %v20571_v12 = vld [vmem:[#allocation6 + $0xf54] ss:$84 sps:$4 sm:$0xff]  }
 0x568   :  { %13310 = vmatpush1.bf16.msra.mxu1 %v20515_v15  ;;  %13065 = vmatprep.subr.bf16.mxu0 %v20520_v19  ;;  %v20566_v15 = vld [vmem:[#allocation6 + $0xf48] ss:$84 sps:$4 sm:$0xff]   ;;  %v20569_v19 = vld [vmem:[#allocation6 + $0xf50] ss:$84 sps:$4 sm:$0xff]  }
 0x569   :  { %13311 = vmatprep.subr.bf16.mxu1 %v20523_v20  ;;  %v20574_v20 = vld [vmem:[#allocation6 + $0xff4] ss:$84 sps:$4 sm:$0xff]  }
 0x56b   :  { %13066 = vmatpush1.bf16.msra.mxu0 %v20518_v22  ;;  %v20577_v22 = vld [vmem:[#allocation6 + $0xffc] ss:$84 sps:$4 sm:$0xff]  }
 0x56c   :  { %13312 = vmatpush1.bf16.msra.mxu1 %v20521_v23  ;;  %13076 = vmatprep.subr.bf16.mxu0 %v20526_v24  ;;  %v20572_v23 = vld [vmem:[#allocation6 + $0xff0] ss:$84 sps:$4 sm:$0xff]   ;;  %v20575_v24 = vld [vmem:[#allocation6 + $0xff8] ss:$84 sps:$4 sm:$0xff]  }
 0x56d   :  { %13322 = vmatprep.subr.bf16.mxu1 %v20529_v25  ;;  %v20580_v25 = vld [vmem:[#allocation6 + $0x109c] ss:$84 sps:$4 sm:$0xff]  }
 0x56e   :  { %13068 = vmatmul.mubr.bf16.vlgmr.msra.gmra.mrb[20].mxu0 %v22111_v2 }
 0x56f   :  { %13314 = vmatmul.mubr.bf16.vlgmr.msra.gmra.mrb[28].mxu1 %v22111_v2  ;;  %13077 = vmatpush1.bf16.msra.mxu0 %v20524_v27  ;;  %v20583_v27 = vld [vmem:[#allocation6 + $0x10a4] ss:$84 sps:$4 sm:$0xff]  }
 0x570   :  { %13108 = vmatprep.mubr.bf16.mxu0 %v22125_v26  ;;  %13323 = vmatpush1.bf16.msra.mxu1 %v20527_v28  ;;  %v20578_v28 = vld [vmem:[#allocation6 + $0x1098] ss:$84 sps:$4 sm:$0xff]  }
 0x571   :  { %13354 = vmatprep.mubr.bf16.mxu1 %v22125_v26  ;;  %13078 = vmatprep.subr.bf16.mxu0 %v20532_v29  ;;  %v20581_v29 = vld [vmem:[#allocation6 + $0x10a0] ss:$84 sps:$4 sm:$0xff]  }
 0x572   :  { %13324 = vmatprep.subr.bf16.mxu1 %v20535_v31  ;;  %v20586_v31 = vld [vmem:[#allocation6 + $0x1144] ss:$84 sps:$4 sm:$0xff]  }
 0x573   :  { %13079 = vmatpush1.bf16.msra.mxu0 %v20530_v32  ;;  %v20589_v32 = vld [vmem:[#allocation6 + $0x114c] ss:$84 sps:$4 sm:$0xff]  }
 0x574   :  { %13325 = vmatpush1.bf16.msra.mxu1 %v20533_v5  ;;  %13080 = vmatprep.subr.bf16.mxu0 %v20538_v35  ;;  %v20584_v5 = vld [vmem:[#allocation6 + $0x1140] ss:$84 sps:$4 sm:$0xff]   ;;  %v20587_v35 = vld [vmem:[#allocation6 + $0x1148] ss:$84 sps:$4 sm:$0xff]  }
 0x575   :  { %13326 = vmatprep.subr.bf16.mxu1 %v20541_v37  ;;  %v20592_v37 = vld [vmem:[#allocation6 + $0x11ec] ss:$84 sps:$4 sm:$0xff]  }
 0x577   :  { %13081 = vmatpush1.bf16.msra.mxu0 %v20536_v55  ;;  %v20595_v55 = vld [vmem:[#allocation6 + $0x11f4] ss:$84 sps:$4 sm:$0xff]  }
 0x578   :  { %13327 = vmatpush1.bf16.msra.mxu1 %v20539_v39  ;;  %13082 = vmatprep.subr.bf16.mxu0 %v20544_v40  ;;  %v20590_v39 = vld [vmem:[#allocation6 + $0x11e8] ss:$84 sps:$4 sm:$0xff]   ;;  %v20593_v40 = vld [vmem:[#allocation6 + $0x11f0] ss:$84 sps:$4 sm:$0xff]  }
 0x579   :  { %13328 = vmatprep.subr.bf16.mxu1 %v20547_v42  ;;  %v20598_v42 = vld [vmem:[#allocation6 + $0x1294] ss:$84 sps:$4 sm:$0xff]  }
 0x57b   :  { %13083 = vmatpush1.bf16.msra.mxu0 %v20542_v13  ;;  %v20601_v13 = vld [vmem:[#allocation6 + $0x129c] ss:$84 sps:$4 sm:$0xff]  }
 0x57c   :  { %13329 = vmatpush1.bf16.msra.mxu1 %v20545_v44  ;;  %13084 = vmatprep.subr.bf16.mxu0 %v20550_v45  ;;  %v20596_v44 = vld [vmem:[#allocation6 + $0x1290] ss:$84 sps:$4 sm:$0xff]   ;;  %v20599_v45 = vld [vmem:[#allocation6 + $0x1298] ss:$84 sps:$4 sm:$0xff]  }
 0x57d   :  { %13330 = vmatprep.subr.bf16.mxu1 %v20553_v46  ;;  %v20604_v46 = vld [vmem:[#allocation6 + $0x133c] ss:$84 sps:$4 sm:$0xff]  }
 0x57f   :  { %13085 = vmatpush1.bf16.msra.mxu0 %v20548_v33  ;;  %v20607_v33 = vld [vmem:[#allocation6 + $0x1344] ss:$84 sps:$4 sm:$0xff]  }
 0x580   :  { %13331 = vmatpush1.bf16.msra.mxu1 %v20551_v53  ;;  %13086 = vmatprep.subr.bf16.mxu0 %v20556_v49  ;;  %v20602_v53 = vld [vmem:[#allocation6 + $0x1338] ss:$84 sps:$4 sm:$0xff]   ;;  %v20605_v49 = vld [vmem:[#allocation6 + $0x1340] ss:$84 sps:$4 sm:$0xff]  }
 0x581   :  { %13332 = vmatprep.subr.bf16.mxu1 %v20559_v54  ;;  %v20610_v54 = vld [vmem:[#allocation6 + $0x13e4] ss:$84 sps:$4 sm:$0xff]  }
 0x583   :  { %13087 = vmatpush1.bf16.msra.mxu0 %v20554_v47  ;;  %v20613_v47 = vld [vmem:[#allocation6 + $0x13ec] ss:$84 sps:$4 sm:$0xff]  }
 0x584   :  { %13333 = vmatpush1.bf16.msra.mxu1 %v20557_v57  ;;  %13088 = vmatprep.subr.bf16.mxu0 %v20562_v60  ;;  %v20608_v57 = vld [vmem:[#allocation6 + $0x13e0] ss:$84 sps:$4 sm:$0xff]   ;;  %v20611_v60 = vld [vmem:[#allocation6 + $0x13e8] ss:$84 sps:$4 sm:$0xff]  }
 0x585   :  { %13334 = vmatprep.subr.bf16.mxu1 %v20565_v3  ;;  %v20616_v3 = vld [vmem:[#allocation6 + $0x148c] ss:$84 sps:$4 sm:$0xff]  }
 0x587   :  { %13089 = vmatpush1.bf16.msra.mxu0 %v20560_v4  ;;  %v20619_v4 = vld [vmem:[#allocation6 + $0x1494] ss:$84 sps:$4 sm:$0xff]  }
 0x588   :  { %13335 = vmatpush1.bf16.msra.mxu1 %v20563_v6  ;;  %13090 = vmatprep.subr.bf16.mxu0 %v20568_v7  ;;  %v20614_v6 = vld [vmem:[#allocation6 + $0x1488] ss:$84 sps:$4 sm:$0xff]   ;;  %v20617_v7 = vld [vmem:[#allocation6 + $0x1490] ss:$84 sps:$4 sm:$0xff]  }
 0x589   :  { %13336 = vmatprep.subr.bf16.mxu1 %v20571_v12  ;;  %v20622_v12 = vld [vmem:[#allocation6 + $0x1534] ss:$84 sps:$4 sm:$0xff]  }
 0x58b   :  { %13091 = vmatpush1.bf16.msra.mxu0 %v20566_v15  ;;  %v20625_v15 = vld [vmem:[#allocation6 + $0x153c] ss:$84 sps:$4 sm:$0xff]  }
 0x58c   :  { %13337 = vmatpush1.bf16.msra.mxu1 %v20569_v19  ;;  %13092 = vmatprep.subr.bf16.mxu0 %v20574_v20  ;;  %v20620_v19 = vld [vmem:[#allocation6 + $0x1530] ss:$84 sps:$4 sm:$0xff]   ;;  %v20623_v20 = vld [vmem:[#allocation6 + $0x1538] ss:$84 sps:$4 sm:$0xff]  }
 0x58d   :  { %13338 = vmatprep.subr.bf16.mxu1 %v20577_v22  ;;  %v20628_v22 = vld [vmem:[#allocation6 + $0x15dc] ss:$84 sps:$4 sm:$0xff]  }
 0x58f   :  { %13093 = vmatpush1.bf16.msra.mxu0 %v20572_v23  ;;  %v20631_v23 = vld [vmem:[#allocation6 + $0x15e4] ss:$84 sps:$4 sm:$0xff]  }
 0x590   :  { %13339 = vmatpush1.bf16.msra.mxu1 %v20575_v24  ;;  %13094 = vmatprep.subr.bf16.mxu0 %v20580_v25  ;;  %v20626_v24 = vld [vmem:[#allocation6 + $0x15d8] ss:$84 sps:$4 sm:$0xff]   ;;  %v20629_v25 = vld [vmem:[#allocation6 + $0x15e0] ss:$84 sps:$4 sm:$0xff]  }
 0x591   :  { %13340 = vmatprep.subr.bf16.mxu1 %v20583_v27  ;;  %v20634_v27 = vld [vmem:[#allocation6 + $0x1684] ss:$84 sps:$4 sm:$0xff]  }
 0x593   :  { %13095 = vmatpush1.bf16.msra.mxu0 %v20578_v28  ;;  %v20637_v28 = vld [vmem:[#allocation6 + $0x168c] ss:$84 sps:$4 sm:$0xff]  }
 0x594   :  { %13341 = vmatpush1.bf16.msra.mxu1 %v20581_v29  ;;  %13096 = vmatprep.subr.bf16.mxu0 %v20586_v31  ;;  %v20632_v29 = vld [vmem:[#allocation6 + $0x1680] ss:$84 sps:$4 sm:$0xff]   ;;  %v20635_v31 = vld [vmem:[#allocation6 + $0x1688] ss:$84 sps:$4 sm:$0xff]  }
 0x595   :  { %13342 = vmatprep.subr.bf16.mxu1 %v20589_v32  ;;  %v20640_v32 = vld [vmem:[#allocation6 + $0x172c] ss:$84 sps:$4 sm:$0xff]  }
 0x597   :  { %13097 = vmatpush1.bf16.msra.mxu0 %v20584_v5  ;;  %v20643_v5 = vld [vmem:[#allocation6 + $0x1734] ss:$84 sps:$4 sm:$0xff]  }
 0x598   :  { %13343 = vmatpush1.bf16.msra.mxu1 %v20587_v35  ;;  %13098 = vmatprep.subr.bf16.mxu0 %v20592_v37  ;;  %v20638_v35 = vld [vmem:[#allocation6 + $0x1728] ss:$84 sps:$4 sm:$0xff]   ;;  %v20641_v37 = vld [vmem:[#allocation6 + $0x1730] ss:$84 sps:$4 sm:$0xff]  }
 0x599   :  { %13344 = vmatprep.subr.bf16.mxu1 %v20595_v55  ;;  %v20646_v55 = vld [vmem:[#allocation6 + $0x17d4] ss:$84 sps:$4 sm:$0xff]  }
 0x59b   :  { %13099 = vmatpush1.bf16.msra.mxu0 %v20590_v39  ;;  %v20649_v39 = vld [vmem:[#allocation6 + $0x17dc] ss:$84 sps:$4 sm:$0xff]  }
 0x59c   :  { %13345 = vmatpush1.bf16.msra.mxu1 %v20593_v40  ;;  %13100 = vmatprep.subr.bf16.mxu0 %v20598_v42  ;;  %v20644_v40 = vld [vmem:[#allocation6 + $0x17d0] ss:$84 sps:$4 sm:$0xff]   ;;  %v20647_v42 = vld [vmem:[#allocation6 + $0x17d8] ss:$84 sps:$4 sm:$0xff]  }
 0x59d   :  { %13346 = vmatprep.subr.bf16.mxu1 %v20601_v13  ;;  %v20652_v13 = vld [vmem:[#allocation6 + $0x187c] ss:$84 sps:$4 sm:$0xff]  }
 0x59f   :  { %13101 = vmatpush1.bf16.msra.mxu0 %v20596_v44  ;;  %v20655_v44 = vld [vmem:[#allocation6 + $0x1884] ss:$84 sps:$4 sm:$0xff]  }
 0x5a0   :  { %13347 = vmatpush1.bf16.msra.mxu1 %v20599_v45  ;;  %13102 = vmatprep.subr.bf16.mxu0 %v20604_v46  ;;  %v20650_v45 = vld [vmem:[#allocation6 + $0x1878] ss:$84 sps:$4 sm:$0xff]   ;;  %v20653_v46 = vld [vmem:[#allocation6 + $0x1880] ss:$84 sps:$4 sm:$0xff]  }
 0x5a1   :  { %13348 = vmatprep.subr.bf16.mxu1 %v20607_v33  ;;  %v20658_v33 = vld [vmem:[#allocation6 + $0x1924] ss:$84 sps:$4 sm:$0xff]  }
 0x5a3   :  { %13103 = vmatpush1.bf16.msra.mxu0 %v20602_v53  ;;  %v20661_v53 = vld [vmem:[#allocation6 + $0x192c] ss:$84 sps:$4 sm:$0xff]  }
 0x5a4   :  { %13349 = vmatpush1.bf16.msra.mxu1 %v20605_v49  ;;  %13104 = vmatprep.subr.bf16.mxu0 %v20610_v54  ;;  %v20656_v49 = vld [vmem:[#allocation6 + $0x1920] ss:$84 sps:$4 sm:$0xff]   ;;  %v20659_v54 = vld [vmem:[#allocation6 + $0x1928] ss:$84 sps:$4 sm:$0xff]  }
 0x5a5   :  { %13350 = vmatprep.subr.bf16.mxu1 %v20613_v47  ;;  %v20664_v47 = vld [vmem:[#allocation6 + $0x19cc] ss:$84 sps:$4 sm:$0xff]  }
 0x5a7   :  { %13105 = vmatpush1.bf16.msra.mxu0 %v20608_v57  ;;  %v20667_v57 = vld [vmem:[#allocation6 + $0x19d4] ss:$84 sps:$4 sm:$0xff]  }
 0x5a8   :  { %13351 = vmatpush1.bf16.msra.mxu1 %v20611_v60  ;;  %13106 = vmatprep.subr.bf16.mxu0 %v20616_v3  ;;  %v20662_v60 = vld [vmem:[#allocation6 + $0x19c8] ss:$84 sps:$4 sm:$0xff]   ;;  %v20665_v3 = vld [vmem:[#allocation6 + $0x19d0] ss:$84 sps:$4 sm:$0xff]  }
 0x5a9   :  { %13352 = vmatprep.subr.bf16.mxu1 %v20619_v4  ;;  %v20670_v4 = vld [vmem:[#allocation6 + $0x1a74] ss:$84 sps:$4 sm:$0xff]  }
 0x5ab   :  { %13107 = vmatpush1.bf16.msra.mxu0 %v20614_v6  ;;  %v20673_v6 = vld [vmem:[#allocation6 + $0x1a7c] ss:$84 sps:$4 sm:$0xff]  }
 0x5ac   :  { %13353 = vmatpush1.bf16.msra.mxu1 %v20617_v7  ;;  %13117 = vmatprep.subr.bf16.mxu0 %v20622_v12  ;;  %v20668_v7 = vld [vmem:[#allocation6 + $0x1a70] ss:$84 sps:$4 sm:$0xff]   ;;  %v20671_v12 = vld [vmem:[#allocation6 + $0x1a78] ss:$84 sps:$4 sm:$0xff]  }
 0x5ad   :  { %13363 = vmatprep.subr.bf16.mxu1 %v20625_v15  ;;  %v20676_v15 = vld [vmem:[#allocation6 + $0x1b1c] ss:$84 sps:$4 sm:$0xff]  }
 0x5ae   :  { %13109 = vmatmul.mubr.bf16.vlgmr.msra.gmra.mrb[20].mxu0 %v22152_v58 }
 0x5af   :  { %13355 = vmatmul.mubr.bf16.vlgmr.msra.gmra.mrb[28].mxu1 %v22152_v58  ;;  %13118 = vmatpush1.bf16.msra.mxu0 %v20620_v19  ;;  %v20679_v19 = vld [vmem:[#allocation6 + $0x1b24] ss:$84 sps:$4 sm:$0xff]  }
 0x5b0   :  { %13149 = vmatprep.mubr.bf16.mxu0 %v22154_v62  ;;  %13364 = vmatpush1.bf16.msra.mxu1 %v20623_v20  ;;  %v20674_v20 = vld [vmem:[#allocation6 + $0x1b18] ss:$84 sps:$4 sm:$0xff]  }
 0x5b1   :  { %13395 = vmatprep.mubr.bf16.mxu1 %v22154_v62  ;;  %13119 = vmatprep.subr.bf16.mxu0 %v20628_v22  ;;  %v20677_v22 = vld [vmem:[#allocation6 + $0x1b20] ss:$84 sps:$4 sm:$0xff]  }
 0x5b2   :  { %13365 = vmatprep.subr.bf16.mxu1 %v20631_v23  ;;  %v20682_v23 = vld [vmem:[#allocation6 + $0x1bc4] ss:$84 sps:$4 sm:$0xff]  }
 0x5b3   :  { %13120 = vmatpush1.bf16.msra.mxu0 %v20626_v24  ;;  %v20685_v24 = vld [vmem:[#allocation6 + $0x1bcc] ss:$84 sps:$4 sm:$0xff]  }
 0x5b4   :  { %13366 = vmatpush1.bf16.msra.mxu1 %v20629_v25  ;;  %13121 = vmatprep.subr.bf16.mxu0 %v20634_v27  ;;  %v20680_v25 = vld [vmem:[#allocation6 + $0x1bc0] ss:$84 sps:$4 sm:$0xff]   ;;  %v20683_v27 = vld [vmem:[#allocation6 + $0x1bc8] ss:$84 sps:$4 sm:$0xff]  }
 0x5b5   :  { %13367 = vmatprep.subr.bf16.mxu1 %v20637_v28  ;;  %v20688_v28 = vld [vmem:[#allocation6 + $0x1c6c] ss:$84 sps:$4 sm:$0xff]  }
 0x5b7   :  { %13122 = vmatpush1.bf16.msra.mxu0 %v20632_v29  ;;  %v20691_v29 = vld [vmem:[#allocation6 + $0x1c74] ss:$84 sps:$4 sm:$0xff]  }
 0x5b8   :  { %13368 = vmatpush1.bf16.msra.mxu1 %v20635_v31  ;;  %13123 = vmatprep.subr.bf16.mxu0 %v20640_v32  ;;  %v20686_v31 = vld [vmem:[#allocation6 + $0x1c68] ss:$84 sps:$4 sm:$0xff]   ;;  %v20689_v32 = vld [vmem:[#allocation6 + $0x1c70] ss:$84 sps:$4 sm:$0xff]  }
 0x5b9   :  { %13369 = vmatprep.subr.bf16.mxu1 %v20643_v5  ;;  %v20694_v5 = vld [vmem:[#allocation6 + $0x1d14] ss:$84 sps:$4 sm:$0xff]  }
 0x5bb   :  { %13124 = vmatpush1.bf16.msra.mxu0 %v20638_v35  ;;  %v20697_v35 = vld [vmem:[#allocation6 + $0x1d1c] ss:$84 sps:$4 sm:$0xff]  }
 0x5bc   :  { %13370 = vmatpush1.bf16.msra.mxu1 %v20641_v37  ;;  %13125 = vmatprep.subr.bf16.mxu0 %v20646_v55  ;;  %v20692_v37 = vld [vmem:[#allocation6 + $0x1d10] ss:$84 sps:$4 sm:$0xff]   ;;  %v20695_v55 = vld [vmem:[#allocation6 + $0x1d18] ss:$84 sps:$4 sm:$0xff]  }
 0x5bd   :  { %13371 = vmatprep.subr.bf16.mxu1 %v20649_v39  ;;  %v20700_v39 = vld [vmem:[#allocation6 + $0x1dbc] ss:$84 sps:$4 sm:$0xff]  }
 0x5bf   :  { %13126 = vmatpush1.bf16.msra.mxu0 %v20644_v40  ;;  %v20703_v40 = vld [vmem:[#allocation6 + $0x1dc4] ss:$84 sps:$4 sm:$0xff]  }
 0x5c0   :  { %13372 = vmatpush1.bf16.msra.mxu1 %v20647_v42  ;;  %13127 = vmatprep.subr.bf16.mxu0 %v20652_v13  ;;  %v20698_v42 = vld [vmem:[#allocation6 + $0x1db8] ss:$84 sps:$4 sm:$0xff]   ;;  %v20701_v13 = vld [vmem:[#allocation6 + $0x1dc0] ss:$84 sps:$4 sm:$0xff]  }
 0x5c1   :  { %13373 = vmatprep.subr.bf16.mxu1 %v20655_v44  ;;  %v20706_v44 = vld [vmem:[#allocation6 + $0x1e64] ss:$84 sps:$4 sm:$0xff]  }
 0x5c3   :  { %13128 = vmatpush1.bf16.msra.mxu0 %v20650_v45  ;;  %v20709_v45 = vld [vmem:[#allocation6 + $0x1e6c] ss:$84 sps:$4 sm:$0xff]  }
 0x5c4   :  { %13374 = vmatpush1.bf16.msra.mxu1 %v20653_v46  ;;  %13129 = vmatprep.subr.bf16.mxu0 %v20658_v33  ;;  %v20704_v46 = vld [vmem:[#allocation6 + $0x1e60] ss:$84 sps:$4 sm:$0xff]   ;;  %v20707_v33 = vld [vmem:[#allocation6 + $0x1e68] ss:$84 sps:$4 sm:$0xff]  }
 0x5c5   :  { %13375 = vmatprep.subr.bf16.mxu1 %v20661_v53  ;;  %v20712_v53 = vld [vmem:[#allocation6 + $0x1f0c] ss:$84 sps:$4 sm:$0xff]  }
 0x5c7   :  { %13130 = vmatpush1.bf16.msra.mxu0 %v20656_v49  ;;  %v20715_v49 = vld [vmem:[#allocation6 + $0x1f14] ss:$84 sps:$4 sm:$0xff]  }
 0x5c8   :  { %13376 = vmatpush1.bf16.msra.mxu1 %v20659_v54  ;;  %13131 = vmatprep.subr.bf16.mxu0 %v20664_v47  ;;  %v20710_v54 = vld [vmem:[#allocation6 + $0x1f08] ss:$84 sps:$4 sm:$0xff]   ;;  %v20713_v47 = vld [vmem:[#allocation6 + $0x1f10] ss:$84 sps:$4 sm:$0xff]  }
 0x5c9   :  { %13377 = vmatprep.subr.bf16.mxu1 %v20667_v57  ;;  %v20718_v57 = vld [vmem:[#allocation6 + $0x1fb4] ss:$84 sps:$4 sm:$0xff]  }
 0x5cb   :  { %13132 = vmatpush1.bf16.msra.mxu0 %v20662_v60  ;;  %v20721_v60 = vld [vmem:[#allocation6 + $0x1fbc] ss:$84 sps:$4 sm:$0xff]  }
 0x5cc   :  { %13378 = vmatpush1.bf16.msra.mxu1 %v20665_v3  ;;  %13133 = vmatprep.subr.bf16.mxu0 %v20670_v4  ;;  %v20716_v3 = vld [vmem:[#allocation6 + $0x1fb0] ss:$84 sps:$4 sm:$0xff]   ;;  %v20719_v4 = vld [vmem:[#allocation6 + $0x1fb8] ss:$84 sps:$4 sm:$0xff]  }
 0x5cd   :  { %13379 = vmatprep.subr.bf16.mxu1 %v20673_v6  ;;  %v20724_v6 = vld [vmem:[#allocation6 + $0x205c] ss:$84 sps:$4 sm:$0xff]  }
 0x5cf   :  { %13134 = vmatpush1.bf16.msra.mxu0 %v20668_v7  ;;  %v20727_v7 = vld [vmem:[#allocation6 + $0x2064] ss:$84 sps:$4 sm:$0xff]  }
 0x5d0   :  { %13380 = vmatpush1.bf16.msra.mxu1 %v20671_v12  ;;  %13135 = vmatprep.subr.bf16.mxu0 %v20676_v15  ;;  %v20722_v12 = vld [vmem:[#allocation6 + $0x2058] ss:$84 sps:$4 sm:$0xff]   ;;  %v20725_v15 = vld [vmem:[#allocation6 + $0x2060] ss:$84 sps:$4 sm:$0xff]  }
 0x5d1   :  { %13381 = vmatprep.subr.bf16.mxu1 %v20679_v19  ;;  %v20730_v19 = vld [vmem:[#allocation6 + $0x2104] ss:$84 sps:$4 sm:$0xff]  }
 0x5d3   :  { %13136 = vmatpush1.bf16.msra.mxu0 %v20674_v20  ;;  %v20733_v20 = vld [vmem:[#allocation6 + $0x210c] ss:$84 sps:$4 sm:$0xff]  }
 0x5d4   :  { %13382 = vmatpush1.bf16.msra.mxu1 %v20677_v22  ;;  %13137 = vmatprep.subr.bf16.mxu0 %v20682_v23  ;;  %v20728_v22 = vld [vmem:[#allocation6 + $0x2100] ss:$84 sps:$4 sm:$0xff]   ;;  %v20731_v23 = vld [vmem:[#allocation6 + $0x2108] ss:$84 sps:$4 sm:$0xff]  }
 0x5d5   :  { %13383 = vmatprep.subr.bf16.mxu1 %v20685_v24  ;;  %v20736_v24 = vld [vmem:[#allocation6 + $0x21ac] ss:$84 sps:$4 sm:$0xff]  }
 0x5d7   :  { %13138 = vmatpush1.bf16.msra.mxu0 %v20680_v25  ;;  %v20739_v25 = vld [vmem:[#allocation6 + $0x21b4] ss:$84 sps:$4 sm:$0xff]  }
 0x5d8   :  { %13384 = vmatpush1.bf16.msra.mxu1 %v20683_v27  ;;  %13139 = vmatprep.subr.bf16.mxu0 %v20688_v28  ;;  %v20734_v27 = vld [vmem:[#allocation6 + $0x21a8] ss:$84 sps:$4 sm:$0xff]   ;;  %v20737_v28 = vld [vmem:[#allocation6 + $0x21b0] ss:$84 sps:$4 sm:$0xff]  }
 0x5d9   :  { %13385 = vmatprep.subr.bf16.mxu1 %v20691_v29  ;;  %v20742_v29 = vld [vmem:[#allocation6 + $0x2254] ss:$84 sps:$4 sm:$0xff]  }
 0x5db   :  { %13140 = vmatpush1.bf16.msra.mxu0 %v20686_v31  ;;  %v20745_v31 = vld [vmem:[#allocation6 + $0x225c] ss:$84 sps:$4 sm:$0xff]  }
 0x5dc   :  { %13386 = vmatpush1.bf16.msra.mxu1 %v20689_v32  ;;  %13141 = vmatprep.subr.bf16.mxu0 %v20694_v5  ;;  %v20740_v32 = vld [vmem:[#allocation6 + $0x2250] ss:$84 sps:$4 sm:$0xff]   ;;  %v20743_v5 = vld [vmem:[#allocation6 + $0x2258] ss:$84 sps:$4 sm:$0xff]  }
 0x5dd   :  { %13387 = vmatprep.subr.bf16.mxu1 %v20697_v35  ;;  %v20748_v35 = vld [vmem:[#allocation6 + $0x22fc] ss:$84 sps:$4 sm:$0xff]  }
 0x5df   :  { %13142 = vmatpush1.bf16.msra.mxu0 %v20692_v37  ;;  %v20751_v37 = vld [vmem:[#allocation6 + $0x2304] ss:$84 sps:$4 sm:$0xff]  }
 0x5e0   :  { %13388 = vmatpush1.bf16.msra.mxu1 %v20695_v55  ;;  %13143 = vmatprep.subr.bf16.mxu0 %v20700_v39  ;;  %v20746_v55 = vld [vmem:[#allocation6 + $0x22f8] ss:$84 sps:$4 sm:$0xff]   ;;  %v20749_v39 = vld [vmem:[#allocation6 + $0x2300] ss:$84 sps:$4 sm:$0xff]  }
 0x5e1   :  { %13389 = vmatprep.subr.bf16.mxu1 %v20703_v40  ;;  %v20754_v40 = vld [vmem:[#allocation6 + $0x23a4] ss:$84 sps:$4 sm:$0xff]  }
 0x5e3   :  { %13144 = vmatpush1.bf16.msra.mxu0 %v20698_v42 }
 0x5e4   :  { %13390 = vmatpush1.bf16.msra.mxu1 %v20701_v13  ;;  %13145 = vmatprep.subr.bf16.mxu0 %v20706_v44  ;;  %v20757_v13 = vld [vmem:[#allocation6 + $0x23ac] ss:$84 sps:$4 sm:$0xff]  }
 0x5e5   :  { %13391 = vmatprep.subr.bf16.mxu1 %v20709_v45 }
 0x5e7   :  { %13146 = vmatpush1.bf16.msra.mxu0 %v20704_v46 }
 0x5e8   :  { %13392 = vmatpush1.bf16.msra.mxu1 %v20707_v33  ;;  %13147 = vmatprep.subr.bf16.mxu0 %v20712_v53  ;;  %v20752_v53 = vld [vmem:[#allocation6 + $0x23a0] ss:$84 sps:$4 sm:$0xff]  }
 0x5e9   :  { %13393 = vmatprep.subr.bf16.mxu1 %v20715_v49 }
 0x5eb   :  { %13148 = vmatpush1.bf16.msra.mxu0 %v20710_v54 }
 0x5ec   :  { %13394 = vmatpush1.bf16.msra.mxu1 %v20713_v47  ;;  %13158 = vmatprep.subr.bf16.mxu0 %v20718_v57  ;;  %v20755_v47 = vld [vmem:[#allocation6 + $0x23a8] ss:$84 sps:$4 sm:$0xff]   ;;  %v20760_v57 = vld [vmem:[#allocation6 + $0x244c] ss:$84 sps:$4 sm:$0xff]  }
 0x5ed   :  { %13404 = vmatprep.subr.bf16.mxu1 %v20721_v60 }
 0x5ee   :  { %13150 = vmatmul.mubr.bf16.vlgmr.msra.gmra.mrb[20].mxu0 %v22174_v34 }
 0x5ef   :  { %13396 = vmatmul.mubr.bf16.vlgmr.msra.gmra.mrb[28].mxu1 %v22174_v34  ;;  %13159 = vmatpush1.bf16.msra.mxu0 %v20716_v3  ;;  %v20763_v3 = vld [vmem:[#allocation6 + $0x2454] ss:$84 sps:$4 sm:$0xff]  }
 0x5f0   :  { %13190 = vmatprep.mubr.bf16.mxu0 %v22176_v38  ;;  %13405 = vmatpush1.bf16.msra.mxu1 %v20719_v4  ;;  %v20758_v4 = vld [vmem:[#allocation6 + $0x2448] ss:$84 sps:$4 sm:$0xff]  }
 0x5f1   :  { %13436 = vmatprep.mubr.bf16.mxu1 %v22176_v38  ;;  %13160 = vmatprep.subr.bf16.mxu0 %v20724_v6  ;;  %v20761_v6 = vld [vmem:[#allocation6 + $0x2450] ss:$84 sps:$4 sm:$0xff]  }
 0x5f2   :  { %13406 = vmatprep.subr.bf16.mxu1 %v20727_v7  ;;  %v20766_v7 = vld [vmem:[#allocation6 + $0x24f4] ss:$84 sps:$4 sm:$0xff]  }
 0x5f3   :  { %13161 = vmatpush1.bf16.msra.mxu0 %v20722_v12  ;;  %v20769_v12 = vld [vmem:[#allocation6 + $0x24fc] ss:$84 sps:$4 sm:$0xff]  }
 0x5f4   :  { %13407 = vmatpush1.bf16.msra.mxu1 %v20725_v15  ;;  %13162 = vmatprep.subr.bf16.mxu0 %v20730_v19  ;;  %v20764_v15 = vld [vmem:[#allocation6 + $0x24f0] ss:$84 sps:$4 sm:$0xff]   ;;  %v20767_v19 = vld [vmem:[#allocation6 + $0x24f8] ss:$84 sps:$4 sm:$0xff]  }
 0x5f5   :  { %13408 = vmatprep.subr.bf16.mxu1 %v20733_v20  ;;  %v20772_v20 = vld [vmem:[#allocation6 + $0x259c] ss:$84 sps:$4 sm:$0xff]  }
 0x5f7   :  { %13163 = vmatpush1.bf16.msra.mxu0 %v20728_v22  ;;  %v20775_v22 = vld [vmem:[#allocation6 + $0x25a4] ss:$84 sps:$4 sm:$0xff]  }
 0x5f8   :  { %13409 = vmatpush1.bf16.msra.mxu1 %v20731_v23  ;;  %13164 = vmatprep.subr.bf16.mxu0 %v20736_v24  ;;  %v20770_v23 = vld [vmem:[#allocation6 + $0x2598] ss:$84 sps:$4 sm:$0xff]   ;;  %v20773_v24 = vld [vmem:[#allocation6 + $0x25a0] ss:$84 sps:$4 sm:$0xff]  }
 0x5f9   :  { %13410 = vmatprep.subr.bf16.mxu1 %v20739_v25  ;;  %v20778_v25 = vld [vmem:[#allocation6 + $0x2644] ss:$84 sps:$4 sm:$0xff]  }
 0x5fb   :  { %13165 = vmatpush1.bf16.msra.mxu0 %v20734_v27  ;;  %v20781_v27 = vld [vmem:[#allocation6 + $0x264c] ss:$84 sps:$4 sm:$0xff]  }
 0x5fc   :  { %13411 = vmatpush1.bf16.msra.mxu1 %v20737_v28  ;;  %13166 = vmatprep.subr.bf16.mxu0 %v20742_v29  ;;  %v20776_v28 = vld [vmem:[#allocation6 + $0x2640] ss:$84 sps:$4 sm:$0xff]   ;;  %v20779_v29 = vld [vmem:[#allocation6 + $0x2648] ss:$84 sps:$4 sm:$0xff]  }
 0x5fd   :  { %13412 = vmatprep.subr.bf16.mxu1 %v20745_v31  ;;  %v20784_v31 = vld [vmem:[#allocation6 + $0x26ec] ss:$84 sps:$4 sm:$0xff]  }
 0x5ff   :  { %13167 = vmatpush1.bf16.msra.mxu0 %v20740_v32  ;;  %v20787_v32 = vld [vmem:[#allocation6 + $0x26f4] ss:$84 sps:$4 sm:$0xff]  }
 0x600   :  { %13413 = vmatpush1.bf16.msra.mxu1 %v20743_v5  ;;  %13168 = vmatprep.subr.bf16.mxu0 %v20748_v35  ;;  %v20782_v5 = vld [vmem:[#allocation6 + $0x26e8] ss:$84 sps:$4 sm:$0xff]   ;;  %v20785_v35 = vld [vmem:[#allocation6 + $0x26f0] ss:$84 sps:$4 sm:$0xff]  }
 0x601   :  { %v22299_v42 = vpop.f32.mrb[16].mxu0  ;;  %13414 = vmatprep.subr.bf16.mxu1 %v20751_v37  ;;  %v20790_v37 = vld [vmem:[#allocation6 + $0x2794] ss:$84 sps:$4 sm:$0xff]  }
 0x602   :  { %v22301_v44 = vpop.f32.mrb[24].mxu1  ;;  %v22303_v45 = vpop.f32.mrb[17].mxu0 }
 0x603   :  { %v22305_v46 = vpop.f32.mrb[25].mxu1  ;;  %v12786_v33 = vpop.f32.mrb[18].mxu0  ;;  %13169 = vmatpush1.bf16.msra.mxu0 %v20746_v55  ;;  %v20793_v55 = vld [vmem:[#allocation6 + $0x279c] ss:$84 sps:$4 sm:$0xff]  }
 0x604   :  { %v13032_v49 = vpop.f32.mrb[26].mxu1  ;;  %13415 = vmatpush1.bf16.msra.mxu1 %v20749_v39  ;;  %v12787_v54 = vpop.f32.mrb[19].mxu0  ;;  %13170 = vmatprep.subr.bf16.mxu0 %v20754_v40  ;;  %v20788_v39 = vld [vmem:[#allocation6 + $0x2790] ss:$84 sps:$4 sm:$0xff]   ;;  %v20791_v40 = vld [vmem:[#allocation6 + $0x2798] ss:$84 sps:$4 sm:$0xff]  }
 0x605   :  { %v13033_v60 = vpop.f32.mrb[27].mxu1  ;;  %13416 = vmatprep.subr.bf16.mxu1 %v20757_v13  ;;  %v20796_v13 = vld [vmem:[#allocation6 + $0x283c] ss:$84 sps:$4 sm:$0xff]   ;;  %v20799_v33 = vld [vmem:[#allocation6 + $0x2844] ss:$84 sps:$4 sm:$0xff]  }
 0x606   :  { %v20797_v49 = vld [vmem:[#allocation6 + $0x2840] ss:$84 sps:$4 sm:$0xff]   ;;  %v20802_v54 = vld [vmem:[#allocation6 + $0x28e4] ss:$84 sps:$4 sm:$0xff]   ;;  %v20803_v60 = vld [vmem:[#allocation6 + $0x28e8] ss:$84 sps:$4 sm:$0xff]  }
 0x607   :  { %13171 = vmatpush1.bf16.msra.mxu0 %v20752_v53  ;;  %v20794_v53 = vld [vmem:[#allocation6 + $0x2838] ss:$84 sps:$4 sm:$0xff]  }
 0x608   :  { %13417 = vmatpush1.bf16.msra.mxu1 %v20755_v47  ;;  %13172 = vmatprep.subr.bf16.mxu0 %v20760_v57  ;;  %v20805_v47 = vld [vmem:[#allocation6 + $0x28ec] ss:$84 sps:$4 sm:$0xff]  }
 0x609   :  { %13418 = vmatprep.subr.bf16.mxu1 %v20763_v3  ;;  %v20800_v57 = vld [vmem:[#allocation6 + $0x28e0] ss:$84 sps:$4 sm:$0xff]  }
 0x60a   :  { %v20808_v3 = vld [vmem:[#allocation6 + $0x298c] ss:$84 sps:$4 sm:$0xff]  }
 0x60b   :  { %13173 = vmatpush1.bf16.msra.mxu0 %v20758_v4  ;;  %v20811_v4 = vld [vmem:[#allocation6 + $0x2994] ss:$84 sps:$4 sm:$0xff]  }
 0x60c   :  { %13419 = vmatpush1.bf16.msra.mxu1 %v20761_v6  ;;  %13174 = vmatprep.subr.bf16.mxu0 %v20766_v7  ;;  %v20806_v6 = vld [vmem:[#allocation6 + $0x2988] ss:$84 sps:$4 sm:$0xff]   ;;  %v20809_v7 = vld [vmem:[#allocation6 + $0x2990] ss:$84 sps:$4 sm:$0xff]  }
 0x60d   :  { %13420 = vmatprep.subr.bf16.mxu1 %v20769_v12  ;;  %v20814_v12 = vld [vmem:[#allocation6 + $0x2a34] ss:$84 sps:$4 sm:$0xff]  }
 0x60f   :  { %13175 = vmatpush1.bf16.msra.mxu0 %v20764_v15  ;;  %v20817_v15 = vld [vmem:[#allocation6 + $0x2a3c] ss:$84 sps:$4 sm:$0xff]  }
 0x610   :  { %13421 = vmatpush1.bf16.msra.mxu1 %v20767_v19  ;;  %13176 = vmatprep.subr.bf16.mxu0 %v20772_v20  ;;  %v20812_v19 = vld [vmem:[#allocation6 + $0x2a30] ss:$84 sps:$4 sm:$0xff]   ;;  %v20815_v20 = vld [vmem:[#allocation6 + $0x2a38] ss:$84 sps:$4 sm:$0xff]  }
 0x611   :  { %13422 = vmatprep.subr.bf16.mxu1 %v20775_v22  ;;  %v20820_v22 = vld [vmem:[#allocation6 + $0x2adc] ss:$84 sps:$4 sm:$0xff]  }
 0x613   :  { %13177 = vmatpush1.bf16.msra.mxu0 %v20770_v23  ;;  %v20823_v23 = vld [vmem:[#allocation6 + $0x2ae4] ss:$84 sps:$4 sm:$0xff]  }
 0x614   :  { %13423 = vmatpush1.bf16.msra.mxu1 %v20773_v24  ;;  %13178 = vmatprep.subr.bf16.mxu0 %v20778_v25  ;;  %v20818_v24 = vld [vmem:[#allocation6 + $0x2ad8] ss:$84 sps:$4 sm:$0xff]   ;;  %v20821_v25 = vld [vmem:[#allocation6 + $0x2ae0] ss:$84 sps:$4 sm:$0xff]  }
 0x615   :  { %13424 = vmatprep.subr.bf16.mxu1 %v20781_v27  ;;  %v20826_v27 = vld [vmem:[#allocation6 + $0x2b84] ss:$84 sps:$4 sm:$0xff]  }
 0x617   :  { %13179 = vmatpush1.bf16.msra.mxu0 %v20776_v28  ;;  %v20829_v28 = vld [vmem:[#allocation6 + $0x2b8c] ss:$84 sps:$4 sm:$0xff]  }
 0x618   :  { %13425 = vmatpush1.bf16.msra.mxu1 %v20779_v29  ;;  %13180 = vmatprep.subr.bf16.mxu0 %v20784_v31  ;;  %v20824_v29 = vld [vmem:[#allocation6 + $0x2b80] ss:$84 sps:$4 sm:$0xff]   ;;  %v20827_v31 = vld [vmem:[#allocation6 + $0x2b88] ss:$84 sps:$4 sm:$0xff]  }
 0x619   :  { %13426 = vmatprep.subr.bf16.mxu1 %v20787_v32  ;;  %v20832_v32 = vld [vmem:[#allocation6 + $0x2c2c] ss:$84 sps:$4 sm:$0xff]  }
 0x61b   :  { %13181 = vmatpush1.bf16.msra.mxu0 %v20782_v5  ;;  %v20835_v5 = vld [vmem:[#allocation6 + $0x2c34] ss:$84 sps:$4 sm:$0xff]  }
 0x61c   :  { %13427 = vmatpush1.bf16.msra.mxu1 %v20785_v35  ;;  %13182 = vmatprep.subr.bf16.mxu0 %v20790_v37  ;;  %v20830_v35 = vld [vmem:[#allocation6 + $0x2c28] ss:$84 sps:$4 sm:$0xff]   ;;  %v20833_v37 = vld [vmem:[#allocation6 + $0x2c30] ss:$84 sps:$4 sm:$0xff]  }
 0x61d   :  { %13428 = vmatprep.subr.bf16.mxu1 %v20793_v55  ;;  %v20838_v55 = vld [vmem:[#allocation6 + $0x2cd4] ss:$84 sps:$4 sm:$0xff]  }
 0x61f   :  { %13183 = vmatpush1.bf16.msra.mxu0 %v20788_v39  ;;  %v20841_v39 = vld [vmem:[#allocation6 + $0x2cdc] ss:$84 sps:$4 sm:$0xff]  }
 0x620   :  { %13429 = vmatpush1.bf16.msra.mxu1 %v20791_v40  ;;  %13184 = vmatprep.subr.bf16.mxu0 %v20796_v13  ;;  %v20836_v40 = vld [vmem:[#allocation6 + $0x2cd0] ss:$84 sps:$4 sm:$0xff]   ;;  %v20839_v13 = vld [vmem:[#allocation6 + $0x2cd8] ss:$84 sps:$4 sm:$0xff]  }
 0x621   :  { %13430 = vmatprep.subr.bf16.mxu1 %v20799_v33  ;;  %v20844_v33 = vld [vmem:[#allocation6 + $0x2d7c] ss:$84 sps:$4 sm:$0xff]  }
 0x623   :  { %13185 = vmatpush1.bf16.msra.mxu0 %v20794_v53  ;;  %v20847_v53 = vld [vmem:[#allocation6 + $0x2d84] ss:$84 sps:$4 sm:$0xff]  }
 0x624   :  { %13431 = vmatpush1.bf16.msra.mxu1 %v20797_v49  ;;  %13186 = vmatprep.subr.bf16.mxu0 %v20802_v54  ;;  %v20842_v49 = vld [vmem:[#allocation6 + $0x2d78] ss:$84 sps:$4 sm:$0xff]   ;;  %v20845_v54 = vld [vmem:[#allocation6 + $0x2d80] ss:$84 sps:$4 sm:$0xff]  }
 0x625   :  { %13432 = vmatprep.subr.bf16.mxu1 %v20805_v47  ;;  %v20850_v47 = vld [vmem:[#allocation6 + $0x2e24] ss:$84 sps:$4 sm:$0xff]  }
 0x627   :  { %13187 = vmatpush1.bf16.msra.mxu0 %v20800_v57  ;;  %v20853_v57 = vld [vmem:[#allocation6 + $0x2e2c] ss:$84 sps:$4 sm:$0xff]  }
 0x628   :  { %13433 = vmatpush1.bf16.msra.mxu1 %v20803_v60  ;;  %13188 = vmatprep.subr.bf16.mxu0 %v20808_v3  ;;  %v20848_v60 = vld [vmem:[#allocation6 + $0x2e20] ss:$84 sps:$4 sm:$0xff]   ;;  %v20851_v3 = vld [vmem:[#allocation6 + $0x2e28] ss:$84 sps:$4 sm:$0xff]  }
 0x629   :  { %13434 = vmatprep.subr.bf16.mxu1 %v20811_v4  ;;  %v20856_v4 = vld [vmem:[#allocation6 + $0x2ecc] ss:$84 sps:$4 sm:$0xff]  }
 0x62b   :  { %13189 = vmatpush1.bf16.msra.mxu0 %v20806_v6  ;;  %v20859_v6 = vld [vmem:[#allocation6 + $0x2ed4] ss:$84 sps:$4 sm:$0xff]  }
 0x62c   :  { %13435 = vmatpush1.bf16.msra.mxu1 %v20809_v7  ;;  %13199 = vmatprep.subr.bf16.mxu0 %v20814_v12  ;;  %v20854_v7 = vld [vmem:[#allocation6 + $0x2ec8] ss:$84 sps:$4 sm:$0xff]   ;;  %v20857_v12 = vld [vmem:[#allocation6 + $0x2ed0] ss:$84 sps:$4 sm:$0xff]  }
 0x62d   :  { %13445 = vmatprep.subr.bf16.mxu1 %v20817_v15  ;;  %v20862_v15 = vld [vmem:[#allocation6 + $0x2f74] ss:$84 sps:$4 sm:$0xff]  }
 0x62e   :  { %13191 = vmatmul.mubr.bf16.vlgmr.msra.gmra.mrb[20].mxu0 %v22193_v52 }
 0x62f   :  { %13437 = vmatmul.mubr.bf16.vlgmr.msra.gmra.mrb[28].mxu1 %v22193_v52  ;;  %13200 = vmatpush1.bf16.msra.mxu0 %v20812_v19  ;;  %v20865_v19 = vld [vmem:[#allocation6 + $0x2f7c] ss:$84 sps:$4 sm:$0xff]  }
 0x630   :  { %13231 = vmatprep.mubr.bf16.mxu0 %v22195_v36  ;;  %13446 = vmatpush1.bf16.msra.mxu1 %v20815_v20  ;;  %v20860_v20 = vld [vmem:[#allocation6 + $0x2f70] ss:$84 sps:$4 sm:$0xff]  }
 0x631   :  { %13477 = vmatprep.mubr.bf16.mxu1 %v22195_v36  ;;  %13201 = vmatprep.subr.bf16.mxu0 %v20820_v22  ;;  %v20863_v22 = vld [vmem:[#allocation6 + $0x2f78] ss:$84 sps:$4 sm:$0xff]  }
 0x632   :  { %13447 = vmatprep.subr.bf16.mxu1 %v20823_v23  ;;  %v20868_v23 = vld [vmem:[#allocation6 + $0x301c] ss:$84 sps:$4 sm:$0xff]  }
 0x633   :  { %13202 = vmatpush1.bf16.msra.mxu0 %v20818_v24  ;;  %v20871_v24 = vld [vmem:[#allocation6 + $0x3024] ss:$84 sps:$4 sm:$0xff]  }
 0x634   :  { %13448 = vmatpush1.bf16.msra.mxu1 %v20821_v25  ;;  %13203 = vmatprep.subr.bf16.mxu0 %v20826_v27  ;;  %v20866_v25 = vld [vmem:[#allocation6 + $0x3018] ss:$84 sps:$4 sm:$0xff]   ;;  %v20869_v27 = vld [vmem:[#allocation6 + $0x3020] ss:$84 sps:$4 sm:$0xff]  }
 0x635   :  { %13449 = vmatprep.subr.bf16.mxu1 %v20829_v28  ;;  %v20874_v28 = vld [vmem:[#allocation6 + $0x30c4] ss:$84 sps:$4 sm:$0xff]  }
 0x637   :  { %13204 = vmatpush1.bf16.msra.mxu0 %v20824_v29  ;;  %v20877_v29 = vld [vmem:[#allocation6 + $0x30cc] ss:$84 sps:$4 sm:$0xff]  }
 0x638   :  { %13450 = vmatpush1.bf16.msra.mxu1 %v20827_v31  ;;  %13205 = vmatprep.subr.bf16.mxu0 %v20832_v32  ;;  %v20872_v31 = vld [vmem:[#allocation6 + $0x30c0] ss:$84 sps:$4 sm:$0xff]   ;;  %v20875_v32 = vld [vmem:[#allocation6 + $0x30c8] ss:$84 sps:$4 sm:$0xff]  }
 0x639   :  { %13451 = vmatprep.subr.bf16.mxu1 %v20835_v5  ;;  %v20880_v5 = vld [vmem:[#allocation6 + $0x316c] ss:$84 sps:$4 sm:$0xff]  }
 0x63b   :  { %13206 = vmatpush1.bf16.msra.mxu0 %v20830_v35  ;;  %v20883_v35 = vld [vmem:[#allocation6 + $0x3174] ss:$84 sps:$4 sm:$0xff]  }
 0x63c   :  { %13452 = vmatpush1.bf16.msra.mxu1 %v20833_v37  ;;  %13207 = vmatprep.subr.bf16.mxu0 %v20838_v55  ;;  %v20878_v37 = vld [vmem:[#allocation6 + $0x3168] ss:$84 sps:$4 sm:$0xff]   ;;  %v20881_v55 = vld [vmem:[#allocation6 + $0x3170] ss:$84 sps:$4 sm:$0xff]  }
 0x63d   :  { %13453 = vmatprep.subr.bf16.mxu1 %v20841_v39  ;;  %v20886_v39 = vld [vmem:[#allocation6 + $0x3214] ss:$84 sps:$4 sm:$0xff]  }
 0x63f   :  { %13208 = vmatpush1.bf16.msra.mxu0 %v20836_v40  ;;  %v20889_v40 = vld [vmem:[#allocation6 + $0x321c] ss:$84 sps:$4 sm:$0xff]  }
 0x640   :  { %13454 = vmatpush1.bf16.msra.mxu1 %v20839_v13  ;;  %13209 = vmatprep.subr.bf16.mxu0 %v20844_v33  ;;  %v20884_v13 = vld [vmem:[#allocation6 + $0x3210] ss:$84 sps:$4 sm:$0xff]   ;;  %v20887_v33 = vld [vmem:[#allocation6 + $0x3218] ss:$84 sps:$4 sm:$0xff]  }
 0x641   :  { %13455 = vmatprep.subr.bf16.mxu1 %v20847_v53  ;;  %v20892_v53 = vld [vmem:[#allocation6 + $0x32bc] ss:$84 sps:$4 sm:$0xff]  }
 0x643   :  { %13210 = vmatpush1.bf16.msra.mxu0 %v20842_v49  ;;  %v20895_v49 = vld [vmem:[#allocation6 + $0x32c4] ss:$84 sps:$4 sm:$0xff]  }
 0x644   :  { %13456 = vmatpush1.bf16.msra.mxu1 %v20845_v54  ;;  %13211 = vmatprep.subr.bf16.mxu0 %v20850_v47  ;;  %v20890_v54 = vld [vmem:[#allocation6 + $0x32b8] ss:$84 sps:$4 sm:$0xff]   ;;  %v20893_v47 = vld [vmem:[#allocation6 + $0x32c0] ss:$84 sps:$4 sm:$0xff]  }
 0x645   :  { %13457 = vmatprep.subr.bf16.mxu1 %v20853_v57  ;;  %v20898_v57 = vld [vmem:[#allocation6 + $0x3364] ss:$84 sps:$4 sm:$0xff]  }
 0x647   :  { %13212 = vmatpush1.bf16.msra.mxu0 %v20848_v60  ;;  %v20901_v60 = vld [vmem:[#allocation6 + $0x336c] ss:$84 sps:$4 sm:$0xff]  }
 0x648   :  { %13458 = vmatpush1.bf16.msra.mxu1 %v20851_v3  ;;  %13213 = vmatprep.subr.bf16.mxu0 %v20856_v4  ;;  %v20896_v3 = vld [vmem:[#allocation6 + $0x3360] ss:$84 sps:$4 sm:$0xff]   ;;  %v20899_v4 = vld [vmem:[#allocation6 + $0x3368] ss:$84 sps:$4 sm:$0xff]  }
 0x649   :  { %13459 = vmatprep.subr.bf16.mxu1 %v20859_v6  ;;  %v20904_v6 = vld [vmem:[#allocation6 + $0x340c] ss:$84 sps:$4 sm:$0xff]  }
 0x64b   :  { %13214 = vmatpush1.bf16.msra.mxu0 %v20854_v7  ;;  %v20907_v7 = vld [vmem:[#allocation6 + $0x3414] ss:$84 sps:$4 sm:$0xff]  }
 0x64c   :  { %13460 = vmatpush1.bf16.msra.mxu1 %v20857_v12  ;;  %13215 = vmatprep.subr.bf16.mxu0 %v20862_v15  ;;  %v20902_v12 = vld [vmem:[#allocation6 + $0x3408] ss:$84 sps:$4 sm:$0xff]   ;;  %v20905_v15 = vld [vmem:[#allocation6 + $0x3410] ss:$84 sps:$4 sm:$0xff]  }
 0x64d   :  { %13461 = vmatprep.subr.bf16.mxu1 %v20865_v19  ;;  %v20910_v19 = vld [vmem:[#allocation6 + $0x34b4] ss:$84 sps:$4 sm:$0xff]  }
 0x64f   :  { %13216 = vmatpush1.bf16.msra.mxu0 %v20860_v20  ;;  %v20913_v20 = vld [vmem:[#allocation6 + $0x34bc] ss:$84 sps:$4 sm:$0xff]  }
 0x650   :  { %13462 = vmatpush1.bf16.msra.mxu1 %v20863_v22  ;;  %13217 = vmatprep.subr.bf16.mxu0 %v20868_v23  ;;  %v20908_v22 = vld [vmem:[#allocation6 + $0x34b0] ss:$84 sps:$4 sm:$0xff]   ;;  %v20911_v23 = vld [vmem:[#allocation6 + $0x34b8] ss:$84 sps:$4 sm:$0xff]  }
 0x651   :  { %13463 = vmatprep.subr.bf16.mxu1 %v20871_v24  ;;  %v20916_v24 = vld [vmem:[#allocation6 + $0x355c] ss:$84 sps:$4 sm:$0xff]  }
 0x653   :  { %13218 = vmatpush1.bf16.msra.mxu0 %v20866_v25  ;;  %v20919_v25 = vld [vmem:[#allocation6 + $0x3564] ss:$84 sps:$4 sm:$0xff]  }
 0x654   :  { %13464 = vmatpush1.bf16.msra.mxu1 %v20869_v27  ;;  %13219 = vmatprep.subr.bf16.mxu0 %v20874_v28  ;;  %v20914_v27 = vld [vmem:[#allocation6 + $0x3558] ss:$84 sps:$4 sm:$0xff]   ;;  %v20917_v28 = vld [vmem:[#allocation6 + $0x3560] ss:$84 sps:$4 sm:$0xff]  }
 0x655   :  { %13465 = vmatprep.subr.bf16.mxu1 %v20877_v29  ;;  %v20922_v29 = vld [vmem:[#allocation6 + $0x3604] ss:$84 sps:$4 sm:$0xff]  }
 0x657   :  { %13220 = vmatpush1.bf16.msra.mxu0 %v20872_v31  ;;  %v20925_v31 = vld [vmem:[#allocation6 + $0x360c] ss:$84 sps:$4 sm:$0xff]  }
 0x658   :  { %13466 = vmatpush1.bf16.msra.mxu1 %v20875_v32  ;;  %13221 = vmatprep.subr.bf16.mxu0 %v20880_v5  ;;  %v20920_v32 = vld [vmem:[#allocation6 + $0x3600] ss:$84 sps:$4 sm:$0xff]   ;;  %v20923_v5 = vld [vmem:[#allocation6 + $0x3608] ss:$84 sps:$4 sm:$0xff]  }
 0x659   :  { %13467 = vmatprep.subr.bf16.mxu1 %v20883_v35  ;;  %v20928_v35 = vld [vmem:[#allocation6 + $0x36ac] ss:$84 sps:$4 sm:$0xff]  }
 0x65b   :  { %13222 = vmatpush1.bf16.msra.mxu0 %v20878_v37  ;;  %v20931_v37 = vld [vmem:[#allocation6 + $0x36b4] ss:$84 sps:$4 sm:$0xff]  }
 0x65c   :  { %13468 = vmatpush1.bf16.msra.mxu1 %v20881_v55  ;;  %13223 = vmatprep.subr.bf16.mxu0 %v20886_v39  ;;  %v20926_v55 = vld [vmem:[#allocation6 + $0x36a8] ss:$84 sps:$4 sm:$0xff]   ;;  %v20929_v39 = vld [vmem:[#allocation6 + $0x36b0] ss:$84 sps:$4 sm:$0xff]  }
 0x65d   :  { %13469 = vmatprep.subr.bf16.mxu1 %v20889_v40  ;;  %v20934_v40 = vld [vmem:[#allocation6 + $0x44] ss:$84 sps:$4 sm:$0xff]  }
 0x65f   :  { %13224 = vmatpush1.bf16.msra.mxu0 %v20884_v13  ;;  %v20937_v13 = vld [vmem:[#allocation6 + $0x4c] ss:$84 sps:$4 sm:$0xff]  }
 0x660   :  { %13470 = vmatpush1.bf16.msra.mxu1 %v20887_v33  ;;  %13225 = vmatprep.subr.bf16.mxu0 %v20892_v53  ;;  %v20932_v33 = vld [vmem:[#allocation6 + $0x40] ss:$84 sps:$4 sm:$0xff]   ;;  %v20935_v53 = vld [vmem:[#allocation6 + $0x48] ss:$84 sps:$4 sm:$0xff]  }
 0x661   :  { %13471 = vmatprep.subr.bf16.mxu1 %v20895_v49  ;;  %v20940_v49 = vld [vmem:[#allocation6 + $0xec] ss:$84 sps:$4 sm:$0xff]  }
 0x663   :  { %13226 = vmatpush1.bf16.msra.mxu0 %v20890_v54  ;;  %v20943_v54 = vld [vmem:[#allocation6 + $0xf4] ss:$84 sps:$4 sm:$0xff]  }
 0x664   :  { %13472 = vmatpush1.bf16.msra.mxu1 %v20893_v47  ;;  %13227 = vmatprep.subr.bf16.mxu0 %v20898_v57  ;;  %v20938_v47 = vld [vmem:[#allocation6 + $0xe8] ss:$84 sps:$4 sm:$0xff]   ;;  %v20941_v57 = vld [vmem:[#allocation6 + $0xf0] ss:$84 sps:$4 sm:$0xff]  }
 0x665   :  { %13473 = vmatprep.subr.bf16.mxu1 %v20901_v60  ;;  %v20946_v60 = vld [vmem:[#allocation6 + $0x194] ss:$84 sps:$4 sm:$0xff]  }
 0x667   :  { %13228 = vmatpush1.bf16.msra.mxu0 %v20896_v3  ;;  %v20949_v3 = vld [vmem:[#allocation6 + $0x19c] ss:$84 sps:$4 sm:$0xff]  }
 0x668   :  { %13474 = vmatpush1.bf16.msra.mxu1 %v20899_v4  ;;  %13229 = vmatprep.subr.bf16.mxu0 %v20904_v6  ;;  %v20944_v4 = vld [vmem:[#allocation6 + $0x190] ss:$84 sps:$4 sm:$0xff]   ;;  %v20947_v6 = vld [vmem:[#allocation6 + $0x198] ss:$84 sps:$4 sm:$0xff]  }
 0x669   :  { %13475 = vmatprep.subr.bf16.mxu1 %v20907_v7  ;;  %v20952_v7 = vld [vmem:[#allocation6 + $0x23c] ss:$84 sps:$4 sm:$0xff]  }
 0x66b   :  { %13230 = vmatpush1.bf16.msra.mxu0 %v20902_v12  ;;  %v20955_v12 = vld [vmem:[#allocation6 + $0x244] ss:$84 sps:$4 sm:$0xff]  }
 0x66c   :  { %13476 = vmatpush1.bf16.msra.mxu1 %v20905_v15  ;;  %13240 = vmatprep.subr.bf16.mxu0 %v20910_v19  ;;  %v20950_v15 = vld [vmem:[#allocation6 + $0x238] ss:$84 sps:$4 sm:$0xff]   ;;  %v20953_v19 = vld [vmem:[#allocation6 + $0x240] ss:$84 sps:$4 sm:$0xff]  }
 0x66d   :  { %13486 = vmatprep.subr.bf16.mxu1 %v20913_v20  ;;  %v20958_v20 = vld [vmem:[#allocation6 + $0x2e4] ss:$84 sps:$4 sm:$0xff]  }
 0x66e   :  { %13232 = vmatmul.mubr.bf16.vlgmr.msra.gmra.mrb[20].mxu0 %v22204_v51 }
 0x66f   :  { %13478 = vmatmul.mubr.bf16.vlgmr.msra.gmra.mrb[28].mxu1 %v22204_v51  ;;  %13241 = vmatpush1.bf16.msra.mxu0 %v20908_v22  ;;  %v20961_v22 = vld [vmem:[#allocation6 + $0x2ec] ss:$84 sps:$4 sm:$0xff]  }
 0x670   :  { %13487 = vmatpush1.bf16.msra.mxu1 %v20911_v23  ;;  %13242 = vmatprep.subr.bf16.mxu0 %v20916_v24  ;;  %v20956_v23 = vld [vmem:[#allocation6 + $0x2e0] ss:$84 sps:$4 sm:$0xff]   ;;  %v20959_v24 = vld [vmem:[#allocation6 + $0x2e8] ss:$84 sps:$4 sm:$0xff]  }
 0x671   :  { %13488 = vmatprep.subr.bf16.mxu1 %v20919_v25  ;;  %13272 = vmatprep.mubr.bf16.mxu0 %v21898_v0  ;;  %v20964_v25 = vld [vmem:[#allocation6 + $0x38c] ss:$84 sps:$4 sm:$0xff]  }
 0x672   :  { %13518 = vmatprep.mubr.bf16.mxu1 %v21898_v0 }
 0x673   :  { %13243 = vmatpush1.bf16.msra.mxu0 %v20914_v27  ;;  %v20967_v27 = vld [vmem:[#allocation6 + $0x394] ss:$84 sps:$4 sm:$0xff]  }
 0x674   :  { %13489 = vmatpush1.bf16.msra.mxu1 %v20917_v28  ;;  %13244 = vmatprep.subr.bf16.mxu0 %v20922_v29  ;;  %v20962_v28 = vld [vmem:[#allocation6 + $0x388] ss:$84 sps:$4 sm:$0xff]   ;;  %v20965_v29 = vld [vmem:[#allocation6 + $0x390] ss:$84 sps:$4 sm:$0xff]  }
 0x675   :  { %13490 = vmatprep.subr.bf16.mxu1 %v20925_v31  ;;  %v20970_v31 = vld [vmem:[#allocation6 + $0x434] ss:$84 sps:$4 sm:$0xff]  }
 0x677   :  { %13245 = vmatpush1.bf16.msra.mxu0 %v20920_v32  ;;  %v20973_v32 = vld [vmem:[#allocation6 + $0x43c] ss:$84 sps:$4 sm:$0xff]  }
 0x678   :  { %13491 = vmatpush1.bf16.msra.mxu1 %v20923_v5  ;;  %13246 = vmatprep.subr.bf16.mxu0 %v20928_v35  ;;  %v20968_v5 = vld [vmem:[#allocation6 + $0x430] ss:$84 sps:$4 sm:$0xff]   ;;  %v20971_v35 = vld [vmem:[#allocation6 + $0x438] ss:$84 sps:$4 sm:$0xff]  }
 0x679   :  { %13492 = vmatprep.subr.bf16.mxu1 %v20931_v37  ;;  %v20976_v37 = vld [vmem:[#allocation6 + $0x4dc] ss:$84 sps:$4 sm:$0xff]  }
 0x67b   :  { %13247 = vmatpush1.bf16.msra.mxu0 %v20926_v55  ;;  %v20979_v55 = vld [vmem:[#allocation6 + $0x4e4] ss:$84 sps:$4 sm:$0xff]  }
 0x67c   :  { %13493 = vmatpush1.bf16.msra.mxu1 %v20929_v39  ;;  %13527 = vmatprep.subr.bf16.mxu0 %v20934_v40  ;;  %v20974_v39 = vld [vmem:[#allocation6 + $0x4d8] ss:$84 sps:$4 sm:$0xff]   ;;  %v20977_v40 = vld [vmem:[#allocation6 + $0x4e0] ss:$84 sps:$4 sm:$0xff]  }
 0x67d   :  { %13773 = vmatprep.subr.bf16.mxu1 %v20937_v13  ;;  %v20982_v13 = vld [vmem:[#allocation6 + $0x584] ss:$84 sps:$4 sm:$0xff]  }
 0x67e   :  { %18029 = vmatmul.mubr.msk.bf16.vlgmr.msra.gmra.mrb[20].mxu0 %vm11555_vm3, %v22211_v17 }
 0x67f   :  { %18030 = vmatmul.mubr.msk.bf16.vlgmr.msra.gmra.mrb[28].mxu1 %vm11555_vm3, %v22211_v17  ;;  %13528 = vmatpush1.bf16.msra.mxu0 %v20932_v33  ;;  %v20985_v33 = vld [vmem:[#allocation6 + $0x58c] ss:$84 sps:$4 sm:$0xff]  }
 0x680   :  { %13559 = vmatprep.mubr.bf16.mxu0 %v22106_v63  ;;  %13774 = vmatpush1.bf16.msra.mxu1 %v20935_v53  ;;  %v20980_v53 = vld [vmem:[#allocation6 + $0x580] ss:$84 sps:$4 sm:$0xff]  }
 0x681   :  { %13805 = vmatprep.mubr.bf16.mxu1 %v22106_v63  ;;  %13529 = vmatprep.subr.bf16.mxu0 %v20940_v49  ;;  %v20983_v49 = vld [vmem:[#allocation6 + $0x588] ss:$84 sps:$4 sm:$0xff]  }
 0x682   :  { %13775 = vmatprep.subr.bf16.mxu1 %v20943_v54  ;;  %v20988_v54 = vld [vmem:[#allocation6 + $0x62c] ss:$84 sps:$4 sm:$0xff]  }
 0x683   :  { %13530 = vmatpush1.bf16.msra.mxu0 %v20938_v47  ;;  %v20991_v47 = vld [vmem:[#allocation6 + $0x634] ss:$84 sps:$4 sm:$0xff]  }
 0x684   :  { %13776 = vmatpush1.bf16.msra.mxu1 %v20941_v57  ;;  %13531 = vmatprep.subr.bf16.mxu0 %v20946_v60  ;;  %v20986_v57 = vld [vmem:[#allocation6 + $0x628] ss:$84 sps:$4 sm:$0xff]   ;;  %v20989_v60 = vld [vmem:[#allocation6 + $0x630] ss:$84 sps:$4 sm:$0xff]  }
 0x685   :  { %13777 = vmatprep.subr.bf16.mxu1 %v20949_v3  ;;  %v20994_v3 = vld [vmem:[#allocation6 + $0x6d4] ss:$84 sps:$4 sm:$0xff]  }
 0x687   :  { %13532 = vmatpush1.bf16.msra.mxu0 %v20944_v4  ;;  %v20997_v4 = vld [vmem:[#allocation6 + $0x6dc] ss:$84 sps:$4 sm:$0xff]  }
 0x688   :  { %13778 = vmatpush1.bf16.msra.mxu1 %v20947_v6  ;;  %13533 = vmatprep.subr.bf16.mxu0 %v20952_v7  ;;  %v20992_v6 = vld [vmem:[#allocation6 + $0x6d0] ss:$84 sps:$4 sm:$0xff]   ;;  %v20995_v7 = vld [vmem:[#allocation6 + $0x6d8] ss:$84 sps:$4 sm:$0xff]  }
 0x689   :  { %13779 = vmatprep.subr.bf16.mxu1 %v20955_v12  ;;  %v21000_v12 = vld [vmem:[#allocation6 + $0x77c] ss:$84 sps:$4 sm:$0xff]  }
 0x68b   :  { %13534 = vmatpush1.bf16.msra.mxu0 %v20950_v15  ;;  %v21003_v15 = vld [vmem:[#allocation6 + $0x784] ss:$84 sps:$4 sm:$0xff]  }
 0x68c   :  { %13780 = vmatpush1.bf16.msra.mxu1 %v20953_v19  ;;  %13535 = vmatprep.subr.bf16.mxu0 %v20958_v20  ;;  %v20998_v19 = vld [vmem:[#allocation6 + $0x778] ss:$84 sps:$4 sm:$0xff]   ;;  %v21001_v20 = vld [vmem:[#allocation6 + $0x780] ss:$84 sps:$4 sm:$0xff]  }
 0x68d   :  { %13781 = vmatprep.subr.bf16.mxu1 %v20961_v22  ;;  %v21006_v22 = vld [vmem:[#allocation6 + $0x824] ss:$84 sps:$4 sm:$0xff]  }
 0x68f   :  { %13536 = vmatpush1.bf16.msra.mxu0 %v20956_v23  ;;  %v21009_v23 = vld [vmem:[#allocation6 + $0x82c] ss:$84 sps:$4 sm:$0xff]  }
 0x690   :  { %13782 = vmatpush1.bf16.msra.mxu1 %v20959_v24  ;;  %13537 = vmatprep.subr.bf16.mxu0 %v20964_v25  ;;  %v21004_v24 = vld [vmem:[#allocation6 + $0x820] ss:$84 sps:$4 sm:$0xff]   ;;  %v21007_v25 = vld [vmem:[#allocation6 + $0x828] ss:$84 sps:$4 sm:$0xff]  }
 0x691   :  { %13783 = vmatprep.subr.bf16.mxu1 %v20967_v27  ;;  %v21012_v27 = vld [vmem:[#allocation6 + $0x8cc] ss:$84 sps:$4 sm:$0xff]  }
 0x693   :  { %13538 = vmatpush1.bf16.msra.mxu0 %v20962_v28  ;;  %v21015_v28 = vld [vmem:[#allocation6 + $0x8d4] ss:$84 sps:$4 sm:$0xff]  }
 0x694   :  { %13784 = vmatpush1.bf16.msra.mxu1 %v20965_v29  ;;  %13539 = vmatprep.subr.bf16.mxu0 %v20970_v31  ;;  %v21010_v29 = vld [vmem:[#allocation6 + $0x8c8] ss:$84 sps:$4 sm:$0xff]   ;;  %v21013_v31 = vld [vmem:[#allocation6 + $0x8d0] ss:$84 sps:$4 sm:$0xff]  }
 0x695   :  { %13785 = vmatprep.subr.bf16.mxu1 %v20973_v32  ;;  %v21018_v32 = vld [vmem:[#allocation6 + $0x974] ss:$84 sps:$4 sm:$0xff]  }
 0x697   :  { %13540 = vmatpush1.bf16.msra.mxu0 %v20968_v5  ;;  %v21021_v5 = vld [vmem:[#allocation6 + $0x97c] ss:$84 sps:$4 sm:$0xff]  }
 0x698   :  { %13786 = vmatpush1.bf16.msra.mxu1 %v20971_v35  ;;  %13541 = vmatprep.subr.bf16.mxu0 %v20976_v37  ;;  %v21016_v35 = vld [vmem:[#allocation6 + $0x970] ss:$84 sps:$4 sm:$0xff]   ;;  %v21019_v37 = vld [vmem:[#allocation6 + $0x978] ss:$84 sps:$4 sm:$0xff]  }
 0x699   :  { %13787 = vmatprep.subr.bf16.mxu1 %v20979_v55  ;;  %v21024_v55 = vld [vmem:[#allocation6 + $0xa1c] ss:$84 sps:$4 sm:$0xff]  }
 0x69b   :  { %13542 = vmatpush1.bf16.msra.mxu0 %v20974_v39  ;;  %v21027_v39 = vld [vmem:[#allocation6 + $0xa24] ss:$84 sps:$4 sm:$0xff]  }
 0x69c   :  { %13788 = vmatpush1.bf16.msra.mxu1 %v20977_v40  ;;  %13543 = vmatprep.subr.bf16.mxu0 %v20982_v13  ;;  %v21022_v40 = vld [vmem:[#allocation6 + $0xa18] ss:$84 sps:$4 sm:$0xff]   ;;  %v21025_v13 = vld [vmem:[#allocation6 + $0xa20] ss:$84 sps:$4 sm:$0xff]  }
 0x69d   :  { %13789 = vmatprep.subr.bf16.mxu1 %v20985_v33  ;;  %v21030_v33 = vld [vmem:[#allocation6 + $0xac4] ss:$84 sps:$4 sm:$0xff]  }
 0x69f   :  { %13544 = vmatpush1.bf16.msra.mxu0 %v20980_v53  ;;  %v21033_v53 = vld [vmem:[#allocation6 + $0xacc] ss:$84 sps:$4 sm:$0xff]  }
 0x6a0   :  { %13790 = vmatpush1.bf16.msra.mxu1 %v20983_v49  ;;  %13545 = vmatprep.subr.bf16.mxu0 %v20988_v54  ;;  %v21028_v49 = vld [vmem:[#allocation6 + $0xac0] ss:$84 sps:$4 sm:$0xff]   ;;  %v21031_v54 = vld [vmem:[#allocation6 + $0xac8] ss:$84 sps:$4 sm:$0xff]  }
 0x6a1   :  { %13791 = vmatprep.subr.bf16.mxu1 %v20991_v47  ;;  %v21036_v47 = vld [vmem:[#allocation6 + $0xb6c] ss:$84 sps:$4 sm:$0xff]  }
 0x6a3   :  { %13546 = vmatpush1.bf16.msra.mxu0 %v20986_v57  ;;  %v21039_v57 = vld [vmem:[#allocation6 + $0xb74] ss:$84 sps:$4 sm:$0xff]  }
 0x6a4   :  { %13792 = vmatpush1.bf16.msra.mxu1 %v20989_v60  ;;  %13547 = vmatprep.subr.bf16.mxu0 %v20994_v3  ;;  %v21034_v60 = vld [vmem:[#allocation6 + $0xb68] ss:$84 sps:$4 sm:$0xff]   ;;  %v21037_v3 = vld [vmem:[#allocation6 + $0xb70] ss:$84 sps:$4 sm:$0xff]  }
 0x6a5   :  { %13793 = vmatprep.subr.bf16.mxu1 %v20997_v4  ;;  %v21042_v4 = vld [vmem:[#allocation6 + $0xc14] ss:$84 sps:$4 sm:$0xff]  }
 0x6a7   :  { %13548 = vmatpush1.bf16.msra.mxu0 %v20992_v6  ;;  %v21045_v6 = vld [vmem:[#allocation6 + $0xc1c] ss:$84 sps:$4 sm:$0xff]  }
 0x6a8   :  { %13794 = vmatpush1.bf16.msra.mxu1 %v20995_v7  ;;  %13549 = vmatprep.subr.bf16.mxu0 %v21000_v12  ;;  %v21040_v7 = vld [vmem:[#allocation6 + $0xc10] ss:$84 sps:$4 sm:$0xff]   ;;  %v21043_v12 = vld [vmem:[#allocation6 + $0xc18] ss:$84 sps:$4 sm:$0xff]  }
 0x6a9   :  { %13795 = vmatprep.subr.bf16.mxu1 %v21003_v15  ;;  %v21048_v15 = vld [vmem:[#allocation6 + $0xcbc] ss:$84 sps:$4 sm:$0xff]  }
 0x6ab   :  { %13550 = vmatpush1.bf16.msra.mxu0 %v20998_v19  ;;  %v21051_v19 = vld [vmem:[#allocation6 + $0xcc4] ss:$84 sps:$4 sm:$0xff]  }
 0x6ac   :  { %13796 = vmatpush1.bf16.msra.mxu1 %v21001_v20  ;;  %13551 = vmatprep.subr.bf16.mxu0 %v21006_v22  ;;  %v21046_v20 = vld [vmem:[#allocation6 + $0xcb8] ss:$84 sps:$4 sm:$0xff]   ;;  %v21049_v22 = vld [vmem:[#allocation6 + $0xcc0] ss:$84 sps:$4 sm:$0xff]  }
 0x6ad   :  { %13797 = vmatprep.subr.bf16.mxu1 %v21009_v23  ;;  %v21054_v23 = vld [vmem:[#allocation6 + $0xd64] ss:$84 sps:$4 sm:$0xff]  }
 0x6af   :  { %13552 = vmatpush1.bf16.msra.mxu0 %v21004_v24  ;;  %v21057_v24 = vld [vmem:[#allocation6 + $0xd6c] ss:$84 sps:$4 sm:$0xff]  }
 0x6b0   :  { %13798 = vmatpush1.bf16.msra.mxu1 %v21007_v25  ;;  %13553 = vmatprep.subr.bf16.mxu0 %v21012_v27  ;;  %v21052_v25 = vld [vmem:[#allocation6 + $0xd60] ss:$84 sps:$4 sm:$0xff]   ;;  %v21055_v27 = vld [vmem:[#allocation6 + $0xd68] ss:$84 sps:$4 sm:$0xff]  }
 0x6b1   :  { %13799 = vmatprep.subr.bf16.mxu1 %v21015_v28  ;;  %v21060_v28 = vld [vmem:[#allocation6 + $0xe0c] ss:$84 sps:$4 sm:$0xff]  }
 0x6b3   :  { %13554 = vmatpush1.bf16.msra.mxu0 %v21010_v29  ;;  %v21063_v29 = vld [vmem:[#allocation6 + $0xe14] ss:$84 sps:$4 sm:$0xff]  }
 0x6b4   :  { %13800 = vmatpush1.bf16.msra.mxu1 %v21013_v31  ;;  %13555 = vmatprep.subr.bf16.mxu0 %v21018_v32  ;;  %v21058_v31 = vld [vmem:[#allocation6 + $0xe08] ss:$84 sps:$4 sm:$0xff]   ;;  %v21061_v32 = vld [vmem:[#allocation6 + $0xe10] ss:$84 sps:$4 sm:$0xff]  }
 0x6b5   :  { %13801 = vmatprep.subr.bf16.mxu1 %v21021_v5  ;;  %v21066_v5 = vld [vmem:[#allocation6 + $0xeb4] ss:$84 sps:$4 sm:$0xff]  }
 0x6b7   :  { %13556 = vmatpush1.bf16.msra.mxu0 %v21016_v35  ;;  %v21069_v35 = vld [vmem:[#allocation6 + $0xebc] ss:$84 sps:$4 sm:$0xff]  }
 0x6b8   :  { %13802 = vmatpush1.bf16.msra.mxu1 %v21019_v37  ;;  %13557 = vmatprep.subr.bf16.mxu0 %v21024_v55  ;;  %v21064_v37 = vld [vmem:[#allocation6 + $0xeb0] ss:$84 sps:$4 sm:$0xff]   ;;  %v21067_v55 = vld [vmem:[#allocation6 + $0xeb8] ss:$84 sps:$4 sm:$0xff]  }
 0x6b9   :  { %13803 = vmatprep.subr.bf16.mxu1 %v21027_v39  ;;  %v21072_v39 = vld [vmem:[#allocation6 + $0xf5c] ss:$84 sps:$4 sm:$0xff]  }
 0x6bb   :  { %13558 = vmatpush1.bf16.msra.mxu0 %v21022_v40  ;;  %v21075_v40 = vld [vmem:[#allocation6 + $0xf64] ss:$84 sps:$4 sm:$0xff]  }
 0x6bc   :  { %13804 = vmatpush1.bf16.msra.mxu1 %v21025_v13  ;;  %13568 = vmatprep.subr.bf16.mxu0 %v21030_v33  ;;  %v21070_v13 = vld [vmem:[#allocation6 + $0xf58] ss:$84 sps:$4 sm:$0xff]   ;;  %v21073_v33 = vld [vmem:[#allocation6 + $0xf60] ss:$84 sps:$4 sm:$0xff]  }
 0x6bd   :  { %13814 = vmatprep.subr.bf16.mxu1 %v21033_v53  ;;  %v21078_v53 = vld [vmem:[#allocation6 + $0x1004] ss:$84 sps:$4 sm:$0xff]  }
 0x6be   :  { %13560 = vmatmul.mubr.bf16.vlgmr.msra.gmra.mrb[24].mxu0 %v22111_v2 }
 0x6bf   :  { %13806 = vmatmul.mubr.bf16.vlgmr.msra.gmra.mrb[32].mxu1 %v22111_v2  ;;  %13569 = vmatpush1.bf16.msra.mxu0 %v21028_v49  ;;  %v21081_v49 = vld [vmem:[#allocation6 + $0x100c] ss:$84 sps:$4 sm:$0xff]  }
 0x6c0   :  { %13600 = vmatprep.mubr.bf16.mxu0 %v22125_v26  ;;  %13815 = vmatpush1.bf16.msra.mxu1 %v21031_v54  ;;  %v21076_v54 = vld [vmem:[#allocation6 + $0x1000] ss:$84 sps:$4 sm:$0xff]  }
 0x6c1   :  { %13846 = vmatprep.mubr.bf16.mxu1 %v22125_v26  ;;  %13570 = vmatprep.subr.bf16.mxu0 %v21036_v47  ;;  %v21079_v47 = vld [vmem:[#allocation6 + $0x1008] ss:$84 sps:$4 sm:$0xff]  }
 0x6c2   :  { %13816 = vmatprep.subr.bf16.mxu1 %v21039_v57  ;;  %v21084_v57 = vld [vmem:[#allocation6 + $0x10ac] ss:$84 sps:$4 sm:$0xff]  }
 0x6c3   :  { %13571 = vmatpush1.bf16.msra.mxu0 %v21034_v60  ;;  %v21087_v60 = vld [vmem:[#allocation6 + $0x10b4] ss:$84 sps:$4 sm:$0xff]  }
 0x6c4   :  { %13817 = vmatpush1.bf16.msra.mxu1 %v21037_v3  ;;  %13572 = vmatprep.subr.bf16.mxu0 %v21042_v4  ;;  %v21082_v3 = vld [vmem:[#allocation6 + $0x10a8] ss:$84 sps:$4 sm:$0xff]   ;;  %v21085_v4 = vld [vmem:[#allocation6 + $0x10b0] ss:$84 sps:$4 sm:$0xff]  }
 0x6c5   :  { %13818 = vmatprep.subr.bf16.mxu1 %v21045_v6  ;;  %v21090_v6 = vld [vmem:[#allocation6 + $0x1154] ss:$84 sps:$4 sm:$0xff]  }
 0x6c7   :  { %13573 = vmatpush1.bf16.msra.mxu0 %v21040_v7  ;;  %v21093_v7 = vld [vmem:[#allocation6 + $0x115c] ss:$84 sps:$4 sm:$0xff]  }
 0x6c8   :  { %13819 = vmatpush1.bf16.msra.mxu1 %v21043_v12  ;;  %13574 = vmatprep.subr.bf16.mxu0 %v21048_v15  ;;  %v21088_v12 = vld [vmem:[#allocation6 + $0x1150] ss:$84 sps:$4 sm:$0xff]   ;;  %v21091_v15 = vld [vmem:[#allocation6 + $0x1158] ss:$84 sps:$4 sm:$0xff]  }
 0x6c9   :  { %13820 = vmatprep.subr.bf16.mxu1 %v21051_v19  ;;  %v21096_v19 = vld [vmem:[#allocation6 + $0x11fc] ss:$84 sps:$4 sm:$0xff]  }
 0x6cb   :  { %13575 = vmatpush1.bf16.msra.mxu0 %v21046_v20  ;;  %v21099_v20 = vld [vmem:[#allocation6 + $0x1204] ss:$84 sps:$4 sm:$0xff]  }
 0x6cc   :  { %13821 = vmatpush1.bf16.msra.mxu1 %v21049_v22  ;;  %13576 = vmatprep.subr.bf16.mxu0 %v21054_v23  ;;  %v21094_v22 = vld [vmem:[#allocation6 + $0x11f8] ss:$84 sps:$4 sm:$0xff]   ;;  %v21097_v23 = vld [vmem:[#allocation6 + $0x1200] ss:$84 sps:$4 sm:$0xff]  }
 0x6cd   :  { %13822 = vmatprep.subr.bf16.mxu1 %v21057_v24  ;;  %v21102_v24 = vld [vmem:[#allocation6 + $0x12a4] ss:$84 sps:$4 sm:$0xff]  }
 0x6cf   :  { %13577 = vmatpush1.bf16.msra.mxu0 %v21052_v25  ;;  %v21105_v25 = vld [vmem:[#allocation6 + $0x12ac] ss:$84 sps:$4 sm:$0xff]  }
 0x6d0   :  { %13823 = vmatpush1.bf16.msra.mxu1 %v21055_v27  ;;  %13578 = vmatprep.subr.bf16.mxu0 %v21060_v28  ;;  %v21100_v27 = vld [vmem:[#allocation6 + $0x12a0] ss:$84 sps:$4 sm:$0xff]   ;;  %v21103_v28 = vld [vmem:[#allocation6 + $0x12a8] ss:$84 sps:$4 sm:$0xff]  }
 0x6d1   :  { %13824 = vmatprep.subr.bf16.mxu1 %v21063_v29  ;;  %v21108_v29 = vld [vmem:[#allocation6 + $0x134c] ss:$84 sps:$4 sm:$0xff]  }
 0x6d3   :  { %13579 = vmatpush1.bf16.msra.mxu0 %v21058_v31  ;;  %v21111_v31 = vld [vmem:[#allocation6 + $0x1354] ss:$84 sps:$4 sm:$0xff]  }
 0x6d4   :  { %13825 = vmatpush1.bf16.msra.mxu1 %v21061_v32  ;;  %13580 = vmatprep.subr.bf16.mxu0 %v21066_v5  ;;  %v21106_v32 = vld [vmem:[#allocation6 + $0x1348] ss:$84 sps:$4 sm:$0xff]   ;;  %v21109_v5 = vld [vmem:[#allocation6 + $0x1350] ss:$84 sps:$4 sm:$0xff]  }
 0x6d5   :  { %13826 = vmatprep.subr.bf16.mxu1 %v21069_v35  ;;  %v21114_v35 = vld [vmem:[#allocation6 + $0x13f4] ss:$84 sps:$4 sm:$0xff]  }
 0x6d7   :  { %13581 = vmatpush1.bf16.msra.mxu0 %v21064_v37  ;;  %v21117_v37 = vld [vmem:[#allocation6 + $0x13fc] ss:$84 sps:$4 sm:$0xff]  }
 0x6d8   :  { %13827 = vmatpush1.bf16.msra.mxu1 %v21067_v55  ;;  %13582 = vmatprep.subr.bf16.mxu0 %v21072_v39  ;;  %v21112_v55 = vld [vmem:[#allocation6 + $0x13f0] ss:$84 sps:$4 sm:$0xff]   ;;  %v21115_v39 = vld [vmem:[#allocation6 + $0x13f8] ss:$84 sps:$4 sm:$0xff]  }
 0x6d9   :  { %13828 = vmatprep.subr.bf16.mxu1 %v21075_v40  ;;  %v21120_v40 = vld [vmem:[#allocation6 + $0x149c] ss:$84 sps:$4 sm:$0xff]  }
 0x6db   :  { %13583 = vmatpush1.bf16.msra.mxu0 %v21070_v13  ;;  %v21123_v13 = vld [vmem:[#allocation6 + $0x14a4] ss:$84 sps:$4 sm:$0xff]  }
 0x6dc   :  { %13829 = vmatpush1.bf16.msra.mxu1 %v21073_v33  ;;  %13584 = vmatprep.subr.bf16.mxu0 %v21078_v53  ;;  %v21118_v33 = vld [vmem:[#allocation6 + $0x1498] ss:$84 sps:$4 sm:$0xff]   ;;  %v21121_v53 = vld [vmem:[#allocation6 + $0x14a0] ss:$84 sps:$4 sm:$0xff]  }
 0x6dd   :  { %13830 = vmatprep.subr.bf16.mxu1 %v21081_v49  ;;  %v21126_v49 = vld [vmem:[#allocation6 + $0x1544] ss:$84 sps:$4 sm:$0xff]  }
 0x6df   :  { %13585 = vmatpush1.bf16.msra.mxu0 %v21076_v54  ;;  %v21129_v54 = vld [vmem:[#allocation6 + $0x154c] ss:$84 sps:$4 sm:$0xff]  }
 0x6e0   :  { %13831 = vmatpush1.bf16.msra.mxu1 %v21079_v47  ;;  %13586 = vmatprep.subr.bf16.mxu0 %v21084_v57  ;;  %v21124_v47 = vld [vmem:[#allocation6 + $0x1540] ss:$84 sps:$4 sm:$0xff]   ;;  %v21127_v57 = vld [vmem:[#allocation6 + $0x1548] ss:$84 sps:$4 sm:$0xff]  }
 0x6e1   :  { %13832 = vmatprep.subr.bf16.mxu1 %v21087_v60  ;;  %v21132_v60 = vld [vmem:[#allocation6 + $0x15ec] ss:$84 sps:$4 sm:$0xff]  }
 0x6e3   :  { %13587 = vmatpush1.bf16.msra.mxu0 %v21082_v3  ;;  %v21135_v3 = vld [vmem:[#allocation6 + $0x15f4] ss:$84 sps:$4 sm:$0xff]  }
 0x6e4   :  { %13833 = vmatpush1.bf16.msra.mxu1 %v21085_v4  ;;  %13588 = vmatprep.subr.bf16.mxu0 %v21090_v6  ;;  %v21130_v4 = vld [vmem:[#allocation6 + $0x15e8] ss:$84 sps:$4 sm:$0xff]   ;;  %v21133_v6 = vld [vmem:[#allocation6 + $0x15f0] ss:$84 sps:$4 sm:$0xff]  }
 0x6e5   :  { %13834 = vmatprep.subr.bf16.mxu1 %v21093_v7  ;;  %v21138_v7 = vld [vmem:[#allocation6 + $0x1694] ss:$84 sps:$4 sm:$0xff]  }
 0x6e7   :  { %13589 = vmatpush1.bf16.msra.mxu0 %v21088_v12  ;;  %v21141_v12 = vld [vmem:[#allocation6 + $0x169c] ss:$84 sps:$4 sm:$0xff]  }
 0x6e8   :  { %13835 = vmatpush1.bf16.msra.mxu1 %v21091_v15  ;;  %13590 = vmatprep.subr.bf16.mxu0 %v21096_v19  ;;  %v21136_v15 = vld [vmem:[#allocation6 + $0x1690] ss:$84 sps:$4 sm:$0xff]   ;;  %v21139_v19 = vld [vmem:[#allocation6 + $0x1698] ss:$84 sps:$4 sm:$0xff]  }
 0x6e9   :  { %13836 = vmatprep.subr.bf16.mxu1 %v21099_v20  ;;  %v21144_v20 = vld [vmem:[#allocation6 + $0x173c] ss:$84 sps:$4 sm:$0xff]  }
 0x6eb   :  { %13591 = vmatpush1.bf16.msra.mxu0 %v21094_v22  ;;  %v21147_v22 = vld [vmem:[#allocation6 + $0x1744] ss:$84 sps:$4 sm:$0xff]  }
 0x6ec   :  { %13837 = vmatpush1.bf16.msra.mxu1 %v21097_v23  ;;  %13592 = vmatprep.subr.bf16.mxu0 %v21102_v24  ;;  %v21142_v23 = vld [vmem:[#allocation6 + $0x1738] ss:$84 sps:$4 sm:$0xff]   ;;  %v21145_v24 = vld [vmem:[#allocation6 + $0x1740] ss:$84 sps:$4 sm:$0xff]  }
 0x6ed   :  { %13838 = vmatprep.subr.bf16.mxu1 %v21105_v25  ;;  %v21150_v25 = vld [vmem:[#allocation6 + $0x17e4] ss:$84 sps:$4 sm:$0xff]  }
 0x6ef   :  { %13593 = vmatpush1.bf16.msra.mxu0 %v21100_v27  ;;  %v21153_v27 = vld [vmem:[#allocation6 + $0x17ec] ss:$84 sps:$4 sm:$0xff]  }
 0x6f0   :  { %13839 = vmatpush1.bf16.msra.mxu1 %v21103_v28  ;;  %13594 = vmatprep.subr.bf16.mxu0 %v21108_v29  ;;  %v21148_v28 = vld [vmem:[#allocation6 + $0x17e0] ss:$84 sps:$4 sm:$0xff]   ;;  %v21151_v29 = vld [vmem:[#allocation6 + $0x17e8] ss:$84 sps:$4 sm:$0xff]  }
 0x6f1   :  { %13840 = vmatprep.subr.bf16.mxu1 %v21111_v31  ;;  %v21156_v31 = vld [vmem:[#allocation6 + $0x188c] ss:$84 sps:$4 sm:$0xff]  }
 0x6f3   :  { %13595 = vmatpush1.bf16.msra.mxu0 %v21106_v32  ;;  %v21159_v32 = vld [vmem:[#allocation6 + $0x1894] ss:$84 sps:$4 sm:$0xff]  }
 0x6f4   :  { %13841 = vmatpush1.bf16.msra.mxu1 %v21109_v5  ;;  %13596 = vmatprep.subr.bf16.mxu0 %v21114_v35  ;;  %v21154_v5 = vld [vmem:[#allocation6 + $0x1888] ss:$84 sps:$4 sm:$0xff]   ;;  %v21157_v35 = vld [vmem:[#allocation6 + $0x1890] ss:$84 sps:$4 sm:$0xff]  }
 0x6f5   :  { %13842 = vmatprep.subr.bf16.mxu1 %v21117_v37  ;;  %v21162_v37 = vld [vmem:[#allocation6 + $0x1934] ss:$84 sps:$4 sm:$0xff]  }
 0x6f7   :  { %13597 = vmatpush1.bf16.msra.mxu0 %v21112_v55  ;;  %v21165_v55 = vld [vmem:[#allocation6 + $0x193c] ss:$84 sps:$4 sm:$0xff]  }
 0x6f8   :  { %13843 = vmatpush1.bf16.msra.mxu1 %v21115_v39  ;;  %13598 = vmatprep.subr.bf16.mxu0 %v21120_v40  ;;  %v21160_v39 = vld [vmem:[#allocation6 + $0x1930] ss:$84 sps:$4 sm:$0xff]   ;;  %v21163_v40 = vld [vmem:[#allocation6 + $0x1938] ss:$84 sps:$4 sm:$0xff]  }
 0x6f9   :  { %13844 = vmatprep.subr.bf16.mxu1 %v21123_v13  ;;  %v21168_v13 = vld [vmem:[#allocation6 + $0x19dc] ss:$84 sps:$4 sm:$0xff]  }
 0x6fb   :  { %13599 = vmatpush1.bf16.msra.mxu0 %v21118_v33  ;;  %v21171_v33 = vld [vmem:[#allocation6 + $0x19e4] ss:$84 sps:$4 sm:$0xff]  }
 0x6fc   :  { %13845 = vmatpush1.bf16.msra.mxu1 %v21121_v53  ;;  %13609 = vmatprep.subr.bf16.mxu0 %v21126_v49  ;;  %v21166_v53 = vld [vmem:[#allocation6 + $0x19d8] ss:$84 sps:$4 sm:$0xff]   ;;  %v21169_v49 = vld [vmem:[#allocation6 + $0x19e0] ss:$84 sps:$4 sm:$0xff]  }
 0x6fd   :  { %13855 = vmatprep.subr.bf16.mxu1 %v21129_v54  ;;  %v21174_v54 = vld [vmem:[#allocation6 + $0x1a84] ss:$84 sps:$4 sm:$0xff]  }
 0x6fe   :  { %13601 = vmatmul.mubr.bf16.vlgmr.msra.gmra.mrb[24].mxu0 %v22152_v58 }
 0x6ff   :  { %13847 = vmatmul.mubr.bf16.vlgmr.msra.gmra.mrb[32].mxu1 %v22152_v58  ;;  %13610 = vmatpush1.bf16.msra.mxu0 %v21124_v47  ;;  %v21177_v47 = vld [vmem:[#allocation6 + $0x1a8c] ss:$84 sps:$4 sm:$0xff]  }
 0x700   :  { %13641 = vmatprep.mubr.bf16.mxu0 %v22154_v62  ;;  %13856 = vmatpush1.bf16.msra.mxu1 %v21127_v57  ;;  %v21172_v57 = vld [vmem:[#allocation6 + $0x1a80] ss:$84 sps:$4 sm:$0xff]  }
 0x701   :  { %13887 = vmatprep.mubr.bf16.mxu1 %v22154_v62  ;;  %13611 = vmatprep.subr.bf16.mxu0 %v21132_v60  ;;  %v21175_v60 = vld [vmem:[#allocation6 + $0x1a88] ss:$84 sps:$4 sm:$0xff]  }
 0x702   :  { %13857 = vmatprep.subr.bf16.mxu1 %v21135_v3  ;;  %v21180_v3 = vld [vmem:[#allocation6 + $0x1b2c] ss:$84 sps:$4 sm:$0xff]  }
 0x703   :  { %13612 = vmatpush1.bf16.msra.mxu0 %v21130_v4  ;;  %v21183_v4 = vld [vmem:[#allocation6 + $0x1b34] ss:$84 sps:$4 sm:$0xff]  }
 0x704   :  { %13858 = vmatpush1.bf16.msra.mxu1 %v21133_v6  ;;  %13613 = vmatprep.subr.bf16.mxu0 %v21138_v7  ;;  %v21178_v6 = vld [vmem:[#allocation6 + $0x1b28] ss:$84 sps:$4 sm:$0xff]   ;;  %v21181_v7 = vld [vmem:[#allocation6 + $0x1b30] ss:$84 sps:$4 sm:$0xff]  }
 0x705   :  { %13859 = vmatprep.subr.bf16.mxu1 %v21141_v12  ;;  %v21186_v12 = vld [vmem:[#allocation6 + $0x1bd4] ss:$84 sps:$4 sm:$0xff]  }
 0x707   :  { %13614 = vmatpush1.bf16.msra.mxu0 %v21136_v15  ;;  %v21189_v15 = vld [vmem:[#allocation6 + $0x1bdc] ss:$84 sps:$4 sm:$0xff]  }
 0x708   :  { %13860 = vmatpush1.bf16.msra.mxu1 %v21139_v19  ;;  %13615 = vmatprep.subr.bf16.mxu0 %v21144_v20  ;;  %v21184_v19 = vld [vmem:[#allocation6 + $0x1bd0] ss:$84 sps:$4 sm:$0xff]   ;;  %v21187_v20 = vld [vmem:[#allocation6 + $0x1bd8] ss:$84 sps:$4 sm:$0xff]  }
 0x709   :  { %13861 = vmatprep.subr.bf16.mxu1 %v21147_v22  ;;  %v21192_v22 = vld [vmem:[#allocation6 + $0x1c7c] ss:$84 sps:$4 sm:$0xff]  }
 0x70b   :  { %13616 = vmatpush1.bf16.msra.mxu0 %v21142_v23  ;;  %v21195_v23 = vld [vmem:[#allocation6 + $0x1c84] ss:$84 sps:$4 sm:$0xff]  }
 0x70c   :  { %13862 = vmatpush1.bf16.msra.mxu1 %v21145_v24  ;;  %13617 = vmatprep.subr.bf16.mxu0 %v21150_v25  ;;  %v21190_v24 = vld [vmem:[#allocation6 + $0x1c78] ss:$84 sps:$4 sm:$0xff]   ;;  %v21193_v25 = vld [vmem:[#allocation6 + $0x1c80] ss:$84 sps:$4 sm:$0xff]  }
 0x70d   :  { %13863 = vmatprep.subr.bf16.mxu1 %v21153_v27  ;;  %v21198_v27 = vld [vmem:[#allocation6 + $0x1d24] ss:$84 sps:$4 sm:$0xff]  }
 0x70f   :  { %13618 = vmatpush1.bf16.msra.mxu0 %v21148_v28  ;;  %v21201_v28 = vld [vmem:[#allocation6 + $0x1d2c] ss:$84 sps:$4 sm:$0xff]  }
 0x710   :  { %13864 = vmatpush1.bf16.msra.mxu1 %v21151_v29  ;;  %13619 = vmatprep.subr.bf16.mxu0 %v21156_v31  ;;  %v21196_v29 = vld [vmem:[#allocation6 + $0x1d20] ss:$84 sps:$4 sm:$0xff]   ;;  %v21199_v31 = vld [vmem:[#allocation6 + $0x1d28] ss:$84 sps:$4 sm:$0xff]  }
 0x711   :  { %13865 = vmatprep.subr.bf16.mxu1 %v21159_v32  ;;  %v21204_v32 = vld [vmem:[#allocation6 + $0x1dcc] ss:$84 sps:$4 sm:$0xff]  }
 0x713   :  { %13620 = vmatpush1.bf16.msra.mxu0 %v21154_v5  ;;  %v21207_v5 = vld [vmem:[#allocation6 + $0x1dd4] ss:$84 sps:$4 sm:$0xff]  }
 0x714   :  { %13866 = vmatpush1.bf16.msra.mxu1 %v21157_v35  ;;  %13621 = vmatprep.subr.bf16.mxu0 %v21162_v37  ;;  %v21202_v35 = vld [vmem:[#allocation6 + $0x1dc8] ss:$84 sps:$4 sm:$0xff]   ;;  %v21205_v37 = vld [vmem:[#allocation6 + $0x1dd0] ss:$84 sps:$4 sm:$0xff]  }
 0x715   :  { %13867 = vmatprep.subr.bf16.mxu1 %v21165_v55  ;;  %v21210_v55 = vld [vmem:[#allocation6 + $0x1e74] ss:$84 sps:$4 sm:$0xff]  }
 0x717   :  { %13622 = vmatpush1.bf16.msra.mxu0 %v21160_v39  ;;  %v21213_v39 = vld [vmem:[#allocation6 + $0x1e7c] ss:$84 sps:$4 sm:$0xff]  }
 0x718   :  { %13868 = vmatpush1.bf16.msra.mxu1 %v21163_v40  ;;  %13623 = vmatprep.subr.bf16.mxu0 %v21168_v13  ;;  %v21208_v40 = vld [vmem:[#allocation6 + $0x1e70] ss:$84 sps:$4 sm:$0xff]   ;;  %v21211_v13 = vld [vmem:[#allocation6 + $0x1e78] ss:$84 sps:$4 sm:$0xff]  }
 0x719   :  { %13869 = vmatprep.subr.bf16.mxu1 %v21171_v33  ;;  %v21216_v33 = vld [vmem:[#allocation6 + $0x1f1c] ss:$84 sps:$4 sm:$0xff]  }
 0x71b   :  { %13624 = vmatpush1.bf16.msra.mxu0 %v21166_v53  ;;  %v21219_v53 = vld [vmem:[#allocation6 + $0x1f24] ss:$84 sps:$4 sm:$0xff]  }
 0x71c   :  { %13870 = vmatpush1.bf16.msra.mxu1 %v21169_v49  ;;  %13625 = vmatprep.subr.bf16.mxu0 %v21174_v54  ;;  %v21214_v49 = vld [vmem:[#allocation6 + $0x1f18] ss:$84 sps:$4 sm:$0xff]   ;;  %v21217_v54 = vld [vmem:[#allocation6 + $0x1f20] ss:$84 sps:$4 sm:$0xff]  }
 0x71d   :  { %13871 = vmatprep.subr.bf16.mxu1 %v21177_v47  ;;  %v21222_v47 = vld [vmem:[#allocation6 + $0x1fc4] ss:$84 sps:$4 sm:$0xff]  }
 0x71f   :  { %13626 = vmatpush1.bf16.msra.mxu0 %v21172_v57  ;;  %v21225_v57 = vld [vmem:[#allocation6 + $0x1fcc] ss:$84 sps:$4 sm:$0xff]  }
 0x720   :  { %13872 = vmatpush1.bf16.msra.mxu1 %v21175_v60  ;;  %13627 = vmatprep.subr.bf16.mxu0 %v21180_v3  ;;  %v21220_v60 = vld [vmem:[#allocation6 + $0x1fc0] ss:$84 sps:$4 sm:$0xff]   ;;  %v21223_v3 = vld [vmem:[#allocation6 + $0x1fc8] ss:$84 sps:$4 sm:$0xff]  }
 0x721   :  { %13873 = vmatprep.subr.bf16.mxu1 %v21183_v4  ;;  %v21228_v4 = vld [vmem:[#allocation6 + $0x206c] ss:$84 sps:$4 sm:$0xff]  }
 0x723   :  { %13628 = vmatpush1.bf16.msra.mxu0 %v21178_v6  ;;  %v21231_v6 = vld [vmem:[#allocation6 + $0x2074] ss:$84 sps:$4 sm:$0xff]  }
 0x724   :  { %13874 = vmatpush1.bf16.msra.mxu1 %v21181_v7  ;;  %13629 = vmatprep.subr.bf16.mxu0 %v21186_v12  ;;  %v21226_v7 = vld [vmem:[#allocation6 + $0x2068] ss:$84 sps:$4 sm:$0xff]   ;;  %v21229_v12 = vld [vmem:[#allocation6 + $0x2070] ss:$84 sps:$4 sm:$0xff]  }
 0x725   :  { %13875 = vmatprep.subr.bf16.mxu1 %v21189_v15  ;;  %v21234_v15 = vld [vmem:[#allocation6 + $0x2114] ss:$84 sps:$4 sm:$0xff]  }
 0x727   :  { %13630 = vmatpush1.bf16.msra.mxu0 %v21184_v19  ;;  %v21237_v19 = vld [vmem:[#allocation6 + $0x211c] ss:$84 sps:$4 sm:$0xff]  }
 0x728   :  { %13876 = vmatpush1.bf16.msra.mxu1 %v21187_v20  ;;  %13631 = vmatprep.subr.bf16.mxu0 %v21192_v22  ;;  %v21232_v20 = vld [vmem:[#allocation6 + $0x2110] ss:$84 sps:$4 sm:$0xff]   ;;  %v21235_v22 = vld [vmem:[#allocation6 + $0x2118] ss:$84 sps:$4 sm:$0xff]  }
 0x729   :  { %13877 = vmatprep.subr.bf16.mxu1 %v21195_v23  ;;  %v21240_v23 = vld [vmem:[#allocation6 + $0x21bc] ss:$84 sps:$4 sm:$0xff]  }
 0x72b   :  { %13632 = vmatpush1.bf16.msra.mxu0 %v21190_v24  ;;  %v21243_v24 = vld [vmem:[#allocation6 + $0x21c4] ss:$84 sps:$4 sm:$0xff]  }
 0x72c   :  { %13878 = vmatpush1.bf16.msra.mxu1 %v21193_v25  ;;  %13633 = vmatprep.subr.bf16.mxu0 %v21198_v27  ;;  %v21238_v25 = vld [vmem:[#allocation6 + $0x21b8] ss:$84 sps:$4 sm:$0xff]   ;;  %v21241_v27 = vld [vmem:[#allocation6 + $0x21c0] ss:$84 sps:$4 sm:$0xff]  }
 0x72d   :  { %13879 = vmatprep.subr.bf16.mxu1 %v21201_v28  ;;  %v21246_v28 = vld [vmem:[#allocation6 + $0x2264] ss:$84 sps:$4 sm:$0xff]  }
 0x72f   :  { %13634 = vmatpush1.bf16.msra.mxu0 %v21196_v29  ;;  %v21249_v29 = vld [vmem:[#allocation6 + $0x226c] ss:$84 sps:$4 sm:$0xff]  }
 0x730   :  { %13880 = vmatpush1.bf16.msra.mxu1 %v21199_v31  ;;  %13635 = vmatprep.subr.bf16.mxu0 %v21204_v32  ;;  %v21244_v31 = vld [vmem:[#allocation6 + $0x2260] ss:$84 sps:$4 sm:$0xff]   ;;  %v21247_v32 = vld [vmem:[#allocation6 + $0x2268] ss:$84 sps:$4 sm:$0xff]  }
 0x731   :  { %13881 = vmatprep.subr.bf16.mxu1 %v21207_v5  ;;  %v21252_v5 = vld [vmem:[#allocation6 + $0x230c] ss:$84 sps:$4 sm:$0xff]  }
 0x733   :  { %13636 = vmatpush1.bf16.msra.mxu0 %v21202_v35  ;;  %v21255_v35 = vld [vmem:[#allocation6 + $0x2314] ss:$84 sps:$4 sm:$0xff]  }
 0x734   :  { %13882 = vmatpush1.bf16.msra.mxu1 %v21205_v37  ;;  %13637 = vmatprep.subr.bf16.mxu0 %v21210_v55  ;;  %v21250_v37 = vld [vmem:[#allocation6 + $0x2308] ss:$84 sps:$4 sm:$0xff]   ;;  %v21253_v55 = vld [vmem:[#allocation6 + $0x2310] ss:$84 sps:$4 sm:$0xff]  }
 0x735   :  { %13883 = vmatprep.subr.bf16.mxu1 %v21213_v39  ;;  %v21258_v39 = vld [vmem:[#allocation6 + $0x23b4] ss:$84 sps:$4 sm:$0xff]  }
 0x737   :  { %13638 = vmatpush1.bf16.msra.mxu0 %v21208_v40 }
 0x738   :  { %13884 = vmatpush1.bf16.msra.mxu1 %v21211_v13  ;;  %13639 = vmatprep.subr.bf16.mxu0 %v21216_v33  ;;  %v21261_v13 = vld [vmem:[#allocation6 + $0x23bc] ss:$84 sps:$4 sm:$0xff]  }
 0x739   :  { %13885 = vmatprep.subr.bf16.mxu1 %v21219_v53 }
 0x73b   :  { %13640 = vmatpush1.bf16.msra.mxu0 %v21214_v49 }
 0x73c   :  { %13886 = vmatpush1.bf16.msra.mxu1 %v21217_v54  ;;  %13650 = vmatprep.subr.bf16.mxu0 %v21222_v47  ;;  %v21256_v47 = vld [vmem:[#allocation6 + $0x23b0] ss:$84 sps:$4 sm:$0xff]  }
 0x73d   :  { %13896 = vmatprep.subr.bf16.mxu1 %v21225_v57 }
 0x73e   :  { %13642 = vmatmul.mubr.bf16.vlgmr.msra.gmra.mrb[24].mxu0 %v22174_v34 }
 0x73f   :  { %13888 = vmatmul.mubr.bf16.vlgmr.msra.gmra.mrb[32].mxu1 %v22174_v34  ;;  %13651 = vmatpush1.bf16.msra.mxu0 %v21220_v60 }
 0x740   :  { %13682 = vmatprep.mubr.bf16.mxu0 %v22176_v38  ;;  %13897 = vmatpush1.bf16.msra.mxu1 %v21223_v3  ;;  %v21259_v3 = vld [vmem:[#allocation6 + $0x23b8] ss:$84 sps:$4 sm:$0xff]  }
 0x741   :  { %13928 = vmatprep.mubr.bf16.mxu1 %v22176_v38  ;;  %13652 = vmatprep.subr.bf16.mxu0 %v21228_v4  ;;  %v21264_v4 = vld [vmem:[#allocation6 + $0x245c] ss:$84 sps:$4 sm:$0xff]  }
 0x742   :  { %13898 = vmatprep.subr.bf16.mxu1 %v21231_v6 }
 0x743   :  { %13653 = vmatpush1.bf16.msra.mxu0 %v21226_v7  ;;  %v21267_v7 = vld [vmem:[#allocation6 + $0x2464] ss:$84 sps:$4 sm:$0xff]  }
 0x744   :  { %13899 = vmatpush1.bf16.msra.mxu1 %v21229_v12  ;;  %13654 = vmatprep.subr.bf16.mxu0 %v21234_v15  ;;  %v21262_v12 = vld [vmem:[#allocation6 + $0x2458] ss:$84 sps:$4 sm:$0xff]   ;;  %v21265_v15 = vld [vmem:[#allocation6 + $0x2460] ss:$84 sps:$4 sm:$0xff]  }
 0x745   :  { %13900 = vmatprep.subr.bf16.mxu1 %v21237_v19  ;;  %v21270_v19 = vld [vmem:[#allocation6 + $0x2504] ss:$84 sps:$4 sm:$0xff]  }
 0x747   :  { %13655 = vmatpush1.bf16.msra.mxu0 %v21232_v20  ;;  %v21273_v20 = vld [vmem:[#allocation6 + $0x250c] ss:$84 sps:$4 sm:$0xff]  }
 0x748   :  { %13901 = vmatpush1.bf16.msra.mxu1 %v21235_v22  ;;  %13656 = vmatprep.subr.bf16.mxu0 %v21240_v23  ;;  %v21268_v22 = vld [vmem:[#allocation6 + $0x2500] ss:$84 sps:$4 sm:$0xff]   ;;  %v21271_v23 = vld [vmem:[#allocation6 + $0x2508] ss:$84 sps:$4 sm:$0xff]  }
 0x749   :  { %13902 = vmatprep.subr.bf16.mxu1 %v21243_v24  ;;  %v21276_v24 = vld [vmem:[#allocation6 + $0x25ac] ss:$84 sps:$4 sm:$0xff]  }
 0x74b   :  { %13657 = vmatpush1.bf16.msra.mxu0 %v21238_v25  ;;  %v21279_v25 = vld [vmem:[#allocation6 + $0x25b4] ss:$84 sps:$4 sm:$0xff]  }
 0x74c   :  { %13903 = vmatpush1.bf16.msra.mxu1 %v21241_v27  ;;  %13658 = vmatprep.subr.bf16.mxu0 %v21246_v28  ;;  %v21274_v27 = vld [vmem:[#allocation6 + $0x25a8] ss:$84 sps:$4 sm:$0xff]   ;;  %v21277_v28 = vld [vmem:[#allocation6 + $0x25b0] ss:$84 sps:$4 sm:$0xff]  }
 0x74d   :  { %13904 = vmatprep.subr.bf16.mxu1 %v21249_v29  ;;  %v21282_v29 = vld [vmem:[#allocation6 + $0x2654] ss:$84 sps:$4 sm:$0xff]  }
 0x74f   :  { %13659 = vmatpush1.bf16.msra.mxu0 %v21244_v31  ;;  %v21285_v31 = vld [vmem:[#allocation6 + $0x265c] ss:$84 sps:$4 sm:$0xff]  }
 0x750   :  { %13905 = vmatpush1.bf16.msra.mxu1 %v21247_v32  ;;  %13660 = vmatprep.subr.bf16.mxu0 %v21252_v5  ;;  %v21280_v32 = vld [vmem:[#allocation6 + $0x2650] ss:$84 sps:$4 sm:$0xff]   ;;  %v21283_v5 = vld [vmem:[#allocation6 + $0x2658] ss:$84 sps:$4 sm:$0xff]  }
 0x751   :  { %v22333_v40 = vpop.f32.mrb[20].mxu0  ;;  %13906 = vmatprep.subr.bf16.mxu1 %v21255_v35  ;;  %v21288_v35 = vld [vmem:[#allocation6 + $0x26fc] ss:$84 sps:$4 sm:$0xff]  }
 0x752   :  { %v22335_v33 = vpop.f32.mrb[28].mxu1  ;;  %v22337_v53 = vpop.f32.mrb[21].mxu0 }
 0x753   :  { %v22339_v49 = vpop.f32.mrb[29].mxu1  ;;  %v13278_v54 = vpop.f32.mrb[22].mxu0  ;;  %13661 = vmatpush1.bf16.msra.mxu0 %v21250_v37  ;;  %v21291_v37 = vld [vmem:[#allocation6 + $0x2704] ss:$84 sps:$4 sm:$0xff]  }
 0x754   :  { %v13524_v57 = vpop.f32.mrb[30].mxu1  ;;  %13907 = vmatpush1.bf16.msra.mxu1 %v21253_v55  ;;  %v13279_v60 = vpop.f32.mrb[23].mxu0  ;;  %13662 = vmatprep.subr.bf16.mxu0 %v21258_v39  ;;  %v21286_v55 = vld [vmem:[#allocation6 + $0x26f8] ss:$84 sps:$4 sm:$0xff]   ;;  %v21289_v39 = vld [vmem:[#allocation6 + $0x2700] ss:$84 sps:$4 sm:$0xff]  }
 0x755   :  { %v13525_v6 = vpop.f32.mrb[31].mxu1  ;;  %13908 = vmatprep.subr.bf16.mxu1 %v21261_v13  ;;  %v21294_v13 = vld [vmem:[#allocation6 + $0x27a4] ss:$84 sps:$4 sm:$0xff]   ;;  %v21297_v54 = vld [vmem:[#allocation6 + $0x27ac] ss:$84 sps:$4 sm:$0xff]  }
 0x756   :  { %v21295_v57 = vld [vmem:[#allocation6 + $0x27a8] ss:$84 sps:$4 sm:$0xff]   ;;  %v21300_v60 = vld [vmem:[#allocation6 + $0x284c] ss:$84 sps:$4 sm:$0xff]   ;;  %v21301_v6 = vld [vmem:[#allocation6 + $0x2850] ss:$84 sps:$4 sm:$0xff]  }
 0x757   :  { %13663 = vmatpush1.bf16.msra.mxu0 %v21256_v47  ;;  %v21292_v47 = vld [vmem:[#allocation6 + $0x27a0] ss:$84 sps:$4 sm:$0xff]  }
 0x758   :  { %13909 = vmatpush1.bf16.msra.mxu1 %v21259_v3  ;;  %13664 = vmatprep.subr.bf16.mxu0 %v21264_v4  ;;  %v21303_v3 = vld [vmem:[#allocation6 + $0x2854] ss:$84 sps:$4 sm:$0xff]  }
 0x759   :  { %13910 = vmatprep.subr.bf16.mxu1 %v21267_v7  ;;  %v21298_v4 = vld [vmem:[#allocation6 + $0x2848] ss:$84 sps:$4 sm:$0xff]  }
 0x75a   :  { %v21306_v7 = vld [vmem:[#allocation6 + $0x28f4] ss:$84 sps:$4 sm:$0xff]  }
 0x75b   :  { %13665 = vmatpush1.bf16.msra.mxu0 %v21262_v12  ;;  %v21309_v12 = vld [vmem:[#allocation6 + $0x28fc] ss:$84 sps:$4 sm:$0xff]  }
 0x75c   :  { %13911 = vmatpush1.bf16.msra.mxu1 %v21265_v15  ;;  %13666 = vmatprep.subr.bf16.mxu0 %v21270_v19  ;;  %v21304_v15 = vld [vmem:[#allocation6 + $0x28f0] ss:$84 sps:$4 sm:$0xff]   ;;  %v21307_v19 = vld [vmem:[#allocation6 + $0x28f8] ss:$84 sps:$4 sm:$0xff]  }
 0x75d   :  { %13912 = vmatprep.subr.bf16.mxu1 %v21273_v20  ;;  %v21312_v20 = vld [vmem:[#allocation6 + $0x299c] ss:$84 sps:$4 sm:$0xff]  }
 0x75f   :  { %13667 = vmatpush1.bf16.msra.mxu0 %v21268_v22  ;;  %v21315_v22 = vld [vmem:[#allocation6 + $0x29a4] ss:$84 sps:$4 sm:$0xff]  }
 0x760   :  { %13913 = vmatpush1.bf16.msra.mxu1 %v21271_v23  ;;  %13668 = vmatprep.subr.bf16.mxu0 %v21276_v24  ;;  %v21310_v23 = vld [vmem:[#allocation6 + $0x2998] ss:$84 sps:$4 sm:$0xff]   ;;  %v21313_v24 = vld [vmem:[#allocation6 + $0x29a0] ss:$84 sps:$4 sm:$0xff]  }
 0x761   :  { %13914 = vmatprep.subr.bf16.mxu1 %v21279_v25  ;;  %v21318_v25 = vld [vmem:[#allocation6 + $0x2a44] ss:$84 sps:$4 sm:$0xff]  }
 0x763   :  { %13669 = vmatpush1.bf16.msra.mxu0 %v21274_v27  ;;  %v21321_v27 = vld [vmem:[#allocation6 + $0x2a4c] ss:$84 sps:$4 sm:$0xff]  }
 0x764   :  { %13915 = vmatpush1.bf16.msra.mxu1 %v21277_v28  ;;  %13670 = vmatprep.subr.bf16.mxu0 %v21282_v29  ;;  %v21316_v28 = vld [vmem:[#allocation6 + $0x2a40] ss:$84 sps:$4 sm:$0xff]   ;;  %v21319_v29 = vld [vmem:[#allocation6 + $0x2a48] ss:$84 sps:$4 sm:$0xff]  }
 0x765   :  { %13916 = vmatprep.subr.bf16.mxu1 %v21285_v31  ;;  %v21324_v31 = vld [vmem:[#allocation6 + $0x2aec] ss:$84 sps:$4 sm:$0xff]  }
 0x767   :  { %13671 = vmatpush1.bf16.msra.mxu0 %v21280_v32  ;;  %v21327_v32 = vld [vmem:[#allocation6 + $0x2af4] ss:$84 sps:$4 sm:$0xff]  }
 0x768   :  { %13917 = vmatpush1.bf16.msra.mxu1 %v21283_v5  ;;  %13672 = vmatprep.subr.bf16.mxu0 %v21288_v35  ;;  %v21322_v5 = vld [vmem:[#allocation6 + $0x2ae8] ss:$84 sps:$4 sm:$0xff]   ;;  %v21325_v35 = vld [vmem:[#allocation6 + $0x2af0] ss:$84 sps:$4 sm:$0xff]  }
 0x769   :  { %13918 = vmatprep.subr.bf16.mxu1 %v21291_v37  ;;  %v21330_v37 = vld [vmem:[#allocation6 + $0x2b94] ss:$84 sps:$4 sm:$0xff]  }
 0x76b   :  { %13673 = vmatpush1.bf16.msra.mxu0 %v21286_v55  ;;  %v21333_v55 = vld [vmem:[#allocation6 + $0x2b9c] ss:$84 sps:$4 sm:$0xff]  }
 0x76c   :  { %13919 = vmatpush1.bf16.msra.mxu1 %v21289_v39  ;;  %13674 = vmatprep.subr.bf16.mxu0 %v21294_v13  ;;  %v21328_v39 = vld [vmem:[#allocation6 + $0x2b90] ss:$84 sps:$4 sm:$0xff]   ;;  %v21331_v13 = vld [vmem:[#allocation6 + $0x2b98] ss:$84 sps:$4 sm:$0xff]  }
 0x76d   :  { %13920 = vmatprep.subr.bf16.mxu1 %v21297_v54  ;;  %v21336_v54 = vld [vmem:[#allocation6 + $0x2c3c] ss:$84 sps:$4 sm:$0xff]  }
 0x76f   :  { %13675 = vmatpush1.bf16.msra.mxu0 %v21292_v47  ;;  %v21339_v47 = vld [vmem:[#allocation6 + $0x2c44] ss:$84 sps:$4 sm:$0xff]  }
 0x770   :  { %13921 = vmatpush1.bf16.msra.mxu1 %v21295_v57  ;;  %13676 = vmatprep.subr.bf16.mxu0 %v21300_v60  ;;  %v21334_v57 = vld [vmem:[#allocation6 + $0x2c38] ss:$84 sps:$4 sm:$0xff]   ;;  %v21337_v60 = vld [vmem:[#allocation6 + $0x2c40] ss:$84 sps:$4 sm:$0xff]  }
 0x771   :  { %13922 = vmatprep.subr.bf16.mxu1 %v21303_v3  ;;  %v21342_v3 = vld [vmem:[#allocation6 + $0x2ce4] ss:$84 sps:$4 sm:$0xff]  }
 0x773   :  { %13677 = vmatpush1.bf16.msra.mxu0 %v21298_v4  ;;  %v21345_v4 = vld [vmem:[#allocation6 + $0x2cec] ss:$84 sps:$4 sm:$0xff]  }
 0x774   :  { %13923 = vmatpush1.bf16.msra.mxu1 %v21301_v6  ;;  %13678 = vmatprep.subr.bf16.mxu0 %v21306_v7  ;;  %v21340_v6 = vld [vmem:[#allocation6 + $0x2ce0] ss:$84 sps:$4 sm:$0xff]   ;;  %v21343_v7 = vld [vmem:[#allocation6 + $0x2ce8] ss:$84 sps:$4 sm:$0xff]  }
 0x775   :  { %13924 = vmatprep.subr.bf16.mxu1 %v21309_v12  ;;  %v21348_v12 = vld [vmem:[#allocation6 + $0x2d8c] ss:$84 sps:$4 sm:$0xff]  }
 0x777   :  { %13679 = vmatpush1.bf16.msra.mxu0 %v21304_v15  ;;  %v21351_v15 = vld [vmem:[#allocation6 + $0x2d94] ss:$84 sps:$4 sm:$0xff]  }
 0x778   :  { %13925 = vmatpush1.bf16.msra.mxu1 %v21307_v19  ;;  %13680 = vmatprep.subr.bf16.mxu0 %v21312_v20  ;;  %v21346_v19 = vld [vmem:[#allocation6 + $0x2d88] ss:$84 sps:$4 sm:$0xff]   ;;  %v21349_v20 = vld [vmem:[#allocation6 + $0x2d90] ss:$84 sps:$4 sm:$0xff]  }
 0x779   :  { %13926 = vmatprep.subr.bf16.mxu1 %v21315_v22  ;;  %v21354_v22 = vld [vmem:[#allocation6 + $0x2e34] ss:$84 sps:$4 sm:$0xff]  }
 0x77b   :  { %13681 = vmatpush1.bf16.msra.mxu0 %v21310_v23  ;;  %v21357_v23 = vld [vmem:[#allocation6 + $0x2e3c] ss:$84 sps:$4 sm:$0xff]  }
 0x77c   :  { %13927 = vmatpush1.bf16.msra.mxu1 %v21313_v24  ;;  %13691 = vmatprep.subr.bf16.mxu0 %v21318_v25  ;;  %v21352_v24 = vld [vmem:[#allocation6 + $0x2e30] ss:$84 sps:$4 sm:$0xff]   ;;  %v21355_v25 = vld [vmem:[#allocation6 + $0x2e38] ss:$84 sps:$4 sm:$0xff]  }
 0x77d   :  { %13937 = vmatprep.subr.bf16.mxu1 %v21321_v27  ;;  %v21360_v27 = vld [vmem:[#allocation6 + $0x2edc] ss:$84 sps:$4 sm:$0xff]  }
 0x77e   :  { %13683 = vmatmul.mubr.bf16.vlgmr.msra.gmra.mrb[24].mxu0 %v22193_v52 }
 0x77f   :  { %13929 = vmatmul.mubr.bf16.vlgmr.msra.gmra.mrb[32].mxu1 %v22193_v52  ;;  %13692 = vmatpush1.bf16.msra.mxu0 %v21316_v28  ;;  %v21363_v28 = vld [vmem:[#allocation6 + $0x2ee4] ss:$84 sps:$4 sm:$0xff]  }
 0x780   :  { %13723 = vmatprep.mubr.bf16.mxu0 %v22195_v36  ;;  %13938 = vmatpush1.bf16.msra.mxu1 %v21319_v29  ;;  %v21358_v29 = vld [vmem:[#allocation6 + $0x2ed8] ss:$84 sps:$4 sm:$0xff]  }
 0x781   :  { %13969 = vmatprep.mubr.bf16.mxu1 %v22195_v36  ;;  %13693 = vmatprep.subr.bf16.mxu0 %v21324_v31  ;;  %v21361_v31 = vld [vmem:[#allocation6 + $0x2ee0] ss:$84 sps:$4 sm:$0xff]  }
 0x782   :  { %13939 = vmatprep.subr.bf16.mxu1 %v21327_v32  ;;  %v21366_v32 = vld [vmem:[#allocation6 + $0x2f84] ss:$84 sps:$4 sm:$0xff]  }
 0x783   :  { %13694 = vmatpush1.bf16.msra.mxu0 %v21322_v5  ;;  %v21369_v5 = vld [vmem:[#allocation6 + $0x2f8c] ss:$84 sps:$4 sm:$0xff]  }
 0x784   :  { %13940 = vmatpush1.bf16.msra.mxu1 %v21325_v35  ;;  %13695 = vmatprep.subr.bf16.mxu0 %v21330_v37  ;;  %v21364_v35 = vld [vmem:[#allocation6 + $0x2f80] ss:$84 sps:$4 sm:$0xff]   ;;  %v21367_v37 = vld [vmem:[#allocation6 + $0x2f88] ss:$84 sps:$4 sm:$0xff]  }
 0x785   :  { %13941 = vmatprep.subr.bf16.mxu1 %v21333_v55  ;;  %v21372_v55 = vld [vmem:[#allocation6 + $0x302c] ss:$84 sps:$4 sm:$0xff]  }
 0x787   :  { %13696 = vmatpush1.bf16.msra.mxu0 %v21328_v39  ;;  %v21375_v39 = vld [vmem:[#allocation6 + $0x3034] ss:$84 sps:$4 sm:$0xff]  }
 0x788   :  { %13942 = vmatpush1.bf16.msra.mxu1 %v21331_v13  ;;  %13697 = vmatprep.subr.bf16.mxu0 %v21336_v54  ;;  %v21370_v13 = vld [vmem:[#allocation6 + $0x3028] ss:$84 sps:$4 sm:$0xff]   ;;  %v21373_v54 = vld [vmem:[#allocation6 + $0x3030] ss:$84 sps:$4 sm:$0xff]  }
 0x789   :  { %13943 = vmatprep.subr.bf16.mxu1 %v21339_v47  ;;  %v21378_v47 = vld [vmem:[#allocation6 + $0x30d4] ss:$84 sps:$4 sm:$0xff]  }
 0x78b   :  { %13698 = vmatpush1.bf16.msra.mxu0 %v21334_v57  ;;  %v21381_v57 = vld [vmem:[#allocation6 + $0x30dc] ss:$84 sps:$4 sm:$0xff]  }
 0x78c   :  { %13944 = vmatpush1.bf16.msra.mxu1 %v21337_v60  ;;  %13699 = vmatprep.subr.bf16.mxu0 %v21342_v3  ;;  %v21376_v60 = vld [vmem:[#allocation6 + $0x30d0] ss:$84 sps:$4 sm:$0xff]   ;;  %v21379_v3 = vld [vmem:[#allocation6 + $0x30d8] ss:$84 sps:$4 sm:$0xff]  }
 0x78d   :  { %13945 = vmatprep.subr.bf16.mxu1 %v21345_v4  ;;  %v21384_v4 = vld [vmem:[#allocation6 + $0x317c] ss:$84 sps:$4 sm:$0xff]  }
 0x78f   :  { %13700 = vmatpush1.bf16.msra.mxu0 %v21340_v6  ;;  %v21387_v6 = vld [vmem:[#allocation6 + $0x3184] ss:$84 sps:$4 sm:$0xff]  }
 0x790   :  { %13946 = vmatpush1.bf16.msra.mxu1 %v21343_v7  ;;  %13701 = vmatprep.subr.bf16.mxu0 %v21348_v12  ;;  %v21382_v7 = vld [vmem:[#allocation6 + $0x3178] ss:$84 sps:$4 sm:$0xff]   ;;  %v21385_v12 = vld [vmem:[#allocation6 + $0x3180] ss:$84 sps:$4 sm:$0xff]  }
 0x791   :  { %13947 = vmatprep.subr.bf16.mxu1 %v21351_v15  ;;  %v21390_v15 = vld [vmem:[#allocation6 + $0x3224] ss:$84 sps:$4 sm:$0xff]  }
 0x793   :  { %13702 = vmatpush1.bf16.msra.mxu0 %v21346_v19  ;;  %v21393_v19 = vld [vmem:[#allocation6 + $0x322c] ss:$84 sps:$4 sm:$0xff]  }
 0x794   :  { %13948 = vmatpush1.bf16.msra.mxu1 %v21349_v20  ;;  %13703 = vmatprep.subr.bf16.mxu0 %v21354_v22  ;;  %v21388_v20 = vld [vmem:[#allocation6 + $0x3220] ss:$84 sps:$4 sm:$0xff]   ;;  %v21391_v22 = vld [vmem:[#allocation6 + $0x3228] ss:$84 sps:$4 sm:$0xff]  }
 0x795   :  { %13949 = vmatprep.subr.bf16.mxu1 %v21357_v23  ;;  %v21396_v23 = vld [vmem:[#allocation6 + $0x32cc] ss:$84 sps:$4 sm:$0xff]  }
 0x797   :  { %13704 = vmatpush1.bf16.msra.mxu0 %v21352_v24  ;;  %v21399_v24 = vld [vmem:[#allocation6 + $0x32d4] ss:$84 sps:$4 sm:$0xff]  }
 0x798   :  { %13950 = vmatpush1.bf16.msra.mxu1 %v21355_v25  ;;  %13705 = vmatprep.subr.bf16.mxu0 %v21360_v27  ;;  %v21394_v25 = vld [vmem:[#allocation6 + $0x32c8] ss:$84 sps:$4 sm:$0xff]   ;;  %v21397_v27 = vld [vmem:[#allocation6 + $0x32d0] ss:$84 sps:$4 sm:$0xff]  }
 0x799   :  { %13951 = vmatprep.subr.bf16.mxu1 %v21363_v28  ;;  %v21402_v28 = vld [vmem:[#allocation6 + $0x3374] ss:$84 sps:$4 sm:$0xff]  }
 0x79b   :  { %13706 = vmatpush1.bf16.msra.mxu0 %v21358_v29  ;;  %v21405_v29 = vld [vmem:[#allocation6 + $0x337c] ss:$84 sps:$4 sm:$0xff]  }
 0x79c   :  { %13952 = vmatpush1.bf16.msra.mxu1 %v21361_v31  ;;  %13707 = vmatprep.subr.bf16.mxu0 %v21366_v32  ;;  %v21400_v31 = vld [vmem:[#allocation6 + $0x3370] ss:$84 sps:$4 sm:$0xff]   ;;  %v21403_v32 = vld [vmem:[#allocation6 + $0x3378] ss:$84 sps:$4 sm:$0xff]  }
 0x79d   :  { %13953 = vmatprep.subr.bf16.mxu1 %v21369_v5  ;;  %v21408_v5 = vld [vmem:[#allocation6 + $0x341c] ss:$84 sps:$4 sm:$0xff]  }
 0x79f   :  { %13708 = vmatpush1.bf16.msra.mxu0 %v21364_v35  ;;  %v21411_v35 = vld [vmem:[#allocation6 + $0x3424] ss:$84 sps:$4 sm:$0xff]  }
 0x7a0   :  { %13954 = vmatpush1.bf16.msra.mxu1 %v21367_v37  ;;  %13709 = vmatprep.subr.bf16.mxu0 %v21372_v55  ;;  %v21406_v37 = vld [vmem:[#allocation6 + $0x3418] ss:$84 sps:$4 sm:$0xff]   ;;  %v21409_v55 = vld [vmem:[#allocation6 + $0x3420] ss:$84 sps:$4 sm:$0xff]  }
 0x7a1   :  { %13955 = vmatprep.subr.bf16.mxu1 %v21375_v39  ;;  %v21414_v39 = vld [vmem:[#allocation6 + $0x34c4] ss:$84 sps:$4 sm:$0xff]  }
 0x7a3   :  { %13710 = vmatpush1.bf16.msra.mxu0 %v21370_v13  ;;  %v21417_v13 = vld [vmem:[#allocation6 + $0x34cc] ss:$84 sps:$4 sm:$0xff]  }
 0x7a4   :  { %13956 = vmatpush1.bf16.msra.mxu1 %v21373_v54  ;;  %13711 = vmatprep.subr.bf16.mxu0 %v21378_v47  ;;  %v21412_v54 = vld [vmem:[#allocation6 + $0x34c0] ss:$84 sps:$4 sm:$0xff]   ;;  %v21415_v47 = vld [vmem:[#allocation6 + $0x34c8] ss:$84 sps:$4 sm:$0xff]  }
 0x7a5   :  { %13957 = vmatprep.subr.bf16.mxu1 %v21381_v57  ;;  %v21420_v57 = vld [vmem:[#allocation6 + $0x356c] ss:$84 sps:$4 sm:$0xff]  }
 0x7a7   :  { %13712 = vmatpush1.bf16.msra.mxu0 %v21376_v60  ;;  %v21423_v60 = vld [vmem:[#allocation6 + $0x3574] ss:$84 sps:$4 sm:$0xff]  }
 0x7a8   :  { %13958 = vmatpush1.bf16.msra.mxu1 %v21379_v3  ;;  %13713 = vmatprep.subr.bf16.mxu0 %v21384_v4  ;;  %v21418_v3 = vld [vmem:[#allocation6 + $0x3568] ss:$84 sps:$4 sm:$0xff]   ;;  %v21421_v4 = vld [vmem:[#allocation6 + $0x3570] ss:$84 sps:$4 sm:$0xff]  }
 0x7a9   :  { %13959 = vmatprep.subr.bf16.mxu1 %v21387_v6  ;;  %v21426_v6 = vld [vmem:[#allocation6 + $0x3614] ss:$84 sps:$4 sm:$0xff]  }
 0x7ab   :  { %13714 = vmatpush1.bf16.msra.mxu0 %v21382_v7  ;;  %v21429_v7 = vld [vmem:[#allocation6 + $0x361c] ss:$84 sps:$4 sm:$0xff]  }
 0x7ac   :  { %13960 = vmatpush1.bf16.msra.mxu1 %v21385_v12  ;;  %13715 = vmatprep.subr.bf16.mxu0 %v21390_v15  ;;  %v21424_v12 = vld [vmem:[#allocation6 + $0x3610] ss:$84 sps:$4 sm:$0xff]   ;;  %v21427_v15 = vld [vmem:[#allocation6 + $0x3618] ss:$84 sps:$4 sm:$0xff]  }
 0x7ad   :  { %13961 = vmatprep.subr.bf16.mxu1 %v21393_v19  ;;  %v21432_v19 = vld [vmem:[#allocation6 + $0x36bc] ss:$84 sps:$4 sm:$0xff]  }
 0x7af   :  { %13716 = vmatpush1.bf16.msra.mxu0 %v21388_v20  ;;  %v21435_v20 = vld [vmem:[#allocation6 + $0x36c4] ss:$84 sps:$4 sm:$0xff]  }
 0x7b0   :  { %13962 = vmatpush1.bf16.msra.mxu1 %v21391_v22  ;;  %13717 = vmatprep.subr.bf16.mxu0 %v21396_v23  ;;  %v21430_v22 = vld [vmem:[#allocation6 + $0x36b8] ss:$84 sps:$4 sm:$0xff]   ;;  %v21433_v23 = vld [vmem:[#allocation6 + $0x36c0] ss:$84 sps:$4 sm:$0xff]  }
 0x7b1   :  { %13963 = vmatprep.subr.bf16.mxu1 %v21399_v24  ;;  %v21436_v24 = vld [vmem:[#allocation6 + $0x590] ss:$84 sps:$4 sm:$0xff]  }
 0x7b3   :  { %13718 = vmatpush1.bf16.msra.mxu0 %v21394_v25  ;;  %v21437_v25 = vld [vmem:[#allocation6 + $0x1010] ss:$84 sps:$4 sm:$0xff]  }
 0x7b4   :  { %13964 = vmatpush1.bf16.msra.mxu1 %v21397_v27  ;;  %13719 = vmatprep.subr.bf16.mxu0 %v21402_v28  ;;  %v21438_v27 = vld [vmem:[#allocation6 + $0x50] ss:$84 sps:$4 sm:$0xff]   ;;  %v21440_v28 = vld [vmem:[#allocation6 + $0x638] ss:$84 sps:$4 sm:$0xff]  }
 0x7b5   :  { %13965 = vmatprep.subr.bf16.mxu1 %v21405_v29  ;;  %v21441_v29 = vld [vmem:[#allocation6 + $0x10b8] ss:$84 sps:$4 sm:$0xff]  }
 0x7b7   :  { %13720 = vmatpush1.bf16.msra.mxu0 %v21400_v31  ;;  %v21442_v31 = vld [vmem:[#allocation6 + $0xf8] ss:$84 sps:$4 sm:$0xff]  }
 0x7b8   :  { %13966 = vmatpush1.bf16.msra.mxu1 %v21403_v32  ;;  %13721 = vmatprep.subr.bf16.mxu0 %v21408_v5  ;;  %v21443_v32 = vld [vmem:[#allocation6 + $0xb78] ss:$84 sps:$4 sm:$0xff]   ;;  %v21444_v5 = vld [vmem:[#allocation6 + $0x6e0] ss:$84 sps:$4 sm:$0xff]  }
 0x7b9   :  { %13967 = vmatprep.subr.bf16.mxu1 %v21411_v35  ;;  %v21445_v35 = vld [vmem:[#allocation6 + $0x1160] ss:$84 sps:$4 sm:$0xff]  }
 0x7bb   :  { %13722 = vmatpush1.bf16.msra.mxu0 %v21406_v37  ;;  %v21446_v37 = vld [vmem:[#allocation6 + $0x1a0] ss:$84 sps:$4 sm:$0xff]  }
 0x7bc   :  { %13968 = vmatpush1.bf16.msra.mxu1 %v21409_v55  ;;  %13732 = vmatprep.subr.bf16.mxu0 %v21414_v39  ;;  %v21447_v55 = vld [vmem:[#allocation6 + $0xc20] ss:$84 sps:$4 sm:$0xff]   ;;  %v21448_v39 = vld [vmem:[#allocation6 + $0x788] ss:$84 sps:$4 sm:$0xff]  }
 0x7bd   :  { %13978 = vmatprep.subr.bf16.mxu1 %v21417_v13  ;;  %v21449_v13 = vld [vmem:[#allocation6 + $0x1208] ss:$84 sps:$4 sm:$0xff]  }
 0x7be   :  { %13724 = vmatmul.mubr.bf16.vlgmr.msra.gmra.mrb[24].mxu0 %v22204_v51 }
 0x7bf   :  { %13970 = vmatmul.mubr.bf16.vlgmr.msra.gmra.mrb[32].mxu1 %v22204_v51  ;;  %13733 = vmatpush1.bf16.msra.mxu0 %v21412_v54  ;;  %v21450_v54 = vld [vmem:[#allocation6 + $0x248] ss:$84 sps:$4 sm:$0xff]  }
 0x7c0   :  { %13979 = vmatpush1.bf16.msra.mxu1 %v21415_v47  ;;  %13734 = vmatprep.subr.bf16.mxu0 %v21420_v57  ;;  %v21452_v47 = vld [vmem:[#allocation6 + $0x830] ss:$84 sps:$4 sm:$0xff]  }
 0x7c1   :  { %13980 = vmatprep.subr.bf16.mxu1 %v21423_v60  ;;  %13764 = vmatprep.mubr.bf16.mxu0 %v21898_v0  ;;  %v21453_v57 = vld [vmem:[#allocation6 + $0x12b0] ss:$84 sps:$4 sm:$0xff]  }
 0x7c2   :  { %14010 = vmatprep.mubr.bf16.mxu1 %v21898_v0  ;;  %v21439_v0 = vld [vmem:[#allocation6 + $0xad0] ss:$84 sps:$4 sm:$0xff]  }
 0x7c3   :  { %13735 = vmatpush1.bf16.msra.mxu0 %v21418_v3  ;;  %v21455_v60 = vld [vmem:[#allocation6 + $0xd70] ss:$84 sps:$4 sm:$0xff]   ;;  %v21456_v3 = vld [vmem:[#allocation6 + $0x8d8] ss:$84 sps:$4 sm:$0xff]  }
 0x7c4   :  { %13981 = vmatpush1.bf16.msra.mxu1 %v21421_v4  ;;  %13736 = vmatprep.subr.bf16.mxu0 %v21426_v6  ;;  %v21457_v4 = vld [vmem:[#allocation6 + $0x1358] ss:$84 sps:$4 sm:$0xff]  }
 0x7c5   :  { %13982 = vmatprep.subr.bf16.mxu1 %v21429_v7  ;;  %v21458_v6 = vld [vmem:[#allocation6 + $0x398] ss:$84 sps:$4 sm:$0xff]  }
 0x7c6   :  { %v21459_v7 = vld [vmem:[#allocation6 + $0xe18] ss:$84 sps:$4 sm:$0xff]  }
 0x7c7   :  { %13737 = vmatpush1.bf16.msra.mxu0 %v21424_v12  ;;  %v21460_v12 = vld [vmem:[#allocation6 + $0x980] ss:$84 sps:$4 sm:$0xff]  }
 0x7c8   :  { %13983 = vmatpush1.bf16.msra.mxu1 %v21427_v15  ;;  %13738 = vmatprep.subr.bf16.mxu0 %v21432_v19  ;;  %v21461_v15 = vld [vmem:[#allocation6 + $0x1400] ss:$84 sps:$4 sm:$0xff]  }
 0x7c9   :  { %13984 = vmatprep.subr.bf16.mxu1 %v21435_v20  ;;  %v21462_v19 = vld [vmem:[#allocation6 + $0x440] ss:$84 sps:$4 sm:$0xff]  }
 0x7ca   :  { %v21463_v20 = vld [vmem:[#allocation6 + $0xec0] ss:$84 sps:$4 sm:$0xff]  }
 0x7cb   :  { %13739 = vmatpush1.bf16.msra.mxu0 %v21430_v22  ;;  %v21464_v22 = vld [vmem:[#allocation6 + $0xa28] ss:$84 sps:$4 sm:$0xff]  }
 0x7cc   :  { %13985 = vmatpush1.bf16.msra.mxu1 %v21433_v23  ;;  %18216 = vmatprep.subr.bf16.mxu0 %v21436_v24  ;;  %v21465_v23 = vld [vmem:[#allocation6 + $0x14a8] ss:$84 sps:$4 sm:$0xff]  }
 0x7cd   :  { %18238 = vmatprep.subr.bf16.mxu1 %v21437_v25  ;;  %v21466_v24 = vld [vmem:[#allocation6 + $0x4e8] ss:$84 sps:$4 sm:$0xff]  }
 0x7ce   :  { %18031 = vmatmul.mubr.msk.bf16.vlgmr.msra.gmra.mrb[24].mxu0 %vm11555_vm3, %v22211_v17  ;;  %v21467_v25 = vld [vmem:[#allocation6 + $0xf68] ss:$84 sps:$4 sm:$0xff]  }
 0x7cf   :  { %18032 = vmatmul.mubr.msk.bf16.vlgmr.msra.gmra.mrb[32].mxu1 %vm11555_vm3, %v22211_v17  ;;  %18217 = vmatpush3.bf16.msra.mxu0 %v21438_v27  ;;  %v21468_v27 = vld [vmem:[#allocation6 + $0x1a90] ss:$84 sps:$4 sm:$0xff]  }
 0x7d0   :  { %14051 = vmatprep.mubr.bf16.mxu0 %v22106_v63  ;;  %18239 = vmatpush3.bf16.msra.mxu1 %v21439_v0  ;;  %v21451_v63 = vld [vmem:[#allocation6 + $0xcc8] ss:$84 sps:$4 sm:$0xff]   ;;  %v21469_v0 = vld [vmem:[#allocation6 + $0x2510] ss:$84 sps:$4 sm:$0xff]  }
 0x7d1   :  { %14091 = vmatprep.mubr.bf16.mxu1 %v22125_v26  ;;  %18218 = vmatprep.subr.bf16.mxu0 %v21440_v28  ;;  %v21454_v26 = vld [vmem:[#allocation6 + $0x2f0] ss:$84 sps:$4 sm:$0xff]  }
 0x7d2   :  { %18240 = vmatprep.subr.bf16.mxu1 %v21441_v29  ;;  %v21470_v28 = vld [vmem:[#allocation6 + $0x1550] ss:$84 sps:$4 sm:$0xff]  }
 0x7d3   :  { %18219 = vmatpush3.bf16.msra.mxu0 %v21442_v31  ;;  %v21471_v29 = vld [vmem:[#allocation6 + $0x1fd0] ss:$84 sps:$4 sm:$0xff]   ;;  %v21472_v31 = vld [vmem:[#allocation6 + $0x1b38] ss:$84 sps:$4 sm:$0xff]  }
 0x7d4   :  { %18241 = vmatpush3.bf16.msra.mxu1 %v21443_v32  ;;  %18220 = vmatprep.subr.bf16.mxu0 %v21444_v5  ;;  %v21473_v32 = vld [vmem:[#allocation6 + $0x25b8] ss:$84 sps:$4 sm:$0xff]  }
 0x7d5   :  { %18242 = vmatprep.subr.bf16.mxu1 %v21445_v35  ;;  %v21474_v5 = vld [vmem:[#allocation6 + $0x15f8] ss:$84 sps:$4 sm:$0xff]  }
 0x7d6   :  { %v21475_v35 = vld [vmem:[#allocation6 + $0x2078] ss:$84 sps:$4 sm:$0xff]  }
 0x7d7   :  { %18221 = vmatpush3.bf16.msra.mxu0 %v21446_v37  ;;  %v21476_v37 = vld [vmem:[#allocation6 + $0x1be0] ss:$84 sps:$4 sm:$0xff]  }
 0x7d8   :  { %18243 = vmatpush3.bf16.msra.mxu1 %v21447_v55  ;;  %18222 = vmatprep.subr.bf16.mxu0 %v21448_v39  ;;  %v21477_v55 = vld [vmem:[#allocation6 + $0x2660] ss:$84 sps:$4 sm:$0xff]  }
 0x7d9   :  { %18244 = vmatprep.subr.bf16.mxu1 %v21449_v13  ;;  %v21478_v39 = vld [vmem:[#allocation6 + $0x16a0] ss:$84 sps:$4 sm:$0xff]   ;;  %v21480_v13 = vld [vmem:[#allocation6 + $0x1c88] ss:$84 sps:$4 sm:$0xff]  }
 0x7db   :  { %18223 = vmatpush3.bf16.msra.mxu0 %v21450_v54  ;;  %v21482_v54 = vld [vmem:[#allocation6 + $0x1748] ss:$84 sps:$4 sm:$0xff]  }
 0x7dc   :  { %18245 = vmatpush3.bf16.msra.mxu1 %v21451_v63  ;;  %18224 = vmatprep.subr.bf16.mxu0 %v21452_v47  ;;  %v21484_v63 = vld [vmem:[#allocation6 + $0x1d30] ss:$84 sps:$4 sm:$0xff]  }
 0x7dd   :  { %18246 = vmatprep.subr.bf16.mxu1 %v21453_v57  ;;  %v21485_v47 = vld [vmem:[#allocation6 + $0x27b0] ss:$84 sps:$4 sm:$0xff]  }
 0x7de   :  { %v21487_v57 = vld [vmem:[#allocation6 + $0x2270] ss:$84 sps:$4 sm:$0xff]  }
 0x7df   :  { %18225 = vmatpush3.bf16.msra.mxu0 %v21454_v26  ;;  %v21488_v26 = vld [vmem:[#allocation6 + $0x1dd8] ss:$84 sps:$4 sm:$0xff]  }
 0x7e0   :  { %18247 = vmatpush3.bf16.msra.mxu1 %v21455_v60  ;;  %18226 = vmatprep.subr.bf16.mxu0 %v21456_v3  ;;  %v21489_v60 = vld [vmem:[#allocation6 + $0x2858] ss:$84 sps:$4 sm:$0xff]  }
 0x7e1   :  { %18248 = vmatprep.subr.bf16.mxu1 %v21457_v4  ;;  %v21490_v3 = vld [vmem:[#allocation6 + $0x1898] ss:$84 sps:$4 sm:$0xff]  }
 0x7e2   :  { %v21491_v4 = vld [vmem:[#allocation6 + $0x2318] ss:$84 sps:$4 sm:$0xff]  }
 0x7e3   :  { %18227 = vmatpush3.bf16.msra.mxu0 %v21458_v6  ;;  %v21492_v6 = vld [vmem:[#allocation6 + $0x1e80] ss:$84 sps:$4 sm:$0xff]  }
 0x7e4   :  { %18249 = vmatpush3.bf16.msra.mxu1 %v21459_v7  ;;  %18228 = vmatprep.subr.bf16.mxu0 %v21460_v12  ;;  %v21493_v7 = vld [vmem:[#allocation6 + $0x2900] ss:$84 sps:$4 sm:$0xff]  }
 0x7e5   :  { %18250 = vmatprep.subr.bf16.mxu1 %v21461_v15  ;;  %v21494_v12 = vld [vmem:[#allocation6 + $0x1940] ss:$84 sps:$4 sm:$0xff]  }
 0x7e6   :  { %v21495_v15 = vld [vmem:[#allocation6 + $0x23c0] ss:$84 sps:$4 sm:$0xff]  }
 0x7e7   :  { %18229 = vmatpush3.bf16.msra.mxu0 %v21462_v19  ;;  %v21496_v19 = vld [vmem:[#allocation6 + $0x1f28] ss:$84 sps:$4 sm:$0xff]  }
 0x7e8   :  { %18251 = vmatpush3.bf16.msra.mxu1 %v21463_v20  ;;  %18230 = vmatprep.subr.bf16.mxu0 %v21464_v22  ;;  %v21497_v20 = vld [vmem:[#allocation6 + $0x29a8] ss:$84 sps:$4 sm:$0xff]  }
 0x7e9   :  { %18252 = vmatprep.subr.bf16.mxu1 %v21465_v23  ;;  %v21498_v22 = vld [vmem:[#allocation6 + $0x19e8] ss:$84 sps:$4 sm:$0xff]  }
 0x7ea   :  { %v21499_v23 = vld [vmem:[#allocation6 + $0x2468] ss:$84 sps:$4 sm:$0xff]  }
 0x7eb   :  { %18231 = vmatpush3.bf16.msra.mxu0 %v21466_v24  ;;  %v21500_v24 = vld [vmem:[#allocation6 + $0x2f90] ss:$84 sps:$4 sm:$0xff]  }
 0x7ec   :  { %18253 = vmatpush3.bf16.msra.mxu1 %v21467_v25  ;;  %18260 = vmatprep.subr.bf16.mxu0 %v21468_v27  ;;  %v21501_v25 = vld [vmem:[#allocation6 + $0x2a50] ss:$84 sps:$4 sm:$0xff]  }
 0x7ed   :  { %18282 = vmatprep.subr.bf16.mxu1 %v21469_v0  ;;  %v21502_v27 = vld [vmem:[#allocation6 + $0x34d0] ss:$84 sps:$4 sm:$0xff]   ;;  %v21503_v0 = vld [vmem:[#allocation6 + $0x3038] ss:$84 sps:$4 sm:$0xff]  }
 0x7ee   :  { %14052 = vmatmul.mubr.bf16.vlgmr.msra.gmra.mrb[28].mxu0 %v22111_v2  ;;  %v21479_v2 = vld [vmem:[#allocation6 + $0x2120] ss:$84 sps:$4 sm:$0xff]  }
 0x7ef   :  { %14092 = vmatmul.mubr.bf16.vlgmr.msra.gmra.mrb[36].mxu1 %v22152_v58  ;;  %18261 = vmatpush3.bf16.msra.mxu0 %v21470_v28  ;;  %v21481_v58 = vld [vmem:[#allocation6 + $0x2708] ss:$84 sps:$4 sm:$0xff]   ;;  %v22361_v28 = vld [vmem:[#allocation7] sm:$0xff] }
 0x7f0   :  { %14131 = vmatprep.mubr.bf16.mxu0 %v22154_v62  ;;  %18283 = vmatpush3.bf16.msra.mxu1 %v21471_v29  ;;  %v21483_v62 = vld [vmem:[#allocation6 + $0x21c8] ss:$84 sps:$4 sm:$0xff]   ;;  %v21504_v29 = vld [vmem:[#allocation6 + $0x2af8] ss:$84 sps:$4 sm:$0xff]  }
 0x7f1   :  { %14171 = vmatprep.mubr.bf16.mxu1 %v22176_v38  ;;  %18262 = vmatprep.subr.bf16.mxu0 %v21472_v31  ;;  %v21486_v38 = vld [vmem:[#allocation6 + $0x17f0] ss:$84 sps:$4 sm:$0xff]   ;;  %v21505_v31 = vld [vmem:[#allocation6 + $0x3578] ss:$84 sps:$4 sm:$0xff]  }
 0x7f2   :  { %18284 = vmatprep.subr.bf16.mxu1 %v21473_v32  ;;  %v21506_v32 = vld [vmem:[#allocation6 + $0x30e0] ss:$84 sps:$4 sm:$0xff]  }
 0x7f3   :  { %18263 = vmatpush3.bf16.msra.mxu0 %v21474_v5  ;;  %v2553_v5 = vrot.slane %v22361_v28, %v22100_v50 }
 0x7f4   :  { %18285 = vmatpush3.bf16.msra.mxu1 %v21475_v35  ;;  %18264 = vmatprep.subr.bf16.mxu0 %v21476_v37  ;;  %v21509_v35 = vld [vmem:[#allocation6 + $0x3188] ss:$84 sps:$4 sm:$0xff]  }
 0x7f5   :  { %18286 = vmatprep.subr.bf16.mxu1 %v21477_v55  ;;  %v21510_v37 = vld [vmem:[#allocation6 + $0x2c48] ss:$84 sps:$4 sm:$0xff]  }
 0x7f6   :  { %v21511_v55 = vld [vmem:[#allocation6 + $0x36c8] ss:$84 sps:$4 sm:$0xff]  }
 0x7f7   :  { %18265 = vmatpush3.bf16.msra.mxu0 %v21478_v39  ;;  %v21512_v39 = vld [vmem:[#allocation6 + $0x3230] ss:$84 sps:$4 sm:$0xff]  }
 0x7f8   :  { %18287 = vmatpush3.bf16.msra.mxu1 %v21479_v2  ;;  %18266 = vmatprep.subr.bf16.mxu0 %v21480_v13  ;;  %v21513_v2 = vld [vmem:[#allocation9 + $0x40] sm:$0xff]  }
 0x7f9   :  { %18288 = vmatprep.subr.bf16.mxu1 %v21481_v58  ;;  %v21514_v58 = vld [vmem:[#allocation6 + $0x2cf0] ss:$84 sps:$4 sm:$0xff]  }
 0x7fb   :  { %18267 = vmatpush3.bf16.msra.mxu0 %v21482_v54  ;;  %v21515_v54 = vld [vmem:[#allocation9] sm:$0xff]  }
 0x7fc   :  { %18289 = vmatpush3.bf16.msra.mxu1 %v21483_v62  ;;  %18268 = vmatprep.subr.bf16.mxu0 %v21484_v63  ;;  %v21516_v62 = vld [vmem:[#allocation6 + $0x32d8] ss:$84 sps:$4 sm:$0xff]   ;;  %v21517_v63 = vld [vmem:[#allocation9 + $0x48] sm:$0xff]  }
 0x7fd   :  { %18290 = vmatprep.subr.bf16.mxu1 %v21485_v47 }
 0x7ff   :  { %18269 = vmatpush3.bf16.msra.mxu0 %v21486_v38  ;;  %v21519_v38 = vld [vmem:[#allocation9 + $0x8] sm:$0xff]  }
 0x800   :  { %18291 = vmatpush3.bf16.msra.mxu1 %v21487_v57  ;;  %18270 = vmatprep.subr.bf16.mxu0 %v21488_v26  ;;  %v21520_v57 = vld [vmem:[#allocation6 + $0x3380] ss:$84 sps:$4 sm:$0xff]   ;;  %v2561_v26 = vrot.slane %v22361_v28, %v22109_v1 }
 0x801   :  { %18292 = vmatprep.subr.bf16.mxu1 %v21489_v60  ;;  %v21521_v60 = vld [vmem:[#allocation9 + $0x50] sm:$0xff]  }
 0x803   :  { %18271 = vmatpush3.bf16.msra.mxu0 %v21490_v3  ;;  %v21522_v3 = vld [vmem:[#allocation6 + $0x2e40] ss:$84 sps:$4 sm:$0xff]  }
 0x804   :  { %18293 = vmatpush3.bf16.msra.mxu1 %v21491_v4  ;;  %18272 = vmatprep.subr.bf16.mxu0 %v21492_v6  ;;  %v21523_v4 = vld [vmem:[#allocation9 + $0x10] sm:$0xff]  }
 0x805   :  { %18294 = vmatprep.subr.bf16.mxu1 %v21493_v7  ;;  %v21524_v6 = vld [vmem:[#allocation6 + $0x3428] ss:$84 sps:$4 sm:$0xff]   ;;  %v21525_v7 = vld [vmem:[#allocation9 + $0x58] sm:$0xff]  }
 0x807   :  { %18273 = vmatpush3.bf16.msra.mxu0 %v21494_v12  ;;  %v21526_v12 = vld [vmem:[#allocation6 + $0x2ee8] ss:$84 sps:$4 sm:$0xff]  }
 0x808   :  { %18295 = vmatpush3.bf16.msra.mxu1 %v21495_v15  ;;  %18274 = vmatprep.subr.bf16.mxu0 %v21496_v19  ;;  %v21527_v15 = vld [vmem:[#allocation9 + $0x18] sm:$0xff]   ;;  %v21529_v19 = vld [vmem:[#allocation9 + $0xc0] sm:$0xff]  }
 0x809   :  { %18296 = vmatprep.subr.bf16.mxu1 %v21497_v20 }
 0x80b   :  { %18275 = vmatpush3.bf16.msra.mxu0 %v21498_v22  ;;  %v21528_v22 = vld [vmem:[#allocation9 + $0x60] sm:$0xff]  }
 0x80c   :  { %18297 = vmatpush3.bf16.msra.mxu1 %v21499_v23  ;;  %18304 = vmatprep.subr.bf16.mxu0 %v21500_v24  ;;  %v21531_v23 = vld [vmem:[#allocation9 + $0x80] sm:$0xff]  }
 0x80d   :  { %18579 = vmatprep.subr.bf16.mxu1 %v21899_v41  ;;  %v21530_v24 = vld [vmem:[#allocation9 + $0x20] sm:$0xff]  }
 0x80e   :  { %14132 = vmatmul.mubr.bf16.vlgmr.msra.gmra.mrb[32].mxu0 %v22174_v34  ;;  %v21507_v34 = vld [vmem:[#allocation6 + $0x2ba0] ss:$84 sps:$4 sm:$0xff]  }
 0x80f   :  { %14172 = vmatmul.mubr.bf16.vlgmr.msra.gmra.mrb[40].mxu1 %v22193_v52  ;;  %18305 = vmatpush3.bf16.msra.mxu0 %v21501_v25  ;;  %v21508_v52 = vld [vmem:[#allocation6 + $0x3620] ss:$84 sps:$4 sm:$0xff]  }
 0x810   :  { %14211 = vmatprep.mubr.bf16.mxu0 %v22195_v36  ;;  %18580 = vmatpush3.bf16.msra.mxu1 %v21502_v27  ;;  %v18632_v36 = vadd.f32 %v22235_v18, %v2553_v5  ;;  %v21518_v18 = vld [vmem:[#allocation6 + $0x2d98] ss:$84 sps:$4 sm:$0xff]   ;;  %v21533_v25 = vld [vmem:[#allocation9 + $0xc8] sm:$0xff]  }
 0x811   :  { %18306 = vmatprep.subr.bf16.mxu0 %v21503_v0  ;;  %18581 = vmatprep.subr.bf16.mxu1 %v21899_v41  ;;  %v21535_v0 = vld [vmem:[#allocation9 + $0x88] sm:$0xff]   ;;  %v21536_v5 = vld [vmem:[#allocation9 + $0x70] sm:$0xff]  }
 0x812   :  { %18587 = vmatprep.mubr.msk.bf16.mxu1 %vm21900_vm2, %v21899_v41  ;;  %v14260_v13 = vmax.f32 %v18632_v36, 0.0 }
 0x813   :  { %18307 = vmatpush3.bf16.msra.mxu0 %v21504_v29  ;;  %v21534_v29 = vld [vmem:[#allocation9 + $0x28] sm:$0xff]  }
 0x814   :  { %18582 = vmatpush3.bf16.msra.mxu1 %v21505_v31  ;;  %18308 = vmatprep.subr.bf16.mxu0 %v21506_v32  ;;  %v14281_v47 = vpack.c.bf16 %v14260_v13, %v14260_v13  ;;  %v21537_v31 = vld [vmem:[#allocation9 + $0xd0] sm:$0xff]   ;;  %v2549_v32 = vrot.slane %v22361_v28, %v22095_v48  ;;  %v21544_v13 = vld [vmem:[#allocation9 + $0xe0] sm:$0xff]  }
 0x815   :  { %18583 = vmatprep.subr.bf16.mxu1 %v21899_v41 }
 0x816   :  { %v18631_v36 = vadd.f32 %v22231_v14, %v2549_v32  ;;  %v21564_v32 = vld [vmem:[#allocation9 + $0x168] sm:$0xff]  }
 0x817   :  { %18309 = vmatpush3.bf16.msra.mxu0 %v21507_v34  ;;  %v2569_v34 = vrot.slane %v22361_v28, %v22144_v30 }
 0x818   :  { %18584 = vmatpush3.bf16.msra.mxu1 %v21508_v52  ;;  %18310 = vmatprep.subr.bf16.mxu0 %v21509_v35  ;;  %v21539_v52 = vld [vmem:[#allocation9 + $0x90] sm:$0xff]   ;;  %v21541_v35 = vld [vmem:[#allocation9 + $0xd8] sm:$0xff]  }
 0x819   :  { %18585 = vmatprep.subr.bf16.mxu1 %v21899_v41 }
 0x81b   :  { %18311 = vmatpush3.bf16.msra.mxu0 %v21510_v37  ;;  %v21540_v37 = vld [vmem:[#allocation9 + $0x78] sm:$0xff]  }
 0x81c   :  { %18586 = vmatpush3.bf16.msra.mxu1 %v21511_v55  ;;  %18312 = vmatprep.subr.bf16.mxu0 %v21512_v39  ;;  %v18636_v55 = vadd.f32 %v22269_v9, %v2569_v34  ;;  %v21543_v39 = vld [vmem:[#allocation9 + $0x98] sm:$0xff]   ;;  %v21567_v34 = vld [vmem:[#allocation9 + $0x188] sm:$0xff]  }
 0x81d   :  { %18331 = vmatprep.subr.bf16.mxu1 %v21513_v2  ;;  %v21542_v2 = vld [vmem:[#allocation9 + $0x38] sm:$0xff]  }
 0x81f   :  { %18588 = vmatmul.mubr.msk.bf16.vlgmr.msra.gmra.mrb[44].mxu1 %vm11555_vm3, %v22211_v17  ;;  %18313 = vmatpush3.bf16.msra.mxu0 %v21514_v58  ;;  %v18634_v17 = vadd.f32 %v22237_v21, %v2561_v26  ;;  %v21532_v21 = vld [vmem:[#allocation9 + $0x68] sm:$0xff]   ;;  %v14259_v58 = vmax.f32 %v18631_v36, 0.0  ;;  %v2557_v26 = vrot.slane %v22361_v28, %v22138_v8  ;;  %v21568_v36 = vld [vmem:[#allocation9 + $0x170] sm:$0xff]  }
 0x820   :  { %18332 = vmatpush3.bf16.msra.mxu1 %v21515_v54  ;;  %15684 = vmatprep.mubr.bf16.mxu1 %v14281_v47  ;;  %v21545_v54 = vld [vmem:[#allocation9 + $0x140] sm:$0xff]  }
 0x821   :  { %18314 = vmatprep.subr.bf16.mxu0 %v21516_v62  ;;  %18333 = vmatprep.subr.bf16.mxu1 %v21517_v63  ;;  %v14262_v20 = vmax.f32 %v18634_v17, 0.0  ;;  %v14264_v62 = vmax.f32 %v18636_v55, 0.0  ;;  %v21546_v63 = vld [vmem:[#allocation9 + $0xa0] sm:$0xff]   ;;  %v14280_v14 = vpack.c.bf16 %v14259_v58, %v14259_v58  ;;  %v21554_v17 = vld [vmem:[#allocation9 + $0xb0] sm:$0xff]   ;;  %v21572_v58 = vld [vmem:[#allocation9 + $0x178] sm:$0xff]  }
 0x822   :  { %v21547_v47 = vld [vmem:[#allocation9 + $0x100] sm:$0xff]   ;;  %v21571_v55 = vld [vmem:[#allocation9 + $0x190] sm:$0xff]  }
 0x823   :  { %18315 = vmatpush3.bf16.msra.mxu0 %v21518_v18  ;;  %v14283_v27 = vpack.c.bf16 %v14262_v20, %v14262_v20  ;;  %v21548_v18 = vld [vmem:[#allocation9 + $0xe8] sm:$0xff]   ;;  %v14285_v9 = vpack.c.bf16 %v14264_v62, %v14264_v62  ;;  %v21557_v20 = vld [vmem:[#allocation9 + $0x158] sm:$0xff]  }
 0x824   :  { %18334 = vmatpush3.bf16.msra.mxu1 %v21519_v38  ;;  %18316 = vmatprep.subr.bf16.mxu0 %v21520_v57  ;;  %v21549_v38 = vld [vmem:[#allocation9 + $0x148] sm:$0xff]   ;;  %v21575_v62 = vld [vmem:[#allocation9 + $0x198] sm:$0xff]  }
 0x825   :  { %18335 = vmatprep.subr.bf16.mxu1 %v21521_v60  ;;  %v21550_v57 = vld [vmem:[#allocation9 + $0xa8] sm:$0xff]  }
 0x826   :  { %v21551_v60 = vld [vmem:[#allocation9 + $0x108] sm:$0xff]  }
 0x827   :  { %18317 = vmatpush3.bf16.msra.mxu0 %v21522_v3  ;;  %v21552_v3 = vld [vmem:[#allocation9 + $0xf0] sm:$0xff]  }
 0x828   :  { %18336 = vmatpush3.bf16.msra.mxu1 %v21523_v4  ;;  %18318 = vmatprep.subr.bf16.mxu0 %v21524_v6  ;;  %v2577_v4 = vrot.slane %v22361_v28, %v22164_v10  ;;  %v21553_v6 = vld [vmem:[#allocation9 + $0x150] sm:$0xff]  }
 0x829   :  { %18337 = vmatprep.subr.bf16.mxu1 %v21525_v7  ;;  %v18633_v7 = vadd.f32 %v22233_v16, %v2557_v26  ;;  %v21563_v16 = vld [vmem:[#allocation9 + $0x180] sm:$0xff]   ;;  %v21580_v26 = vld [vmem:[#allocation9 + $0x1e8] sm:$0xff]  }
 0x82b   :  { %18319 = vmatpush3.bf16.msra.mxu0 %v21526_v12  ;;  %v21555_v12 = vld [vmem:[#allocation9 + $0x110] sm:$0xff]  }
 0x82c   :  { %18338 = vmatpush3.bf16.msra.mxu1 %v21527_v15  ;;  %18353 = vmatprep.subr.bf16.mxu0 %v21529_v19  ;;  %v21556_v15 = vld [vmem:[#allocation9 + $0xf8] sm:$0xff]   ;;  %v18638_v19 = vadd.f32 %v22271_v11, %v2577_v4  ;;  %v2573_v4 = vrot.slane %v22361_v28, %v22183_v43 }
 0x82d   :  { %18339 = vmatprep.subr.bf16.mxu1 %v21528_v22  ;;  %v21558_v22 = vld [vmem:[#allocation9 + $0xb8] sm:$0xff]  }
 0x82e   :  { %14212 = vmatmul.mubr.bf16.vlgmr.msra.gmra.mrb[36].mxu0 %v22204_v51  ;;  %v21538_v51 = vld [vmem:[#allocation9 + $0x30] sm:$0xff]  }
 0x82f   :  { %18354 = vmatpush3.bf16.msra.mxu0 %v21531_v23  ;;  %15724 = vmatprep.mubr.bf16.mxu0 %v14283_v27  ;;  %v14261_v23 = vmax.f32 %v18633_v7, 0.0  ;;  %v14266_v27 = vmax.f32 %v18638_v19, 0.0  ;;  %v18637_v19 = vadd.f32 %v22267_v59, %v2573_v4  ;;  %v21595_v59 = vld [vmem:[#allocation9 + $0x280] sm:$0xff]  }
 0x830   :  { %18340 = vmatpush3.bf16.msra.mxu1 %v21530_v24  ;;  %18355 = vmatprep.subr.bf16.mxu0 %v21533_v25  ;;  %v21559_v24 = vld [vmem:[#allocation9 + $0x118] sm:$0xff]   ;;  %v21561_v25 = vld [vmem:[#allocation9 + $0x1c0] sm:$0xff]  }
 0x831   :  { %18341 = vmatprep.subr.bf16.mxu1 %v21532_v21  ;;  %v21560_v21 = vld [vmem:[#allocation9 + $0x160] sm:$0xff]   ;;  %v14287_v11 = vpack.c.bf16 %v14266_v27, %v14266_v27  ;;  %v21591_v27 = vld [vmem:[#allocation9 + $0x218] sm:$0xff]  }
 0x833   :  { %18356 = vmatpush3.bf16.msra.mxu0 %v21535_v0  ;;  %v14282_v0 = vpack.c.bf16 %v14261_v23, %v14261_v23  ;;  %v21589_v23 = vld [vmem:[#allocation9 + $0x258] sm:$0xff]  }
 0x834   :  { %18342 = vmatpush3.bf16.msra.mxu1 %v21534_v29  ;;  %18357 = vmatprep.subr.bf16.mxu0 %v21537_v31  ;;  %v21562_v29 = vld [vmem:[#allocation9 + $0x120] sm:$0xff]   ;;  %v21565_v31 = vld [vmem:[#allocation9 + $0x1c8] sm:$0xff]  }
 0x835   :  { %18343 = vmatprep.subr.bf16.mxu1 %v21536_v5  ;;  %v22391_v5 = vld [vmem:[#allocation7 + $0x8] sm:$0xff] }
 0x836   :  { %v2593_v7 = vrot.slane %v22391_v5, %v22109_v1  ;;  %v2609_v4 = vrot.slane %v22391_v5, %v22164_v10  ;;  %v21623_v10 = vld [vmem:[#allocation9 + $0x318] sm:$0xff]  }
 0x837   :  { %18358 = vmatpush3.bf16.msra.mxu0 %v21539_v52  ;;  %v21566_v52 = vld [vmem:[#allocation9 + $0x128] sm:$0xff]  }
 0x838   :  { %18344 = vmatpush3.bf16.msra.mxu1 %v21538_v51  ;;  %18359 = vmatprep.subr.bf16.mxu0 %v21541_v35  ;;  %v21569_v51 = vld [vmem:[#allocation9 + $0x1d0] sm:$0xff]   ;;  %v2565_v35 = vrot.slane %v22361_v28, %v22161_v61  ;;  %v18642_v28 = vadd.f32 %v22305_v46, %v2593_v7 }
 0x839   :  { %18345 = vmatprep.subr.bf16.mxu1 %v21540_v37  ;;  %v2585_v37 = vrot.slane %v22391_v5, %v22100_v50 }
 0x83b   :  { %18360 = vmatpush3.bf16.msra.mxu0 %v21543_v39  ;;  %v21570_v39 = vld [vmem:[#allocation9 + $0x130] sm:$0xff]  }
 0x83c   :  { %18346 = vmatpush3.bf16.msra.mxu1 %v21542_v2  ;;  %18361 = vmatprep.subr.bf16.mxu0 %v21544_v13  ;;  %v21573_v2 = vld [vmem:[#allocation9 + $0x1d8] sm:$0xff]   ;;  %v18635_v13 = vadd.f32 %v22265_v56, %v2565_v35  ;;  %v2581_v35 = vrot.slane %v22391_v5, %v22095_v48 }
 0x83d   :  { %18375 = vmatprep.subr.bf16.mxu1 %v21545_v54  ;;  %v18640_v54 = vadd.f32 %v22303_v45, %v2585_v37  ;;  %v2601_v37 = vrot.slane %v22391_v5, %v22144_v30  ;;  %v21609_v30 = vld [vmem:[#allocation9 + $0x340] sm:$0xff]  }
 0x83f   :  { %15685 = vmatmul.mubr.bf16.vlgmr.msra.gmra.mrb[48].mxu1 %v14280_v14  ;;  %18362 = vmatpush3.bf16.msra.mxu0 %v21546_v63  ;;  %v21574_v63 = vld [vmem:[#allocation9 + $0x138] sm:$0xff]   ;;  %v14263_v14 = vmax.f32 %v18635_v13, 0.0  ;;  %v18639_v13 = vadd.f32 %v22299_v42, %v2581_v35 }
 0x840   :  { %18376 = vmatpush3.bf16.msra.mxu1 %v21547_v47  ;;  %15764 = vmatprep.mubr.bf16.mxu1 %v14285_v9  ;;  %v21576_v47 = vld [vmem:[#allocation9 + $0x1e0] sm:$0xff]   ;;  %v21636_v35 = vld [vmem:[#allocation9 + $0x378] sm:$0xff]  }
 0x841   :  { %18363 = vmatprep.subr.bf16.mxu0 %v21548_v18  ;;  %18377 = vmatprep.subr.bf16.mxu1 %v21549_v38  ;;  %v21577_v18 = vld [vmem:[#allocation9 + $0x240] sm:$0xff]   ;;  %v14268_v38 = vmax.f32 %v18640_v54, 0.0  ;;  %v14284_v56 = vpack.c.bf16 %v14263_v14, %v14263_v14  ;;  %v18644_v54 = vadd.f32 %v22337_v53, %v2601_v37  ;;  %v14267_v14 = vmax.f32 %v18639_v13, 0.0  ;;  %v21638_v37 = vld [vmem:[#allocation9 + $0x338] sm:$0xff]  }
 0x842   :  { %v21578_v9 = vld [vmem:[#allocation9 + $0x1a0] sm:$0xff]  }
 0x843   :  { %18364 = vmatpush3.bf16.msra.mxu0 %v21550_v57  ;;  %v21579_v57 = vld [vmem:[#allocation9 + $0x200] sm:$0xff]   ;;  %v14289_v45 = vpack.c.bf16 %v14268_v38, %v14268_v38  ;;  %v14288_v42 = vpack.c.bf16 %v14267_v14, %v14267_v14  ;;  %v21646_v14 = vld [vmem:[#allocation9 + $0x3a8] sm:$0xff]  }
 0x844   :  { %18378 = vmatpush3.bf16.msra.mxu1 %v21551_v60  ;;  %18365 = vmatprep.subr.bf16.mxu0 %v21552_v3  ;;  %v21581_v60 = vld [vmem:[#allocation9 + $0x248] sm:$0xff]   ;;  %v21610_v38 = vld [vmem:[#allocation9 + $0x2a0] sm:$0xff]  }
 0x845   :  { %18379 = vmatprep.subr.bf16.mxu1 %v21553_v6  ;;  %v21582_v3 = vld [vmem:[#allocation9 + $0x1a8] sm:$0xff]   ;;  %v21642_v13 = vld [vmem:[#allocation9 + $0x3a0] sm:$0xff]  }
 0x846   :  { %v21583_v6 = vld [vmem:[#allocation9 + $0x208] sm:$0xff]  }
 0x847   :  { %18366 = vmatpush3.bf16.msra.mxu0 %v21554_v17  ;;  %v21584_v17 = vld [vmem:[#allocation9 + $0x1f0] sm:$0xff]  }
 0x848   :  { %18380 = vmatpush3.bf16.msra.mxu1 %v21555_v12  ;;  %18367 = vmatprep.subr.bf16.mxu0 %v21556_v15  ;;  %v21585_v12 = vld [vmem:[#allocation9 + $0x250] sm:$0xff]  }
 0x849   :  { %18381 = vmatprep.subr.bf16.mxu1 %v21557_v20  ;;  %v21586_v15 = vld [vmem:[#allocation9 + $0x1b0] sm:$0xff]  }
 0x84a   :  { %v21587_v20 = vld [vmem:[#allocation9 + $0x210] sm:$0xff]  }
 0x84b   :  { %18368 = vmatpush3.bf16.msra.mxu0 %v21558_v22  ;;  %v21588_v22 = vld [vmem:[#allocation9 + $0x1f8] sm:$0xff]  }
 0x84c   :  { %18382 = vmatpush3.bf16.msra.mxu1 %v21559_v24  ;;  %18397 = vmatprep.subr.bf16.mxu0 %v21561_v25  ;;  %v21590_v24 = vld [vmem:[#allocation9 + $0x1b8] sm:$0xff]   ;;  %v14265_v25 = vmax.f32 %v18637_v19, 0.0  ;;  %v18646_v19 = vadd.f32 %v22339_v49, %v2609_v4  ;;  %v21651_v4 = vld [vmem:[#allocation9 + $0x410] sm:$0xff]  }
 0x84d   :  { %18383 = vmatprep.subr.bf16.mxu1 %v21560_v21  ;;  %v21593_v21 = vld [vmem:[#allocation9 + $0x2c0] sm:$0xff]  }
 0x84e   :  { %15725 = vmatmul.mubr.bf16.vlgmr.msra.gmra.mrb[40].mxu0 %v14282_v0  ;;  %v21592_v0 = vld [vmem:[#allocation9 + $0x260] sm:$0xff]  }
 0x84f   :  { %18398 = vmatpush3.bf16.msra.mxu0 %v21563_v16  ;;  %15804 = vmatprep.mubr.bf16.mxu0 %v14287_v11  ;;  %v14270_v16 = vmax.f32 %v18642_v28, 0.0  ;;  %v21597_v11 = vld [vmem:[#allocation9 + $0x2c8] sm:$0xff]  }
 0x850   :  { %18384 = vmatpush3.bf16.msra.mxu1 %v21562_v29  ;;  %18399 = vmatprep.subr.bf16.mxu0 %v21565_v31  ;;  %v14286_v29 = vpack.c.bf16 %v14265_v25, %v14265_v25  ;;  %v21594_v31 = vld [vmem:[#allocation9 + $0x220] sm:$0xff]  }
 0x851   :  { %18385 = vmatprep.subr.bf16.mxu1 %v21564_v32  ;;  %v14291_v46 = vpack.c.bf16 %v14270_v16, %v14270_v16  ;;  %v21596_v32 = vld [vmem:[#allocation9 + $0x268] sm:$0xff]   ;;  %v21624_v25 = vld [vmem:[#allocation9 + $0x360] sm:$0xff]  }
 0x852   :  { %v21629_v16 = vld [vmem:[#allocation9 + $0x3c8] sm:$0xff]  }
 0x853   :  { %18400 = vmatpush3.bf16.msra.mxu0 %v21567_v34  ;;  %v21599_v34 = vld [vmem:[#allocation9 + $0x288] sm:$0xff]  }
 0x854   :  { %18386 = vmatpush3.bf16.msra.mxu1 %v21566_v52  ;;  %18401 = vmatprep.subr.bf16.mxu0 %v21569_v51  ;;  %v21598_v52 = vld [vmem:[#allocation9 + $0x228] sm:$0xff]   ;;  %v21601_v51 = vld [vmem:[#allocation9 + $0x2d0] sm:$0xff]  }
 0x855   :  { %18387 = vmatprep.subr.bf16.mxu1 %v21568_v36  ;;  %v21600_v36 = vld [vmem:[#allocation9 + $0x270] sm:$0xff]  }
 0x857   :  { %18402 = vmatpush3.bf16.msra.mxu0 %v21571_v55  ;;  %v21603_v55 = vld [vmem:[#allocation9 + $0x290] sm:$0xff]  }
 0x858   :  { %18388 = vmatpush3.bf16.msra.mxu1 %v21570_v39  ;;  %18403 = vmatprep.subr.bf16.mxu0 %v21573_v2  ;;  %v21602_v39 = vld [vmem:[#allocation9 + $0x230] sm:$0xff]   ;;  %v21605_v2 = vld [vmem:[#allocation9 + $0x2d8] sm:$0xff]  }
 0x859   :  { %18389 = vmatprep.subr.bf16.mxu1 %v21572_v58  ;;  %v21604_v58 = vld [vmem:[#allocation9 + $0x278] sm:$0xff]  }
 0x85b   :  { %18404 = vmatpush3.bf16.msra.mxu0 %v21575_v62  ;;  %v21607_v62 = vld [vmem:[#allocation9 + $0x298] sm:$0xff]  }
 0x85c   :  { %18390 = vmatpush3.bf16.msra.mxu1 %v21574_v63  ;;  %18405 = vmatprep.subr.bf16.mxu0 %v21576_v47  ;;  %v21606_v63 = vld [vmem:[#allocation9 + $0x238] sm:$0xff]   ;;  %v21608_v47 = vld [vmem:[#allocation9 + $0x2e0] sm:$0xff]  }
 0x85d   :  { %18419 = vmatprep.subr.bf16.mxu1 %v21577_v18  ;;  %v14272_v18 = vmax.f32 %v18644_v54, 0.0  ;;  %v22420_v54 = vld [vmem:[#allocation7 + $0x10] sm:$0x1f] }
 0x85f   :  { %15765 = vmatmul.mubr.bf16.vlgmr.msra.gmra.mrb[52].mxu1 %v14284_v56  ;;  %18406 = vmatpush3.bf16.msra.mxu0 %v21578_v9  ;;  %v21611_v9 = vld [vmem:[#allocation9 + $0x300] sm:$0xff]   ;;  %v21613_v56 = vld [vmem:[#allocation9 + $0x348] sm:$0xff]   ;;  %v14293_v53 = vpack.c.bf16 %v14272_v18, %v14272_v18 }
 0x860   :  { %18420 = vmatpush3.bf16.msra.mxu1 %v21579_v57  ;;  %15844 = vmatprep.mubr.bf16.mxu1 %v14289_v45  ;;  %v21612_v57 = vld [vmem:[#allocation9 + $0x2e8] sm:$0xff]  }
 0x861   :  { %18407 = vmatprep.subr.bf16.mxu0 %v21580_v26  ;;  %18421 = vmatprep.subr.bf16.mxu1 %v21581_v60  ;;  %v21614_v26 = vld [vmem:[#allocation9 + $0x2a8] sm:$0xff]   ;;  %v2589_v60 = vrot.slane %v22391_v5, %v22138_v8 }
 0x862   :  { %v21615_v45 = vld [vmem:[#allocation9 + $0x308] sm:$0xff]  }
 0x863   :  { %18408 = vmatpush3.bf16.msra.mxu0 %v21582_v3  ;;  %v21616_v3 = vld [vmem:[#allocation9 + $0x2f0] sm:$0xff]   ;;  %v18641_v7 = vadd.f32 %v22301_v44, %v2589_v60  ;;  %v21627_v44 = vld [vmem:[#allocation9 + $0x380] sm:$0xff]   ;;  %v21647_v18 = vld [vmem:[#allocation9 + $0x408] sm:$0xff]  }
 0x864   :  { %18422 = vmatpush3.bf16.msra.mxu1 %v21583_v6  ;;  %18409 = vmatprep.subr.bf16.mxu0 %v21584_v17  ;;  %v21617_v6 = vld [vmem:[#allocation9 + $0x350] sm:$0xff]  }
 0x865   :  { %18423 = vmatprep.subr.bf16.mxu1 %v21585_v12  ;;  %v21618_v17 = vld [vmem:[#allocation9 + $0x2b0] sm:$0xff]   ;;  %v14269_v28 = vmax.f32 %v18641_v7, 0.0 }
 0x866   :  { %v21619_v12 = vld [vmem:[#allocation9 + $0x310] sm:$0xff]  }
 0x867   :  { %18410 = vmatpush3.bf16.msra.mxu0 %v21586_v15  ;;  %v21620_v15 = vld [vmem:[#allocation9 + $0x2f8] sm:$0xff]  }
 0x868   :  { %18424 = vmatpush3.bf16.msra.mxu1 %v21587_v20  ;;  %18411 = vmatprep.subr.bf16.mxu0 %v21588_v22  ;;  %v21621_v20 = vld [vmem:[#allocation9 + $0x358] sm:$0xff]  }
 0x869   :  { %18425 = vmatprep.subr.bf16.mxu1 %v21589_v23  ;;  %v21622_v22 = vld [vmem:[#allocation9 + $0x2b8] sm:$0xff]   ;;  %v21625_v23 = vld [vmem:[#allocation9 + $0x3c0] sm:$0xff]  }
 0x86b   :  { %18412 = vmatpush3.bf16.msra.mxu0 %v21590_v24  ;;  %v14274_v24 = vmax.f32 %v18646_v19, 0.0  ;;  %v21654_v19 = vld [vmem:[#allocation9 + $0x3b8] sm:$0xff]  }
 0x86c   :  { %18426 = vmatpush3.bf16.msra.mxu1 %v21591_v27  ;;  %18441 = vmatprep.subr.bf16.mxu0 %v21593_v21  ;;  %v14290_v27 = vpack.c.bf16 %v14269_v28, %v14269_v28  ;;  %v21626_v21 = vld [vmem:[#allocation9 + $0x320] sm:$0xff]  }
 0x86d   :  { %18427 = vmatprep.subr.bf16.mxu1 %v21592_v0  ;;  %v14295_v49 = vpack.c.bf16 %v14274_v24, %v14274_v24  ;;  %v21628_v0 = vld [vmem:[#allocation9 + $0x368] sm:$0xff]   ;;  %v21657_v28 = vld [vmem:[#allocation9 + $0x4c0] sm:$0xff]  }
 0x86e   :  { %15805 = vmatmul.mubr.bf16.vlgmr.msra.gmra.mrb[44].mxu0 %v14286_v29  ;;  %v21630_v29 = vld [vmem:[#allocation9 + $0x328] sm:$0xff]  }
 0x86f   :  { %18442 = vmatpush3.bf16.msra.mxu0 %v21595_v59  ;;  %15884 = vmatprep.mubr.bf16.mxu0 %v14291_v46  ;;  %v21631_v59 = vld [vmem:[#allocation9 + $0x388] sm:$0xff]   ;;  %v21632_v46 = vld [vmem:[#allocation9 + $0x370] sm:$0xff]  }
 0x870   :  { %18428 = vmatpush3.bf16.msra.mxu1 %v21594_v31  ;;  %18443 = vmatprep.subr.bf16.mxu0 %v21597_v11  ;;  %v21633_v31 = vld [vmem:[#allocation9 + $0x3d0] sm:$0xff]   ;;  %v2597_v11 = vrot.slane %v22391_v5, %v22161_v61 }
 0x871   :  { %18429 = vmatprep.subr.bf16.mxu1 %v21596_v32  ;;  %v21635_v32 = vld [vmem:[#allocation9 + $0x390] sm:$0xff]  }
 0x873   :  { %18444 = vmatpush3.bf16.msra.mxu0 %v21599_v34  ;;  %v21634_v34 = vld [vmem:[#allocation9 + $0x330] sm:$0xff]  }
 0x874   :  { %18430 = vmatpush3.bf16.msra.mxu1 %v21598_v52  ;;  %18445 = vmatprep.subr.bf16.mxu0 %v21601_v51  ;;  %v21637_v52 = vld [vmem:[#allocation9 + $0x3d8] sm:$0xff]   ;;  %v18643_v51 = vadd.f32 %v22333_v40, %v2597_v11  ;;  %v21666_v11 = vld [vmem:[#allocation9 + $0x430] sm:$0xff]  }
 0x875   :  { %18431 = vmatprep.subr.bf16.mxu1 %v21600_v36  ;;  %v21639_v36 = vld [vmem:[#allocation9 + $0x398] sm:$0xff]  }
 0x877   :  { %18446 = vmatpush3.bf16.msra.mxu0 %v21603_v55  ;;  %v21640_v55 = vld [vmem:[#allocation9 + $0x3e0] sm:$0xff]  }
 0x878   :  { %18432 = vmatpush3.bf16.msra.mxu1 %v21602_v39  ;;  %18447 = vmatprep.subr.bf16.mxu0 %v21605_v2  ;;  %v14271_v39 = vmax.f32 %v18643_v51, 0.0  ;;  %v21641_v2 = vld [vmem:[#allocation9 + $0x440] sm:$0xff]   ;;  %v21670_v51 = vld [vmem:[#allocation9 + $0x438] sm:$0xff]  }
 0x879   :  { %18433 = vmatprep.subr.bf16.mxu1 %v21604_v58  ;;  %v21643_v58 = vld [vmem:[#allocation9 + $0x400] sm:$0xff]  }
 0x87a   :  { %v14292_v40 = vpack.c.bf16 %v14271_v39, %v14271_v39 }
 0x87b   :  { %18448 = vmatpush3.bf16.msra.mxu0 %v21607_v62  ;;  %v21644_v62 = vld [vmem:[#allocation9 + $0x3e8] sm:$0xff]  }
 0x87c   :  { %18434 = vmatpush3.bf16.msra.mxu1 %v21606_v63  ;;  %18449 = vmatprep.subr.bf16.mxu0 %v21608_v47  ;;  %v21645_v63 = vld [vmem:[#allocation9 + $0x448] sm:$0xff]   ;;  %v2617_v47 = vrot.slane %v22420_v54, %v22100_v50 }
 0x87d   :  { %18463 = vmatprep.subr.bf16.mxu1 %v21609_v30  ;;  %v2605_v30 = vrot.slane %v22391_v5, %v22183_v43 }
 0x87f   :  { %15845 = vmatmul.mubr.bf16.vlgmr.msra.gmra.mrb[56].mxu1 %v14288_v42  ;;  %18450 = vmatpush3.bf16.msra.mxu0 %v21610_v38  ;;  %v21648_v38 = vld [vmem:[#allocation9 + $0x3f0] sm:$0xff]   ;;  %v2625_v42 = vrot.slane %v22420_v54, %v22109_v1  ;;  %v18645_v43 = vadd.f32 %v22335_v33, %v2605_v30 }
 0x880   :  { %18464 = vmatpush3.bf16.msra.mxu1 %v21611_v9  ;;  %15924 = vmatprep.mubr.bf16.mxu1 %v14293_v53 }
 0x881   :  { %18451 = vmatprep.subr.bf16.mxu0 %v21612_v57  ;;  %18465 = vmatprep.subr.bf16.mxu1 %v21613_v56  ;;  %v21649_v57 = vld [vmem:[#allocation9 + $0x450] sm:$0xff]  }
 0x883   :  { %18452 = vmatpush3.bf16.msra.mxu0 %v21614_v26 }
 0x884   :  { %18466 = vmatpush3.bf16.msra.mxu1 %v21615_v45  ;;  %18453 = vmatprep.subr.bf16.mxu0 %v21616_v3  ;;  %v21650_v45 = vld [vmem:[#allocation9 + $0x3b0] sm:$0xff]  }
 0x885   :  { %18467 = vmatprep.subr.bf16.mxu1 %v21617_v6  ;;  %v21652_v6 = vld [vmem:[#allocation9 + $0x3f8] sm:$0xff]  }
 0x887   :  { %18454 = vmatpush3.bf16.msra.mxu0 %v21618_v17 }
 0x888   :  { %18468 = vmatpush3.bf16.msra.mxu1 %v21619_v12  ;;  %18455 = vmatprep.subr.bf16.mxu0 %v21620_v15  ;;  %v21653_v12 = vld [vmem:[#allocation9 + $0x458] sm:$0xff]  }
 0x889   :  { %18469 = vmatprep.subr.bf16.mxu1 %v21621_v20  ;;  %v14273_v20 = vmax.f32 %v18645_v43, 0.0 }
 0x88b   :  { %18456 = vmatpush3.bf16.msra.mxu0 %v21622_v22  ;;  %v21655_v22 = vld [vmem:[#allocation9 + $0x418] sm:$0xff]   ;;  %v14294_v24 = vpack.c.bf16 %v14273_v20, %v14273_v20 }
 0x88c   :  { %18470 = vmatpush3.bf16.msra.mxu1 %v21623_v10  ;;  %18485 = vmatprep.subr.bf16.mxu0 %v21625_v23  ;;  %v21656_v10 = vld [vmem:[#allocation9 + $0x460] sm:$0xff]  }
 0x88d   :  { %18471 = vmatprep.subr.bf16.mxu1 %v21624_v25  ;;  %v21659_v23 = vld [vmem:[#allocation9 + $0x480] sm:$0xff]  }
 0x88e   :  { %15885 = vmatmul.mubr.bf16.vlgmr.msra.gmra.mrb[48].mxu0 %v14290_v27  ;;  %v21658_v25 = vld [vmem:[#allocation9 + $0x420] sm:$0xff]  }
 0x88f   :  { %18486 = vmatpush3.bf16.msra.mxu0 %v21627_v44  ;;  %15964 = vmatprep.mubr.bf16.mxu0 %v14295_v49  ;;  %v21661_v44 = vld [vmem:[#allocation9 + $0x4c8] sm:$0xff]  }
 0x890   :  { %18472 = vmatpush3.bf16.msra.mxu1 %v21626_v21  ;;  %18487 = vmatprep.subr.bf16.mxu0 %v21629_v16  ;;  %v21660_v21 = vld [vmem:[#allocation9 + $0x468] sm:$0xff]  }
 0x891   :  { %18473 = vmatprep.subr.bf16.mxu1 %v21628_v0  ;;  %v21663_v16 = vld [vmem:[#allocation9 + $0x488] sm:$0xff]   ;;  %v21665_v0 = vld [vmem:[#allocation9 + $0x4d0] sm:$0xff]  }
 0x892   :  { %v21662_v49 = vld [vmem:[#allocation9 + $0x428] sm:$0xff]  }
 0x893   :  { %18488 = vmatpush3.bf16.msra.mxu0 %v21631_v59  ;;  %v2613_v59 = vrot.slane %v22420_v54, %v22095_v48  ;;  %v21673_v48 = vld [vmem:[#allocation9 + $0x4a0] sm:$0xff]  }
 0x894   :  { %18474 = vmatpush3.bf16.msra.mxu1 %v21630_v29  ;;  %18489 = vmatprep.subr.bf16.mxu0 %v21633_v31  ;;  %v21664_v29 = vld [vmem:[#allocation9 + $0x470] sm:$0xff]  }
 0x895   :  { %18475 = vmatprep.subr.bf16.mxu1 %v21632_v46  ;;  %v21667_v31 = vld [vmem:[#allocation9 + $0x490] sm:$0xff]   ;;  %v21669_v46 = vld [vmem:[#allocation9 + $0x4d8] sm:$0xff]  }
 0x897   :  { %18490 = vmatpush3.bf16.msra.mxu0 %v21635_v32 }
 0x898   :  { %18476 = vmatpush3.bf16.msra.mxu1 %v21634_v34  ;;  %18491 = vmatprep.subr.bf16.mxu0 %v21637_v52  ;;  %v21668_v34 = vld [vmem:[#allocation9 + $0x478] sm:$0xff]  }
 0x899   :  { %18477 = vmatprep.subr.bf16.mxu1 %v21636_v35  ;;  %v21671_v52 = vld [vmem:[#allocation9 + $0x498] sm:$0xff]   ;;  %v21672_v35 = vld [vmem:[#allocation9 + $0x4e0] sm:$0xff]  }
 0x89b   :  { %18492 = vmatpush3.bf16.msra.mxu0 %v21639_v36 }
 0x89c   :  { %18478 = vmatpush3.bf16.msra.mxu1 %v21638_v37  ;;  %18493 = vmatprep.subr.bf16.mxu0 %v21640_v55  ;;  %v21674_v37 = vld [vmem:[#allocation9 + $0x4e8] sm:$0xff]   ;;  %v21680_v55 = vld [vmem:[#allocation9 + $0x500] sm:$0xff]  }
 0x89d   :  { %18507 = vmatprep.subr.bf16.mxu1 %v21641_v2  ;;  %v21675_v2 = vld [vmem:[#allocation9 + $0x4a8] sm:$0xff]  }
 0x89f   :  { %15925 = vmatmul.mubr.bf16.vlgmr.msra.gmra.mrb[60].mxu1 %v14292_v40  ;;  %18494 = vmatpush3.bf16.msra.mxu0 %v21642_v13  ;;  %v2621_v13 = vrot.slane %v22420_v54, %v22138_v8  ;;  %v21677_v8 = vld [vmem:[#allocation9 + $0x4b0] sm:$0xff]  }
 0x8a0   :  { %18508 = vmatpush3.bf16.msra.mxu1 %v21643_v58  ;;  %18495 = vmatprep.subr.bf16.mxu0 %v21644_v62  ;;  %v21676_v58 = vld [vmem:[#allocation9 + $0x4f0] sm:$0xff]   ;;  %v21681_v62 = vld [vmem:[#allocation9 + $0x508] sm:$0xff]  }
 0x8a1   :  { %v13766_v9 = vpop.f32.mrb[24].mxu0  ;;  %18509 = vmatprep.subr.bf16.mxu1 %v21645_v63  ;;  %v2629_v63 = vrot.slane %v22420_v54, %v22161_v61  ;;  %v21682_v61 = vld [vmem:[#allocation9 + $0x510] sm:$0xff]  }
 0x8a2   :  { %v22428_v56 = vpop.f32.mrb[32].mxu1  ;;  %v13768_v53 = vpop.f32.mrb[25].mxu0  ;;  %v18647_v32 = vadd.f32 %v13766_v9, %v2613_v59 }
 0x8a3   :  { %v18648_v26 = vadd.f32 %v13768_v53, %v2617_v47  ;;  %v14014_v60 = vpop.f32.mrb[33].mxu1  ;;  %v13770_v50 = vpop.f32.mrb[26].mxu0  ;;  %18496 = vmatpush3.bf16.msra.mxu0 %v21646_v14  ;;  %v18649_v9 = vadd.f32 %v22428_v56, %v2621_v13 }
 0x8a4   :  { %v14016_v5 = vpop.f32.mrb[34].mxu1  ;;  %18510 = vmatpush3.bf16.msra.mxu1 %v21647_v18  ;;  %v13771_v3 = vpop.f32.mrb[27].mxu0  ;;  %18497 = vmatprep.subr.bf16.mxu0 %v21648_v38  ;;  %v18650_v1 = vadd.f32 %v14014_v60, %v2625_v42  ;;  %v14275_v36 = vmax.f32 %v18647_v32, 0.0 }
 0x8a5   :  { %v14276_v17 = vmax.f32 %v18648_v26, 0.0  ;;  %v14017_v7 = vpop.f32.mrb[35].mxu1  ;;  %18511 = vmatprep.subr.bf16.mxu1 %v21649_v57  ;;  %v21678_v26 = vld [vmem:[#allocation9 + $0x4f8] sm:$0xff]   ;;  %v14277_v43 = vmax.f32 %v18649_v9, 0.0  ;;  %v21684_v3 = vld [vmem:[#allocation9 + $0x520] sm:$0xff]  }
 0x8a6   :  { %v14278_v33 = vmax.f32 %v18650_v1, 0.0  ;;  %v14296_v39 = vpack.c.bf16 %v14275_v36, %v14275_v36  ;;  %v21683_v5 = vld [vmem:[#allocation9 + $0x518] sm:$0xff]  }
 0x8a7   :  { %v14297_v15 = vpack.c.bf16 %v14276_v17, %v14276_v17  ;;  %18498 = vmatpush3.bf16.msra.mxu0 %v21650_v45  ;;  %v21679_v45 = vld [vmem:[#allocation9 + $0x4b8] sm:$0xff]   ;;  %v14298_v56 = vpack.c.bf16 %v14277_v43, %v14277_v43 }
 0x8a8   :  { %18512 = vmatpush3.bf16.msra.mxu1 %v21651_v4  ;;  %18499 = vmatprep.subr.bf16.mxu0 %v21652_v6  ;;  %v14299_v27 = vpack.c.bf16 %v14278_v33, %v14278_v33  ;;  %v21685_v4 = vld [vmem:[#allocation9 + $0x528] sm:$0xff]   ;;  %v21686_v6 = vld [vmem:[#allocation9 + $0x530] sm:$0xff]   ;;  %v21687_v17 = vld [vmem:[#allocation9 + $0x538] sm:$0xff]  }
 0x8a9   :  { %16004 = vmatprep.mubr.bf16.mxu1 %v14297_v15  ;;  %18513 = vmatprep.subr.bf16.mxu1 %v21653_v12 }
 0x8ab   :  { %18500 = vmatpush3.bf16.msra.mxu0 %v21654_v19 }
 0x8ac   :  { %18514 = vmatpush3.bf16.msra.mxu1 %v21655_v22  ;;  %18529 = vmatprep.subr.bf16.mxu0 %v21657_v28 }
 0x8ad   :  { %18515 = vmatprep.subr.bf16.mxu1 %v21656_v10 }
 0x8ae   :  { %15965 = vmatmul.mubr.bf16.vlgmr.msra.gmra.mrb[52].mxu0 %v14294_v24 }
 0x8af   :  { %18530 = vmatpush3.bf16.msra.mxu0 %v21659_v23  ;;  %16044 = vmatprep.mubr.bf16.mxu0 %v14299_v27 }
 0x8b0   :  { %18516 = vmatpush3.bf16.msra.mxu1 %v21658_v25  ;;  %18531 = vmatprep.subr.bf16.mxu0 %v21661_v44 }
 0x8b1   :  { %18517 = vmatprep.subr.bf16.mxu1 %v21660_v21 }
 0x8b3   :  { %18532 = vmatpush3.bf16.msra.mxu0 %v21663_v16 }
 0x8b4   :  { %18518 = vmatpush3.bf16.msra.mxu1 %v21662_v49  ;;  %18533 = vmatprep.subr.bf16.mxu0 %v21665_v0 }
 0x8b5   :  { %18519 = vmatprep.subr.bf16.mxu1 %v21664_v29 }
 0x8b7   :  { %18534 = vmatpush3.bf16.msra.mxu0 %v21667_v31 }
 0x8b8   :  { %18520 = vmatpush3.bf16.msra.mxu1 %v21666_v11  ;;  %18535 = vmatprep.subr.bf16.mxu0 %v21669_v46 }
 0x8b9   :  { %18521 = vmatprep.subr.bf16.mxu1 %v21668_v34 }
 0x8bb   :  { %18536 = vmatpush3.bf16.msra.mxu0 %v21671_v52 }
 0x8bc   :  { %18522 = vmatpush3.bf16.msra.mxu1 %v21670_v51  ;;  %18537 = vmatprep.subr.bf16.mxu0 %v21672_v35 }
 0x8bd   :  { %18591 = vmatprep.subr.bf16.mxu1 %v21899_v41 }
 0x8bf   :  { %16005 = vmatmul.mubr.bf16.vlgmr.msra.gmra.mrb[64].mxu1 %v14296_v39  ;;  %18538 = vmatpush3.bf16.msra.mxu0 %v21673_v48  ;;  %v18034_v48 = vld [vmem:[#allocation10] ss:$0 sm:$0xff] }
 0x8c0   :  { %18539 = vmatprep.subr.bf16.mxu0 %v21674_v37  ;;  %18592 = vmatpush3.bf16.msra.mxu1 %v21680_v55 }
 0x8c1   :  { %v18232_v40 = vpop.f32.mrb[28].mxu0  ;;  %18593 = vmatprep.subr.bf16.mxu1 %v21899_v41  ;;  %18607 = vmatprep.mubr.msk.bf16.mxu1 %vm21900_vm2, %v21899_v41 }
 0x8c2   :  { %v18254_v47 = vpop.f32.mrb[36].mxu1  ;;  %v18233_v14 = vpop.f32.mrb[29].mxu0 }
 0x8c3   :  { %v18234_v30 = vadd.f32 %v18233_v14, %v18232_v40  ;;  %v18255_v18 = vpop.f32.mrb[37].mxu1  ;;  %v18235_v38 = vpop.f32.mrb[30].mxu0  ;;  %18540 = vmatpush3.bf16.msra.mxu0 %v21675_v2  ;;  %v21691_v14 = vld [vmem:[#allocation12 + $0x18] sm:$0xff]  }
 0x8c4   :  { %v18256_v42 = vadd.f32 %v18255_v18, %v18254_v47  ;;  %v18257_v57 = vpop.f32.mrb[38].mxu1  ;;  %v18236_v53 = vpop.f32.mrb[31].mxu0  ;;  %18541 = vmatprep.subr.bf16.mxu0 %v21676_v58  ;;  %18594 = vmatpush3.bf16.msra.mxu1 %v21681_v62  ;;  %v21688_v62 = vld [vmem:[#allocation12] sm:$0xff]   ;;  %v21690_v47 = vld [vmem:[#allocation12 + $0x10] sm:$0xff]  }
 0x8c5   :  { %v14054_v54 = vadd.f32 %v18234_v30, %v2629_v63  ;;  %v18258_v60 = vpop.f32.mrb[39].mxu1  ;;  %18595 = vmatprep.subr.bf16.mxu1 %v21899_v41  ;;  %v21689_v63 = vld [vmem:[#allocation12 + $0x8] sm:$0xff]   ;;  %v21692_v18 = vld [vmem:[#allocation12 + $0x20] sm:$0xff]  }
 0x8c6   :  { %v21693_v53 = vld [vmem:[#allocation12 + $0x28] sm:$0xff]  }
 0x8c7   :  { %v14094_v50 = vadd.f32 %v18256_v42, %v14054_v54  ;;  %18542 = vmatpush3.bf16.msra.mxu0 %v21677_v8 }
 0x8c8   :  { %18543 = vmatprep.subr.bf16.mxu0 %v21678_v26  ;;  %18596 = vmatpush3.bf16.msra.mxu1 %v21682_v61 }
 0x8c9   :  { %18597 = vmatprep.subr.bf16.mxu1 %v21899_v41 }
 0x8cb   :  { %18544 = vmatpush3.bf16.msra.mxu0 %v21679_v45 }
 0x8cc   :  { %18598 = vmatpush3.bf16.msra.mxu1 %v21683_v5  ;;  %18611 = vmatprep.subr.bf16.mxu0 %v21899_v41 }
 0x8cd   :  { %18599 = vmatprep.subr.bf16.mxu1 %v21899_v41 }
 0x8ce   :  { %16045 = vmatmul.mubr.bf16.vlgmr.msra.gmra.mrb[56].mxu0 %v14298_v56 }
 0x8cf   :  { %18627 = vmatprep.mubr.msk.bf16.mxu0 %vm21900_vm2, %v21899_v41  ;;  %18612 = vmatpush3.bf16.msra.mxu0 %v21688_v62  ;;  %v18203_v62 = vld [vmem:[#allocation13] ss:$0 sm:$0xff] }
 0x8d0   :  { %18600 = vmatpush3.bf16.msra.mxu1 %v21684_v3  ;;  %18613 = vmatprep.subr.bf16.mxu0 %v21899_v41 }
 0x8d1   :  { %18601 = vmatprep.subr.bf16.mxu1 %v21899_v41 }
 0x8d3   :  { %18614 = vmatpush3.bf16.msra.mxu0 %v21689_v63 }
 0x8d4   :  { %18602 = vmatpush3.bf16.msra.mxu1 %v21685_v4  ;;  %18615 = vmatprep.subr.bf16.mxu0 %v21899_v41 }
 0x8d5   :  { %18603 = vmatprep.subr.bf16.mxu1 %v21899_v41 }
 0x8d7   :  { %18616 = vmatpush3.bf16.msra.mxu0 %v21690_v47 }
 0x8d8   :  { %18604 = vmatpush3.bf16.msra.mxu1 %v21686_v6  ;;  %18617 = vmatprep.subr.bf16.mxu0 %v21899_v41 }
 0x8d9   :  { %18605 = vmatprep.subr.bf16.mxu1 %v21899_v41 }
 0x8db   :  { %18618 = vmatpush3.bf16.msra.mxu0 %v21691_v14 }
 0x8dc   :  { %18606 = vmatpush3.bf16.msra.mxu1 %v21687_v17  ;;  %18619 = vmatprep.subr.bf16.mxu0 %v21899_v41  ;;  %v21694_v17 = vld [vmem:[#allocation12 + $0x30] sm:$0xff]  }
 0x8df   :  { %18620 = vmatpush3.bf16.msra.mxu0 %v21692_v18 }
 0x8e0   :  { %18621 = vmatprep.subr.bf16.mxu0 %v21899_v41 }
 0x8e1   :  { %v18276_v1 = vpop.f32.mrb[32].mxu0 }
 0x8e2   :  { %v18298_v7 = vpop.f32.mrb[40].mxu1  ;;  %v18277_v12 = vpop.f32.mrb[33].mxu0 }
 0x8e3   :  { %v18278_v15 = vadd.f32 %v18277_v12, %v18276_v1  ;;  %v18299_v19 = vpop.f32.mrb[41].mxu1  ;;  %v18279_v20 = vpop.f32.mrb[34].mxu0  ;;  %18622 = vmatpush3.bf16.msra.mxu0 %v21693_v53 }
 0x8e4   :  { %v18300_v22 = vadd.f32 %v18299_v19, %v18298_v7  ;;  %v18301_v28 = vpop.f32.mrb[42].mxu1  ;;  %v18280_v33 = vpop.f32.mrb[35].mxu0  ;;  %18623 = vmatprep.subr.bf16.mxu0 %v21899_v41  ;;  %v21695_v20 = vld [vmem:[#allocation12 + $0x38] sm:$0xff]  }
 0x8e5   :  { %v14134_v10 = vadd.f32 %v18278_v15, %v14094_v50  ;;  %v18302_v23 = vpop.f32.mrb[43].mxu1 }
 0x8e7   :  { %v14174_v24 = vadd.f32 %v18300_v22, %v14134_v10  ;;  %18624 = vmatpush3.bf16.msra.mxu0 %v21694_v17 }
 0x8e8   :  { %18625 = vmatprep.subr.bf16.mxu0 %v21899_v41 }
 0x8eb   :  { %18626 = vmatpush3.bf16.msra.mxu0 %v21695_v20 }
 0x8f2   :  { %v14253_v25 = vpop.f32.mrb[44].mxu1 }
 0x8f3   :  { %v18589_v44 = vpop.f32.mrb[45].mxu1 }
 0x8f4   :  { %v14256_v27 = vpop.f32.mrb[46].mxu1 }
 0x8f5   :  { %v18590_v21 = vpop.f32.mrb[47].mxu1 }
 0x901   :  { %v18320_v16 = vpop.f32.mrb[36].mxu0 }
 0x902   :  { %v18321_v49 = vpop.f32.mrb[37].mxu0 }
 0x903   :  { %v18322_v0 = vadd.f32 %v18321_v49, %v18320_v16  ;;  %v18323_v59 = vpop.f32.mrb[38].mxu0 }
 0x904   :  { %v18324_v29 = vpop.f32.mrb[39].mxu0 }
 0x905   :  { %v14214_v31 = vadd.f32 %v18322_v0, %v14174_v24 }
 0x907   :  { %v14254_v11 = vadd.f32 %v14253_v25, %v14214_v31 }
 0x909   :  { %v14279_v46 = vmax.f32 %v14254_v11, 0.0 }
 0x90b   :  { %v14300_v32 = vpack.c.bf16 %v14279_v46, %v14279_v46 }
 0x90d   :  { %18608 = vmatmul.mubr.bf16.vlgmr.msra.gmra.mrb[68].mxu1 %v14300_v32 }
 0x912   :  { %v18347_v34 = vpop.f32.mrb[48].mxu1 }
 0x913   :  { %v18348_v52 = vpop.f32.mrb[49].mxu1 }
 0x914   :  { %v18349_v51 = vadd.f32 %v18348_v52, %v18347_v34  ;;  %v18350_v35 = vpop.f32.mrb[50].mxu1 }
 0x915   :  { %v18351_v36 = vpop.f32.mrb[51].mxu1 }
 0x916   :  { %v15687_v39 = vadd.f32 %v18349_v51, %v18034_v48 }
 0x921   :  { %v18369_v37 = vpop.f32.mrb[40].mxu0 }
 0x922   :  { %v18370_v55 = vpop.f32.mrb[41].mxu0 }
 0x923   :  { %v18371_v2 = vadd.f32 %v18370_v55, %v18369_v37  ;;  %v18372_v13 = vpop.f32.mrb[42].mxu0 }
 0x924   :  { %v18373_v58 = vpop.f32.mrb[43].mxu0 }
 0x925   :  { %v15727_v40 = vadd.f32 %v18371_v2, %v15687_v39 }
 0x932   :  { %v18391_v30 = vpop.f32.mrb[52].mxu1 }
 0x933   :  { %v18392_v38 = vpop.f32.mrb[53].mxu1 }
 0x934   :  { %v18393_v8 = vadd.f32 %v18392_v38, %v18391_v30  ;;  %v18394_v9 = vpop.f32.mrb[54].mxu1 }
 0x935   :  { %v18395_v42 = vpop.f32.mrb[55].mxu1 }
 0x936   :  { %v15767_v57 = vadd.f32 %v18393_v8, %v15727_v40 }
 0x941   :  { %v18413_v26 = vpop.f32.mrb[44].mxu0 }
 0x942   :  { %v18414_v61 = vpop.f32.mrb[45].mxu0 }
 0x943   :  { %v18415_v54 = vadd.f32 %v18414_v61, %v18413_v26  ;;  %v18416_v60 = vpop.f32.mrb[46].mxu0 }
 0x944   :  { %v18417_v50 = vpop.f32.mrb[47].mxu0 }
 0x945   :  { %v15807_v45 = vadd.f32 %v18415_v54, %v15767_v57 }
 0x952   :  { %v18435_v43 = vpop.f32.mrb[56].mxu1 }
 0x953   :  { %v18436_v5 = vpop.f32.mrb[57].mxu1 }
 0x954   :  { %v18437_v56 = vadd.f32 %v18436_v5, %v18435_v43  ;;  %v18438_v3 = vpop.f32.mrb[58].mxu1 }
 0x955   :  { %v18439_v4 = vpop.f32.mrb[59].mxu1 }
 0x956   :  { %v15847_v6 = vadd.f32 %v18437_v56, %v15807_v45 }
 0x961   :  { %v18457_v1 = vpop.f32.mrb[48].mxu0 }
 0x962   :  { %v18458_v7 = vpop.f32.mrb[49].mxu0 }
 0x963   :  { %v18459_v12 = vadd.f32 %v18458_v7, %v18457_v1  ;;  %v18460_v15 = vpop.f32.mrb[50].mxu0 }
 0x964   :  { %v18461_v19 = vpop.f32.mrb[51].mxu0 }
 0x965   :  { %v15887_v22 = vadd.f32 %v18459_v12, %v15847_v6 }
 0x972   :  { %v18479_v28 = vpop.f32.mrb[60].mxu1 }
 0x973   :  { %v18480_v33 = vpop.f32.mrb[61].mxu1 }
 0x974   :  { %v18481_v10 = vadd.f32 %v18480_v33, %v18479_v28  ;;  %v18482_v23 = vpop.f32.mrb[62].mxu1 }
 0x975   :  { %v18483_v24 = vpop.f32.mrb[63].mxu1 }
 0x976   :  { %v15927_v25 = vadd.f32 %v18481_v10, %v15887_v22 }
 0x981   :  { %v18501_v44 = vpop.f32.mrb[52].mxu0 }
 0x982   :  { %v18502_v27 = vpop.f32.mrb[53].mxu0 }
 0x983   :  { %v18503_v21 = vadd.f32 %v18502_v27, %v18501_v44  ;;  %v18504_v16 = vpop.f32.mrb[54].mxu0 }
 0x984   :  { %v18505_v49 = vpop.f32.mrb[55].mxu0 }
 0x985   :  { %v15967_v0 = vadd.f32 %v18503_v21, %v15927_v25 }
 0x992   :  { %v18523_v59 = vpop.f32.mrb[64].mxu1 }
 0x993   :  { %v18524_v29 = vpop.f32.mrb[65].mxu1 }
 0x994   :  { %v18525_v31 = vadd.f32 %v18524_v29, %v18523_v59  ;;  %v18526_v41 = vpop.f32.mrb[66].mxu1 }
 0x995   :  { %v18527_v11 = vpop.f32.mrb[67].mxu1 }
 0x996   :  { %v16007_v46 = vadd.f32 %v18525_v31, %v15967_v0 }
 0x9a1   :  { %v18545_v32 = vpop.f32.mrb[56].mxu0 }
 0x9a2   :  { %v18546_v34 = vpop.f32.mrb[57].mxu0 }
 0x9a3   :  { %v18547_v52 = vadd.f32 %v18546_v34, %v18545_v32  ;;  %v18548_v51 = vpop.f32.mrb[58].mxu0 }
 0x9a4   :  { %v18549_v35 = vpop.f32.mrb[59].mxu0 }
 0x9a5   :  { %v16047_v36 = vadd.f32 %v18547_v52, %v16007_v46 }
 0x9e0   :  { %v16086_v48 = vpop.f32.mrb[68].mxu1 }
 0x9e1   :  { %v16087_v37 = vadd.f32 %v16086_v48, %v16047_v36  ;;  %v18609_v55 = vpop.f32.mrb[69].mxu1 }
 0x9e2   :  { %v16089_v39 = vpop.f32.mrb[70].mxu1 }
 0x9e3   :  { %v16092_v2 = vmax.f32 %v16087_v37, 0.0  ;;  %v18610_v13 = vpop.f32.mrb[71].mxu1 }
 0x9e5   :  { %v16093_v58 = vpack.c.bf16 %v16092_v2, %v16092_v2 }
 0x9e7   :  { %18628 = vmatmul.mubr.bf16.vlgmr.msra.gmra.mrb[60].mxu0 %v16093_v58 }
 0xaba   :  { %v16199_v40 = vpop.f32.mrb[60].mxu0 }
 0xabb   :  { %v16200_v63 = vadd.f32 %v18203_v62, %v16199_v40  ;;  %v18629_v47 = vpop.f32.mrb[61].mxu0 }
 0xabc   :  { %v16202_v14 = vpop.f32.mrb[62].mxu0 }
 0xabd   :  { %16205 = vst [vmem:[%s22470_s9] sm:$0xff] %v16200_v63  ;;  %v18630_v30 = vpop.f32.mrb[63].mxu0 }
 0xabe   :  { %16210 = vsyncpa [#allocation3], 1 }
 0xabf   :  { %16211 = vsyncpa [#allocation5], 1 }
 0xac0   :  { %16212 = vsyncpa [#allocation8], 1 }
 0xac1   :  { %16213 = vsyncpa [#allocation11], 1 }
 0xac2   :  { %16214 = vsyncpa [#allocation14], 1 }

</bundles_post_ra>
